<compile_context>
chip_gen: v6e
topology: v6e:2x2x1
jax: 0.10.0
libtpu: 0.0.40
codegen_flags: <defaults>
</compile_context>

<pallas_src>
import functools

import jax
import jax.numpy as jnp
from jax.experimental import pallas as pl
from jax.experimental.pallas import tpu as pltpu


def encoder_kernel(x_ref,
                   w1_ref, s1_ref, t1_ref,
                   w2_ref, b2_ref,
                   w3g_ref, w3l_ref, s3_ref, t3_ref,
                   w4_ref, b4_ref,
                   out_ref, *, tg, n, cp):
    """One grid step == TG point groups of shape (N, 3) each (M = TG*N rows)."""
    m = tg * n
    x = x_ref[...].astype(jnp.float32).reshape(m, 3)                    # (M, 3)

    # ---- first_conv[0]: Conv1d(3,128) on the VPU (K=3 underfills the MXU) ----
    h = (x[:, 0:1] * w1_ref[0:1, :]
         + x[:, 1:2] * w1_ref[1:2, :]
         + x[:, 2:3] * w1_ref[2:3, :])                                  # (M, 128)
    # BN(128) with conv bias folded into the shift, then ReLU.
    h = jnp.maximum(h * s1_ref[...] + t1_ref[...], 0.0)

    # ---- first_conv[3]: Conv1d(128,256), bf16 operands / f32 accumulate ----
    f = jnp.dot(h.astype(jnp.bfloat16), w2_ref[...],
                preferred_element_type=jnp.float32) + b2_ref[...]       # (M, 256)

    # ---- per-group global max pool over the N points ----
    g = jnp.max(f.reshape(tg, n, 256), axis=1)                          # (TG, 256)

    # ---- second_conv[0]: Conv1d(512,512) on concat([global, local]) ----
    # concat @ W3 == g @ W3[:256, :] (broadcast over N) + f @ W3[256:, :]
    loc = jnp.dot(f.astype(jnp.bfloat16), w3l_ref[...],
                  preferred_element_type=jnp.float32)                   # (M, 512)
    glb = jnp.dot(g.astype(jnp.bfloat16), w3g_ref[...],
                  preferred_element_type=jnp.float32)                   # (TG, 512)
    h2 = (loc.reshape(tg, n, 512) + glb[:, None, :]).reshape(m, 512)
    # BN(512) with conv bias folded, then ReLU.
    h2 = jnp.maximum(h2 * s3_ref[...] + t3_ref[...], 0.0)

    # ---- second_conv[3]: Conv1d(512, Cp) (Cp = C padded to lane width) ----
    f2 = jnp.dot(h2.astype(jnp.bfloat16), w4_ref[...],
                 preferred_element_type=jnp.float32) + b4_ref[...]      # (M, Cp)

    # ---- final per-group max pool; lane-dense (Cp % 128 == 0) store ----
    out_ref[0] = jnp.max(f2.reshape(tg, n, cp), axis=1)                 # (TG, Cp)


def _pick_tg(bg, n, target_rows=512, max_tg=32):
    """Largest-enough divisor of `bg` such that TG*N rows fill the MXU M dim."""
    best = 1
    for tg in range(1, min(bg, max_tg) + 1):
        if bg % tg == 0:
            best = tg
            if tg * n >= target_rows:
                break
    return best


def encoder_forward(point_groups, params, encoder_channel):
    """point_groups: (B, G, N, 3) float32 -> (B, G, encoder_channel) float32."""
    B, G, N, _ = point_groups.shape
    BG = B * G
    C = encoder_channel
    Cp = max(128, ((C + 127) // 128) * 128)   # lane-dense padded output channels

    (w1, b1, s1, t1, w2, b2, w3g, w3l, b3, s3, t3, w4, b4) = params

    # Fold conv biases into the BN shift; cast matmul weights to bf16; pad C.
    t1f = (b1 * s1 + t1).astype(jnp.float32)
    t3f = (b3 * s3 + t3).astype(jnp.float32)
    w1f = w1.astype(jnp.float32)
    w2b = w2.astype(jnp.bfloat16)
    w3gb = w3g.astype(jnp.bfloat16)
    w3lb = w3l.astype(jnp.bfloat16)
    w4p = jnp.zeros((512, Cp), jnp.float32).at[:, :C].set(w4).astype(jnp.bfloat16)
    b4p = jnp.zeros((1, Cp), jnp.float32).at[:, :C].set(b4)

    TG = _pick_tg(BG, N)
    steps = BG // TG
    x = point_groups.reshape(BG, N, 3).astype(jnp.float32)

    kern = functools.partial(encoder_kernel, tg=TG, n=N, cp=Cp)

    def whole(arr):
        nd = arr.ndim
        return pl.BlockSpec(arr.shape, lambda i, _nd=nd: (0,) * _nd)

    out = pl.pallas_call(
        kern,
        out_shape=jax.ShapeDtypeStruct((steps, TG, Cp), jnp.float32),
        grid_spec=pltpu.PrefetchScalarGridSpec(
            num_scalar_prefetch=0,
            grid=(steps,),
            in_specs=[
                pl.BlockSpec((TG, N, 3), lambda i: (i, 0, 0)),   # TG point groups
                whole(w1f), whole(s1), whole(t1f),
                whole(w2b), whole(b2),
                whole(w3gb), whole(w3lb), whole(s3), whole(t3f),
                whole(w4p), whole(b4p),
            ],
            out_specs=pl.BlockSpec((1, TG, Cp), lambda i: (i, 0, 0)),
        ),
        compiler_params=pltpu.CompilerParams(
            dimension_semantics=("parallel",)),
    )(x, w1f, s1, t1f, w2b, b2, w3gb, w3lb, s3, t3f, w4p, b4p)

    return out.reshape(BG, Cp)[:, :C].reshape(B, G, C)


def init_params(key, encoder_channel):
    """Deterministic synthetic parameters matching the PyTorch module shapes."""
    C = encoder_channel
    ks = jax.random.split(key, 16)
    eps = 1e-5

    def lin(k, fan_in, fan_out, scale=0.1):
        return scale * jax.random.normal(k, (fan_in, fan_out), jnp.float32)

    # first_conv
    w1 = lin(ks[0], 3, 128)
    b1 = 0.1 * jax.random.normal(ks[1], (1, 128), jnp.float32)
    gamma1 = 1.0 + 0.1 * jax.random.normal(ks[2], (1, 128), jnp.float32)
    beta1 = 0.1 * jax.random.normal(ks[3], (1, 128), jnp.float32)
    mean1 = 0.1 * jax.random.normal(ks[4], (1, 128), jnp.float32)
    var1 = 1.0 + 0.1 * jax.random.uniform(ks[5], (1, 128), jnp.float32)
    s1 = gamma1 / jnp.sqrt(var1 + eps)
    t1 = beta1 - mean1 * s1
    w2 = lin(ks[6], 128, 256)
    b2 = 0.1 * jax.random.normal(ks[7], (1, 256), jnp.float32)

    # second_conv (input channels = 512 = [global 256 | local 256])
    w3 = lin(ks[8], 512, 512, scale=0.05)
    w3g, w3l = w3[:256], w3[256:]
    b3 = 0.1 * jax.random.normal(ks[9], (1, 512), jnp.float32)
    gamma3 = 1.0 + 0.1 * jax.random.normal(ks[10], (1, 512), jnp.float32)
    beta3 = 0.1 * jax.random.normal(ks[11], (1, 512), jnp.float32)
    mean3 = 0.1 * jax.random.normal(ks[12], (1, 512), jnp.float32)
    var3 = 1.0 + 0.1 * jax.random.uniform(ks[13], (1, 512), jnp.float32)
    s3 = gamma3 / jnp.sqrt(var3 + eps)
    t3 = beta3 - mean3 * s3
    w4 = lin(ks[14], 512, C, scale=0.05)
    b4 = 0.1 * jax.random.normal(ks[15], (1, C), jnp.float32)

    return (w1, b1, s1, t1, w2, b2, w3g, w3l, b3, s3, t3, w4, b4)


def encoder_reference(point_groups, params, encoder_channel):
    """Pure-JAX (f32) reference of the same math, used for correctness check."""
    (w1, b1, s1, t1, w2, b2, w3g, w3l, b3, s3, t3, w4, b4) = params
    B, G, N, _ = point_groups.shape
    x = point_groups.reshape(B * G, N, 3).astype(jnp.float32)
    h = (x @ w1 + b1) * s1 + t1
    h = jnp.maximum(h, 0.0)
    f = h @ w2 + b2                                              # (BG, N, 256)
    g = jnp.max(f, axis=1, keepdims=True)                        # (BG, 1, 256)
    h2 = f @ w3l + g @ w3g + b3                                  # (BG, N, 512)
    h2 = jnp.maximum(h2 * s3 + t3, 0.0)
    f2 = h2 @ w4 + b4                                            # (BG, N, C)
    out = jnp.max(f2, axis=1)                                    # (BG, C)
    return out.reshape(B, G, encoder_channel)


if __name__ == "__main__":
    B, G, N = 2, 16, 32
    encoder_channel = 64

    key = jax.random.PRNGKey(0)
    k_pts, k_par = jax.random.split(key)
    point_groups = jax.random.normal(k_pts, (B, G, N, 3), jnp.float32)
    params = init_params(k_par, encoder_channel)

    out = jax.block_until_ready(
        encoder_forward(point_groups, params, encoder_channel))
    ref = jax.block_until_ready(
        encoder_reference(point_groups, params, encoder_channel))

    assert out.shape == (B, G, encoder_channel), out.shape
    max_err = float(jnp.max(jnp.abs(out - ref)))
    # bf16 matmul operands (f32 accumulation) -> loosened tolerance.
    assert jnp.allclose(out, ref, atol=3e-2, rtol=3e-2), max_err

    print("KERNEL_OK")
</pallas_src>

<mosaic_0001>
module attributes {stable_mosaic.version = 11 : i64} {
  func.func @encoder_kernel(%arg0: i32, %arg1: memref<16x32x3xf32, #tpu.memory_space<vmem>>, %arg2: memref<3x128xf32, #tpu.memory_space<vmem>>, %arg3: memref<1x128xf32, #tpu.memory_space<vmem>>, %arg4: memref<1x128xf32, #tpu.memory_space<vmem>>, %arg5: memref<128x256xbf16, #tpu.memory_space<vmem>>, %arg6: memref<1x256xf32, #tpu.memory_space<vmem>>, %arg7: memref<256x512xbf16, #tpu.memory_space<vmem>>, %arg8: memref<256x512xbf16, #tpu.memory_space<vmem>>, %arg9: memref<1x512xf32, #tpu.memory_space<vmem>>, %arg10: memref<1x512xf32, #tpu.memory_space<vmem>>, %arg11: memref<512x128xbf16, #tpu.memory_space<vmem>>, %arg12: memref<1x128xf32, #tpu.memory_space<vmem>>, %arg13: memref<1x16x128xf32, #tpu.memory_space<vmem>>) attributes {dimension_semantics = [#tpu.dimension_semantics<parallel>], iteration_bounds = array<i64: 2>, scalar_prefetch = 0 : i64, scratch_operands = 0 : i64, tpu.core_type = #tpu.core_type<tc>, window_params = [{transform_indices = @transform_0, window_bounds = array<i64: 16, 32, 3>}, {pipeline_mode = #tpu.pipeline_mode<synchronous>, transform_indices = @transform_1, window_bounds = array<i64: 3, 128>}, {pipeline_mode = #tpu.pipeline_mode<synchronous>, transform_indices = @transform_2, window_bounds = array<i64: 1, 128>}, {pipeline_mode = #tpu.pipeline_mode<synchronous>, transform_indices = @transform_3, window_bounds = array<i64: 1, 128>}, {pipeline_mode = #tpu.pipeline_mode<synchronous>, transform_indices = @transform_4, window_bounds = array<i64: 128, 256>}, {pipeline_mode = #tpu.pipeline_mode<synchronous>, transform_indices = @transform_5, window_bounds = array<i64: 1, 256>}, {pipeline_mode = #tpu.pipeline_mode<synchronous>, transform_indices = @transform_6, window_bounds = array<i64: 256, 512>}, {pipeline_mode = #tpu.pipeline_mode<synchronous>, transform_indices = @transform_7, window_bounds = array<i64: 256, 512>}, {pipeline_mode = #tpu.pipeline_mode<synchronous>, transform_indices = @transform_8, window_bounds = array<i64: 1, 512>}, {pipeline_mode = #tpu.pipeline_mode<synchronous>, transform_indices = @transform_9, window_bounds = array<i64: 1, 512>}, {pipeline_mode = #tpu.pipeline_mode<synchronous>, transform_indices = @transform_10, window_bounds = array<i64: 512, 128>}, {pipeline_mode = #tpu.pipeline_mode<synchronous>, transform_indices = @transform_11, window_bounds = array<i64: 1, 128>}, {transform_indices = @transform_12, window_bounds = array<i64: 1, 16, 128>}]} {
    %c0 = arith.constant 0 : index
    %c0_0 = arith.constant 0 : index
    %c0_1 = arith.constant 0 : index
    %0 = vector.load %arg1[%c0, %c0_0, %c0_1] : memref<16x32x3xf32, #tpu.memory_space<vmem>>, vector<16x32x3xf32>
    %1 = vector.shape_cast %0 : vector<16x32x3xf32> to vector<512x3xf32>
    %2 = vector.extract_strided_slice %1 {offsets = [0, 0], sizes = [512, 1], strides = [1, 1]} : vector<512x3xf32> to vector<512x1xf32>
    %c0_2 = arith.constant 0 : index
    %c0_3 = arith.constant 0 : index
    %3 = vector.load %arg2[%c0_2, %c0_3] : memref<3x128xf32, #tpu.memory_space<vmem>>, vector<1x128xf32>
    %4 = vector.broadcast %2 : vector<512x1xf32> to vector<512x128xf32>
    %5 = vector.broadcast %3 : vector<1x128xf32> to vector<512x128xf32>
    %6 = arith.mulf %4, %5 : vector<512x128xf32>
    %7 = vector.extract_strided_slice %1 {offsets = [0, 1], sizes = [512, 1], strides = [1, 1]} : vector<512x3xf32> to vector<512x1xf32>
    %c1 = arith.constant 1 : index
    %c0_4 = arith.constant 0 : index
    %8 = vector.load %arg2[%c1, %c0_4] : memref<3x128xf32, #tpu.memory_space<vmem>>, vector<1x128xf32>
    %9 = vector.broadcast %7 : vector<512x1xf32> to vector<512x128xf32>
    %10 = vector.broadcast %8 : vector<1x128xf32> to vector<512x128xf32>
    %11 = arith.mulf %9, %10 : vector<512x128xf32>
    %12 = arith.addf %6, %11 : vector<512x128xf32>
    %13 = vector.extract_strided_slice %1 {offsets = [0, 2], sizes = [512, 1], strides = [1, 1]} : vector<512x3xf32> to vector<512x1xf32>
    %c2 = arith.constant 2 : index
    %c0_5 = arith.constant 0 : index
    %14 = vector.load %arg2[%c2, %c0_5] : memref<3x128xf32, #tpu.memory_space<vmem>>, vector<1x128xf32>
    %15 = vector.broadcast %13 : vector<512x1xf32> to vector<512x128xf32>
    %16 = vector.broadcast %14 : vector<1x128xf32> to vector<512x128xf32>
    %17 = arith.mulf %15, %16 : vector<512x128xf32>
    %18 = arith.addf %12, %17 : vector<512x128xf32>
    %c0_6 = arith.constant 0 : index
    %c0_7 = arith.constant 0 : index
    %19 = vector.load %arg3[%c0_6, %c0_7] : memref<1x128xf32, #tpu.memory_space<vmem>>, vector<1x128xf32>
    %20 = vector.broadcast %19 : vector<1x128xf32> to vector<512x128xf32>
    %21 = arith.mulf %18, %20 : vector<512x128xf32>
    %c0_8 = arith.constant 0 : index
    %c0_9 = arith.constant 0 : index
    %22 = vector.load %arg4[%c0_8, %c0_9] : memref<1x128xf32, #tpu.memory_space<vmem>>, vector<1x128xf32>
    %23 = vector.broadcast %22 : vector<1x128xf32> to vector<512x128xf32>
    %24 = arith.addf %21, %23 : vector<512x128xf32>
    %cst = arith.constant 0.000000e+00 : f32
    %25 = vector.broadcast %cst : f32 to vector<512x128xf32>
    %26 = arith.maximumf %24, %25 : vector<512x128xf32>
    %27 = arith.truncf %26 : vector<512x128xf32> to vector<512x128xbf16>
    %c0_10 = arith.constant 0 : index
    %c0_11 = arith.constant 0 : index
    %28 = vector.load %arg5[%c0_10, %c0_11] : memref<128x256xbf16, #tpu.memory_space<vmem>>, vector<128x256xbf16>
    %cst_12 = arith.constant dense<0.000000e+00> : vector<512x256xf32>
    %29 = tpu.matmul %27, %28, %cst_12 {dimension_numbers = #tpu.dot_dimension_numbers<[1], [0], [0], [1], [0, 0, 1, 1], [], []>} : vector<512x128xbf16>, vector<128x256xbf16>, vector<512x256xf32> -> vector<512x256xf32>
    %c0_13 = arith.constant 0 : index
    %c0_14 = arith.constant 0 : index
    %30 = vector.load %arg6[%c0_13, %c0_14] : memref<1x256xf32, #tpu.memory_space<vmem>>, vector<1x256xf32>
    %31 = vector.broadcast %30 : vector<1x256xf32> to vector<512x256xf32>
    %32 = arith.addf %29, %31 : vector<512x256xf32>
    %33 = vector.shape_cast %32 : vector<512x256xf32> to vector<16x32x256xf32>
    %cst_15 = arith.constant dense<0xFF800000> : vector<16x256xf32>
    %34 = vector.multi_reduction <maximumf>, %33, %cst_15 [1] : vector<16x32x256xf32> to vector<16x256xf32>
    %35 = arith.truncf %32 : vector<512x256xf32> to vector<512x256xbf16>
    %c0_16 = arith.constant 0 : index
    %c0_17 = arith.constant 0 : index
    %36 = vector.load %arg8[%c0_16, %c0_17] : memref<256x512xbf16, #tpu.memory_space<vmem>>, vector<256x512xbf16>
    %cst_18 = arith.constant dense<0.000000e+00> : vector<512x512xf32>
    %37 = tpu.matmul %35, %36, %cst_18 {dimension_numbers = #tpu.dot_dimension_numbers<[1], [0], [0], [1], [0, 0, 1, 1], [], []>} : vector<512x256xbf16>, vector<256x512xbf16>, vector<512x512xf32> -> vector<512x512xf32>
    %38 = arith.truncf %34 : vector<16x256xf32> to vector<16x256xbf16>
    %c0_19 = arith.constant 0 : index
    %c0_20 = arith.constant 0 : index
    %39 = vector.load %arg7[%c0_19, %c0_20] : memref<256x512xbf16, #tpu.memory_space<vmem>>, vector<256x512xbf16>
    %cst_21 = arith.constant dense<0.000000e+00> : vector<16x512xf32>
    %40 = tpu.matmul %38, %39, %cst_21 {dimension_numbers = #tpu.dot_dimension_numbers<[1], [0], [0], [1], [0, 0, 1, 1], [], []>} : vector<16x256xbf16>, vector<256x512xbf16>, vector<16x512xf32> -> vector<16x512xf32>
    %41 = vector.shape_cast %37 : vector<512x512xf32> to vector<16x32x512xf32>
    %42 = vector.shape_cast %40 : vector<16x512xf32> to vector<16x1x512xf32>
    %43 = vector.broadcast %42 : vector<16x1x512xf32> to vector<16x32x512xf32>
    %44 = arith.addf %41, %43 : vector<16x32x512xf32>
    %45 = vector.shape_cast %44 : vector<16x32x512xf32> to vector<512x512xf32>
    %c0_22 = arith.constant 0 : index
    %c0_23 = arith.constant 0 : index
    %46 = vector.load %arg9[%c0_22, %c0_23] : memref<1x512xf32, #tpu.memory_space<vmem>>, vector<1x512xf32>
    %47 = vector.broadcast %46 : vector<1x512xf32> to vector<512x512xf32>
    %48 = arith.mulf %45, %47 : vector<512x512xf32>
    %c0_24 = arith.constant 0 : index
    %c0_25 = arith.constant 0 : index
    %49 = vector.load %arg10[%c0_24, %c0_25] : memref<1x512xf32, #tpu.memory_space<vmem>>, vector<1x512xf32>
    %50 = vector.broadcast %49 : vector<1x512xf32> to vector<512x512xf32>
    %51 = arith.addf %48, %50 : vector<512x512xf32>
    %cst_26 = arith.constant 0.000000e+00 : f32
    %52 = vector.broadcast %cst_26 : f32 to vector<512x512xf32>
    %53 = arith.maximumf %51, %52 : vector<512x512xf32>
    %54 = arith.truncf %53 : vector<512x512xf32> to vector<512x512xbf16>
    %c0_27 = arith.constant 0 : index
    %c0_28 = arith.constant 0 : index
    %55 = vector.load %arg11[%c0_27, %c0_28] : memref<512x128xbf16, #tpu.memory_space<vmem>>, vector<512x128xbf16>
    %cst_29 = arith.constant dense<0.000000e+00> : vector<512x128xf32>
    %56 = tpu.matmul %54, %55, %cst_29 {dimension_numbers = #tpu.dot_dimension_numbers<[1], [0], [0], [1], [0, 0, 1, 1], [], []>} : vector<512x512xbf16>, vector<512x128xbf16>, vector<512x128xf32> -> vector<512x128xf32>
    %c0_30 = arith.constant 0 : index
    %c0_31 = arith.constant 0 : index
    %57 = vector.load %arg12[%c0_30, %c0_31] : memref<1x128xf32, #tpu.memory_space<vmem>>, vector<1x128xf32>
    %58 = vector.broadcast %57 : vector<1x128xf32> to vector<512x128xf32>
    %59 = arith.addf %56, %58 : vector<512x128xf32>
    %60 = vector.shape_cast %59 : vector<512x128xf32> to vector<16x32x128xf32>
    %cst_32 = arith.constant dense<0xFF800000> : vector<16x128xf32>
    %61 = vector.multi_reduction <maximumf>, %60, %cst_32 [1] : vector<16x32x128xf32> to vector<16x128xf32>
    %c0_33 = arith.constant 0 : index
    %c0_34 = arith.constant 0 : index
    %c0_35 = arith.constant 0 : index
    %62 = vector.load %arg13[%c0_33, %c0_34, %c0_35] : memref<1x16x128xf32, #tpu.memory_space<vmem>>, vector<1x16x128xf32>
    %63 = vector.shape_cast %62 : vector<1x16x128xf32> to vector<16x128xf32>
    %64 = vector.shape_cast %61 : vector<16x128xf32> to vector<1x16x128xf32>
    tpu.vector_store %arg13[%c0_33, %c0_34, %c0_35], %64 {strides = array<i32>} : memref<1x16x128xf32, #tpu.memory_space<vmem>>, vector<1x16x128xf32>,
    return
  }
  func.func @transform_0(%arg0: i32) -> (i32, i32, i32) {
    %c0_i32 = arith.constant 0 : i32
    %c0_i32_0 = arith.constant 0 : i32
    %c0_i32_1 = arith.constant 0 : i32
    return %arg0, %c0_i32, %c0_i32_0 : i32, i32, i32
  }
  func.func @transform_1(%arg0: i32) -> (i32, i32) {
    %c0_i32 = arith.constant 0 : i32
    %c0_i32_0 = arith.constant 0 : i32
    %c0_i32_1 = arith.constant 0 : i32
    return %c0_i32, %c0_i32_0 : i32, i32
  }
  func.func @transform_2(%arg0: i32) -> (i32, i32) {
    %c0_i32 = arith.constant 0 : i32
    %c0_i32_0 = arith.constant 0 : i32
    %c0_i32_1 = arith.constant 0 : i32
    return %c0_i32, %c0_i32_0 : i32, i32
  }
  func.func @transform_3(%arg0: i32) -> (i32, i32) {
    %c0_i32 = arith.constant 0 : i32
    %c0_i32_0 = arith.constant 0 : i32
    %c0_i32_1 = arith.constant 0 : i32
    return %c0_i32, %c0_i32_0 : i32, i32
  }
  func.func @transform_4(%arg0: i32) -> (i32, i32) {
    %c0_i32 = arith.constant 0 : i32
    %c0_i32_0 = arith.constant 0 : i32
    %c0_i32_1 = arith.constant 0 : i32
    return %c0_i32, %c0_i32_0 : i32, i32
  }
  func.func @transform_5(%arg0: i32) -> (i32, i32) {
    %c0_i32 = arith.constant 0 : i32
    %c0_i32_0 = arith.constant 0 : i32
    %c0_i32_1 = arith.constant 0 : i32
    return %c0_i32, %c0_i32_0 : i32, i32
  }
  func.func @transform_6(%arg0: i32) -> (i32, i32) {
    %c0_i32 = arith.constant 0 : i32
    %c0_i32_0 = arith.constant 0 : i32
    %c0_i32_1 = arith.constant 0 : i32
    return %c0_i32, %c0_i32_0 : i32, i32
  }
  func.func @transform_7(%arg0: i32) -> (i32, i32) {
    %c0_i32 = arith.constant 0 : i32
    %c0_i32_0 = arith.constant 0 : i32
    %c0_i32_1 = arith.constant 0 : i32
    return %c0_i32, %c0_i32_0 : i32, i32
  }
  func.func @transform_8(%arg0: i32) -> (i32, i32) {
    %c0_i32 = arith.constant 0 : i32
    %c0_i32_0 = arith.constant 0 : i32
    %c0_i32_1 = arith.constant 0 : i32
    return %c0_i32, %c0_i32_0 : i32, i32
  }
  func.func @transform_9(%arg0: i32) -> (i32, i32) {
    %c0_i32 = arith.constant 0 : i32
    %c0_i32_0 = arith.constant 0 : i32
    %c0_i32_1 = arith.constant 0 : i32
    return %c0_i32, %c0_i32_0 : i32, i32
  }
  func.func @transform_10(%arg0: i32) -> (i32, i32) {
    %c0_i32 = arith.constant 0 : i32
    %c0_i32_0 = arith.constant 0 : i32
    %c0_i32_1 = arith.constant 0 : i32
    return %c0_i32, %c0_i32_0 : i32, i32
  }
  func.func @transform_11(%arg0: i32) -> (i32, i32) {
    %c0_i32 = arith.constant 0 : i32
    %c0_i32_0 = arith.constant 0 : i32
    %c0_i32_1 = arith.constant 0 : i32
    return %c0_i32, %c0_i32_0 : i32, i32
  }
  func.func @transform_12(%arg0: i32) -> (i32, i32, i32) {
    %c0_i32 = arith.constant 0 : i32
    %c0_i32_0 = arith.constant 0 : i32
    %c0_i32_1 = arith.constant 0 : i32
    return %arg0, %c0_i32, %c0_i32_0 : i32, i32, i32
  }
}

</mosaic_0001>

<bundles_post_ra>
// kernel: tpu_custom_call.1
= control target key start
LH: loop header
LB: loop body
LE: loop exit
PB: predicated region body
PF: predicated region fallthrough
CT: control target
= control target key end

     0   :  { %17 = vsyncpa [#allocation3], 0  ;;  %s12443_s0 = inlined_call_operand.vmem [shape: f32[32,32,3], index: 0, kind: input, shape index: {}]   ;;  %s12444_s1 = inlined_call_operand.vmem [shape: f32[3,128], index: 1, kind: input, shape index: {}]   ;;  %s12445_s2 = inlined_call_operand.vmem [shape: f32[1,128], index: 2, kind: input, shape index: {}]   ;;  %s12446_s3 = inlined_call_operand.vmem [shape: f32[1,128], index: 3, kind: input, shape index: {}]   ;;  %s12447_s4 = inlined_call_operand.hbm [shape: bf16[128,256], index: 4, kind: input, shape index: {}]   ;;  %s12448_s5 = inlined_call_operand.vmem [shape: f32[1,256], index: 5, kind: input, shape index: {}]   ;;  %s12449_s6 = inlined_call_operand.vmem [shape: bf16[256,512], index: 6, kind: input, shape index: {}]   ;;  %s12450_s7 = inlined_call_operand.vmem [shape: bf16[256,512], index: 7, kind: input, shape index: {}]   ;;  %s12451_s8 = inlined_call_operand.vmem [shape: f32[1,512], index: 8, kind: input, shape index: {}]   ;;  %s12452_s9 = inlined_call_operand.vmem [shape: f32[1,512], index: 9, kind: input, shape index: {}]   ;;  %s12453_s10 = inlined_call_operand.hbm [shape: bf16[512,128], index: 10, kind: input, shape index: {}]   ;;  %s12454_s11 = inlined_call_operand.vmem [shape: f32[1,128], index: 11, kind: input, shape index: {}]   ;;  %s12455_s12 = inlined_call_operand.hbm [shape: f32[2,16,128], index: 12, kind: output, shape index: {}]  }
   0x1   :  { %18 = vsyncpa [#allocation6], 0 }
   0x2   :  { %19 = vsyncpa [#allocation4], 0 }
   0x3   :  { %21 = vsyncpa [#allocation4 + $0x1], 0  ;;  %s8064_s21 = smov 0   ;;  %s8066_s22 = smov 0  }
   0x4   :  { %s8068_s23 = smov 0   ;;  %s8070_s24 = smov 0  }
   0x5 LB: > { %12534 = sst [smem:[#allocation11_spill]] %s7980_s23  ;;  %s8085_s25 = sadd.s32 4294967295, %s7984_s24   ;;  %s7984_s24 = sphi %s8070_s24, %s13065_s24   ;;  %s7980_s23 = sphi %s8068_s23, %s13067_s23   ;;  %s7976_s22 = sphi %s8066_s22, %s13069_s22   ;;  %s7972_s21 = sphi %s8064_s21, %s13068_s21  }
   0x6   : > { %s7202_s26 = sadd.s32 4294967294, %s7984_s24   ;;  %s8089_s27 = sadd.s32 1, %s7984_s24  }
   0x7   : > { %12535 = sst [smem:[#allocation12_spill]] %s8089_s27  ;;  %s291_s28 = sadd.s32 1, %s7980_s23 }
   0x8   : > { %s288_s29 = ssub.s32 %s7984_s24, %s8089_s27  ;;  %p301_p0 = scmp.ne.s32.totalorder %s7980_s23, %s7976_s22 }
   0x9   : > { %p289_p1 = scmp.eq.s32.totalorder %s288_s29, 0  ;;  %p302_p2 = scmp.eq.s32.totalorder %s8085_s25, 1 }
   0xa   : > { %p307_p3 = scmp.ne.s32.totalorder %s7976_s22, %s7972_s21  ;;  %p308_p4 = scmp.eq.s32.totalorder %s7202_s26, 1 }
   0xb   : > { %s8100_s30 = scalar_select %p289_p1, %s7980_s23, %s291_s28  }
   0xc   : > { %p8102_p5 = por %p302_p2, %p301_p0  ;;  %p8106_p6 = por %p308_p4, %p307_p3 }
   0xd   : > { %12536 = sst [smem:[#allocation13_spill]] %s8100_s30  ;;  %p7203_p7 = scmp.ge.s32.totalorder %s7984_s24, 1 }
   0xe   : > { %s12538_s14 = scalar_select %p8106_p6, 1, 0 }
   0xf   : > { %p315_p8 = scmp.lt.s32.totalorder %s7984_s24, 3  ;;  %p12456_p9 = scmp.eq.s32.totalorder %s8085_s25, 0 }
  0x10   : > { %12539 = sst [smem:[#allocation14_spill]] %s12538_s14  ;;  %s7986_s16 = smov [#allocation2]  }
  0x11   : > { %p8113_p10 = pnand %p7203_p7, %p315_p8  ;;  %s336_s17 = sshll.u32 %s7986_s16, 4  ;;  %s337_s17 = int_to_ptr.vmem [resolvable:$true] %s336_s17 }
  0x12   : > { %s7987_s19 = smov [#allocation5]   ;;  %s7875_s26 = scalar_lea.vmem %s337_s17, 2048 }
  0x13   : > { %p7429_p11 = pneg %p8113_p10  ;;  %s364_s20 = sshll.u32 %s7987_s19, 4  ;;  %s365_s20 = int_to_ptr.vmem [resolvable:$true] %s364_s20 }
  0x14   : > { %p7876_p0 = scmp.ne.s32.totalorder %s337_s17, %s7875_s26  ;;  %p7883_p3 = scmp.lt.s32.totalorder %s337_s17, %s337_s17 }
  0x15   : > { %p8121_p12 = pnand %p12456_p9, %p7429_p11  ;;  %p7884_p4 = scmp.lt.s32.totalorder %s7875_s26, %s7875_s26 }
  0x17   : > { %p7866_p13 = pneg %p8121_p12  ;;  %p7885_p7 = por %p7884_p4, %p7883_p3 }
  0x19   : > { %p7878_p1 = pnand %p7876_p0, %p7866_p13 }
  0x1b   : > { %p7879_p2 = pneg %p7878_p1 }
  0x1d   : > { %p7886_p8 = pnand %p7885_p7, %p7879_p2 }
  0x1f   : > { %7889 = shalt.err (!%p7886_p8)
}
  0x20   : > { %s7988_s28 = smov 128   ;;  %s7989_s29 = smov 8  }
  0x21   : > { %7432 = dma.hbm_to_vmem [thread:$0]  (!%p8121_p12), %s12447_s4, 2048, %s337_s17, [#allocation3], %s7988_s28, %s7988_s28, %s7989_s29  }
  0x22   : > { %s7901_s30 = scalar_lea.vmem %s365_s20, 4096  ;;  %p7909_p9 = scmp.lt.s32.totalorder %s365_s20, %s365_s20 }
  0x23   : > { %p7902_p11 = scmp.ne.s32.totalorder %s365_s20, %s7901_s30  ;;  %p7910_p6 = scmp.lt.s32.totalorder %s7901_s30, %s7901_s30 }
  0x25   : > { %p7904_p0 = pnand %p7902_p11, %p7866_p13  ;;  %p7911_p3 = por %p7910_p6, %p7909_p9 }
  0x27   : > { %p7905_p1 = pneg %p7904_p0 }
  0x29   : > { %p7912_p2 = pnand %p7911_p3, %p7905_p1 }
  0x2b   : > { %7915 = shalt.err (!%p7912_p2)
}
  0x2c   : > { %s7990_s26 = smov 64   ;;  %s7991_s23 = smov 4  }
  0x2d   : > { %7435 = dma.hbm_to_vmem [thread:$0]  (!%p8121_p12), %s12453_s10, 4096, %s365_s20, [#allocation6], %s7990_s26, %s7990_s26, %s7991_s23  }
  0x2e   : > { %393 = sbr.rel (%p8113_p10) target bundleno = 1889 (0x761), region = 68 }
  0x33   : > { %p12542_p4 = scmp.eq.s32.totalorder %s8085_s25, 0 }
  0x35   : > { %7959 = dma.done.wait (%p12542_p4), [#allocation3], 2048   ;;  %p12543_p13 = pmov %p12542_p4 }
  0x36   : > { %p12544_p6 = pmov %p12542_p4 }
  0x37   : > { %7961 = vsyncadd (%p12543_p13), [#allocation3], 4294965248 }
  0x38   : > { %7963 = dma.done.wait (%p12544_p6), [#allocation6], 4096   ;;  %p12545_p9 = pmov %p12542_p4 }
  0x39   : > { %s7211_s30 = sshll.u32 %s8085_s25, 4  ;;  %v12463_v0 = vmov 1   ;;  %v12465_v1 = vmov 0   ;;  %v12461_v4 = vmov 2   ;;  %v7590_v5 = vld [vmem:[#allocation2 + $0x74] ss:$8 sps:$4 sm:$0xff]  }
  0x3a   : > { %7965 = vsyncadd (%p12545_p9), [#allocation6], 4294963200  ;;  %7490 = vset.pattern.permute.xlu1 %v12463_v0  ;;  %7489 = vset.pattern.permute.xlu0 %v12465_v1  ;;  %p441_p10 = scmp.lt.s32.totalorder %s7211_s30, 31  ;;  %v7592_v6 = vld [vmem:[#allocation2 + $0x70] ss:$8 sps:$4 sm:$0xff]   ;;  %vm3980_vm0 = vcmask 1041409  }
  0x3b   : > { %2057 = vmatprep.mubr.bf16.mxu0 %v12465_v1  ;;  %2297 = vmatprep.mubr.bf16.mxu1 %v12465_v1  ;;  %v7593_v7 = vld [vmem:[#allocation2 + $0x64] ss:$8 sps:$4 sm:$0xff]   ;;  %v7595_v10 = vld [vmem:[#allocation2 + $0x60] ss:$8 sps:$4 sm:$0xff]   ;;  %v7596_v11 = vld [vmem:[#allocation2 + $0x54] ss:$8 sps:$4 sm:$0xff]  }
  0x3c   : > { %s13071_s30 = smov (!%p441_p10, %s7211_s30), 31  ;;  %2025 = vmatprep.subr.bf16.mxu0 %v7590_v5  ;;  %7403 = vmatprep.subr.bf16.mxu1 %v7590_v5  ;;  %v7598_v13 = vld [vmem:[#allocation2 + $0x50] ss:$8 sps:$4 sm:$0xff]   ;;  %v7599_v14 = vld [vmem:[#allocation2 + $0x44] ss:$8 sps:$4 sm:$0xff]   ;;  %vm3982_vm1 = vcmask 1042434  }
  0x3d   : > { %s7401_s23 = sshll.u32 %s13071_s30, 5  ;;  %2026 = vmatpush1.bf16.msra.mxu0 %v7592_v6  ;;  %7411 = vmatpush1.bf16.msra.mxu1 %v7592_v6  ;;  %v7601_v16 = vld [vmem:[#allocation2 + $0x40] ss:$8 sps:$4 sm:$0xff]   ;;  %v7602_v17 = vld [vmem:[#allocation2 + $0x34] ss:$8 sps:$4 sm:$0xff]   ;;  %vm3984_vm2 = vcmask 1043459  }
  0x3e   : > { %s8161_s15 = scalar_lea.vmem %s12443_s0, %s7401_s23  ;;  %2027 = vmatprep.subr.bf16.mxu0 %v7593_v7  ;;  %7404 = vmatprep.subr.bf16.mxu1 %v7593_v7  ;;  %v7604_v19 = vld [vmem:[#allocation2 + $0x30] ss:$8 sps:$4 sm:$0xff]   ;;  %v7605_v20 = vld [vmem:[#allocation2 + $0x24] ss:$8 sps:$4 sm:$0xff]   ;;  %v7607_v22 = vld [vmem:[#allocation2 + $0x20] ss:$8 sps:$4 sm:$0xff]  }
  0x3f   : > { %v448_v2 = vld [vmem:[%s8161_s15] sm:$0xff]  ;;  %v449_v3 = vld [vmem:[%s8161_s15 + $0x8] sm:$0xff]  ;;  %v8169_v8 = vld [vmem:[%s8161_s15 + $0x10] sm:$0xff]  ;;  %vm3986_vm3 = vcmask 1044484   ;;  %vm3988_vm4 = vcmask 1045509   ;;  %vm3990_vm5 = vcmask 1046534  }
  0x40   : > { %903 = vperm.xlu1 %7490, %v448_v2   ;;  %515 = vperm.xlu0 %7489, %v448_v2   ;;  %v451_v9 = vld [vmem:[%s8161_s15 + $0x18] sm:$0xff]  ;;  %v8175_v12 = vld [vmem:[%s8161_s15 + $0x28] sm:$0xff]  ;;  %v452_v24 = vld [vmem:[%s8161_s15 + $0x20] sm:$0xff]  ;;  %vm3992_vm6 = vcmask 1047559   ;;  %s437_s18 = sand.u32 1, %s7976_s22   ;;  %s7402_s29 = sshll.u32 %s8085_s25, 8 }
  0x41   : > { %2028 = vmatpush1.bf16.msra.mxu0 %v7595_v10  ;;  %7412 = vmatpush1.bf16.msra.mxu1 %v7595_v10  ;;  %v8181_v15 = vld [vmem:[%s8161_s15 + $0x38] sm:$0xff]  ;;  %v8184_v18 = vld [vmem:[%s8161_s15 + $0x48] sm:$0xff]  ;;  %v454_v33 = vld [vmem:[%s8161_s15 + $0x30] sm:$0xff]  ;;  %s7210_s20 = sshll.u32 %s437_s18, 4  ;;  %s12394_s30 = scalar_lea.hbm %s12455_s12, %s7402_s29 }
  0x42   : > { %2029 = vmatprep.subr.bf16.mxu0 %v7596_v11  ;;  %7405 = vmatprep.subr.bf16.mxu1 %v7596_v11  ;;  %v8188_v21 = vld [vmem:[%s8161_s15 + $0x58] sm:$0xff]  ;;  %v8194_v25 = vld [vmem:[%s8161_s15 + $0x68] sm:$0xff]  ;;  %v456_v39 = vld [vmem:[%s8161_s15 + $0x40] sm:$0xff]  ;;  %s12350_s28 = scalar_lea.vmem [#allocation7], %s7210_s20  ;;  %s12403_s25 = scalar_lea.sflag [#allocation4], %s437_s18 }
  0x43   : > { %v7608_v23 = vld [vmem:[#allocation2 + $0x14] ss:$8 sps:$4 sm:$0xff]   ;;  %v7610_v26 = vld [vmem:[#allocation2 + $0x10] ss:$8 sps:$4 sm:$0xff]   ;;  %v7611_v27 = vld [vmem:[#allocation2 + $0x4] ss:$8 sps:$4 sm:$0xff]  }
  0x44   : > { %907 = vperm.xlu1 %7490, %v449_v3   ;;  %7491 = vset.pattern.permute.xlu0 %v12461_v4  ;;  %v8199_v28 = vld [vmem:[%s8161_s15 + $0x78] sm:$0xff]  ;;  %v7613_v29 = vld [vmem:[#allocation2] ss:$8 sps:$4 sm:$0xff]   ;;  %v458_v41 = vld [vmem:[%s8161_s15 + $0x50] sm:$0xff]  ;;  %s7118_s16 = sshll.u32 %s12350_s28, 4  ;;  %s7996_s27 = smov [#allocation7]   ;;  %s12396_s16 = int_to_ptr.vmem [resolvable:$true] %s7118_s16 }
  0x45   : > { %1292 = vperm.xlu0 %7491, %v448_v2   ;;  %2030 = vmatpush1.bf16.msra.mxu0 %v7598_v13  ;;  %v8204_v30 = vld [vmem:[%s8161_s15 + $0x88] sm:$0xff]  ;;  %v8208_v31 = vld [vmem:[%s8161_s15 + $0x98] sm:$0xff]  ;;  %v460_v42 = vld [vmem:[%s8161_s15 + $0x60] sm:$0xff]  ;;  %s7916_s23 = scalar_lea.vmem %s12396_s16, 256  ;;  %s7920_s14 = sshll.u32 %s7996_s27, 4  ;;  %s7921_s14 = int_to_ptr.vmem [resolvable:$false] %s7920_s14 }
  0x46   : > { %2031 = vmatprep.subr.bf16.mxu0 %v7599_v14  ;;  %7413 = vmatpush1.bf16.msra.mxu1 %v7598_v13  ;;  %v8213_v32 = vld [vmem:[%s8161_s15 + $0xa8] sm:$0xff]  ;;  %v8220_v34 = vld [vmem:[%s8161_s15 + $0xb8] sm:$0xff]  ;;  %v462_v43 = vld [vmem:[%s8161_s15 + $0x70] sm:$0xff]  ;;  %p7917_p12 = scmp.ne.s32.totalorder %s12396_s16, %s7916_s23  ;;  %p7923_p11 = scmp.lt.s32.totalorder %s12396_s16, %s7921_s14 }
  0x47   : > { %7406 = vmatprep.subr.bf16.mxu1 %v7599_v14  ;;  %v8225_v35 = vld [vmem:[%s8161_s15 + $0xc8] sm:$0xff]  ;;  %v8230_v36 = vld [vmem:[%s8161_s15 + $0xd8] sm:$0xff]  ;;  %v8266_v44 = vld [vmem:[%s8161_s15 + $0x80] sm:$0xff] }
  0x48   : > { %7493 = vset.pattern.permute.xlu1 %v12461_v4  ;;  %v8235_v37 = vld [vmem:[%s8161_s15 + $0xe8] sm:$0xff]  ;;  %v8240_v38 = vld [vmem:[%s8161_s15 + $0xf8] sm:$0xff]  ;;  %v8271_v45 = vld [vmem:[%s8161_s15 + $0x90] sm:$0xff]  ;;  %p7918_p7 = pnand %p7917_p12, %p8102_p5 }
  0x49   : > { %1296 = vperm.xlu1 %7493, %v449_v3   ;;  %7492 = vset.pattern.permute.xlu0 %v12465_v1  ;;  %v8246_v40 = vld [vmem:[%s8161_s15 + $0x108] sm:$0xff]  ;;  %v8276_v46 = vld [vmem:[%s8161_s15 + $0xa0] sm:$0xff]  ;;  %v8281_v47 = vld [vmem:[%s8161_s15 + $0xb0] sm:$0xff] }
  0x4a   : > { %520 = vperm.xlu0 %7492, %v449_v3   ;;  %2032 = vmatpush1.bf16.msra.mxu0 %v7601_v16  ;;  %v8286_v48 = vld [vmem:[%s8161_s15 + $0xc0] sm:$0xff]  ;;  %v8308_v56 = vld [vmem:[%s8161_s15 + $0xd0] sm:$0xff]  ;;  %p7919_p8 = pneg %p7918_p7 }
  0x4b   : > { %2033 = vmatprep.subr.bf16.mxu0 %v7602_v17  ;;  %7414 = vmatpush1.bf16.msra.mxu1 %v7601_v16  ;;  %v8292_v49 = vld [vmem:[%s12444_s1 + $0x1] ss:$0 sm:$0xff]  ;;  %v8297_v51 = vld [vmem:[%s12444_s1] ss:$0 sm:$0xff]  ;;  %v8305_v55 = vld [vmem:[%s12444_s1 + $0x2] ss:$0 sm:$0xff] }
  0x4c   : > { %7407 = vmatprep.subr.bf16.mxu1 %v7602_v17  ;;  %v8314_v60 = vld [vmem:[%s8161_s15 + $0xe0] sm:$0xff]  ;;  %v8324_v5 = vld [vmem:[%s8161_s15 + $0xf0] sm:$0xff] }
  0x4d   : > { %7494 = vset.pattern.permute.xlu1 %v12465_v1  ;;  %v8321_v2 = vld [vmem:[%s12445_s2] ss:$0 sm:$0xff] }
  0x4e   : > { %525 = vperm.xlu1 %7494, %v8169_v8   ;;  %530 = vperm.xlu0 %7492, %v451_v9   ;;  %v8339_v13 = vld [vmem:[%s12446_s3] ss:$0 sm:$0xff] }
  0x4f   : > { %2034 = vmatpush1.bf16.msra.mxu0 %v7604_v19  ;;  %7415 = vmatpush1.bf16.msra.mxu1 %v7604_v19  ;;  %v8342_v14 = vld [vmem:[%s8161_s15 + $0x100] sm:$0xff]  ;;  %v8351_v19 = vld [vmem:[%s8161_s15 + $0x110] sm:$0xff] }
  0x50   : > { %2035 = vmatprep.subr.bf16.mxu0 %v7605_v20  ;;  %7408 = vmatprep.subr.bf16.mxu1 %v7605_v20 }
  0x52   : > { %7495 = vset.pattern.permute.xlu1 %v12463_v0  ;;  %540 = vperm.xlu0 %7492, %v8175_v12  }
  0x53   : > { %911 = vperm.xlu1 %7495, %v8169_v8   ;;  %2036 = vmatpush1.bf16.msra.mxu0 %v7607_v22 }
  0x54   : > { %2037 = vmatprep.subr.bf16.mxu0 %v7608_v23  ;;  %7416 = vmatpush1.bf16.msra.mxu1 %v7607_v22 }
  0x55   : > { %7409 = vmatprep.subr.bf16.mxu1 %v7608_v23 }
  0x56   : > { %550 = vperm.xlu0 %7492, %v8181_v15  }
  0x57   : > { %915 = vperm.xlu1 %7495, %v451_v9   ;;  %2038 = vmatpush1.bf16.msra.mxu0 %v7610_v26 }
  0x58   : > { %2039 = vmatprep.subr.bf16.mxu0 %v7611_v27  ;;  %7417 = vmatpush1.bf16.msra.mxu1 %v7610_v26 }
  0x59   : > { %7410 = vmatprep.subr.bf16.mxu1 %v7611_v27 }
  0x5a   : > { %560 = vperm.xlu0 %7492, %v8184_v18  }
  0x5b   : > { %7496 = vset.pattern.permute.xlu1 %v12461_v4  ;;  %2040 = vmatpush1.bf16.msra.mxu0 %v7613_v29 }
  0x5c   : > { %1304 = vperm.xlu1 %7496, %v451_v9   ;;  %7418 = vmatpush1.bf16.msra.mxu1 %v7613_v29  ;;  %v8372_v29 = vld [vmem:[%s8161_s15 + $0x120] sm:$0xff] }
  0x5e   : > { %570 = vperm.xlu0 %7492, %v8188_v21  }
  0x60   : > { %7497 = vset.pattern.permute.xlu1 %v12465_v1 }
  0x61   : > { %535 = vperm.xlu1 %7497, %v452_v24  }
  0x62   : > { %580 = vperm.xlu0 %7492, %v8194_v25  }
  0x65   : > { %7498 = vset.pattern.permute.xlu1 %v12463_v0 }
  0x66   : > { %919 = vperm.xlu1 %7498, %v452_v24   ;;  %590 = vperm.xlu0 %7492, %v8199_v28  }
  0x6a   : > { %923 = vperm.xlu1 %7498, %v8175_v12   ;;  %600 = vperm.xlu0 %7492, %v8204_v30  }
  0x6e   : > { %7499 = vset.pattern.permute.xlu1 %v12461_v4  ;;  %610 = vperm.xlu0 %7492, %v8208_v31  }
  0x6f   : > { %1312 = vperm.xlu1 %7499, %v8175_v12  }
  0x72   : > { %620 = vperm.xlu0 %7492, %v8213_v32  }
  0x73   : > { %7500 = vset.pattern.permute.xlu1 %v12465_v1 }
  0x74   : > { %545 = vperm.xlu1 %7500, %v454_v33  }
  0x76   : > { %630 = vperm.xlu0 %7492, %v8220_v34  }
  0x78   : > { %7501 = vset.pattern.permute.xlu1 %v12463_v0 }
  0x79   : > { %927 = vperm.xlu1 %7501, %v454_v33  }
  0x7a   : > { %640 = vperm.xlu0 %7492, %v8225_v35  }
  0x7d   : > { %931 = vperm.xlu1 %7501, %v8181_v15  }
  0x7e   : > { %650 = vperm.xlu0 %7492, %v8230_v36  }
  0x81   : > { %7502 = vset.pattern.permute.xlu1 %v12461_v4 }
  0x82   : > { %1320 = vperm.xlu1 %7502, %v8181_v15   ;;  %660 = vperm.xlu0 %7492, %v8235_v37  }
  0x86   : > { %7503 = vset.pattern.permute.xlu1 %v12465_v1  ;;  %670 = vperm.xlu0 %7492, %v8240_v38  }
  0x87   : > { %555 = vperm.xlu1 %7503, %v456_v39  }
  0x8a   : > { %680 = vperm.xlu0 %7492, %v8246_v40  }
  0x8b   : > { %7504 = vset.pattern.permute.xlu1 %v12463_v0 }
  0x8c   : > { %935 = vperm.xlu1 %7504, %v456_v39  }
  0x8e   : > { %7540 = vset.pattern.permute.xlu0 %v12461_v4 }
  0x8f   : > { %1300 = vperm.xlu0 %7540, %v8169_v8  }
  0x90   : > { %939 = vperm.xlu1 %7504, %v8184_v18  }
  0x93   : > { %1308 = vperm.xlu0 %7540, %v452_v24  }
  0x94   : > { %7505 = vset.pattern.permute.xlu1 %v12461_v4 }
  0x95   : > { %1328 = vperm.xlu1 %7505, %v8184_v18  }
  0x97   : > { %1316 = vperm.xlu0 %7540, %v454_v33  }
  0x99   : > { %7506 = vset.pattern.permute.xlu1 %v12465_v1 }
  0x9a   : > { %565 = vperm.xlu1 %7506, %v458_v41  }
  0x9b   : > { %1324 = vperm.xlu0 %7540, %v456_v39  }
  0x9e   : > { %7507 = vset.pattern.permute.xlu1 %v12463_v0 }
  0x9f   : > { %943 = vperm.xlu1 %7507, %v458_v41   ;;  %1332 = vperm.xlu0 %7540, %v458_v41   ;;  %v8380_v41 = vld [vmem:[%s8161_s15 + $0x190] sm:$0xff] }
  0xa3   : > { %947 = vperm.xlu1 %7507, %v8188_v21   ;;  %1340 = vperm.xlu0 %7540, %v460_v42  }
  0xa7   : > { %7508 = vset.pattern.permute.xlu1 %v12461_v4  ;;  %1348 = vperm.xlu0 %7540, %v462_v43  }
  0xa8   : > { %1336 = vperm.xlu1 %7508, %v8188_v21  }
  0xab   : > { %1356 = vperm.xlu0 %7540, %v8266_v44  }
  0xac   : > { %7509 = vset.pattern.permute.xlu1 %v12465_v1 }
  0xad   : > { %575 = vperm.xlu1 %7509, %v460_v42  }
  0xaf   : > { %1364 = vperm.xlu0 %7540, %v8271_v45  }
  0xb1   : > { %7510 = vset.pattern.permute.xlu1 %v12463_v0 }
  0xb2   : > { %951 = vperm.xlu1 %7510, %v460_v42  }
  0xb3   : > { %1372 = vperm.xlu0 %7540, %v8276_v46  }
  0xb6   : > { %955 = vperm.xlu1 %7510, %v8194_v25  }
  0xb7   : > { %1380 = vperm.xlu0 %7540, %v8281_v47  }
  0xba   : > { %7511 = vset.pattern.permute.xlu1 %v12461_v4 }
  0xbb   : > { %1344 = vperm.xlu1 %7511, %v8194_v25   ;;  %v904_v50 = vpop.permute.xlu1 %903  ;;  %v516_v52 = vpop.permute.xlu0 %515  ;;  %1388 = vperm.xlu0 %7540, %v8286_v48   ;;  %v8361_v25 = vld [vmem:[%s8161_s15 + $0x180] sm:$0xff] }
  0xbc   : > { %v1162_v53 = vmul.f32 %v8292_v49, %v904_v50  ;;  %v837_v54 = vmul.f32 %v8297_v51, %v516_v52  ;;  %v8389_v50 = vld [vmem:[%s8161_s15 + $0x130] sm:$0xff] }
  0xbe   : > { %v1226_v61 = vadd.f32 %v1162_v53, %v837_v54  ;;  %v500_v53 = vld [vmem:[%s8161_s15 + $0x1a0] sm:$0xff] }
  0xbf   : > { %7512 = vset.pattern.permute.xlu1 %v12465_v1  ;;  %v908_v57 = vpop.permute.xlu1 %907  ;;  %1396 = vperm.xlu0 %7540, %v8308_v56  }
  0xc0   : > { %585 = vperm.xlu1 %7512, %v462_v43   ;;  %v1293_v58 = vpop.permute.xlu0 %1292  ;;  %v1163_v6 = vmul.f32 %v8292_v49, %v908_v57 }
  0xc1   : > { %v1551_v59 = vmul.f32 %v8305_v55, %v1293_v58  ;;  %v488_v58 = vld [vmem:[%s8161_s15 + $0x140] sm:$0xff] }
  0xc3   : > { %1404 = vperm.xlu0 %7540, %v8314_v60   ;;  %v1615_v62 = vadd.f32 %v1551_v59, %v1226_v61 }
  0xc4   : > { %7513 = vset.pattern.permute.xlu1 %v12463_v0  ;;  %v1297_v63 = vpop.permute.xlu1 %1296 }
  0xc5   : > { %959 = vperm.xlu1 %7513, %v462_v43   ;;  %v521_v3 = vpop.permute.xlu0 %520  ;;  %v1686_v8 = vmul.f32 %v8321_v2, %v1615_v62  ;;  %v1552_v9 = vmul.f32 %v8305_v55, %v1297_v63  ;;  %v490_v63 = vld [vmem:[%s8161_s15 + $0x150] sm:$0xff] }
  0xc6   : > { %v838_v7 = vmul.f32 %v8297_v51, %v521_v3 }
  0xc7   : > { %1412 = vperm.xlu0 %7540, %v8324_v5   ;;  %v1757_v17 = vadd.f32 %v8339_v13, %v1686_v8 }
  0xc8   : > { %v1227_v10 = vadd.f32 %v1163_v6, %v838_v7  ;;  %v504_v7 = vld [vmem:[%s8161_s15 + $0x1c0] sm:$0xff] }
  0xc9   : > { %963 = vperm.xlu1 %7513, %v8199_v28   ;;  %v8332_v11 = vpop.permute.xlu1 %525  ;;  %v8334_v12 = vpop.permute.xlu0 %530  ;;  %v1821_v22 = vmax.f32 %v1757_v17, 0.0 }
  0xca   : > { %v1616_v15 = vadd.f32 %v1552_v9, %v1227_v10  ;;  %v492_v9 = vld [vmem:[%s8161_s15 + $0x160] sm:$0xff] }
  0xcb   : > { %1420 = vperm.xlu0 %7540, %v8342_v14  }
  0xcc   : > { %v1687_v16 = vmul.f32 %v8321_v2, %v1616_v15 }
  0xcd   : > { %7514 = vset.pattern.permute.xlu1 %v12461_v4  ;;  %v8348_v18 = vpop.permute.xlu0 %540 }
  0xce   : > { %1352 = vperm.xlu1 %7514, %v8199_v28   ;;  %v8354_v20 = vpop.permute.xlu1 %911  ;;  %v1758_v21 = vadd.f32 %v8339_v13, %v1687_v16  ;;  %v506_v16 = vld [vmem:[%s8161_s15 + $0x1d0] sm:$0xff] }
  0xcf   : > { %1428 = vperm.xlu0 %7540, %v8351_v19  }
  0xd0   : > { %v1822_v23 = vmax.f32 %v1758_v21, 0.0 }
  0xd1   : > { %v8358_v24 = vpop.permute.xlu0 %550 }
  0xd2   : > { %7515 = vset.pattern.permute.xlu1 %v12465_v1  ;;  %v8364_v26 = vpop.permute.xlu1 %915  ;;  %v1885_v27 = vpack.c.bf16 %v1822_v23, %v1821_v22  ;;  %v840_v22 = vmul.f32 %v8297_v51, %v8334_v12  ;;  %v1164_v12 = vmul.f32 %v8292_v49, %v8354_v20 }
  0xd3   : > { %595 = vperm.xlu1 %7515, %v8266_v44   ;;  %1484 = vperm.xlu0 %7540, %v8361_v25   ;;  %v1165_v23 = vmul.f32 %v8292_v49, %v8364_v26 }
  0xd4   : > { %2058 = vmatmul.mubr.bf16.vlgmr.msra.gmra.mxu0 %v1885_v27 }
  0xd5   : > { %v8368_v28 = vpop.permute.xlu0 %560  ;;  %2067 = vmatprep.mubr.bf16.mxu0 %v12465_v1 }
  0xd7   : > { %7516 = vset.pattern.permute.xlu1 %v12463_v0  ;;  %v1305_v33 = vpop.permute.xlu1 %1304  ;;  %1436 = vperm.xlu0 %7540, %v8372_v29  }
  0xd8   : > { %967 = vperm.xlu1 %7516, %v8266_v44  }
  0xd9   : > { %v8377_v39 = vpop.permute.xlu0 %570 }
  0xdb   : > { %1492 = vperm.xlu0 %7540, %v8380_v41  }
  0xdc   : > { %971 = vperm.xlu1 %7516, %v8204_v30   ;;  %v8384_v42 = vpop.permute.xlu1 %535 }
  0xdd   : > { %v8386_v43 = vpop.permute.xlu0 %580 }
  0xdf   : > { %1444 = vperm.xlu0 %7540, %v8389_v50  }
  0xe0   : > { %7517 = vset.pattern.permute.xlu1 %v12461_v4 }
  0xe1   : > { %1360 = vperm.xlu1 %7517, %v8204_v30   ;;  %v8394_v44 = vpop.permute.xlu1 %919  ;;  %v8396_v52 = vpop.permute.xlu0 %590  ;;  %v502_v30 = vld [vmem:[%s8161_s15 + $0x1b0] sm:$0xff] }
  0xe3   : > { %1500 = vperm.xlu0 %7540, %v500_v53   ;;  %v508_v53 = vld [vmem:[%s8161_s15 + $0x1e0] sm:$0xff] }
  0xe5   : > { %7518 = vset.pattern.permute.xlu1 %v12465_v1  ;;  %v924_v54 = vpop.permute.xlu1 %923  ;;  %v8400_v57 = vpop.permute.xlu0 %600 }
  0xe6   : > { %605 = vperm.xlu1 %7518, %v8271_v45  }
  0xe7   : > { %1452 = vperm.xlu0 %7540, %v488_v58   ;;  %v1554_v58 = vmul.f32 %v8305_v55, %v1305_v33  ;;  %v842_v33 = vmul.f32 %v8297_v51, %v8348_v18 }
  0xe9   : > { %v8404_v59 = vpop.permute.xlu0 %610 }
  0xea   : > { %7519 = vset.pattern.permute.xlu1 %v12463_v0  ;;  %v1313_v61 = vpop.permute.xlu1 %1312 }
  0xeb   : > { %975 = vperm.xlu1 %7519, %v8271_v45   ;;  %1508 = vperm.xlu0 %7540, %v502_v30  }
  0xed   : > { %v8409_v62 = vpop.permute.xlu0 %620 }
  0xef   : > { %979 = vperm.xlu1 %7519, %v8208_v31   ;;  %v8413_v3 = vpop.permute.xlu1 %545  ;;  %1460 = vperm.xlu0 %7540, %v490_v63   ;;  %v1229_v63 = vadd.f32 %v1165_v23, %v840_v22  ;;  %v1556_v23 = vmul.f32 %v8305_v55, %v1313_v61 }
  0xf1   : > { %v8415_v6 = vpop.permute.xlu0 %630 }
  0xf3   : > { %7520 = vset.pattern.permute.xlu1 %v12461_v4  ;;  %1516 = vperm.xlu0 %7540, %v504_v7  }
  0xf4   : > { %1368 = vperm.xlu1 %7520, %v8208_v31   ;;  %v928_v45 = vpop.permute.xlu1 %927  ;;  %v494_v31 = vld [vmem:[%s8161_s15 + $0x170] sm:$0xff] }
  0xf5   : > { %v8420_v8 = vpop.permute.xlu0 %640  ;;  %v1168_v61 = vmul.f32 %v8292_v49, %v928_v45 }
  0xf7   : > { %1468 = vperm.xlu0 %7540, %v492_v9   ;;  %v8446_v9 = vld [vmem:[%s8161_s15 + $0x118] sm:$0xff] }
  0xf8   : > { %7521 = vset.pattern.permute.xlu1 %v12465_v1  ;;  %v932_v10 = vpop.permute.xlu1 %931 }
  0xf9   : > { %615 = vperm.xlu1 %7521, %v8276_v46   ;;  %v8425_v15 = vpop.permute.xlu0 %650 }
  0xfb   : > { %1524 = vperm.xlu0 %7540, %v506_v16   ;;  %v1167_v16 = vmul.f32 %v8292_v49, %v924_v54 }
  0xfd   : > { %7522 = vset.pattern.permute.xlu1 %v12463_v0  ;;  %v1321_v17 = vpop.permute.xlu1 %1320  ;;  %v8429_v21 = vpop.permute.xlu0 %660  ;;  %v1231_v54 = vadd.f32 %v1167_v16, %v842_v33  ;;  %v843_v33 = vmul.f32 %v8297_v51, %v8413_v3 }
  0xfe   : > { %983 = vperm.xlu1 %7522, %v8276_v46   ;;  %v1618_v46 = vadd.f32 %v1554_v58, %v1229_v63  ;;  %v1558_v3 = vmul.f32 %v8305_v55, %v1321_v17 }
  0xff   : > { %1476 = vperm.xlu0 %7540, %v494_v31   ;;  %v839_v31 = vmul.f32 %v8297_v51, %v8332_v11  ;;  %v841_v11 = vmul.f32 %v8297_v51, %v8384_v42  ;;  %v844_v42 = vmul.f32 %v8297_v51, %v8358_v24 }
 0x100   : > { %v1689_v22 = vmul.f32 %v8321_v2, %v1618_v46  ;;  %v1620_v46 = vadd.f32 %v1556_v23, %v1231_v54  ;;  %v1169_v23 = vmul.f32 %v8292_v49, %v932_v10 }
 0x101   : > { %v8437_v27 = vpop.permute.xlu0 %670 }
 0x102   : > { %987 = vperm.xlu1 %7522, %v8213_v32   ;;  %v556_v30 = vpop.permute.xlu1 %555  ;;  %v1233_v24 = vadd.f32 %v1169_v23, %v844_v42 }
 0x103   : > { %1532 = vperm.xlu0 %7540, %v508_v53   ;;  %v1228_v53 = vadd.f32 %v1164_v12, %v839_v31  ;;  %v1760_v12 = vadd.f32 %v8339_v13, %v1689_v22 }
 0x105   : > { %v8442_v7 = vpop.permute.xlu0 %680 }
 0x106   : > { %7523 = vset.pattern.permute.xlu1 %v12461_v4 }
 0x107   : > { %1376 = vperm.xlu1 %7523, %v8213_v32   ;;  %v936_v26 = vpop.permute.xlu1 %935  ;;  %7584 = vset.pattern.permute.xlu0 %v12465_v1  ;;  %v1166_v32 = vmul.f32 %v8292_v49, %v8394_v44 }
 0x108   : > { %690 = vperm.xlu0 %7584, %v8446_v9  }
 0x109   : > { %v1230_v31 = vadd.f32 %v1166_v32, %v841_v11  ;;  %v1232_v32 = vadd.f32 %v1168_v61, %v843_v33  ;;  %v1622_v61 = vadd.f32 %v1558_v3, %v1233_v24 }
 0x10a   : > { %v1301_v20 = vpop.permute.xlu0 %1300 }
 0x10b   : > { %v1553_v58 = vmul.f32 %v8305_v55, %v1301_v20  ;;  %7524 = vset.pattern.permute.xlu1 %v12465_v1  ;;  %v940_v18 = vpop.permute.xlu1 %939 }
 0x10c   : > { %625 = vperm.xlu1 %7524, %v8281_v47   ;;  %v1171_v33 = vmul.f32 %v8292_v49, %v940_v18 }
 0x10d   : > { %v1617_v63 = vadd.f32 %v1553_v58, %v1228_v53  ;;  %v1691_v53 = vmul.f32 %v8321_v2, %v1620_v46  ;;  %v1824_v58 = vmax.f32 %v1760_v12, 0.0  ;;  %v1170_v12 = vmul.f32 %v8292_v49, %v936_v26  ;;  %v8496_v26 = vld [vmem:[%s8161_s15 + $0x188] sm:$0xff] }
 0x10e   : > { %v1309_v4 = vpop.permute.xlu0 %1308  ;;  %760 = vperm.xlu0 %7584, %v8496_v26  }
 0x10f   : > { %v1688_v44 = vmul.f32 %v8321_v2, %v1617_v63  ;;  %v1555_v20 = vmul.f32 %v8305_v55, %v1309_v4  ;;  %v1762_v17 = vadd.f32 %v8339_v13, %v1691_v53 }
 0x110   : > { %7525 = vset.pattern.permute.xlu1 %v12463_v0  ;;  %v1329_v16 = vpop.permute.xlu1 %1328 }
 0x111   : > { %v1619_v45 = vadd.f32 %v1555_v20, %v1230_v31  ;;  %991 = vperm.xlu1 %7525, %v8281_v47   ;;  %v1759_v22 = vadd.f32 %v8339_v13, %v1688_v44  ;;  %v846_v44 = vmul.f32 %v8297_v51, %v8368_v28  ;;  %v845_v20 = vmul.f32 %v8297_v51, %v556_v30 }
 0x112   : > { %v1317_v4 = vpop.permute.xlu0 %1316  ;;  %v1693_v28 = vmul.f32 %v8321_v2, %v1622_v61  ;;  %v1826_v18 = vmax.f32 %v1762_v17, 0.0 }
 0x113   : > { %v1690_v54 = vmul.f32 %v8321_v2, %v1619_v45  ;;  %v1557_v11 = vmul.f32 %v8305_v55, %v1317_v4  ;;  %v1823_v63 = vmax.f32 %v1759_v22, 0.0  ;;  %v12546_v45 = vmov 2  }
 0x114   : > { %v1234_v30 = vadd.f32 %v1170_v12, %v845_v20  ;;  %v1235_v4 = vadd.f32 %v1171_v33, %v846_v44  ;;  %v12547_v20 = vmov 1  }
 0x115   : > { %v1621_v0 = vadd.f32 %v1557_v11, %v1232_v32  ;;  %995 = vperm.xlu1 %7525, %v8220_v34   ;;  %v566_v10 = vpop.permute.xlu1 %565  ;;  %v1886_v47 = vpack.c.bf16 %v1824_v58, %v1823_v63  ;;  %v1761_v31 = vadd.f32 %v8339_v13, %v1690_v54  ;;  %v1560_v32 = vmul.f32 %v8305_v55, %v1329_v16 }
 0x116   : > { %v1325_v46 = vpop.permute.xlu0 %1324  ;;  %v1764_v63 = vadd.f32 %v8339_v13, %v1693_v28  ;;  %v848_v16 = vmul.f32 %v8297_v51, %v8377_v39 }
 0x117   : > { %2068 = vmatmul.mubr.bf16.gmra.mxu0 %v1886_v47  ;;  %v1692_v42 = vmul.f32 %v8321_v2, %v1621_v0  ;;  %v1559_v23 = vmul.f32 %v8305_v55, %v1325_v46  ;;  %v1825_v22 = vmax.f32 %v1761_v31, 0.0  ;;  %v1624_v11 = vadd.f32 %v1560_v32, %v1235_v4 }
 0x118   : > { %2077 = vmatprep.mubr.bf16.mxu0 %v12465_v1  ;;  %v847_v31 = vmul.f32 %v8297_v51, %v566_v10 }
 0x119   : > { %7526 = vset.pattern.permute.xlu1 %v12546_v45  ;;  %v1623_v0 = vadd.f32 %v1559_v23, %v1234_v30  ;;  %v1887_v58 = vpack.c.bf16 %v1826_v18, %v1825_v22  ;;  %v1763_v3 = vadd.f32 %v8339_v13, %v1692_v42  ;;  %v1695_v12 = vmul.f32 %v8321_v2, %v1624_v11 }
 0x11a   : > { %1384 = vperm.xlu1 %7526, %v8220_v34   ;;  %v944_v53 = vpop.permute.xlu1 %943  ;;  %v1333_v24 = vpop.permute.xlu0 %1332  ;;  %v1828_v42 = vmax.f32 %v1764_v63, 0.0 }
 0x11b   : > { %v1172_v34 = vmul.f32 %v8292_v49, %v944_v53  ;;  %v1694_v46 = vmul.f32 %v8321_v2, %v1623_v0  ;;  %v1827_v61 = vmax.f32 %v1763_v3, 0.0  ;;  %v1561_v44 = vmul.f32 %v8305_v55, %v1333_v24  ;;  %v8526_v3 = vld [vmem:[%s8161_s15 + $0x128] sm:$0xff] }
 0x11c   : > { %v1766_v30 = vadd.f32 %v8339_v13, %v1695_v12  ;;  %700 = vperm.xlu0 %7584, %v8526_v3  }
 0x11d   : > { %v1236_v17 = vadd.f32 %v1172_v34, %v847_v31  ;;  %v1888_v22 = vpack.c.bf16 %v1828_v42, %v1827_v61  ;;  %v1765_v10 = vadd.f32 %v8339_v13, %v1694_v46  ;;  %v850_v61 = vmul.f32 %v8297_v51, %v8386_v43 }
 0x11e   : > { %7527 = vset.pattern.permute.xlu1 %v12465_v1  ;;  %v948_v54 = vpop.permute.xlu1 %947 }
 0x11f   : > { %635 = vperm.xlu1 %7527, %v8286_v48   ;;  %2078 = vmatmul.mubr.bf16.gmra.mxu0 %v1887_v58  ;;  %v1173_v47 = vmul.f32 %v8292_v49, %v948_v54  ;;  %v1625_v28 = vadd.f32 %v1561_v44, %v1236_v17  ;;  %v1829_v4 = vmax.f32 %v1765_v10, 0.0  ;;  %v1341_v58 = vpop.permute.xlu0 %1340 }
 0x120   : > { %2087 = vmatprep.mubr.bf16.mxu0 %v12465_v1  ;;  %v1563_v24 = vmul.f32 %v8305_v55, %v1341_v58 }
 0x121   : > { %v1237_v39 = vadd.f32 %v1173_v47, %v848_v16  ;;  %v1696_v0 = vmul.f32 %v8321_v2, %v1625_v28 }
 0x123   : > { %7528 = vset.pattern.permute.xlu1 %v12547_v20  ;;  %v1337_v33 = vpop.permute.xlu1 %1336  ;;  %v1767_v47 = vadd.f32 %v8339_v13, %v1696_v0  ;;  %v8552_v0 = vld [vmem:[%s8161_s15 + $0x198] sm:$0xff] }
 0x124   : > { %v1562_v23 = vmul.f32 %v8305_v55, %v1337_v33  ;;  %999 = vperm.xlu1 %7528, %v8286_v48   ;;  %v1830_v48 = vmax.f32 %v1766_v30, 0.0  ;;  %770 = vperm.xlu0 %7584, %v8552_v0  }
 0x125   : > { %v1831_v44 = vmax.f32 %v1767_v47, 0.0 }
 0x126   : > { %v1626_v53 = vadd.f32 %v1562_v23, %v1237_v39  ;;  %v1889_v11 = vpack.c.bf16 %v1830_v48, %v1829_v4 }
 0x127   : > { %2088 = vmatmul.mubr.bf16.gmra.mxu0 %v1888_v22 }
 0x128   : > { %1003 = vperm.xlu1 %7528, %v8225_v35   ;;  %v576_v32 = vpop.permute.xlu1 %575  ;;  %2097 = vmatprep.mubr.bf16.mxu0 %v12465_v1  ;;  %v1697_v18 = vmul.f32 %v8321_v2, %v1626_v53 }
 0x129   : > { %v849_v63 = vmul.f32 %v8297_v51, %v576_v32  ;;  %v1349_v32 = vpop.permute.xlu0 %1348 }
 0x12a   : > { %v1768_v34 = vadd.f32 %v8339_v13, %v1697_v18 }
 0x12c   : > { %7529 = vset.pattern.permute.xlu1 %v12546_v45  ;;  %v1832_v46 = vmax.f32 %v1768_v34, 0.0 }
 0x12d   : > { %1392 = vperm.xlu1 %7529, %v8225_v35   ;;  %v952_v54 = vpop.permute.xlu1 %951 }
 0x12e   : > { %v1174_v16 = vmul.f32 %v8292_v49, %v952_v54  ;;  %v1890_v33 = vpack.c.bf16 %v1832_v46, %v1831_v44 }
 0x12f   : > { %2098 = vmatmul.mubr.bf16.gmra.mxu0 %v1889_v11  ;;  %v1565_v11 = vmul.f32 %v8305_v55, %v1349_v32 }
 0x130   : > { %v1238_v31 = vadd.f32 %v1174_v16, %v849_v63  ;;  %2107 = vmatprep.mubr.bf16.mxu0 %v12465_v1 }
 0x131   : > { %7530 = vset.pattern.permute.xlu1 %v12465_v1  ;;  %v956_v35 = vpop.permute.xlu1 %955 }
 0x132   : > { %645 = vperm.xlu1 %7530, %v8308_v56   ;;  %v1627_v12 = vadd.f32 %v1563_v24, %v1238_v31  ;;  %v1175_v17 = vmul.f32 %v8292_v49, %v956_v35 }
 0x134   : > { %v1698_v39 = vmul.f32 %v8321_v2, %v1627_v12  ;;  %v1239_v23 = vadd.f32 %v1175_v17, %v850_v61 }
 0x136   : > { %7531 = vset.pattern.permute.xlu1 %v12547_v20  ;;  %v1345_v42 = vpop.permute.xlu1 %1344  ;;  %v1769_v28 = vadd.f32 %v8339_v13, %v1698_v39 }
 0x137   : > { %v1564_v22 = vmul.f32 %v8305_v55, %v1345_v42  ;;  %1007 = vperm.xlu1 %7531, %v8308_v56   ;;  %2108 = vmatmul.mubr.bf16.gmra.mxu0 %v1890_v33  ;;  %v1357_v33 = vpop.permute.xlu0 %1356 }
 0x138   : > { %2117 = vmatprep.mubr.bf16.mxu0 %v12465_v1  ;;  %v1833_v18 = vmax.f32 %v1769_v28, 0.0 }
 0x139   : > { %v1628_v43 = vadd.f32 %v1564_v22, %v1239_v23  ;;  %v8575_v23 = vld [vmem:[%s8161_s15 + $0x138] sm:$0xff] }
 0x13a   : > { %710 = vperm.xlu0 %7584, %v8575_v23  }
 0x13b   : > { %v1699_v10 = vmul.f32 %v8321_v2, %v1628_v43  ;;  %1011 = vperm.xlu1 %7531, %v8230_v36   ;;  %v586_v53 = vpop.permute.xlu1 %585 }
 0x13c   : > { %v851_v48 = vmul.f32 %v8297_v51, %v586_v53  ;;  %v1567_v53 = vmul.f32 %v8305_v55, %v1357_v33 }
 0x13d   : > { %v1770_v30 = vadd.f32 %v8339_v13, %v1699_v10 }
 0x13f   : > { %7532 = vset.pattern.permute.xlu1 %v12546_v45  ;;  %v1834_v4 = vmax.f32 %v1770_v30, 0.0 }
 0x140   : > { %1400 = vperm.xlu1 %7532, %v8230_v36   ;;  %v960_v56 = vpop.permute.xlu1 %959  ;;  %v852_v36 = vmul.f32 %v8297_v51, %v8396_v52 }
 0x141   : > { %v1176_v58 = vmul.f32 %v8292_v49, %v960_v56  ;;  %v1891_v54 = vpack.c.bf16 %v1834_v4, %v1833_v18 }
 0x143   : > { %v1240_v34 = vadd.f32 %v1176_v58, %v851_v48  ;;  %2118 = vmatmul.mubr.bf16.gmra.mxu0 %v1891_v54 }
 0x144   : > { %7533 = vset.pattern.permute.xlu1 %v12465_v1  ;;  %v964_v63 = vpop.permute.xlu1 %963  ;;  %2127 = vmatprep.mubr.bf16.mxu0 %v12465_v1 }
 0x145   : > { %655 = vperm.xlu1 %7533, %v8314_v60   ;;  %v1629_v16 = vadd.f32 %v1565_v11, %v1240_v34  ;;  %v1177_v24 = vmul.f32 %v8292_v49, %v964_v63 }
 0x147   : > { %v1700_v31 = vmul.f32 %v8321_v2, %v1629_v16  ;;  %v1241_v35 = vadd.f32 %v1177_v24, %v852_v36  ;;  %v1365_v36 = vpop.permute.xlu0 %1364 }
 0x149   : > { %7534 = vset.pattern.permute.xlu1 %v12547_v20  ;;  %v1353_v47 = vpop.permute.xlu1 %1352  ;;  %v1771_v17 = vadd.f32 %v8339_v13, %v1700_v31  ;;  %v8599_v31 = vld [vmem:[%s8161_s15 + $0x1a8] sm:$0xff] }
 0x14a   : > { %v1566_v46 = vmul.f32 %v8305_v55, %v1353_v47  ;;  %1015 = vperm.xlu1 %7534, %v8314_v60   ;;  %780 = vperm.xlu0 %7584, %v8599_v31  }
 0x14b   : > { %v1835_v42 = vmax.f32 %v1771_v17, 0.0 }
 0x14c   : > { %v1630_v61 = vadd.f32 %v1566_v46, %v1241_v35 }
 0x14e   : > { %v1701_v12 = vmul.f32 %v8321_v2, %v1630_v61  ;;  %1019 = vperm.xlu1 %7534, %v8235_v37   ;;  %v596_v52 = vpop.permute.xlu1 %595  ;;  %v1569_v61 = vmul.f32 %v8305_v55, %v1365_v36 }
 0x14f   : > { %v853_v22 = vmul.f32 %v8297_v51, %v596_v52 }
 0x150   : > { %v1772_v44 = vadd.f32 %v8339_v13, %v1701_v12 }
 0x152   : > { %7535 = vset.pattern.permute.xlu1 %v12546_v45  ;;  %v1836_v39 = vmax.f32 %v1772_v44, 0.0 }
 0x153   : > { %1408 = vperm.xlu1 %7535, %v8235_v37   ;;  %v968_v60 = vpop.permute.xlu1 %967  ;;  %v854_v37 = vmul.f32 %v8297_v51, %v8400_v57 }
 0x154   : > { %v1178_v43 = vmul.f32 %v8292_v49, %v968_v60  ;;  %v1892_v10 = vpack.c.bf16 %v1836_v39, %v1835_v42 }
 0x156   : > { %v1242_v28 = vadd.f32 %v1178_v43, %v853_v22  ;;  %2128 = vmatmul.mubr.bf16.gmra.mxu0 %v1892_v10 }
 0x157   : > { %7536 = vset.pattern.permute.xlu1 %v12465_v1  ;;  %v972_v30 = vpop.permute.xlu1 %971  ;;  %2137 = vmatprep.mubr.bf16.mxu0 %v12465_v1 }
 0x158   : > { %665 = vperm.xlu1 %7536, %v8324_v5   ;;  %v1631_v32 = vadd.f32 %v1567_v53, %v1242_v28  ;;  %v1179_v18 = vmul.f32 %v8292_v49, %v972_v30  ;;  %v1373_v28 = vpop.permute.xlu0 %1372 }
 0x15a   : > { %v1702_v56 = vmul.f32 %v8321_v2, %v1631_v32  ;;  %v1243_v48 = vadd.f32 %v1179_v18, %v854_v37  ;;  %v8622_v18 = vld [vmem:[%s8161_s15 + $0x148] sm:$0xff] }
 0x15b   : > { %720 = vperm.xlu0 %7584, %v8622_v18  }
 0x15c   : > { %7537 = vset.pattern.permute.xlu1 %v12547_v20  ;;  %v1361_v4 = vpop.permute.xlu1 %1360  ;;  %v1773_v34 = vadd.f32 %v8339_v13, %v1702_v56 }
 0x15d   : > { %v1568_v58 = vmul.f32 %v8305_v55, %v1361_v4  ;;  %1023 = vperm.xlu1 %7537, %v8324_v5  }
 0x15e   : > { %v1837_v16 = vmax.f32 %v1773_v34, 0.0 }
 0x15f   : > { %v1632_v54 = vadd.f32 %v1568_v58, %v1243_v48  ;;  %v1571_v48 = vmul.f32 %v8305_v55, %v1373_v28  ;;  %v1933_v28 = vld [vmem:[%s12448_s5] sm:$0x3] }
 0x161   : > { %v1703_v11 = vmul.f32 %v8321_v2, %v1632_v54  ;;  %1027 = vperm.xlu1 %7537, %v8240_v38   ;;  %v606_v57 = vpop.permute.xlu1 %605 }
 0x162   : > { %v855_v5 = vmul.f32 %v8297_v51, %v606_v57 }
 0x163   : > { %v1774_v63 = vadd.f32 %v8339_v13, %v1703_v11 }
 0x165   : > { %7538 = vset.pattern.permute.xlu1 %v12546_v45  ;;  %v1838_v24 = vmax.f32 %v1774_v63, 0.0 }
 0x166   : > { %1416 = vperm.xlu1 %7538, %v8240_v38   ;;  %v976_v47 = vpop.permute.xlu1 %975  ;;  %v856_v38 = vmul.f32 %v8297_v51, %v8404_v59 }
 0x167   : > { %v1180_v35 = vmul.f32 %v8292_v49, %v976_v47  ;;  %v1893_v46 = vpack.c.bf16 %v1838_v24, %v1837_v16 }
 0x169   : > { %v1244_v12 = vadd.f32 %v1180_v35, %v855_v5  ;;  %2138 = vmatmul.mubr.bf16.gmra.mxu0 %v1893_v46  ;;  %v1935_v46 = vlaneseq }
 0x16a   : > { %7539 = vset.pattern.permute.xlu1 %v12465_v1  ;;  %v980_v52 = vpop.permute.xlu1 %979  ;;  %2147 = vmatprep.mubr.bf16.mxu0 %v12465_v1 }
 0x16b   : > { %675 = vperm.xlu1 %7539, %v8342_v14   ;;  %v1633_v17 = vadd.f32 %v1569_v61, %v1244_v12  ;;  %v1181_v44 = vmul.f32 %v8292_v49, %v980_v52  ;;  %v1381_v61 = vpop.permute.xlu0 %1380 }
 0x16d   : > { %v1704_v42 = vmul.f32 %v8321_v2, %v1633_v17  ;;  %v1245_v39 = vadd.f32 %v1181_v44, %v856_v38 }
 0x16f   : > { %7541 = vset.pattern.permute.xlu1 %v12547_v20  ;;  %v1369_v33 = vpop.permute.xlu1 %1368  ;;  %v1775_v10 = vadd.f32 %v8339_v13, %v1704_v42  ;;  %v8649_v42 = vshrl.u32 %v1935_v46, 7 }
 0x170   : > { %v1570_v60 = vmul.f32 %v8305_v55, %v1369_v33  ;;  %1031 = vperm.xlu1 %7541, %v8342_v14  }
 0x171   : > { %v1839_v30 = vmax.f32 %v1775_v10, 0.0  ;;  %12548 = vst [vmem:[#allocation15_spill] sm:$0xff] %v8649_v42 }
 0x172   : > { %v1634_v22 = vadd.f32 %v1570_v60, %v1245_v39  ;;  %v1573_v39 = vmul.f32 %v8305_v55, %v1381_v61 }
 0x174   : > { %v1705_v43 = vmul.f32 %v8321_v2, %v1634_v22  ;;  %1035 = vperm.xlu1 %7541, %v8246_v40   ;;  %v616_v59 = vpop.permute.xlu1 %615 }
 0x175   : > { %v857_v14 = vmul.f32 %v8297_v51, %v616_v59  ;;  %v860_v59 = vmul.f32 %v8297_v51, %v8415_v6 }
 0x176   : > { %v1776_v53 = vadd.f32 %v8339_v13, %v1705_v43  ;;  %v1389_v43 = vpop.permute.xlu0 %1388 }
 0x178   : > { %7542 = vset.pattern.permute.xlu1 %v12546_v45  ;;  %v1840_v37 = vmax.f32 %v1776_v53, 0.0 }
 0x179   : > { %1424 = vperm.xlu1 %7542, %v8246_v40   ;;  %v984_v32 = vpop.permute.xlu1 %983  ;;  %v858_v40 = vmul.f32 %v8297_v51, %v8409_v62 }
 0x17a   : > { %v1182_v4 = vmul.f32 %v8292_v49, %v984_v32  ;;  %v1894_v56 = vpack.c.bf16 %v1840_v37, %v1839_v30  ;;  %v8666_v30 = vsub.s32 1, %v8649_v42 }
 0x17c   : > { %v1246_v58 = vadd.f32 %v1182_v4, %v857_v14  ;;  %2148 = vmatmul.mubr.bf16.gmra.mxu0 %v1894_v56  ;;  %12550 = vst [vmem:[#allocation17_spill] sm:$0xff] %v8666_v30  ;;  %v8672_v4 = vpop.permute.xlu0 %1396 }
 0x17d   : > { %7543 = vset.pattern.permute.xlu1 %v12465_v1  ;;  %v988_v54 = vpop.permute.xlu1 %987  ;;  %2157 = vmatprep.mubr.bf16.mxu0 %v12465_v1 }
 0x17e   : > { %685 = vperm.xlu1 %7543, %v8351_v19   ;;  %v1635_v11 = vadd.f32 %v1571_v48, %v1246_v58  ;;  %v1183_v57 = vmul.f32 %v8292_v49, %v988_v54  ;;  %v8678_v54 = vrot.slane %v1933_v28, %v8666_v30 }
 0x180   : > { %v1706_v63 = vmul.f32 %v8321_v2, %v1635_v11  ;;  %v1247_v36 = vadd.f32 %v1183_v57, %v858_v40 }
 0x182   : > { %7544 = vset.pattern.permute.xlu1 %v12547_v20  ;;  %v1377_v34 = vpop.permute.xlu1 %1376  ;;  %v1777_v5 = vadd.f32 %v8339_v13, %v1706_v63  ;;  %v8686_v63 = vpop.permute.xlu0 %1404 }
 0x183   : > { %v1572_v16 = vmul.f32 %v8305_v55, %v1377_v34  ;;  %1039 = vperm.xlu1 %7544, %v8351_v19   ;;  %v8645_v19 = vld [vmem:[%s8161_s15 + $0x1b8] sm:$0xff] }
 0x184   : > { %v1841_v12 = vmax.f32 %v1777_v5, 0.0  ;;  %790 = vperm.xlu0 %7584, %v8645_v19  }
 0x185   : > { %v1636_v24 = vadd.f32 %v1572_v16, %v1247_v36 }
 0x187   : > { %v1707_v47 = vmul.f32 %v8321_v2, %v1636_v24  ;;  %1043 = vperm.xlu1 %7544, %v8446_v9   ;;  %v626_v62 = vpop.permute.xlu1 %625 }
 0x188   : > { %v859_v17 = vmul.f32 %v8297_v51, %v626_v62 }
 0x189   : > { %v1778_v35 = vadd.f32 %v8339_v13, %v1707_v47 }
 0x18b   : > { %7545 = vset.pattern.permute.xlu1 %v12546_v45  ;;  %v1842_v52 = vmax.f32 %v1778_v35, 0.0 }
 0x18c   : > { %1432 = vperm.xlu1 %7545, %v8446_v9   ;;  %v992_v38 = vpop.permute.xlu1 %991  ;;  %v8657_v9 = vsub.s32 0, %v8649_v42 }
 0x18d   : > { %v1184_v44 = vmul.f32 %v8292_v49, %v992_v38  ;;  %v1895_v33 = vpack.c.bf16 %v1842_v52, %v1841_v12  ;;  %v8705_v38 = vld [vmem:[%s8161_s15 + $0x158] sm:$0xff] }
 0x18e   : > { %12549 = vst [vmem:[#allocation16_spill] sm:$0xff] %v8657_v9  ;;  %v8669_v32 = vrot.slane %v1933_v28, %v8657_v9  ;;  %730 = vperm.xlu0 %7584, %v8705_v38  }
 0x18f   : > { %v1248_v60 = vadd.f32 %v1184_v44, %v859_v17  ;;  %2158 = vmatmul.mubr.bf16.gmra.mxu0 %v1895_v33 }
 0x190   : > { %7546 = vset.pattern.permute.xlu1 %v12465_v1  ;;  %v996_v22 = vpop.permute.xlu1 %995  ;;  %2167 = vmatprep.mubr.bf16.mxu0 %v12465_v1 }
 0x191   : > { %755 = vperm.xlu1 %7546, %v8361_v25   ;;  %v1637_v10 = vadd.f32 %v1573_v39, %v1248_v60  ;;  %v1185_v53 = vmul.f32 %v8292_v49, %v996_v22  ;;  %v8709_v39 = vpop.permute.xlu0 %1412  ;;  %v1575_v60 = vmul.f32 %v8305_v55, %v1389_v43 }
 0x193   : > { %v1708_v6 = vmul.f32 %v8321_v2, %v1637_v10  ;;  %v1249_v56 = vadd.f32 %v1185_v53, %v860_v59 }
 0x194   : > { %v2059_v37 = vpop.f32.mrf.mxu0 }
 0x195   : > { %7547 = vset.pattern.permute.xlu1 %v12547_v20  ;;  %v1385_v14 = vpop.permute.xlu1 %1384  ;;  %v8681_v57 = vadd.f32 %v2059_v37, %v8669_v32  ;;  %v1779_v24 = vadd.f32 %v8339_v13, %v1708_v6  ;;  %v8719_v28 = vpop.permute.xlu0 %1420 }
 0x196   : > { %v1574_v48 = vmul.f32 %v8305_v55, %v1385_v14  ;;  %1095 = vperm.xlu1 %7547, %v8361_v25   ;;  %v2061_v58 = vpop.f32.mrf.mxu0 }
 0x197   : > { %v8692_v47 = vadd.f32 %v2061_v58, %v8678_v54  ;;  %v1843_v61 = vmax.f32 %v1779_v24, 0.0  ;;  %v8736_v24 = vld [vmem:[%s8161_s15 + $0x1c8] sm:$0xff] }
 0x198   : > { %v1638_v40 = vadd.f32 %v1574_v48, %v1249_v56  ;;  %v2063_v11 = vpop.f32.mrf.mxu0  ;;  %800 = vperm.xlu0 %7584, %v8736_v24  }
 0x199   : > { %v8684_v34 = vadd.f32 %v2063_v11, %v8669_v32  ;;  %v8725_v48 = vpop.permute.xlu0 %1428 }
 0x19a   : > { %v1709_v36 = vmul.f32 %v8321_v2, %v1638_v40  ;;  %1099 = vperm.xlu1 %7547, %v8496_v26   ;;  %v636_v25 = vpop.permute.xlu1 %635  ;;  %v2065_v16 = vpop.f32.mrf.mxu0 }
 0x19b   : > { %v2378_v62 = vmax.f32 %v8681_v57, %v8684_v34  ;;  %v8697_v5 = vadd.f32 %v2065_v16, %v8678_v54  ;;  %v861_v17 = vmul.f32 %v8297_v51, %v636_v25 }
 0x19c   : > { %v1780_v35 = vadd.f32 %v8339_v13, %v1709_v36 }
 0x19d   : > { %v2387_v46 = vmax.f32 %v8692_v47, %v8697_v5 }
 0x19e   : > { %7548 = vset.pattern.permute.xlu1 %v12546_v45  ;;  %v1844_v12 = vmax.f32 %v1780_v35, 0.0 }
 0x19f   : > { %1488 = vperm.xlu1 %7548, %v8496_v26   ;;  %v1000_v52 = vpop.permute.xlu1 %999  ;;  %v862_v26 = vmul.f32 %v8297_v51, %v8420_v8 }
 0x1a0   : > { %v1186_v44 = vmul.f32 %v8292_v49, %v1000_v52  ;;  %v1896_v33 = vpack.c.bf16 %v1844_v12, %v1843_v61  ;;  %v1577_v52 = vmul.f32 %v8305_v55, %v8672_v4 }
 0x1a2   : > { %v1250_v22 = vadd.f32 %v1186_v44, %v861_v17  ;;  %2168 = vmatmul.mubr.bf16.gmra.mxu0 %v1896_v33 }
 0x1a3   : > { %7549 = vset.pattern.permute.xlu1 %v12465_v1  ;;  %v1004_v59 = vpop.permute.xlu1 %1003  ;;  %2177 = vmatprep.mubr.bf16.mxu0 %v12465_v1 }
 0x1a4   : > { %695 = vperm.xlu1 %7549, %v8372_v29   ;;  %v1639_v10 = vadd.f32 %v1575_v60, %v1250_v22  ;;  %v1187_v53 = vmul.f32 %v8292_v49, %v1004_v59 }
 0x1a6   : > { %v1710_v37 = vmul.f32 %v8321_v2, %v1639_v10  ;;  %v1251_v14 = vadd.f32 %v1187_v53, %v862_v26 }
 0x1a8   : > { %7550 = vset.pattern.permute.xlu1 %v12547_v20  ;;  %v1393_v43 = vpop.permute.xlu1 %1392  ;;  %v1781_v40 = vadd.f32 %v8339_v13, %v1710_v37 }
 0x1a9   : > { %v1576_v6 = vmul.f32 %v8305_v55, %v1393_v43  ;;  %1047 = vperm.xlu1 %7550, %v8372_v29   ;;  %v8733_v29 = vpop.permute.xlu0 %1484  ;;  %v8756_v55 = vld [vmem:[%s12444_s1 + $0x1] ss:$0 sm:$0xff] }
 0x1aa   : > { %v1845_v36 = vmax.f32 %v1781_v40, 0.0  ;;  %v8781_v40 = vld [vmem:[%s8161_s15 + $0x168] sm:$0xff] }
 0x1ab   : > { %v1640_v56 = vadd.f32 %v1576_v6, %v1251_v14  ;;  %740 = vperm.xlu0 %7584, %v8781_v40  }
 0x1ad   : > { %v1711_v8 = vmul.f32 %v8321_v2, %v1640_v56  ;;  %1051 = vperm.xlu1 %7550, %v8526_v3   ;;  %v646_v58 = vpop.permute.xlu1 %645  ;;  %v8759_v33 = vpop.permute.xlu0 %1436 }
 0x1ae   : > { %v863_v35 = vmul.f32 %v8297_v51, %v646_v58  ;;  %v8749_v51 = vld [vmem:[%s12444_s1] ss:$0 sm:$0xff] }
 0x1af   : > { %v1782_v11 = vadd.f32 %v8339_v13, %v1711_v8 }
 0x1b1   : > { %7551 = vset.pattern.permute.xlu1 %v12546_v45  ;;  %v1846_v25 = vmax.f32 %v1782_v11, 0.0  ;;  %v8770_v53 = vpop.permute.xlu0 %1492 }
 0x1b2   : > { %1440 = vperm.xlu1 %7551, %v8526_v3   ;;  %v1008_v16 = vpop.permute.xlu1 %1007 }
 0x1b3   : > { %v1188_v61 = vmul.f32 %v8292_v49, %v1008_v16  ;;  %v1897_v12 = vpack.c.bf16 %v1846_v25, %v1845_v36  ;;  %v864_v49 = vmul.f32 %v8749_v51, %v8425_v15  ;;  %v8766_v15 = vld [vmem:[%s12444_s1 + $0x2] ss:$0 sm:$0xff] }
 0x1b5   : > { %v1252_v17 = vadd.f32 %v1188_v61, %v863_v35  ;;  %2178 = vmatmul.mubr.bf16.gmra.mxu0 %v1897_v12  ;;  %v8777_v58 = vpop.permute.xlu0 %1444  ;;  %v866_v35 = vmul.f32 %v8749_v51, %v8429_v21 }
 0x1b6   : > { %7552 = vset.pattern.permute.xlu1 %v12465_v1  ;;  %v1012_v3 = vpop.permute.xlu1 %1011  ;;  %2187 = vmatprep.mubr.bf16.mxu0 %v12465_v1 }
 0x1b7   : > { %765 = vperm.xlu1 %7552, %v8380_v41   ;;  %v1641_v44 = vadd.f32 %v1577_v52, %v1252_v17  ;;  %v1189_v4 = vmul.f32 %v8756_v55, %v1012_v3  ;;  %v8797_v52 = vld [vmem:[%s8161_s15 + $0x1d8] sm:$0xff]  ;;  %v8804_v17 = vld [vmem:[%s12445_s2] ss:$0 sm:$0xff] }
 0x1b8   : > { %810 = vperm.xlu0 %7584, %v8797_v52  }
 0x1b9   : > { %v1712_v22 = vmul.f32 %v8321_v2, %v1641_v44  ;;  %v1253_v59 = vadd.f32 %v1189_v4, %v864_v49  ;;  %v495_v4 = vld [vmem:[%s8161_s15 + $0x178] sm:$0xff] }
 0x1bb   : > { %7553 = vset.pattern.permute.xlu1 %v12547_v20  ;;  %v1401_v60 = vpop.permute.xlu1 %1400  ;;  %v1783_v14 = vadd.f32 %v8339_v13, %v1712_v22 }
 0x1bc   : > { %v1578_v26 = vmul.f32 %v8766_v15, %v1401_v60  ;;  %1103 = vperm.xlu1 %7553, %v8380_v41   ;;  %750 = vperm.xlu0 %7584, %v495_v4   ;;  %v868_v4 = vmul.f32 %v8749_v51, %v8437_v27 }
 0x1bd   : > { %v1847_v56 = vmax.f32 %v1783_v14, 0.0 }
 0x1be   : > { %v1642_v10 = vadd.f32 %v1578_v26, %v1253_v59  ;;  %v8817_v26 = vld [vmem:[%s12446_s3] ss:$0 sm:$0xff] }
 0x1c0   : > { %v1713_v43 = vmul.f32 %v8321_v2, %v1642_v10  ;;  %1107 = vperm.xlu1 %7553, %v8552_v0   ;;  %v656_v37 = vpop.permute.xlu1 %655 }
 0x1c1   : > { %v865_v2 = vmul.f32 %v8749_v51, %v656_v37 }
 0x1c2   : > { %v1784_v6 = vadd.f32 %v8339_v13, %v1713_v43  ;;  %v1579_v13 = vmul.f32 %v8766_v15, %v8686_v63  ;;  %v509_v43 = vld [vmem:[%s8161_s15 + $0x1e8] sm:$0xff] }
 0x1c3   : > { %820 = vperm.xlu0 %7584, %v509_v43  }
 0x1c4   : > { %7554 = vset.pattern.permute.xlu1 %v12546_v45  ;;  %v1848_v8 = vmax.f32 %v1784_v6, 0.0 }
 0x1c5   : > { %1496 = vperm.xlu1 %7554, %v8552_v0   ;;  %v1016_v41 = vpop.permute.xlu1 %1015  ;;  %v8791_v0 = vpop.permute.xlu0 %1500 }
 0x1c6   : > { %v1190_v11 = vmul.f32 %v8756_v55, %v1016_v41  ;;  %v1898_v36 = vpack.c.bf16 %v1848_v8, %v1847_v56 }
 0x1c8   : > { %v1254_v25 = vadd.f32 %v1190_v11, %v865_v2  ;;  %2188 = vmatmul.mubr.bf16.gmra.mxu0 %v1898_v36  ;;  %v511_v2 = vld [vmem:[%s8161_s15 + $0x1f8] sm:$0xff] }
 0x1c9   : > { %7555 = vset.pattern.permute.xlu1 %v12465_v1  ;;  %v1020_v16 = vpop.permute.xlu1 %1019  ;;  %2197 = vmatprep.mubr.bf16.mxu0 %v12465_v1  ;;  %v8809_v44 = vpop.permute.xlu0 %1452 }
 0x1ca   : > { %705 = vperm.xlu1 %7555, %v8389_v50   ;;  %v1643_v61 = vadd.f32 %v1579_v13, %v1254_v25  ;;  %v1191_v12 = vmul.f32 %v8756_v55, %v1020_v16  ;;  %830 = vperm.xlu0 %7584, %v511_v2  }
 0x1cc   : > { %v1714_v3 = vmul.f32 %v8804_v17, %v1643_v61  ;;  %v1255_v49 = vadd.f32 %v1191_v12, %v866_v35 }
 0x1cd   : > { %v8822_v37 = vpop.permute.xlu0 %1508 }
 0x1ce   : > { %7556 = vset.pattern.permute.xlu1 %v12547_v20  ;;  %v1409_v63 = vpop.permute.xlu1 %1408  ;;  %v1785_v10 = vadd.f32 %v8817_v26, %v1714_v3  ;;  %7588 = vset.pattern.permute.xlu0 %v12546_v45 }
 0x1cf   : > { %v1580_v21 = vmul.f32 %v8766_v15, %v1409_v63  ;;  %1055 = vperm.xlu1 %7556, %v8389_v50  }
 0x1d0   : > { %v1849_v6 = vmax.f32 %v1785_v10, 0.0 }
 0x1d1   : > { %v1644_v60 = vadd.f32 %v1580_v21, %v1255_v49  ;;  %v8849_v49 = vpop.permute.xlu0 %1460  ;;  %v7843_v21 = vld [vmem:[%s8161_s15 + $0x1a0] sm:$0xff] }
 0x1d3   : > { %v1715_v22 = vmul.f32 %v8804_v17, %v1644_v60  ;;  %1059 = vperm.xlu1 %7556, %v8575_v23   ;;  %v666_v59 = vpop.permute.xlu1 %665 }
 0x1d4   : > { %v867_v11 = vmul.f32 %v8749_v51, %v666_v59 }
 0x1d5   : > { %v1786_v50 = vadd.f32 %v8817_v26, %v1715_v22  ;;  %v8864_v27 = vpop.permute.xlu0 %1516 }
 0x1d7   : > { %7557 = vset.pattern.permute.xlu1 %v12546_v45  ;;  %v2069_v14 = vpop.f32.mrf.mxu0  ;;  %v1850_v56 = vmax.f32 %v1786_v50, 0.0 }
 0x1d8   : > { %v8826_v8 = vadd.f32 %v2069_v14, %v8669_v32  ;;  %1448 = vperm.xlu1 %7557, %v8575_v23   ;;  %v1024_v41 = vpop.permute.xlu1 %1023  ;;  %v1581_v23 = vmul.f32 %v8766_v15, %v8709_v39 }
 0x1d9   : > { %v1192_v36 = vmul.f32 %v8756_v55, %v1024_v41  ;;  %v2071_v13 = vpop.f32.mrf.mxu0  ;;  %v1899_v25 = vpack.c.bf16 %v1850_v56, %v1849_v6 }
 0x1da   : > { %v2379_v16 = vmax.f32 %v2378_v62, %v8826_v8  ;;  %v8837_v35 = vadd.f32 %v2071_v13, %v8678_v54 }
 0x1db   : > { %v1256_v61 = vadd.f32 %v1192_v36, %v867_v11  ;;  %v2073_v12 = vpop.f32.mrf.mxu0  ;;  %2198 = vmatmul.mubr.bf16.gmra.mxu0 %v1899_v25 }
 0x1dc   : > { %v2388_v63 = vmax.f32 %v2387_v46, %v8837_v35  ;;  %v8846_v3 = vadd.f32 %v2073_v12, %v8669_v32  ;;  %7558 = vset.pattern.permute.xlu1 %v12465_v1  ;;  %v1028_v62 = vpop.permute.xlu1 %1027  ;;  %2207 = vmatprep.mubr.bf16.mxu0 %v12465_v1 }
 0x1dd   : > { %775 = vperm.xlu1 %7558, %v7843_v21   ;;  %v2075_v39 = vpop.f32.mrf.mxu0  ;;  %v1193_v60 = vmul.f32 %v8756_v55, %v1028_v62  ;;  %v1645_v59 = vadd.f32 %v1581_v23, %v1256_v61 }
 0x1de   : > { %v2380_v46 = vmax.f32 %v2379_v16, %v8846_v3  ;;  %v8859_v22 = vadd.f32 %v2075_v39, %v8678_v54 }
 0x1df   : > { %v2079_v10 = vpop.f32.mrf.mxu0  ;;  %v1257_v56 = vadd.f32 %v1193_v60, %v868_v4  ;;  %v1716_v2 = vmul.f32 %v8804_v17, %v1645_v59 }
 0x1e0   : > { %v2381_v43 = vrot.slane %v2380_v46, 4  ;;  %v2389_v50 = vmax.f32 %v2388_v63, %v8859_v22  ;;  %v8868_v25 = vadd.f32 %v2079_v10, %v8669_v32 }
 0x1e1   : > { %7559 = vset.pattern.permute.xlu1 %v12547_v20  ;;  %v1417_v14 = vpop.permute.xlu1 %1416  ;;  %v2081_v6 = vpop.f32.mrf.mxu0  ;;  %v1787_v60 = vadd.f32 %v8817_v26, %v1716_v2 }
 0x1e2   : > { %v1582_v41 = vmul.f32 %v8766_v15, %v1417_v14  ;;  %1111 = vperm.xlu1 %7559, %v7843_v21   ;;  %v2382_v11 = vmax.f32 %v2380_v46, %v2381_v43  ;;  %v2390_v13 = vrot.slane %v2389_v50, 4  ;;  %12551 = vst [vmem:[#allocation18_spill] sm:$0xff] %v8868_v25  ;;  %v8878_v39 = vadd.f32 %v2081_v6, %v8678_v54  ;;  %v8888_v14 = vpop.permute.xlu0 %1468 }
 0x1e3   : > { %v2083_v36 = vpop.f32.mrf.mxu0 }
 0x1e4   : > { %v1646_v16 = vadd.f32 %v1582_v41, %v1257_v56  ;;  %v8871_v23 = vadd.f32 %v2083_v36, %v8669_v32  ;;  %v2383_v21 = vrot.slane %v2382_v11, 2  ;;  %v2391_v59 = vmax.f32 %v2389_v50, %v2390_v13 }
 0x1e5   : > { %v2085_v61 = vpop.f32.mrf.mxu0 }
 0x1e6   : > { %12552 = vst [vmem:[#allocation19_spill] sm:$0xff] %v8871_v23  ;;  %v1717_v12 = vmul.f32 %v8804_v17, %v1646_v16  ;;  %v2396_v63 = vmax.f32 %v8868_v25, %v8871_v23  ;;  %1115 = vperm.xlu1 %7559, %v8599_v31   ;;  %v676_v62 = vpop.permute.xlu1 %675  ;;  %v8881_v4 = vadd.f32 %v2085_v61, %v8678_v54  ;;  %v1851_v16 = vmax.f32 %v1787_v60, 0.0 }
 0x1e7   : > { %v2089_v46 = vpop.f32.mrf.mxu0  ;;  %v2384_v2 = vmax.f32 %v2382_v11, %v2383_v21 }
 0x1e8   : > { %12553 = vst [vmem:[#allocation20_spill] sm:$0xff] %v8881_v4  ;;  %v8885_v10 = vadd.f32 %v2089_v46, %v8669_v32  ;;  %v1788_v43 = vadd.f32 %v8817_v26, %v1717_v12  ;;  %v2405_v56 = vmax.f32 %v8878_v39, %v8881_v4  ;;  %v2392_v12 = vrot.slane %v2391_v59, 2 }
 0x1e9   : > { %v2091_v41 = vpop.f32.mrf.mxu0  ;;  %v869_v46 = vmul.f32 %v8749_v51, %v676_v62  ;;  %v2385_v62 = vrot.slane %v2384_v2, 1 }
 0x1ea   : > { %12554 = vst [vmem:[#allocation21_spill] sm:$0xff] %v8885_v10  ;;  %v2397_v6 = vmax.f32 %v2396_v63, %v8885_v10  ;;  %v8894_v36 = vadd.f32 %v2091_v41, %v8678_v54  ;;  %7560 = vset.pattern.permute.xlu1 %v12546_v45  ;;  %v1852_v61 = vmax.f32 %v1788_v43, 0.0  ;;  %v1583_v63 = vmul.f32 %v8766_v15, %v8719_v28  ;;  %v8909_v43 = vpop.permute.xlu0 %1524  ;;  %v7844_v10 = vld [vmem:[%s8161_s15 + $0x140] sm:$0xff] }
 0x1eb   : > { %1504 = vperm.xlu1 %7560, %v8599_v31   ;;  %v1032_v50 = vpop.permute.xlu1 %1031  ;;  %v2093_v13 = vpop.f32.mrf.mxu0  ;;  %v2393_v28 = vmax.f32 %v2391_v59, %v2392_v12 }
 0x1ec   : > { %12555 = vst [vmem:[#allocation22_spill] sm:$0xff] %v8894_v36  ;;  %v2406_v1 = vmax.f32 %v2405_v56, %v8894_v36  ;;  %v1194_v9 = vmul.f32 %v8756_v55, %v1032_v50  ;;  %v8904_v41 = vadd.f32 %v2093_v13, %v8669_v32  ;;  %v1900_v31 = vpack.c.bf16 %v1852_v61, %v1851_v16 }
 0x1ed   : > { %v2095_v11 = vpop.f32.mrf.mxu0  ;;  %v12558_v50 = vmov 0   ;;  %v2394_v23 = vrot.slane %v2393_v28, 1 }
 0x1ee   : > { %12556 = vst [vmem:[#allocation23_spill] sm:$0xff] %v8904_v41  ;;  %v1258_v21 = vadd.f32 %v1194_v9, %v869_v46  ;;  %v8907_v60 = vadd.f32 %v2095_v11, %v8678_v54  ;;  %v2398_v56 = vmax.f32 %v2397_v6, %v8904_v41  ;;  %2208 = vmatmul.mubr.bf16.gmra.mxu0 %v1900_v31 }
 0x1ef   : > { %7561 = vset.pattern.permute.xlu1 %v12558_v50  ;;  %v1036_v30 = vpop.permute.xlu1 %1035  ;;  %v2099_v42 = vpop.f32.mrf.mxu0  ;;  %2217 = vmatprep.mubr.bf16.mxu0 %v12558_v50  ;;  %v870_v9 = vmul.f32 %v8749_v51, %v8442_v7  ;;  %v2386_v31 = vmax.f32 %v2384_v2, %v2385_v62 }
 0x1f0   : > { %12557 = vst [vmem:[#allocation24_spill] sm:$0xff] %v8907_v60  ;;  %v2407_v13 = vmax.f32 %v2406_v1, %v8907_v60  ;;  %715 = vperm.xlu1 %7561, %v7844_v10   ;;  %v1647_v16 = vadd.f32 %v1583_v63, %v1258_v21  ;;  %v2399_v61 = vrot.slane %v2398_v56, 4  ;;  %v1195_v46 = vmul.f32 %v8756_v55, %v1036_v30  ;;  %v8926_v63 = vpop.permute.xlu0 %1476 }
 0x1f1   : > { %v2101_v6 = vpop.f32.mrf.mxu0  ;;  %v8920_v1 = vadd.f32 %v2099_v42, %v8669_v32 }
 0x1f2   : > { %v2408_v11 = vrot.slane %v2407_v13, 4  ;;  %v2400_v41 = vmax.f32 %v2398_v56, %v2399_v61  ;;  %v1718_v30 = vmul.f32 %v8804_v17, %v1647_v16  ;;  %v1259_v60 = vadd.f32 %v1195_v46, %v870_v9 }
 0x1f3   : > { %v2103_v36 = vpop.f32.mrf.mxu0  ;;  %12559 = vst [vmem:[#allocation25_spill] sm:$0xff] %v8920_v1  ;;  %v8931_v42 = vadd.f32 %v2101_v6, %v8678_v54  ;;  %v2395_v16 = vmax.f32 %v2393_v28, %v2394_v23 }
 0x1f4   : > { %v2409_v59 = vmax.f32 %v2407_v13, %v2408_v11  ;;  %v8923_v12 = vadd.f32 %v2103_v36, %v8669_v32  ;;  %7562 = vset.pattern.permute.xlu1 %v12547_v20  ;;  %v1425_v7 = vpop.permute.xlu1 %1424  ;;  %v2401_v21 = vrot.slane %v2400_v41, 2 }
 0x1f5   : > { %v1584_v2 = vmul.f32 %v8766_v15, %v1425_v7  ;;  %1063 = vperm.xlu1 %7562, %v7844_v10   ;;  %v2105_v62 = vpop.f32.mrf.mxu0  ;;  %12561 = vst [vmem:[#allocation27_spill] sm:$0xff] %v8931_v42 }
 0x1f6   : > { %12560 = vst [vmem:[#allocation26_spill] sm:$0xff] %v8923_v12  ;;  %v2410_v56 = vrot.slane %v2409_v59, 2  ;;  %v2414_v36 = vmax.f32 %v8920_v1, %v8923_v12  ;;  %v8936_v13 = vadd.f32 %v2105_v62, %v8678_v54  ;;  %v2402_v61 = vmax.f32 %v2400_v41, %v2401_v21 }
 0x1f7   : > { %v1648_v11 = vadd.f32 %v1584_v2, %v1259_v60  ;;  %v2109_v25 = vpop.f32.mrf.mxu0  ;;  %v1789_v62 = vadd.f32 %v8817_v26, %v1718_v30  ;;  %v3820_v41 = vpack.c.bf16 %v2386_v31, %v2386_v31 }
 0x1f8   : > { %12562 = vst [vmem:[#allocation28_spill] sm:$0xff] %v8936_v13  ;;  %v2411_v4 = vmax.f32 %v2409_v59, %v2410_v56  ;;  %v2423_v9 = vmax.f32 %v8931_v42, %v8936_v13  ;;  %v8941_v10 = vadd.f32 %v2109_v25, %v8669_v32  ;;  %v2403_v46 = vrot.slane %v2402_v61, 1  ;;  %v8950_v59 = vpop.permute.xlu0 %1532 }
 0x1f9   : > { %v1719_v6 = vmul.f32 %v8804_v17, %v1648_v11  ;;  %1067 = vperm.xlu1 %7562, %v8622_v18   ;;  %v686_v7 = vpop.permute.xlu1 %685  ;;  %v2111_v12 = vpop.f32.mrf.mxu0  ;;  %v1585_v25 = vmul.f32 %v8766_v15, %v8725_v48  ;;  %v3821_v11 = vpack.c.bf16 %v2395_v16, %v2395_v16  ;;  %v3948_v42 = vunpack.c.l.b16 %v3820_v41 }
 0x1fa   : > { %12563 = vst [vmem:[#allocation29_spill] sm:$0xff] %v8941_v10  ;;  %v2412_v60 = vrot.slane %v2411_v4, 1  ;;  %v2415_v23 = vmax.f32 %v2414_v36, %v8941_v10  ;;  %v8948_v28 = vadd.f32 %v2111_v12, %v8678_v54  ;;  %v2404_v21 = vmax.f32 %v2402_v61, %v2403_v46 }
 0x1fb   : > { %v2113_v2 = vpop.f32.mrf.mxu0  ;;  %v1790_v56 = vadd.f32 %v8817_v26, %v1719_v6  ;;  %v1853_v10 = vmax.f32 %v1789_v62, 0.0 }
 0x1fc   : > { %v2413_v1 = vmax.f32 %v2411_v4, %v2412_v60  ;;  %v2424_v30 = vmax.f32 %v2423_v9, %v8948_v28  ;;  %v8957_v31 = vadd.f32 %v2113_v2, %v8669_v32  ;;  %v3822_v36 = vpack.c.bf16 %v2404_v21, %v2404_v21  ;;  %v691_v41 = vpop.permute.xlu0 %690 }
 0x1fd   : > { %7563 = vset.pattern.permute.xlu1 %v12546_v45  ;;  %v2115_v12 = vpop.f32.mrf.mxu0  ;;  %v1854_v13 = vmax.f32 %v1790_v56, 0.0  ;;  %v871_v9 = vmul.f32 %v8749_v51, %v686_v7  ;;  %v3949_v21 = vunpack.c.l.b16 %v3821_v11  ;;  %v872_v11 = vmul.f32 %v8749_v51, %v691_v41 }
 0x1fe   : > { %v3823_v48 = vpack.c.bf16 %v2413_v1, %v2413_v1  ;;  %v2416_v61 = vmax.f32 %v2415_v23, %v8957_v31  ;;  %v8962_v46 = vadd.f32 %v2115_v12, %v8678_v54  ;;  %1456 = vperm.xlu1 %7563, %v8622_v18   ;;  %v1040_v4 = vpop.permute.xlu1 %1039  ;;  %v3950_v16 = vunpack.c.l.b16 %v3822_v36 }
 0x1ff   : > { %v1196_v6 = vmul.f32 %v8756_v55, %v1040_v4  ;;  %v1901_v60 = vpack.c.bf16 %v1854_v13, %v1853_v10 }
 0x200   : > { %v3951_v2 = vunpack.c.l.b16 %v3823_v48  ;;  %v2417_v62 = vrot.slane %v2416_v61, 4  ;;  %v2425_v1 = vmax.f32 %v2424_v30, %v8962_v46  ;;  %v3981_v23 = vsel %vm3980_vm0, %v3950_v16, %v3948_v42  ;;  %v7845_v30 = vld [vmem:[%s8161_s15 + $0x1b0] sm:$0xff] }
 0x201   : > { %v1260_v56 = vadd.f32 %v1196_v6, %v871_v9  ;;  %2218 = vmatmul.mubr.bf16.gmra.mxu0 %v1901_v60 }
 0x202   : > { %v3994_v18 = vsel %vm3980_vm0, %v3951_v2, %v3949_v21  ;;  %v2418_v12 = vmax.f32 %v2416_v61, %v2417_v62  ;;  %v2426_v36 = vrot.slane %v2425_v1, 4  ;;  %7564 = vset.pattern.permute.xlu1 %v12558_v50  ;;  %v1044_v7 = vpop.permute.xlu1 %1043  ;;  %2227 = vmatprep.mubr.bf16.mxu0 %v12558_v50 }
 0x203   : > { %v1649_v13 = vadd.f32 %v1585_v25, %v1260_v56  ;;  %v1197_v10 = vmul.f32 %v8756_v55, %v1044_v7  ;;  %785 = vperm.xlu1 %7564, %v7845_v30   ;;  %v2119_v48 = vpop.f32.mrf.mxu0 }
 0x204   : > { %v2419_v42 = vrot.slane %v2418_v12, 2  ;;  %v2427_v4 = vmax.f32 %v2425_v1, %v2426_v36  ;;  %v8977_v21 = vadd.f32 %v2119_v48, %v8669_v32  ;;  %v8985_v1 = vld [vmem:[%s8161_s15 + $0x1f0] sm:$0xff] }
 0x205   : > { %v2121_v16 = vpop.f32.mrf.mxu0  ;;  %v1720_v6 = vmul.f32 %v8804_v17, %v1649_v13  ;;  %v1261_v60 = vadd.f32 %v1197_v10, %v872_v11  ;;  %1540 = vperm.xlu0 %7588, %v8985_v1  }
 0x206   : > { %v2420_v9 = vmax.f32 %v2418_v12, %v2419_v42  ;;  %v2428_v61 = vrot.slane %v2427_v4, 2  ;;  %v8991_v48 = vadd.f32 %v2121_v16, %v8678_v54 }
 0x207   : > { %7565 = vset.pattern.permute.xlu1 %v12547_v20  ;;  %v1433_v25 = vpop.permute.xlu1 %1432  ;;  %v2123_v2 = vpop.f32.mrf.mxu0 }
 0x208   : > { %v2421_v62 = vrot.slane %v2420_v9, 1  ;;  %v2429_v41 = vmax.f32 %v2427_v4, %v2428_v61  ;;  %v1586_v56 = vmul.f32 %v8766_v15, %v1433_v25  ;;  %v8982_v7 = vadd.f32 %v2123_v2, %v8669_v32  ;;  %1119 = vperm.xlu1 %7565, %v7845_v30  }
 0x209   : > { %v2125_v12 = vpop.f32.mrf.mxu0 }
 0x20a   : > { %v2422_v36 = vmax.f32 %v2420_v9, %v2421_v62  ;;  %v2430_v13 = vrot.slane %v2429_v41, 1  ;;  %v1650_v10 = vadd.f32 %v1586_v56, %v1261_v60  ;;  %v2432_v11 = vmax.f32 %v8977_v21, %v8982_v7 }
 0x20b   : > { %v8994_v42 = vadd.f32 %v2125_v12, %v8678_v54  ;;  %v1791_v9 = vadd.f32 %v8817_v26, %v1720_v6  ;;  %v1599_v6 = vmul.f32 %v8766_v15, %v8733_v29 }
 0x20c   : > { %v3824_v4 = vpack.c.bf16 %v2422_v36, %v2422_v36  ;;  %v2431_v61 = vmax.f32 %v2429_v41, %v2430_v13  ;;  %v1721_v30 = vmul.f32 %v8804_v17, %v1650_v10  ;;  %1123 = vperm.xlu1 %7565, %v8645_v19   ;;  %v756_v25 = vpop.permute.xlu1 %755 }
 0x20d   : > { %v2441_v60 = vmax.f32 %v8991_v48, %v8994_v42  ;;  %v1855_v41 = vmax.f32 %v1791_v9, 0.0 }
 0x20e   : > { %v3952_v2 = vunpack.c.l.b16 %v3824_v4  ;;  %v3825_v62 = vpack.c.bf16 %v2431_v61, %v2431_v61  ;;  %v1792_v16 = vadd.f32 %v8817_v26, %v1721_v30  ;;  %v885_v4 = vmul.f32 %v8749_v51, %v756_v25 }
 0x210   : > { %v9003_v56 = vsel %vm3982_vm1, %v3952_v2, %v3981_v23  ;;  %v3953_v12 = vunpack.c.l.b16 %v3825_v62  ;;  %7566 = vset.pattern.permute.xlu1 %v12546_v45  ;;  %v1856_v36 = vmax.f32 %v1792_v16, 0.0  ;;  %v761_v2 = vpop.permute.xlu0 %760  ;;  %v7846_v62 = vld [vmem:[%s8161_s15 + $0x150] sm:$0xff] }
 0x211   : > { %1512 = vperm.xlu1 %7566, %v8645_v19   ;;  %v1096_v13 = vpop.permute.xlu1 %1095  ;;  %v886_v16 = vmul.f32 %v8749_v51, %v761_v2 }
 0x212   : > { %v9010_v10 = vsel %vm3982_vm1, %v3953_v12, %v3994_v18  ;;  %v1210_v23 = vmul.f32 %v8756_v55, %v1096_v13  ;;  %v1902_v61 = vpack.c.bf16 %v1856_v36, %v1855_v41 }
 0x214   : > { %v1274_v30 = vadd.f32 %v1210_v23, %v885_v4  ;;  %2228 = vmatmul.mubr.bf16.gmra.mxu0 %v1902_v61 }
 0x215   : > { %7567 = vset.pattern.permute.xlu1 %v12558_v50  ;;  %v1100_v9 = vpop.permute.xlu1 %1099  ;;  %2237 = vmatprep.mubr.bf16.mxu0 %v12558_v50 }
 0x216   : > { %v1663_v29 = vadd.f32 %v1599_v6, %v1274_v30  ;;  %725 = vperm.xlu1 %7567, %v7846_v62   ;;  %v2129_v19 = vpop.f32.mrf.mxu0  ;;  %v1211_v18 = vmul.f32 %v8756_v55, %v1100_v9 }
 0x217   : > { %v9020_v25 = vadd.f32 %v2129_v19, %v8669_v32 }
 0x218   : > { %v2131_v12 = vpop.f32.mrf.mxu0  ;;  %v1734_v13 = vmul.f32 %v8804_v17, %v1663_v29  ;;  %v1275_v23 = vadd.f32 %v1211_v18, %v886_v16 }
 0x219   : > { %12564 = vst [vmem:[#allocation30_spill] sm:$0xff] %v9020_v25  ;;  %v2433_v41 = vmax.f32 %v2432_v11, %v9020_v25  ;;  %v9024_v36 = vadd.f32 %v2131_v12, %v8678_v54 }
 0x21a   : > { %7568 = vset.pattern.permute.xlu1 %v12547_v20  ;;  %v1489_v6 = vpop.permute.xlu1 %1488  ;;  %v2133_v4 = vpop.f32.mrf.mxu0  ;;  %v1805_v16 = vadd.f32 %v8817_v26, %v1734_v13 }
 0x21b   : > { %12565 = vst [vmem:[#allocation31_spill] sm:$0xff] %v9024_v36  ;;  %v2442_v61 = vmax.f32 %v2441_v60, %v9024_v36  ;;  %v1600_v30 = vmul.f32 %v8766_v15, %v1489_v6  ;;  %v9031_v2 = vadd.f32 %v2133_v4, %v8669_v32  ;;  %1071 = vperm.xlu1 %7568, %v7846_v62  }
 0x21c   : > { %v2135_v9 = vpop.f32.mrf.mxu0 }
 0x21d   : > { %12566 = vst [vmem:[#allocation32_spill] sm:$0xff] %v9031_v2  ;;  %v1664_v11 = vadd.f32 %v1600_v30, %v1275_v23  ;;  %v2434_v19 = vmax.f32 %v2433_v41, %v9031_v2  ;;  %v9035_v12 = vadd.f32 %v2135_v9, %v8678_v54  ;;  %v1869_v41 = vmax.f32 %v1805_v16, 0.0  ;;  %v701_v16 = vpop.permute.xlu0 %700 }
 0x21f   : > { %12567 = vst [vmem:[#allocation33_spill] sm:$0xff] %v9035_v12  ;;  %v1735_v29 = vmul.f32 %v8804_v17, %v1664_v11  ;;  %v2435_v25 = vrot.slane %v2434_v19, 4  ;;  %v2443_v18 = vmax.f32 %v2442_v61, %v9035_v12  ;;  %1075 = vperm.xlu1 %7568, %v8705_v38   ;;  %v696_v60 = vpop.permute.xlu1 %695 }
 0x220   : > { %v873_v11 = vmul.f32 %v8749_v51, %v696_v60 }
 0x221   : > { %v2436_v6 = vmax.f32 %v2434_v19, %v2435_v25  ;;  %v2444_v4 = vrot.slane %v2443_v18, 4  ;;  %v1806_v62 = vadd.f32 %v8817_v26, %v1735_v29  ;;  %v1587_v19 = vmul.f32 %v8766_v15, %v8759_v33 }
 0x222   : > { %v874_v33 = vmul.f32 %v8749_v51, %v701_v16 }
 0x223   : > { %v2437_v23 = vrot.slane %v2436_v6, 2  ;;  %v2445_v30 = vmax.f32 %v2443_v18, %v2444_v4  ;;  %7569 = vset.pattern.permute.xlu1 %v12546_v45  ;;  %v1870_v9 = vmax.f32 %v1806_v62, 0.0 }
 0x224   : > { %1464 = vperm.xlu1 %7569, %v8705_v38   ;;  %v1048_v61 = vpop.permute.xlu1 %1047 }
 0x225   : > { %v2438_v2 = vmax.f32 %v2436_v6, %v2437_v23  ;;  %v2446_v12 = vrot.slane %v2445_v30, 2  ;;  %v1198_v13 = vmul.f32 %v8756_v55, %v1048_v61  ;;  %v1909_v25 = vpack.c.bf16 %v1870_v9, %v1869_v41  ;;  %v7847_v6 = vld [vmem:[%s8161_s15 + $0x1c0] sm:$0xff] }
 0x227   : > { %v2439_v29 = vrot.slane %v2438_v2, 1  ;;  %v2447_v18 = vmax.f32 %v2445_v30, %v2446_v12  ;;  %v1262_v4 = vadd.f32 %v1198_v13, %v873_v11  ;;  %2298 = vmatmul.mubr.bf16.vlgmr.msra.gmra.mxu1 %v1909_v25 }
 0x228   : > { %7570 = vset.pattern.permute.xlu1 %v12558_v50  ;;  %v1052_v60 = vpop.permute.xlu1 %1051  ;;  %2307 = vmatprep.mubr.bf16.mxu1 %v12558_v50 }
 0x229   : > { %v2440_v38 = vmax.f32 %v2438_v2, %v2439_v29  ;;  %v2448_v62 = vrot.slane %v2447_v18, 1  ;;  %795 = vperm.xlu1 %7570, %v7847_v6   ;;  %v2139_v23 = vpop.f32.mrf.mxu0  ;;  %v1651_v61 = vadd.f32 %v1587_v19, %v1262_v4  ;;  %v1199_v41 = vmul.f32 %v8756_v55, %v1052_v60 }
 0x22a   : > { %v9054_v25 = vadd.f32 %v2139_v23, %v8669_v32 }
 0x22b   : > { %v3826_v9 = vpack.c.bf16 %v2440_v38, %v2440_v38  ;;  %v2449_v12 = vmax.f32 %v2447_v18, %v2448_v62  ;;  %v2141_v30 = vpop.f32.mrf.mxu0  ;;  %v1722_v36 = vmul.f32 %v8804_v17, %v1651_v61  ;;  %v1263_v19 = vadd.f32 %v1199_v41, %v874_v33 }
 0x22c   : > { %v9067_v62 = vadd.f32 %v2141_v30, %v8678_v54 }
 0x22d   : > { %v3954_v11 = vunpack.c.l.b16 %v3826_v9  ;;  %v3827_v13 = vpack.c.bf16 %v2449_v12, %v2449_v12  ;;  %7571 = vset.pattern.permute.xlu1 %v12547_v20  ;;  %v1441_v2 = vpop.permute.xlu1 %1440  ;;  %v2143_v29 = vpop.f32.mrf.mxu0  ;;  %v1793_v12 = vadd.f32 %v8817_v26, %v1722_v36 }
 0x22e   : > { %v1588_v4 = vmul.f32 %v8766_v15, %v1441_v2  ;;  %v9060_v16 = vadd.f32 %v2143_v29, %v8669_v32  ;;  %1127 = vperm.xlu1 %7571, %v7847_v6   ;;  %v1601_v2 = vmul.f32 %v8766_v15, %v8770_v53 }
 0x22f   : > { %v9064_v18 = vsel %vm3984_vm2, %v3954_v11, %v9003_v56  ;;  %v3955_v60 = vunpack.c.l.b16 %v3827_v13  ;;  %v2145_v38 = vpop.f32.mrf.mxu0  ;;  %v1857_v11 = vmax.f32 %v1793_v12, 0.0  ;;  %v7848_v12 = vld [vmem:[%s8161_s15 + $0x160] sm:$0xff] }
 0x230   : > { %v1652_v23 = vadd.f32 %v1588_v4, %v1263_v19  ;;  %v2450_v61 = vmax.f32 %v9054_v25, %v9060_v16  ;;  %v9072_v41 = vadd.f32 %v2145_v38, %v8678_v54 }
 0x231   : > { %v9076_v33 = vsel %vm3984_vm2, %v3955_v60, %v9010_v10  ;;  %v771_v60 = vpop.permute.xlu0 %770 }
 0x232   : > { %v1723_v6 = vmul.f32 %v8804_v17, %v1652_v23  ;;  %v2459_v56 = vmax.f32 %v9067_v62, %v9072_v41  ;;  %1131 = vperm.xlu1 %7571, %v8736_v24   ;;  %v766_v9 = vpop.permute.xlu1 %765 }
 0x233   : > { %v887_v29 = vmul.f32 %v8749_v51, %v766_v9 }
 0x234   : > { %v1794_v30 = vadd.f32 %v8817_v26, %v1723_v6  ;;  %v888_v6 = vmul.f32 %v8749_v51, %v771_v60  ;;  %v7614_v60 = vld [vmem:[%s12450_s7 + $0xe8] ss:$16 sps:$4 sm:$0xff]  }
 0x236   : > { %7572 = vset.pattern.permute.xlu1 %v12546_v45  ;;  %v1858_v13 = vmax.f32 %v1794_v30, 0.0 }
 0x237   : > { %1520 = vperm.xlu1 %7572, %v8736_v24   ;;  %v1104_v10 = vpop.permute.xlu1 %1103 }
 0x238   : > { %v1212_v19 = vmul.f32 %v8756_v55, %v1104_v10  ;;  %v1903_v4 = vpack.c.bf16 %v1858_v13, %v1857_v11  ;;  %v7616_v10 = vld [vmem:[%s12450_s7 + $0xec] ss:$16 sps:$4 sm:$0xff]  }
 0x239   : > { %3467 = vmatprep.subr.bf16.mxu0 %v7616_v10 }
 0x23a   : > { %v1276_v36 = vadd.f32 %v1212_v19, %v887_v29  ;;  %2238 = vmatmul.mubr.bf16.gmra.mxu0 %v1903_v4 }
 0x23b   : > { %7573 = vset.pattern.permute.xlu1 %v12558_v50  ;;  %v1108_v38 = vpop.permute.xlu1 %1107  ;;  %2247 = vmatprep.mubr.bf16.mxu0 %v12558_v50 }
 0x23c   : > { %v1665_v23 = vadd.f32 %v1601_v2, %v1276_v36  ;;  %v1213_v24 = vmul.f32 %v8756_v55, %v1108_v38  ;;  %735 = vperm.xlu1 %7573, %v7848_v12   ;;  %v2149_v53 = vpop.f32.mrf.mxu0  ;;  %3468 = vmatpush1.bf16.msra.mxu0 %v7614_v60 }
 0x23d   : > { %v9096_v9 = vadd.f32 %v2149_v53, %v8669_v32 }
 0x23e   : > { %v2151_v30 = vpop.f32.mrf.mxu0  ;;  %v1736_v2 = vmul.f32 %v8804_v17, %v1665_v23  ;;  %v1277_v29 = vadd.f32 %v1213_v24, %v888_v6 }
 0x23f   : > { %12568 = vst [vmem:[#allocation34_spill] sm:$0xff] %v9096_v9  ;;  %v2451_v11 = vmax.f32 %v2450_v61, %v9096_v9  ;;  %v9100_v13 = vadd.f32 %v2151_v30, %v8678_v54  ;;  %v7619_v30 = vld [vmem:[%s12450_s7 + $0xcc] ss:$16 sps:$4 sm:$0xff]  }
 0x240   : > { %7574 = vset.pattern.permute.xlu1 %v12547_v20  ;;  %v1497_v19 = vpop.permute.xlu1 %1496  ;;  %v2153_v4 = vpop.f32.mrf.mxu0  ;;  %3469 = vmatprep.subr.bf16.mxu0 %v7619_v30 }
 0x241   : > { %v2460_v61 = vmax.f32 %v2459_v56, %v9100_v13  ;;  %v1602_v36 = vmul.f32 %v8766_v15, %v1497_v19  ;;  %v9113_v38 = vadd.f32 %v2153_v4, %v8669_v32  ;;  %1079 = vperm.xlu1 %7574, %v7848_v12   ;;  %v7617_v56 = vld [vmem:[%s12450_s7 + $0xc8] ss:$16 sps:$4 sm:$0xff]  }
 0x242   : > { %v2155_v53 = vpop.f32.mrf.mxu0  ;;  %3470 = vmatpush1.bf16.msra.mxu0 %v7617_v56 }
 0x243   : > { %12569 = vst [vmem:[#allocation35_spill] sm:$0xff] %v9113_v38  ;;  %v1666_v23 = vadd.f32 %v1602_v36, %v1277_v29  ;;  %v2452_v24 = vmax.f32 %v2451_v11, %v9113_v38  ;;  %v9117_v6 = vadd.f32 %v2155_v53, %v8678_v54  ;;  %v1807_v11 = vadd.f32 %v8817_v26, %v1736_v2  ;;  %v7622_v53 = vld [vmem:[%s12450_s7 + $0xac] ss:$16 sps:$4 sm:$0xff]  }
 0x244   : > { %3471 = vmatprep.subr.bf16.mxu0 %v7622_v53 }
 0x245   : > { %12570 = vst [vmem:[#allocation36_spill] sm:$0xff] %v9117_v6  ;;  %v1737_v19 = vmul.f32 %v8804_v17, %v1666_v23  ;;  %v2453_v12 = vrot.slane %v2452_v24, 4  ;;  %v2461_v10 = vmax.f32 %v2460_v61, %v9117_v6  ;;  %1083 = vperm.xlu1 %7574, %v8781_v40   ;;  %v706_v29 = vpop.permute.xlu1 %705  ;;  %v7620_v23 = vld [vmem:[%s12450_s7 + $0xa8] ss:$16 sps:$4 sm:$0xff]   ;;  %v1871_v9 = vmax.f32 %v1807_v11, 0.0 }
 0x246   : > { %3472 = vmatpush1.bf16.msra.mxu0 %v7620_v23  ;;  %v7625_v11 = vld [vmem:[%s12450_s7 + $0x8c] ss:$16 sps:$4 sm:$0xff]  }
 0x247   : > { %v2454_v4 = vmax.f32 %v2452_v24, %v2453_v12  ;;  %v2462_v60 = vrot.slane %v2461_v10, 4  ;;  %v1808_v36 = vadd.f32 %v8817_v26, %v1737_v19  ;;  %v875_v24 = vmul.f32 %v8749_v51, %v706_v29  ;;  %3473 = vmatprep.subr.bf16.mxu0 %v7625_v11 }
 0x248   : > { %v1589_v29 = vmul.f32 %v8766_v15, %v8777_v58  ;;  %v7628_v58 = vld [vmem:[%s12450_s7 + $0x6c] ss:$16 sps:$4 sm:$0xff]  }
 0x249   : > { %v2455_v61 = vrot.slane %v2454_v4, 2  ;;  %v2463_v38 = vmax.f32 %v2461_v10, %v2462_v60  ;;  %7575 = vset.pattern.permute.xlu1 %v12546_v45  ;;  %v1872_v2 = vmax.f32 %v1808_v36, 0.0  ;;  %v7623_v10 = vld [vmem:[%s12450_s7 + $0x88] ss:$16 sps:$4 sm:$0xff]  }
 0x24a   : > { %1472 = vperm.xlu1 %7575, %v8781_v40   ;;  %v1056_v30 = vpop.permute.xlu1 %1055  ;;  %3474 = vmatpush1.bf16.msra.mxu0 %v7623_v10 }
 0x24b   : > { %v2456_v56 = vmax.f32 %v2454_v4, %v2455_v61  ;;  %v2464_v19 = vrot.slane %v2463_v38, 2  ;;  %v1200_v12 = vmul.f32 %v8756_v55, %v1056_v30  ;;  %v1910_v6 = vpack.c.bf16 %v1872_v2, %v1871_v9  ;;  %v711_v4 = vpop.permute.xlu0 %710  ;;  %v7849_v61 = vld [vmem:[%s8161_s15 + $0x1d0] sm:$0xff]  ;;  %v7626_v30 = vld [vmem:[%s12450_s7 + $0x68] ss:$16 sps:$4 sm:$0xff]   ;;  %3475 = vmatprep.subr.bf16.mxu0 %v7628_v58 }
 0x24d   : > { %v2457_v40 = vrot.slane %v2456_v56, 1  ;;  %v2465_v60 = vmax.f32 %v2463_v38, %v2464_v19  ;;  %v1264_v36 = vadd.f32 %v1200_v12, %v875_v24  ;;  %2308 = vmatmul.mubr.bf16.gmra.mxu1 %v1910_v6  ;;  %v876_v24 = vmul.f32 %v8749_v51, %v711_v4  ;;  %v7631_v51 = vld [vmem:[%s12450_s7 + $0x4c] ss:$16 sps:$4 sm:$0xff]  }
 0x24e   : > { %7576 = vset.pattern.permute.xlu1 %v12558_v50  ;;  %v1060_v9 = vpop.permute.xlu1 %1059  ;;  %2317 = vmatprep.mubr.bf16.mxu1 %v12558_v50 }
 0x24f   : > { %v2458_v53 = vmax.f32 %v2456_v56, %v2457_v40  ;;  %v2466_v23 = vrot.slane %v2465_v60, 1  ;;  %805 = vperm.xlu1 %7576, %v7849_v61   ;;  %v2159_v2 = vpop.f32.mrf.mxu0  ;;  %v1653_v38 = vadd.f32 %v1589_v29, %v1264_v36  ;;  %v1201_v6 = vmul.f32 %v8756_v55, %v1060_v9  ;;  %3476 = vmatpush1.bf16.msra.mxu0 %v7626_v30 }
 0x250   : > { %v9160_v40 = vadd.f32 %v2159_v2, %v8669_v32  ;;  %3477 = vmatprep.subr.bf16.mxu0 %v7631_v51  ;;  %v7635_v51 = vld [vmem:[%s12450_s7 + $0x8] ss:$16 sps:$4 sm:$0xff]  }
 0x251   : > { %v3828_v19 = vpack.c.bf16 %v2458_v53, %v2458_v53  ;;  %v2467_v56 = vmax.f32 %v2465_v60, %v2466_v23  ;;  %v2161_v12 = vpop.f32.mrf.mxu0  ;;  %v1724_v36 = vmul.f32 %v8804_v17, %v1653_v38  ;;  %v1265_v60 = vadd.f32 %v1201_v6, %v876_v24  ;;  %v7629_v53 = vld [vmem:[%s12450_s7 + $0x48] ss:$16 sps:$4 sm:$0xff]   ;;  %v7634_v24 = vld [vmem:[%s12450_s7 + $0x2c] ss:$16 sps:$4 sm:$0xff]  }
 0x252   : > { %12571 = vst [vmem:[#allocation37_spill] sm:$0xff] %v9160_v40  ;;  %v9179_v38 = vadd.f32 %v2161_v12, %v8678_v54 }
 0x253   : > { %v3956_v11 = vunpack.c.l.b16 %v3828_v19  ;;  %v3829_v10 = vpack.c.bf16 %v2467_v56, %v2467_v56  ;;  %7577 = vset.pattern.permute.xlu1 %v12547_v20  ;;  %v1449_v29 = vpop.permute.xlu1 %1448  ;;  %v2163_v55 = vpop.f32.mrf.mxu0  ;;  %3478 = vmatpush1.bf16.msra.mxu0 %v7629_v53  ;;  %v1795_v12 = vadd.f32 %v8817_v26, %v1724_v36 }
 0x254   : > { %v1590_v4 = vmul.f32 %v8766_v15, %v1449_v29  ;;  %v9169_v9 = vadd.f32 %v2163_v55, %v8669_v32  ;;  %1135 = vperm.xlu1 %7577, %v7849_v61   ;;  %3479 = vmatprep.subr.bf16.mxu0 %v7634_v24 }
 0x255   : > { %v9176_v23 = vsel %vm3986_vm3, %v3956_v11, %v9064_v18  ;;  %v3957_v2 = vunpack.c.l.b16 %v3829_v10  ;;  %v2165_v58 = vpop.f32.mrf.mxu0  ;;  %v7632_v11 = vld [vmem:[%s12450_s7 + $0x28] ss:$16 sps:$4 sm:$0xff]   ;;  %v1859_v29 = vmax.f32 %v1795_v12, 0.0 }
 0x256   : > { %12572 = vst [vmem:[#allocation38_spill] sm:$0xff] %v9169_v9  ;;  %v1654_v6 = vadd.f32 %v1590_v4, %v1265_v60  ;;  %v2468_v15 = vmax.f32 %v9160_v40, %v9169_v9  ;;  %v9184_v61 = vadd.f32 %v2165_v58, %v8678_v54  ;;  %v9219_v4 = vld [vmem:[%s12444_s1 + $0x1] ss:$0 sm:$0xff]  ;;  %v781_v58 = vpop.permute.xlu0 %780 }
 0x257   : > { %v9191_v18 = vsel %vm3986_vm3, %v3957_v2, %v9076_v33  ;;  %3480 = vmatpush1.bf16.msra.mxu0 %v7632_v11  ;;  %v7637_v33 = vld [vmem:[%s12450_s7 + $0xc] ss:$16 sps:$4 sm:$0xff]  }
 0x258   : > { %12573 = vst [vmem:[#allocation39_spill] sm:$0xff] %v9184_v61  ;;  %v1725_v30 = vmul.f32 %v8804_v17, %v1654_v6  ;;  %v2477_v19 = vmax.f32 %v9179_v38, %v9184_v61  ;;  %1139 = vperm.xlu1 %7577, %v8797_v52   ;;  %v776_v56 = vpop.permute.xlu1 %775  ;;  %3481 = vmatprep.subr.bf16.mxu0 %v7637_v33  ;;  %v9228_v6 = vld [vmem:[%s12444_s1 + $0x2] ss:$0 sm:$0xff] }
 0x259   : > { %v1603_v24 = vmul.f32 %v9228_v6, %v8791_v0 }
 0x25a   : > { %v1796_v10 = vadd.f32 %v8817_v26, %v1725_v30  ;;  %v9213_v26 = vld [vmem:[%s12444_s1] ss:$0 sm:$0xff] }
 0x25b   : > { %v889_v60 = vmul.f32 %v9213_v26, %v776_v56  ;;  %3482 = vmatpush1.bf16.msra.mxu0 %v7635_v51  ;;  %v7638_v56 = vld [vmem:[%s12450_s7 + $0x1e8] ss:$16 sps:$4 sm:$0xff]   ;;  %v890_v33 = vmul.f32 %v9213_v26, %v781_v58  ;;  %v7643_v51 = vld [vmem:[%s12450_s7 + $0x1cc] ss:$16 sps:$4 sm:$0xff]   ;;  %v7646_v58 = vld [vmem:[%s12450_s7 + $0xe4] ss:$16 sps:$4 sm:$0xff]  }
 0x25c   : > { %7578 = vset.pattern.permute.xlu1 %v12546_v45  ;;  %v1860_v55 = vmax.f32 %v1796_v10, 0.0  ;;  %3114 = vmatprep.subr.bf16.mxu1 %v7646_v58  ;;  %v9285_v58 = vld [vmem:[%s12445_s2] ss:$0 sm:$0xff] }
 0x25d   : > { %1528 = vperm.xlu1 %7578, %v8797_v52   ;;  %v1112_v36 = vpop.permute.xlu1 %1111  ;;  %v7640_v52 = vld [vmem:[%s12450_s7 + $0x1ec] ss:$16 sps:$4 sm:$0xff]  }
 0x25e   : > { %v1214_v53 = vmul.f32 %v9219_v4, %v1112_v36  ;;  %v1904_v2 = vpack.c.bf16 %v1860_v55, %v1859_v29  ;;  %v7853_v29 = vld [vmem:[%s8161_s15 + $0x170] sm:$0xff]  ;;  %3483 = vmatprep.subr.bf16.mxu0 %v7640_v52 }
 0x25f   : > { %3484 = vmatpush2.bf16.msra.mxu0 %v7638_v56 }
 0x260   : > { %v1278_v30 = vadd.f32 %v1214_v53, %v889_v60  ;;  %2248 = vmatmul.mubr.bf16.gmra.mxu0 %v1904_v2  ;;  %v7641_v60 = vld [vmem:[%s12450_s7 + $0x1c8] ss:$16 sps:$4 sm:$0xff]   ;;  %3485 = vmatprep.subr.bf16.mxu0 %v7643_v51 }
 0x261   : > { %7579 = vset.pattern.permute.xlu1 %v12558_v50  ;;  %v1116_v12 = vpop.permute.xlu1 %1115  ;;  %2257 = vmatprep.mubr.bf16.mxu0 %v12558_v50 }
 0x262   : > { %v1667_v11 = vadd.f32 %v1603_v24, %v1278_v30  ;;  %v1215_v10 = vmul.f32 %v9219_v4, %v1116_v12  ;;  %745 = vperm.xlu1 %7579, %v7853_v29   ;;  %v2169_v55 = vpop.f32.mrf.mxu0  ;;  %v7644_v12 = vld [vmem:[%s12450_s7 + $0xe0] ss:$16 sps:$4 sm:$0xff]  }
 0x263   : > { %v9241_v0 = vadd.f32 %v2169_v55, %v8669_v32  ;;  %3486 = vmatpush2.bf16.msra.mxu0 %v7641_v60  ;;  %3115 = vmatpush1.bf16.msra.mxu1 %v7644_v12  ;;  %v7650_v60 = vld [vmem:[%s12450_s7 + $0xc0] ss:$16 sps:$4 sm:$0xff]  }
 0x264   : > { %v2171_v36 = vpop.f32.mrf.mxu0  ;;  %v1738_v52 = vmul.f32 %v8804_v17, %v1667_v11  ;;  %v1279_v24 = vadd.f32 %v1215_v10, %v890_v33  ;;  %v7649_v17 = vld [vmem:[%s12450_s7 + $0x1ac] ss:$16 sps:$4 sm:$0xff]   ;;  %v7647_v10 = vld [vmem:[%s12450_s7 + $0x1a8] ss:$16 sps:$4 sm:$0xff]  }
 0x265   : > { %12574 = vst [vmem:[#allocation40_spill] sm:$0xff] %v9241_v0  ;;  %v2469_v53 = vmax.f32 %v2468_v15, %v9241_v0  ;;  %v9251_v2 = vadd.f32 %v2171_v36, %v8678_v54  ;;  %3487 = vmatprep.subr.bf16.mxu0 %v7649_v17 }
 0x266   : > { %7580 = vset.pattern.permute.xlu1 %v12547_v20  ;;  %v1505_v30 = vpop.permute.xlu1 %1504  ;;  %v2173_v56 = vpop.f32.mrf.mxu0 }
 0x267   : > { %12575 = vst [vmem:[#allocation41_spill] sm:$0xff] %v9251_v2  ;;  %v2478_v15 = vmax.f32 %v2477_v19, %v9251_v2  ;;  %v1604_v55 = vmul.f32 %v9228_v6, %v1505_v30  ;;  %v9264_v51 = vadd.f32 %v2173_v56, %v8669_v32  ;;  %1087 = vperm.xlu1 %7580, %v7853_v29   ;;  %v7652_v29 = vld [vmem:[%s12450_s7 + $0xc4] ss:$16 sps:$4 sm:$0xff]   ;;  %v7855_v56 = vld [vmem:[%s8161_s15 + $0x178] sm:$0xff] }
 0x268   : > { %v2175_v11 = vpop.f32.mrf.mxu0  ;;  %3116 = vmatprep.subr.bf16.mxu1 %v7652_v29  ;;  %3488 = vmatpush2.bf16.msra.mxu0 %v7647_v10  ;;  %v7656_v29 = vld [vmem:[%s12450_s7 + $0xa0] ss:$16 sps:$4 sm:$0xff]  }
 0x269   : > { %12576 = vst [vmem:[#allocation42_spill] sm:$0xff] %v9264_v51  ;;  %v1668_v19 = vadd.f32 %v1604_v55, %v1279_v24  ;;  %v2470_v33 = vmax.f32 %v2469_v53, %v9264_v51  ;;  %v9274_v36 = vadd.f32 %v2175_v11, %v8678_v54  ;;  %v9293_v55 = vld [vmem:[%s12446_s3] ss:$0 sm:$0xff]  ;;  %v7655_v11 = vld [vmem:[%s12450_s7 + $0x18c] ss:$16 sps:$4 sm:$0xff]   ;;  %3117 = vmatpush1.bf16.msra.mxu1 %v7650_v60 }
 0x26a   : > { %v1809_v17 = vadd.f32 %v9293_v55, %v1738_v52  ;;  %3489 = vmatprep.subr.bf16.mxu0 %v7655_v11  ;;  %v7658_v52 = vld [vmem:[%s12450_s7 + $0xa4] ss:$16 sps:$4 sm:$0xff]  }
 0x26b   : > { %12577 = vst [vmem:[#allocation43_spill] sm:$0xff] %v9274_v36  ;;  %v1739_v24 = vmul.f32 %v9285_v58, %v1668_v19  ;;  %v2471_v53 = vrot.slane %v2470_v33, 4  ;;  %v2479_v30 = vmax.f32 %v2478_v15, %v9274_v36  ;;  %1091 = vperm.xlu1 %7580, %v7855_v56   ;;  %v716_v12 = vpop.permute.xlu1 %715  ;;  %v7653_v15 = vld [vmem:[%s12450_s7 + $0x188] ss:$16 sps:$4 sm:$0xff]   ;;  %3118 = vmatprep.subr.bf16.mxu1 %v7658_v52 }
 0x26c   : > { %v1873_v60 = vmax.f32 %v1809_v17, 0.0  ;;  %3490 = vmatpush2.bf16.msra.mxu0 %v7653_v15  ;;  %v721_v15 = vpop.permute.xlu0 %720 }
 0x26d   : > { %v2472_v19 = vmax.f32 %v2470_v33, %v2471_v53  ;;  %v2480_v51 = vrot.slane %v2479_v30, 4  ;;  %v1810_v0 = vadd.f32 %v9293_v55, %v1739_v24  ;;  %v7661_v33 = vld [vmem:[%s12450_s7 + $0x16c] ss:$16 sps:$4 sm:$0xff]   ;;  %v877_v24 = vmul.f32 %v9213_v26, %v716_v12  ;;  %3119 = vmatpush1.bf16.msra.mxu1 %v7656_v29 }
 0x26e   : > { %3491 = vmatprep.subr.bf16.mxu0 %v7661_v33  ;;  %v7857_v33 = vld [vmem:[%s8161_s15 + $0x1e0] sm:$0xff] }
 0x26f   : > { %v2473_v36 = vrot.slane %v2472_v19, 2  ;;  %v2481_v10 = vmax.f32 %v2479_v30, %v2480_v51  ;;  %7581 = vset.pattern.permute.xlu1 %v12546_v45  ;;  %v1874_v2 = vmax.f32 %v1810_v0, 0.0  ;;  %v7659_v0 = vld [vmem:[%s12450_s7 + $0x168] ss:$16 sps:$4 sm:$0xff]   ;;  %v7664_v51 = vld [vmem:[%s12450_s7 + $0x84] ss:$16 sps:$4 sm:$0xff]  }
 0x270   : > { %1480 = vperm.xlu1 %7581, %v7855_v56   ;;  %v1064_v53 = vpop.permute.xlu1 %1063  ;;  %v7662_v30 = vld [vmem:[%s12450_s7 + $0x80] ss:$16 sps:$4 sm:$0xff]   ;;  %3120 = vmatprep.subr.bf16.mxu1 %v7664_v51  ;;  %v7673_v51 = vld [vmem:[%s12450_s7 + $0x12c] ss:$16 sps:$4 sm:$0xff]  }
 0x271   : > { %v2474_v11 = vmax.f32 %v2472_v19, %v2473_v36  ;;  %v2482_v9 = vrot.slane %v2481_v10, 2  ;;  %v1202_v40 = vmul.f32 %v9219_v4, %v1064_v53  ;;  %v1911_v61 = vpack.c.bf16 %v1874_v2, %v1873_v60  ;;  %v7667_v36 = vld [vmem:[%s12450_s7 + $0x14c] ss:$16 sps:$4 sm:$0xff]   ;;  %3492 = vmatpush2.bf16.msra.mxu0 %v7659_v0  ;;  %3121 = vmatpush1.bf16.msra.mxu1 %v7662_v30 }
 0x272   : > { %v1591_v2 = vmul.f32 %v9228_v6, %v8809_v44  ;;  %v7665_v44 = vld [vmem:[%s12450_s7 + $0x148] ss:$16 sps:$4 sm:$0xff]   ;;  %3493 = vmatprep.subr.bf16.mxu0 %v7667_v36 }
 0x273   : > { %v2475_v56 = vrot.slane %v2474_v11, 1  ;;  %v2483_v12 = vmax.f32 %v2481_v10, %v2482_v9  ;;  %v1266_v17 = vadd.f32 %v1202_v40, %v877_v24  ;;  %2318 = vmatmul.mubr.bf16.gmra.mxu1 %v1911_v61  ;;  %v7670_v40 = vld [vmem:[%s12450_s7 + $0x64] ss:$16 sps:$4 sm:$0xff]   ;;  %v878_v61 = vmul.f32 %v9213_v26, %v721_v15  ;;  %v7668_v10 = vld [vmem:[%s12450_s7 + $0x60] ss:$16 sps:$4 sm:$0xff]  }
 0x274   : > { %7582 = vset.pattern.permute.xlu1 %v12558_v50  ;;  %v1068_v19 = vpop.permute.xlu1 %1067  ;;  %2327 = vmatprep.mubr.bf16.mxu1 %v12558_v50 }
 0x275   : > { %v2476_v52 = vmax.f32 %v2474_v11, %v2475_v56  ;;  %v2484_v29 = vrot.slane %v2483_v12, 1  ;;  %v1655_v60 = vadd.f32 %v1591_v2, %v1266_v17  ;;  %815 = vperm.xlu1 %7582, %v7857_v33   ;;  %v2179_v53 = vpop.f32.mrf.mxu0  ;;  %v1203_v9 = vmul.f32 %v9219_v4, %v1068_v19  ;;  %3122 = vmatprep.subr.bf16.mxu1 %v7670_v40  ;;  %v7676_v19 = vld [vmem:[%s12450_s7 + $0x44] ss:$16 sps:$4 sm:$0xff]  }
 0x276   : > { %v9348_v30 = vadd.f32 %v2179_v53, %v8669_v32  ;;  %3494 = vmatpush2.bf16.msra.mxu0 %v7665_v44  ;;  %3123 = vmatpush1.bf16.msra.mxu1 %v7668_v10  ;;  %v7674_v53 = vld [vmem:[%s12450_s7 + $0x40] ss:$16 sps:$4 sm:$0xff]  }
 0x277   : > { %v3830_v24 = vpack.c.bf16 %v2476_v52, %v2476_v52  ;;  %v2485_v11 = vmax.f32 %v2483_v12, %v2484_v29  ;;  %v2181_v0 = vpop.f32.mrf.mxu0  ;;  %v1726_v17 = vmul.f32 %v9285_v58, %v1655_v60  ;;  %v7671_v12 = vld [vmem:[%s12450_s7 + $0x128] ss:$16 sps:$4 sm:$0xff]   ;;  %v1267_v52 = vadd.f32 %v1203_v9, %v878_v61  ;;  %3495 = vmatprep.subr.bf16.mxu0 %v7673_v51  ;;  %v7679_v9 = vld [vmem:[%s12450_s7 + $0x10c] ss:$16 sps:$4 sm:$0xff]   ;;  %v7682_v51 = vld [vmem:[%s12450_s7 + $0x24] ss:$16 sps:$4 sm:$0xff]  }
 0x278   : > { %3124 = vmatprep.subr.bf16.mxu1 %v7676_v19  ;;  %v7680_v19 = vld [vmem:[%s12450_s7 + $0x20] ss:$16 sps:$4 sm:$0xff]  }
 0x279   : > { %v3958_v2 = vunpack.c.l.b16 %v3830_v24  ;;  %v3831_v56 = vpack.c.bf16 %v2485_v11, %v2485_v11  ;;  %7583 = vset.pattern.permute.xlu1 %v12547_v20  ;;  %v1457_v36 = vpop.permute.xlu1 %1456  ;;  %v2183_v15 = vpop.f32.mrf.mxu0 }
 0x27a   : > { %v1592_v29 = vmul.f32 %v9228_v6, %v1457_v36  ;;  %v9359_v60 = vadd.f32 %v2183_v15, %v8669_v32  ;;  %1143 = vperm.xlu1 %7583, %v7857_v33   ;;  %v9372_v33 = vadd.f32 %v2181_v0, %v8678_v54  ;;  %3496 = vmatpush2.bf16.msra.mxu0 %v7671_v12  ;;  %v7858_v36 = vld [vmem:[%s8161_s15 + $0x1e8] sm:$0xff] }
 0x27b   : > { %v9366_v44 = vsel %vm3988_vm4, %v3958_v2, %v9176_v23  ;;  %v3959_v40 = vunpack.c.l.b16 %v3831_v56  ;;  %v2185_v24 = vpop.f32.mrf.mxu0  ;;  %v7677_v23 = vld [vmem:[%s12450_s7 + $0x108] ss:$16 sps:$4 sm:$0xff]   ;;  %v1797_v12 = vadd.f32 %v9293_v55, %v1726_v17  ;;  %3125 = vmatpush1.bf16.msra.mxu1 %v7674_v53  ;;  %3497 = vmatprep.subr.bf16.mxu0 %v7679_v9  ;;  %v7683_v17 = vld [vmem:[%s12450_s7] ss:$16 sps:$4 sm:$0xff]  }
 0x27c   : > { %v1656_v61 = vadd.f32 %v1592_v29, %v1267_v52  ;;  %v2486_v10 = vmax.f32 %v9348_v30, %v9359_v60  ;;  %v9377_v11 = vadd.f32 %v2185_v24, %v8678_v54  ;;  %3126 = vmatprep.subr.bf16.mxu1 %v7682_v51  ;;  %v7685_v52 = vld [vmem:[%s12450_s7 + $0x4] ss:$16 sps:$4 sm:$0xff]   ;;  %v1605_v51 = vmul.f32 %v9228_v6, %v8822_v37 }
 0x27d   : > { %v9387_v0 = vsel %vm3988_vm4, %v3959_v40, %v9191_v18  ;;  %v1861_v29 = vmax.f32 %v1797_v12, 0.0  ;;  %v791_v12 = vpop.permute.xlu0 %790 }
 0x27e   : > { %v1727_v2 = vmul.f32 %v9285_v58, %v1656_v61  ;;  %v2495_v56 = vmax.f32 %v9372_v33, %v9377_v11  ;;  %1147 = vperm.xlu1 %7583, %v7858_v36   ;;  %v786_v15 = vpop.permute.xlu1 %785  ;;  %3498 = vmatpush2.bf16.msra.mxu0 %v7677_v23  ;;  %v7688_v23 = vld [vmem:[%s12450_s7 + $0x1e4] ss:$16 sps:$4 sm:$0xff]  }
 0x27f   : > { %3127 = vmatpush1.bf16.msra.mxu1 %v7680_v19  ;;  %v891_v24 = vmul.f32 %v9213_v26, %v786_v15  ;;  %6637 = vmatprep.subr.bf16.mxu0 %v12558_v50 }
 0x280   : > { %v1798_v18 = vadd.f32 %v9293_v55, %v1727_v2  ;;  %3128 = vmatprep.subr.bf16.mxu1 %v7685_v52  ;;  %v892_v52 = vmul.f32 %v9213_v26, %v791_v12 }
 0x282   : > { %7585 = vset.pattern.permute.xlu1 %v12546_v45  ;;  %v1862_v40 = vmax.f32 %v1798_v18, 0.0 }
 0x283   : > { %1536 = vperm.xlu1 %7585, %v7858_v36   ;;  %v1120_v53 = vpop.permute.xlu1 %1119  ;;  %3129 = vmatpush1.bf16.msra.mxu1 %v7683_v17  ;;  %v7686_v36 = vld [vmem:[%s12450_s7 + $0x1e0] ss:$16 sps:$4 sm:$0xff]  }
 0x284   : > { %v1216_v9 = vmul.f32 %v9219_v4, %v1120_v53  ;;  %v1905_v61 = vpack.c.bf16 %v1862_v40, %v1861_v29  ;;  %3130 = vmatprep.subr.bf16.mxu1 %v7688_v23  ;;  %v7691_v40 = vld [vmem:[%s12450_s7 + $0x1c4] ss:$16 sps:$4 sm:$0xff]   ;;  %v7689_v53 = vld [vmem:[%s12450_s7 + $0x1c0] ss:$16 sps:$4 sm:$0xff]  }
 0x286   : > { %v1280_v2 = vadd.f32 %v1216_v9, %v891_v24  ;;  %2258 = vmatmul.mubr.bf16.gmra.mxu0 %v1905_v61 }
 0x287   : > { %7586 = vset.pattern.permute.xlu1 %v12558_v50  ;;  %v1124_v15 = vpop.permute.xlu1 %1123  ;;  %2267 = vmatprep.mubr.bf16.mxu0 %v12558_v50 }
 0x288   : > { %v1669_v19 = vadd.f32 %v1605_v51, %v1280_v2  ;;  %825 = vperm.xlu1 %7586, %v8985_v1   ;;  %v2189_v18 = vpop.f32.mrf.mxu0  ;;  %v1217_v37 = vmul.f32 %v9219_v4, %v1124_v15  ;;  %3131 = vmatpush2.bf16.msra.mxu1 %v7686_v36 }
 0x289   : > { %v9422_v29 = vadd.f32 %v2189_v18, %v8669_v32  ;;  %3132 = vmatprep.subr.bf16.mxu1 %v7691_v40 }
 0x28a   : > { %v2191_v17 = vpop.f32.mrf.mxu0  ;;  %v1740_v61 = vmul.f32 %v9285_v58, %v1669_v19  ;;  %v1281_v2 = vadd.f32 %v1217_v37, %v892_v52 }
 0x28b   : > { %12578 = vst [vmem:[#allocation44_spill] sm:$0xff] %v9422_v29  ;;  %v2487_v24 = vmax.f32 %v2486_v10, %v9422_v29  ;;  %v9432_v9 = vadd.f32 %v2191_v17, %v8678_v54  ;;  %v7694_v10 = vld [vmem:[%s12450_s7 + $0x1a4] ss:$16 sps:$4 sm:$0xff]   ;;  %v7859_v17 = vld [vmem:[%s8161_s15 + $0x1f8] sm:$0xff]  ;;  %s7922_s15 = scalar_lea.vmem %s7921_s14, 512 }
 0x28c   : > { %7587 = vset.pattern.permute.xlu1 %v12547_v20  ;;  %v1513_v23 = vpop.permute.xlu1 %1512  ;;  %v2193_v51 = vpop.f32.mrf.mxu0  ;;  %3133 = vmatpush2.bf16.msra.mxu1 %v7689_v53  ;;  %v7692_v20 = vld [vmem:[%s12450_s7 + $0x1a0] ss:$16 sps:$4 sm:$0xff]   ;;  %v1811_v53 = vadd.f32 %v9293_v55, %v1740_v61  ;;  %p7924_p0 = scmp.lt.s32.totalorder %s7922_s15, %s7916_s23 }
 0x28d   : > { %v2496_v12 = vmax.f32 %v2495_v56, %v9432_v9  ;;  %v1606_v36 = vmul.f32 %v9228_v6, %v1513_v23  ;;  %v9439_v15 = vadd.f32 %v2193_v51, %v8669_v32  ;;  %1151 = vperm.xlu1 %7587, %v8985_v1   ;;  %3134 = vmatprep.subr.bf16.mxu1 %v7694_v10  ;;  %v7697_v51 = vld [vmem:[%s12450_s7 + $0x184] ss:$16 sps:$4 sm:$0xff]  }
 0x28e   : > { %v2195_v19 = vpop.f32.mrf.mxu0  ;;  %p7925_p1 = por %p7924_p0, %p7923_p11 }
 0x28f   : > { %12579 = vst [vmem:[#allocation45_spill] sm:$0xff] %v9439_v15  ;;  %v1670_v18 = vadd.f32 %v1606_v36, %v1281_v2  ;;  %v2488_v56 = vmax.f32 %v2487_v24, %v9439_v15  ;;  %v9450_v37 = vadd.f32 %v2195_v19, %v8678_v54  ;;  %v7695_v24 = vld [vmem:[%s12450_s7 + $0x180] ss:$16 sps:$4 sm:$0xff]   ;;  %v7700_v15 = vld [vmem:[%s12450_s7 + $0x164] ss:$16 sps:$4 sm:$0xff]  }
 0x290   : > { %3135 = vmatpush2.bf16.msra.mxu1 %v7692_v20  ;;  %p7926_p3 = pnand %p7925_p1, %p7919_p8 }
 0x291   : > { %v1741_v52 = vmul.f32 %v9285_v58, %v1670_v18  ;;  %v2489_v1 = vrot.slane %v2488_v56, 4  ;;  %v2497_v40 = vmax.f32 %v2496_v12, %v9450_v37  ;;  %1155 = vperm.xlu1 %7587, %v7859_v17   ;;  %v726_v23 = vpop.permute.xlu1 %725  ;;  %3136 = vmatprep.subr.bf16.mxu1 %v7697_v51  ;;  %v1875_v18 = vmax.f32 %v1811_v53, 0.0 }
 0x292   : > { %v879_v20 = vmul.f32 %v9213_v26, %v726_v23  ;;  %v1593_v23 = vmul.f32 %v9228_v6, %v8849_v49 }
 0x293   : > { %v2490_v2 = vmax.f32 %v2488_v56, %v2489_v1  ;;  %v2498_v36 = vrot.slane %v2497_v40, 4  ;;  %v1812_v10 = vadd.f32 %v9293_v55, %v1741_v52  ;;  %v7698_v56 = vld [vmem:[%s12450_s7 + $0x160] ss:$16 sps:$4 sm:$0xff]  }
 0x294   : > { %3137 = vmatpush2.bf16.msra.mxu1 %v7695_v24 }
 0x295   : > { %v2491_v12 = vrot.slane %v2490_v2, 2  ;;  %v2499_v19 = vmax.f32 %v2497_v40, %v2498_v36  ;;  %7589 = vset.pattern.permute.xlu1 %v12546_v45  ;;  %v1876_v61 = vmax.f32 %v1812_v10, 0.0  ;;  %3138 = vmatprep.subr.bf16.mxu1 %v7700_v15  ;;  %v731_v10 = vpop.permute.xlu0 %730 }
 0x296   : > { %1544 = vperm.xlu1 %7589, %v7859_v17   ;;  %v1072_v29 = vpop.permute.xlu1 %1071  ;;  %v7703_v17 = vld [vmem:[%s12450_s7 + $0x144] ss:$16 sps:$4 sm:$0xff]  }
 0x297   : > { %v2492_v52 = vmax.f32 %v2490_v2, %v2491_v12  ;;  %v2500_v1 = vrot.slane %v2499_v19, 2  ;;  %v1204_v40 = vmul.f32 %v9219_v4, %v1072_v29  ;;  %v1912_v45 = vpack.c.bf16 %v1876_v61, %v1875_v18  ;;  %v7701_v29 = vld [vmem:[%s12450_s7 + $0x140] ss:$16 sps:$4 sm:$0xff]  }
 0x298   : > { %3139 = vmatpush2.bf16.msra.mxu1 %v7698_v56  ;;  %v880_v61 = vmul.f32 %v9213_v26, %v731_v10  ;;  %v7706_v56 = vld [vmem:[%s12450_s7 + $0x124] ss:$16 sps:$4 sm:$0xff]  }
 0x299   : > { %v2493_v53 = vrot.slane %v2492_v52, 1  ;;  %v2501_v51 = vmax.f32 %v2499_v19, %v2500_v1  ;;  %v1268_v36 = vadd.f32 %v1204_v40, %v879_v20  ;;  %2328 = vmatmul.mubr.bf16.gmra.mxu1 %v1912_v45  ;;  %3140 = vmatprep.subr.bf16.mxu1 %v7703_v17 }
 0x29a   : > { %v1076_v24 = vpop.permute.xlu1 %1075  ;;  %2337 = vmatprep.mubr.bf16.mxu1 %v12558_v50 }
 0x29b   : > { %v2494_v15 = vmax.f32 %v2492_v52, %v2493_v53  ;;  %v2502_v2 = vrot.slane %v2501_v51, 1  ;;  %v2199_v12 = vpop.f32.mrf.mxu0  ;;  %v1657_v19 = vadd.f32 %v1593_v23, %v1268_v36  ;;  %v1205_v18 = vmul.f32 %v9219_v4, %v1076_v24  ;;  %v7704_v52 = vld [vmem:[%s12450_s7 + $0x120] ss:$16 sps:$4 sm:$0xff]  }
 0x29c   : > { %3141 = vmatpush2.bf16.msra.mxu1 %v7701_v29  ;;  %v9490_v53 = vadd.f32 %v2199_v12, %v8669_v32  ;;  %v7709_v12 = vld [vmem:[%s12450_s7 + $0x104] ss:$16 sps:$4 sm:$0xff]  }
 0x29d   : > { %v3832_v20 = vpack.c.bf16 %v2494_v15, %v2494_v15  ;;  %v2503_v1 = vmax.f32 %v2501_v51, %v2502_v2  ;;  %v2201_v49 = vpop.f32.mrf.mxu0  ;;  %3142 = vmatprep.subr.bf16.mxu1 %v7706_v56  ;;  %v1728_v51 = vmul.f32 %v9285_v58, %v1657_v19  ;;  %v1269_v17 = vadd.f32 %v1205_v18, %v880_v61 }
 0x29e   : > { %12580 = vst [vmem:[#allocation46_spill] sm:$0xff] %v9490_v53 }
 0x29f   : > { %v3960_v40 = vunpack.c.l.b16 %v3832_v20  ;;  %v3833_v45 = vpack.c.bf16 %v2503_v1, %v2503_v1  ;;  %v1465_v36 = vpop.permute.xlu1 %1464  ;;  %v2203_v10 = vpop.f32.mrf.mxu0  ;;  %v9505_v20 = vadd.f32 %v2201_v49, %v8678_v54 }
 0x2a0   : > { %v1594_v23 = vmul.f32 %v9228_v6, %v1465_v36  ;;  %v9495_v24 = vadd.f32 %v2203_v10, %v8669_v32  ;;  %3143 = vmatpush2.bf16.msra.mxu1 %v7704_v52 }
 0x2a1   : > { %v9499_v29 = vsel %vm3990_vm5, %v3960_v40, %v9366_v44  ;;  %v3961_v15 = vunpack.c.l.b16 %v3833_v45  ;;  %v2205_v2 = vpop.f32.mrf.mxu0  ;;  %12582 = vst [vmem:[#allocation48_spill] sm:$0xff] %v9505_v20  ;;  %v7707_v44 = vld [vmem:[%s12450_s7 + $0x100] ss:$16 sps:$4 sm:$0xff]   ;;  %3144 = vmatprep.subr.bf16.mxu1 %v7709_v12  ;;  %v1799_v45 = vadd.f32 %v9293_v55, %v1728_v51  ;;  %v801_v12 = vpop.permute.xlu0 %800 }
 0x2a2   : > { %12581 = vst [vmem:[#allocation47_spill] sm:$0xff] %v9495_v24  ;;  %v1658_v19 = vadd.f32 %v1594_v23, %v1269_v17  ;;  %v2504_v18 = vmax.f32 %v9490_v53, %v9495_v24  ;;  %v9510_v61 = vadd.f32 %v2205_v2, %v8678_v54 }
 0x2a3   : > { %v9517_v1 = vsel %vm3990_vm5, %v3961_v15, %v9387_v0  ;;  %v1863_v52 = vmax.f32 %v1799_v45, 0.0 }
 0x2a4   : > { %12583 = vst [vmem:[#allocation49_spill] sm:$0xff] %v9510_v61  ;;  %v1729_v49 = vmul.f32 %v9285_v58, %v1658_v19  ;;  %v2513_v56 = vmax.f32 %v9505_v20, %v9510_v61  ;;  %v796_v40 = vpop.permute.xlu1 %795  ;;  %3145 = vmatpush2.bf16.msra.mxu1 %v7707_v44  ;;  %v1607_v19 = vmul.f32 %v9228_v6, %v8864_v27 }
 0x2a5   : > { %v893_v23 = vmul.f32 %v9213_v26, %v796_v40  ;;  %v1595_v61 = vmul.f32 %v9228_v6, %v8888_v14 }
 0x2a6   : > { %v1800_v36 = vadd.f32 %v9293_v55, %v1729_v49  ;;  %v894_v49 = vmul.f32 %v9213_v26, %v801_v12 }
 0x2a8   : > { %v1864_v10 = vmax.f32 %v1800_v36, 0.0 }
 0x2a9   : > { %v1128_v17 = vpop.permute.xlu1 %1127 }
 0x2aa   : > { %v1218_v2 = vmul.f32 %v9219_v4, %v1128_v17  ;;  %v1906_v0 = vpack.c.bf16 %v1864_v10, %v1863_v52 }
 0x2ac   : > { %v1282_v15 = vadd.f32 %v1218_v2, %v893_v23  ;;  %2268 = vmatmul.mubr.bf16.gmra.mxu0 %v1906_v0 }
 0x2ad   : > { %v1132_v24 = vpop.permute.xlu1 %1131  ;;  %2277 = vmatprep.mubr.bf16.mxu0 %v12558_v50 }
 0x2ae   : > { %v1671_v51 = vadd.f32 %v1607_v19, %v1282_v15  ;;  %v1219_v44 = vmul.f32 %v9219_v4, %v1132_v24  ;;  %v2209_v45 = vpop.f32.mrf.mxu0 }
 0x2af   : > { %v9532_v40 = vadd.f32 %v2209_v45, %v8669_v32 }
 0x2b0   : > { %v2211_v36 = vpop.f32.mrf.mxu0  ;;  %v1742_v27 = vmul.f32 %v9285_v58, %v1671_v51  ;;  %v1283_v23 = vadd.f32 %v1219_v44, %v894_v49 }
 0x2b1   : > { %12584 = vst [vmem:[#allocation50_spill] sm:$0xff] %v9532_v40  ;;  %v2505_v52 = vmax.f32 %v2504_v18, %v9532_v40  ;;  %v9536_v10 = vadd.f32 %v2211_v36, %v8678_v54 }
 0x2b2   : > { %v1521_v17 = vpop.permute.xlu1 %1520  ;;  %v2213_v0 = vpop.f32.mrf.mxu0  ;;  %v1813_v51 = vadd.f32 %v9293_v55, %v1742_v27 }
 0x2b3   : > { %12585 = vst [vmem:[#allocation51_spill] sm:$0xff] %v9536_v10  ;;  %v1608_v2 = vmul.f32 %v9228_v6, %v1521_v17  ;;  %v2514_v24 = vmax.f32 %v2513_v56, %v9536_v10  ;;  %v9542_v15 = vadd.f32 %v2213_v0, %v8669_v32  ;;  %v7712_v17 = vld [vmem:[%s12449_s6 + $0xe4] ss:$16 sps:$4 sm:$0xff]  }
 0x2b4   : > { %v2215_v19 = vpop.f32.mrf.mxu0  ;;  %4339 = vmatprep.subr.bf16.mxu1 %v7712_v17 }
 0x2b5   : > { %12586 = vst [vmem:[#allocation52_spill] sm:$0xff] %v9542_v15  ;;  %v1672_v12 = vadd.f32 %v1608_v2, %v1283_v23  ;;  %v2506_v45 = vmax.f32 %v2505_v52, %v9542_v15  ;;  %v9546_v18 = vadd.f32 %v2215_v19, %v8678_v54  ;;  %v1877_v52 = vmax.f32 %v1813_v51, 0.0 }
 0x2b7   : > { %12587 = vst [vmem:[#allocation53_spill] sm:$0xff] %v9546_v18  ;;  %v1743_v36 = vmul.f32 %v9285_v58, %v1672_v12  ;;  %v736_v40 = vpop.permute.xlu1 %735  ;;  %v2507_v44 = vrot.slane %v2506_v45, 4  ;;  %v2515_v49 = vmax.f32 %v2514_v24, %v9546_v18 }
 0x2b8   : > { %v881_v10 = vmul.f32 %v9213_v26, %v736_v40 }
 0x2b9   : > { %v1814_v56 = vadd.f32 %v9293_v55, %v1743_v36  ;;  %v2508_v23 = vmax.f32 %v2506_v45, %v2507_v44  ;;  %v2516_v2 = vrot.slane %v2515_v49, 4  ;;  %v741_v36 = vpop.permute.xlu0 %740 }
 0x2ba   : > { %v882_v40 = vmul.f32 %v9213_v26, %v741_v36 }
 0x2bb   : > { %v1878_v0 = vmax.f32 %v1814_v56, 0.0  ;;  %v2509_v19 = vrot.slane %v2508_v23, 2  ;;  %v2517_v15 = vmax.f32 %v2515_v49, %v2516_v2 }
 0x2bc   : > { %v1080_v12 = vpop.permute.xlu1 %1079 }
 0x2bd   : > { %v1206_v27 = vmul.f32 %v9219_v4, %v1080_v12  ;;  %v1913_v53 = vpack.c.bf16 %v1878_v0, %v1877_v52  ;;  %v2510_v24 = vmax.f32 %v2508_v23, %v2509_v19  ;;  %v2518_v18 = vrot.slane %v2517_v15, 2 }
 0x2bf   : > { %v1270_v20 = vadd.f32 %v1206_v27, %v881_v10  ;;  %2338 = vmatmul.mubr.bf16.gmra.mxu1 %v1913_v53  ;;  %v2511_v45 = vrot.slane %v2510_v24, 1  ;;  %v2519_v51 = vmax.f32 %v2517_v15, %v2518_v18 }
 0x2c0   : > { %v1084_v44 = vpop.permute.xlu1 %1083  ;;  %2347 = vmatprep.mubr.bf16.mxu1 %v12558_v50 }
 0x2c1   : > { %v1659_v49 = vadd.f32 %v1595_v61, %v1270_v20  ;;  %v1207_v56 = vmul.f32 %v9219_v4, %v1084_v44  ;;  %v2219_v17 = vpop.f32.mrf.mxu0  ;;  %v2512_v2 = vmax.f32 %v2510_v24, %v2511_v45  ;;  %v2520_v23 = vrot.slane %v2519_v51, 1 }
 0x2c2   : > { %v9564_v10 = vadd.f32 %v2219_v17, %v8669_v32 }
 0x2c3   : > { %v2221_v52 = vpop.f32.mrf.mxu0  ;;  %v3834_v0 = vpack.c.bf16 %v2512_v2, %v2512_v2  ;;  %v2521_v19 = vmax.f32 %v2519_v51, %v2520_v23  ;;  %v1730_v14 = vmul.f32 %v9285_v58, %v1659_v49  ;;  %v1271_v53 = vadd.f32 %v1207_v56, %v882_v40 }
 0x2c4   : > { %v9577_v44 = vadd.f32 %v2221_v52, %v8678_v54 }
 0x2c5   : > { %v1473_v15 = vpop.permute.xlu1 %1472  ;;  %v2223_v18 = vpop.f32.mrf.mxu0  ;;  %v3962_v20 = vunpack.c.l.b16 %v3834_v0  ;;  %v3835_v27 = vpack.c.bf16 %v2521_v19, %v2521_v19  ;;  %v1801_v2 = vadd.f32 %v9293_v55, %v1730_v14  ;;  %v1609_v14 = vmul.f32 %v9228_v6, %v8909_v43 }
 0x2c6   : > { %v1596_v61 = vmul.f32 %v9228_v6, %v1473_v15  ;;  %v9568_v12 = vadd.f32 %v2223_v18, %v8669_v32 }
 0x2c7   : > { %v2225_v24 = vpop.f32.mrf.mxu0  ;;  %v9572_v36 = vsel %vm3992_vm6, %v3962_v20, %v9499_v29  ;;  %v3963_v56 = vunpack.c.l.b16 %v3835_v27  ;;  %v1865_v52 = vmax.f32 %v1801_v2, 0.0 }
 0x2c8   : > { %12588 = vst [vmem:[#allocation54_spill] sm:$0xff] %v9572_v36  ;;  %v1660_v45 = vadd.f32 %v1596_v61, %v1271_v53  ;;  %v2522_v51 = vmax.f32 %v9564_v10, %v9568_v12  ;;  %v9580_v49 = vadd.f32 %v2225_v24, %v8678_v54 }
 0x2c9   : > { %v9588_v23 = vsel %vm3992_vm6, %v3963_v56, %v9517_v1  ;;  %v811_v1 = vpop.permute.xlu0 %810 }
 0x2ca   : > { %v1731_v40 = vmul.f32 %v9285_v58, %v1660_v45  ;;  %v806_v17 = vpop.permute.xlu1 %805  ;;  %v2531_v29 = vmax.f32 %v9577_v44, %v9580_v49  ;;  %12589 = vst [vmem:[#allocation55_spill] sm:$0xff] %v9588_v23  ;;  %v896_v56 = vmul.f32 %v9213_v26, %v811_v1 }
 0x2cb   : > { %v895_v15 = vmul.f32 %v9213_v26, %v806_v17 }
 0x2cc   : > { %v1802_v0 = vadd.f32 %v9293_v55, %v1731_v40 }
 0x2ce   : > { %v1866_v19 = vmax.f32 %v1802_v0, 0.0 }
 0x2cf   : > { %v1136_v53 = vpop.permute.xlu1 %1135 }
 0x2d0   : > { %v1220_v18 = vmul.f32 %v9219_v4, %v1136_v53  ;;  %v1907_v20 = vpack.c.bf16 %v1866_v19, %v1865_v52 }
 0x2d2   : > { %v1284_v61 = vadd.f32 %v1220_v18, %v895_v15  ;;  %2278 = vmatmul.mubr.bf16.gmra.mxu0 %v1907_v20 }
 0x2d3   : > { %v1140_v27 = vpop.permute.xlu1 %1139  ;;  %2287 = vmatprep.mubr.bf16.mxu0 %v12558_v50 }
 0x2d4   : > { %v1673_v24 = vadd.f32 %v1609_v14, %v1284_v61  ;;  %v2229_v45 = vpop.f32.mrf.mxu0  ;;  %v1221_v40 = vmul.f32 %v9219_v4, %v1140_v27 }
 0x2d5   : > { %v9599_v17 = vadd.f32 %v2229_v45, %v8669_v32 }
 0x2d6   : > { %v2231_v2 = vpop.f32.mrf.mxu0  ;;  %v1744_v52 = vmul.f32 %v9285_v58, %v1673_v24  ;;  %v1285_v15 = vadd.f32 %v1221_v40, %v896_v56 }
 0x2d7   : > { %v2523_v0 = vmax.f32 %v2522_v51, %v9599_v17  ;;  %v9603_v43 = vadd.f32 %v2231_v2, %v8678_v54 }
 0x2d8   : > { %v1529_v19 = vpop.permute.xlu1 %1528  ;;  %v2233_v53 = vpop.f32.mrf.mxu0 }
 0x2d9   : > { %v2532_v18 = vmax.f32 %v2531_v29, %v9603_v43  ;;  %v1610_v20 = vmul.f32 %v9228_v6, %v1529_v19  ;;  %v9609_v14 = vadd.f32 %v2233_v53, %v8669_v32  ;;  %v1815_v29 = vadd.f32 %v9293_v55, %v1744_v52 }
 0x2da   : > { %v2235_v61 = vpop.f32.mrf.mxu0 }
 0x2db   : > { %12590 = vst [vmem:[#allocation56_spill] sm:$0xff] %v9609_v14  ;;  %v1674_v27 = vadd.f32 %v1610_v20, %v1285_v15  ;;  %v9612_v1 = vmax.f32 %v2523_v0, %v9609_v14  ;;  %v9615_v51 = vadd.f32 %v2235_v61, %v8678_v54  ;;  %v1879_v2 = vmax.f32 %v1815_v29, 0.0  ;;  %v751_v29 = vpop.permute.xlu0 %750 }
 0x2dc   : > { %v884_v36 = vmul.f32 %v9213_v26, %v751_v29 }
 0x2dd   : > { %v1745_v24 = vmul.f32 %v9285_v58, %v1674_v27  ;;  %v9619_v45 = vmax.f32 %v2532_v18, %v9615_v51  ;;  %v746_v56 = vpop.permute.xlu1 %745  ;;  %v1597_v27 = vmul.f32 %v9228_v6, %v8926_v63 }
 0x2de   : > { %v883_v15 = vmul.f32 %v9213_v26, %v746_v56 }
 0x2df   : > { %v1816_v40 = vadd.f32 %v9293_v55, %v1745_v24 }
 0x2e1   : > { %v1880_v19 = vmax.f32 %v1816_v40, 0.0 }
 0x2e2   : > { %v1088_v53 = vpop.permute.xlu1 %1087 }
 0x2e3   : > { %v1208_v0 = vmul.f32 %v9219_v4, %v1088_v53  ;;  %v1914_v20 = vpack.c.bf16 %v1880_v19, %v1879_v2 }
 0x2e5   : > { %v1272_v61 = vadd.f32 %v1208_v0, %v883_v15  ;;  %2348 = vmatmul.mubr.bf16.gmra.mxu1 %v1914_v20 }
 0x2e6   : > { %v1092_v18 = vpop.permute.xlu1 %1091  ;;  %2357 = vmatprep.mubr.bf16.mxu1 %v12558_v50 }
 0x2e7   : > { %v2299_v23 = vpop.f32.mrf.mxu1  ;;  %v1661_v52 = vadd.f32 %v1597_v27, %v1272_v61  ;;  %v1209_v24 = vmul.f32 %v9219_v4, %v1092_v18 }
 0x2e8   : > { %v9631_v56 = vadd.f32 %v2299_v23, %v8669_v32 }
 0x2e9   : > { %v2301_v40 = vpop.f32.mrf.mxu1  ;;  %v1732_v53 = vmul.f32 %v9285_v58, %v1661_v52  ;;  %v1273_v15 = vadd.f32 %v1209_v24, %v884_v36  ;;  %v1611_v36 = vmul.f32 %v9228_v6, %v8950_v59 }
 0x2ea   : > { %v9639_v61 = vadd.f32 %v2301_v40, %v8678_v54 }
 0x2eb   : > { %v1481_v2 = vpop.permute.xlu1 %1480  ;;  %v2303_v19 = vpop.f32.mrf.mxu1  ;;  %v1803_v24 = vadd.f32 %v9293_v55, %v1732_v53 }
 0x2ec   : > { %v1598_v63 = vmul.f32 %v9228_v6, %v1481_v2  ;;  %v9636_v0 = vadd.f32 %v2303_v19, %v8669_v32 }
 0x2ed   : > { %v2305_v20 = vpop.f32.mrf.mxu1  ;;  %v1867_v19 = vmax.f32 %v1803_v24, 0.0 }
 0x2ee   : > { %v1662_v27 = vadd.f32 %v1598_v63, %v1273_v15  ;;  %v9644_v23 = vadd.f32 %v2305_v20, %v8678_v54  ;;  %v9655_v20 = vpack.c.bf16 %v8697_v5, %v8692_v47  ;;  %v9664_v47 = vpack.c.bf16 %v8684_v34, %v8681_v57 }
 0x2ef   : > { %v9668_v5 = vpack.c.bf16 %v8859_v22, %v8837_v35 }
 0x2f0   : > { %12591 = vst [vmem:[#allocation57_spill] sm:$0xff] %v9644_v23  ;;  %v1733_v29 = vmul.f32 %v9285_v58, %v1662_v27  ;;  %v816_v52 = vpop.permute.xlu1 %815 }
 0x2f1   : > { %v897_v15 = vmul.f32 %v9213_v26, %v816_v52  ;;  %v821_v52 = vpop.permute.xlu0 %820 }
 0x2f2   : > { %v1804_v2 = vadd.f32 %v9293_v55, %v1733_v29 }
 0x2f4   : > { %v1868_v40 = vmax.f32 %v1804_v2, 0.0 }
 0x2f5   : > { %v1144_v14 = vpop.permute.xlu1 %1143 }
 0x2f6   : > { %v1222_v63 = vmul.f32 %v9219_v4, %v1144_v14  ;;  %v1908_v18 = vpack.c.bf16 %v1868_v40, %v1867_v19  ;;  %v898_v14 = vmul.f32 %v9213_v26, %v821_v52 }
 0x2f8   : > { %v1286_v27 = vadd.f32 %v1222_v63, %v897_v15  ;;  %2288 = vmatmul.mubr.bf16.gmra.mxu0 %v1908_v18 }
 0x2f9   : > { %v1148_v53 = vpop.permute.xlu1 %1147  ;;  %3499 = vmatprep.mubr.bf16.mxu0 %v9655_v20 }
 0x2fa   : > { %v2239_v29 = vpop.f32.mrf.mxu0  ;;  %v1675_v24 = vadd.f32 %v1611_v36, %v1286_v27  ;;  %v1223_v2 = vmul.f32 %v9219_v4, %v1148_v53  ;;  %v831_v53 = vpop.permute.xlu0 %830 }
 0x2fb   : > { %v9671_v59 = vadd.f32 %v2239_v29, %v8669_v32 }
 0x2fc   : > { %v2241_v23 = vpop.f32.mrf.mxu0  ;;  %v1746_v36 = vmul.f32 %v9285_v58, %v1675_v24  ;;  %v1287_v40 = vadd.f32 %v1223_v2, %v898_v14  ;;  %v9695_v14 = vpack.c.bf16 %v8846_v3, %v8826_v8 }
 0x2fd   : > { %v9680_v57 = vadd.f32 %v2241_v23, %v8678_v54 }
 0x2fe   : > { %v1537_v18 = vpop.permute.xlu1 %1536  ;;  %v2243_v19 = vpop.f32.mrf.mxu0  ;;  %v1817_v52 = vadd.f32 %v9293_v55, %v1746_v36 }
 0x2ff   : > { %v1612_v15 = vmul.f32 %v9228_v6, %v1537_v18  ;;  %v9676_v63 = vadd.f32 %v2243_v19, %v8669_v32  ;;  %v12592_v18 = vld [vmem:[#allocation20_spill] sm:$0xff] }
 0x300   : > { %v2245_v27 = vpop.f32.mrf.mxu0  ;;  %3500 = vmatmul.mubr.bf16.vlgmr.msra.gmra.mxu0 %v9664_v47  ;;  %v9699_v19 = vpack.c.bf16 %v12592_v18, %v8878_v39  ;;  %v12593_v39 = vld [vmem:[#allocation18_spill] sm:$0xff] }
 0x301   : > { %v1676_v34 = vadd.f32 %v1612_v15, %v1287_v40  ;;  %v9685_v22 = vadd.f32 %v2245_v27, %v8678_v54  ;;  %3509 = vmatprep.mubr.bf16.mxu0 %v9668_v5  ;;  %v1541_v40 = vpop.permute.xlu0 %1540  ;;  %v1881_v15 = vmax.f32 %v1817_v52, 0.0  ;;  %v12594_v52 = vld [vmem:[#allocation19_spill] sm:$0xff] }
 0x302   : > { %v1613_v8 = vmul.f32 %v9228_v6, %v1541_v40  ;;  %v7861_v6 = vld [vmem:[%s12444_s1] ss:$0 sm:$0xff] }
 0x303   : > { %v1747_v29 = vmul.f32 %v9285_v58, %v1676_v34  ;;  %v826_v2 = vpop.permute.xlu1 %825 }
 0x304   : > { %v899_v24 = vmul.f32 %v9213_v26, %v826_v2  ;;  %v7860_v26 = vld [vmem:[%s12444_s1 + $0x1] ss:$0 sm:$0xff]  ;;  %v12595_v2 = vld [vmem:[#allocation22_spill] sm:$0xff] }
 0x305   : > { %v1818_v23 = vadd.f32 %v9293_v55, %v1747_v29 }
 0x307   : > { %v1882_v27 = vmax.f32 %v1818_v23, 0.0  ;;  %v9709_v23 = vpack.c.bf16 %v12594_v52, %v12593_v39  ;;  %v12598_v39 = vld [vmem:[#allocation23_spill] sm:$0xff] }
 0x308   : > { %v1152_v34 = vpop.permute.xlu1 %1151  ;;  %3510 = vmatmul.mubr.bf16.gmra.mxu0 %v9695_v14 }
 0x309   : > { %v1224_v36 = vmul.f32 %v9219_v4, %v1152_v34  ;;  %3519 = vmatprep.mubr.bf16.mxu0 %v9699_v19  ;;  %v1915_v29 = vpack.c.bf16 %v1882_v27, %v1881_v15  ;;  %v12596_v34 = vld [vmem:[#allocation24_spill] sm:$0xff] }
 0x30a   : > { %v9716_v15 = vpack.c.bf16 %v12596_v34, %v12595_v2  ;;  %v12599_v2 = vld [vmem:[#allocation27_spill] sm:$0xff]  ;;  %v12600_v34 = vld [vmem:[#allocation28_spill] sm:$0xff] }
 0x30b   : > { %v1288_v3 = vadd.f32 %v1224_v36, %v899_v24  ;;  %2358 = vmatmul.mubr.bf16.gmra.mxu1 %v1915_v29  ;;  %v900_v24 = vmul.f32 %v7861_v6, %v831_v53  ;;  %v9735_v6 = vpack.c.bf16 %v12600_v34, %v12599_v2  ;;  %v7715_v34 = vld [vmem:[%s12449_s6 + $0xc4] ss:$16 sps:$4 sm:$0xff]  }
 0x30c   : > { %v1156_v35 = vpop.permute.xlu1 %1155  ;;  %2367 = vmatprep.mubr.bf16.mxu1 %v12558_v50 }
 0x30d   : > { %v1677_v18 = vadd.f32 %v1613_v8, %v1288_v3  ;;  %v1225_v4 = vmul.f32 %v7860_v26, %v1156_v35  ;;  %v7862_v35 = vld [vmem:[%s12444_s1 + $0x2] ss:$0 sm:$0xff]  ;;  %v12597_v3 = vld [vmem:[#allocation21_spill] sm:$0xff] }
 0x30e   : > { %v9729_v52 = vpack.c.bf16 %v12598_v39, %v12597_v3 }
 0x30f   : > { %v1748_v27 = vmul.f32 %v9285_v58, %v1677_v18  ;;  %v1289_v36 = vadd.f32 %v1225_v4, %v900_v24 }
 0x310   : > { %3520 = vmatmul.mubr.bf16.gmra.mxu0 %v9709_v23 }
 0x311   : > { %v1545_v40 = vpop.permute.xlu1 %1544  ;;  %3529 = vmatprep.mubr.bf16.mxu0 %v9716_v15  ;;  %v1819_v26 = vadd.f32 %v9293_v55, %v1748_v27 }
 0x312   : > { %v1614_v29 = vmul.f32 %v7862_v35, %v1545_v40  ;;  %v2525_v40 = vrot.slane %v9612_v1, 4  ;;  %v2534_v35 = vrot.slane %v9619_v45, 4 }
 0x313   : > { %v1883_v4 = vmax.f32 %v1819_v26, 0.0 }
 0x314   : > { %v1678_v8 = vadd.f32 %v1614_v29, %v1289_v36  ;;  %v12602_v29 = vld [vmem:[#allocation26_spill] sm:$0xff]  ;;  %v2535_v39 = vmax.f32 %v9619_v45, %v2534_v35 }
 0x316   : > { %v1749_v53 = vmul.f32 %v9285_v58, %v1678_v8  ;;  %v12601_v58 = vld [vmem:[#allocation25_spill] sm:$0xff]  ;;  %v9748_v8 = vpack.c.bf16 %v8962_v46, %v8948_v28  ;;  %v12603_v28 = vmax.f32 %v9671_v59, %v9676_v63 }
 0x317   : > { %v9744_v27 = vpack.c.bf16 %v12602_v29, %v12601_v58  ;;  %v9784_v58 = vpack.c.bf16 %v8994_v42, %v8991_v48  ;;  %v7718_v48 = vld [vmem:[%s12449_s6 + $0xa4] ss:$16 sps:$4 sm:$0xff]  }
 0x318   : > { %3530 = vmatmul.mubr.bf16.gmra.mxu0 %v9729_v52  ;;  %v1820_v18 = vadd.f32 %v9293_v55, %v1749_v53  ;;  %v2526_v55 = vmax.f32 %v9612_v1, %v2525_v40 }
 0x319   : > { %3539 = vmatprep.mubr.bf16.mxu0 %v9735_v6 }
 0x31a   : > { %v1884_v24 = vmax.f32 %v1820_v18, 0.0  ;;  %v2527_v2 = vrot.slane %v2526_v55, 2  ;;  %v2536_v18 = vrot.slane %v2535_v39, 2 }
 0x31c   : > { %v1916_v36 = vpack.c.bf16 %v1884_v24, %v1883_v4  ;;  %v12604_v4 = vmax.f32 %v9680_v57, %v9685_v22  ;;  %v2537_v42 = vmax.f32 %v2535_v39, %v2536_v18 }
 0x31e   : > { %2368 = vmatmul.mubr.bf16.gmra.mxu1 %v1916_v36  ;;  %v12605_v36 = vld [vmem:[#allocation29_spill] sm:$0xff] }
 0x31f   : > { %3146 = vmatprep.mubr.bf16.mxu1 %v9655_v20  ;;  %v7710_v20 = vld [vmem:[%s12449_s6 + $0xe0] ss:$16 sps:$4 sm:$0xff]   ;;  %v9780_v35 = vpack.c.bf16 %v8957_v31, %v12605_v36 }
 0x320   : > { %v2249_v3 = vpop.f32.mrf.mxu0  ;;  %3540 = vmatmul.mubr.bf16.gmra.mxu0 %v9744_v27  ;;  %v7713_v31 = vld [vmem:[%s12449_s6 + $0xc0] ss:$16 sps:$4 sm:$0xff]  }
 0x321   : > { %v9755_v53 = vadd.f32 %v2249_v3, %v8669_v32  ;;  %3549 = vmatprep.mubr.bf16.mxu0 %v9748_v8  ;;  %v2528_v3 = vmax.f32 %v2526_v55, %v2527_v2  ;;  %v12607_v36 = vld [vmem:[#allocation33_spill] sm:$0xff] }
 0x322   : > { %v2251_v26 = vpop.f32.mrf.mxu0 }
 0x323   : > { %v2541_v46 = vmax.f32 %v12603_v28, %v9755_v53  ;;  %v9763_v1 = vadd.f32 %v2251_v26, %v8678_v54  ;;  %v2529_v2 = vrot.slane %v2528_v3, 1 }
 0x324   : > { %v2253_v45 = vpop.f32.mrf.mxu0 }
 0x325   : > { %v2550_v24 = vmax.f32 %v12604_v4, %v9763_v1  ;;  %v9776_v40 = vadd.f32 %v2253_v45, %v8669_v32  ;;  %v7721_v45 = vld [vmem:[%s12449_s6 + $0x84] ss:$16 sps:$4 sm:$0xff]   ;;  %v9809_v4 = vpack.c.bf16 %v8982_v7, %v8977_v21 }
 0x326   : > { %v2255_v29 = vpop.f32.mrf.mxu0  ;;  %3147 = vmatmul.mubr.bf16.vlgmr.msra.gmra.mxu1 %v9664_v47  ;;  %v7724_v21 = vld [vmem:[%s12449_s6 + $0x64] ss:$16 sps:$4 sm:$0xff]  }
 0x327   : > { %v2542_v26 = vmax.f32 %v2541_v46, %v9776_v40  ;;  %v9789_v28 = vadd.f32 %v2255_v29, %v8678_v54  ;;  %4340 = vmatpush1.bf16.msra.mxu1 %v7710_v20  ;;  %3156 = vmatprep.mubr.bf16.mxu1 %v9668_v5  ;;  %v7716_v20 = vld [vmem:[%s12449_s6 + $0xa0] ss:$16 sps:$4 sm:$0xff]  }
 0x328   : > { %3550 = vmatmul.mubr.bf16.gmra.mxu0 %v9780_v35  ;;  %4341 = vmatprep.subr.bf16.mxu1 %v7715_v34  ;;  %v2538_v34 = vrot.slane %v2537_v42, 1 }
 0x329   : > { %v2543_v47 = vrot.slane %v2542_v26, 4  ;;  %v2551_v55 = vmax.f32 %v2550_v24, %v9789_v28  ;;  %3559 = vmatprep.mubr.bf16.mxu0 %v9784_v58  ;;  %v12606_v24 = vld [vmem:[#allocation31_spill] sm:$0xff] }
 0x32a   : > { %v9814_v29 = vpack.c.bf16 %v12607_v36, %v12606_v24  ;;  %v2539_v7 = vmax.f32 %v2537_v42, %v2538_v34  ;;  %v12608_v34 = vld [vmem:[#allocation30_spill] sm:$0xff]  ;;  %v9838_v24 = vpack.c.bf16 %v9072_v41, %v9067_v62 }
 0x32b   : > { %v2544_v46 = vmax.f32 %v2542_v26, %v2543_v47  ;;  %v2552_v5 = vrot.slane %v2551_v55, 4  ;;  %4342 = vmatpush1.bf16.msra.mxu1 %v7713_v31  ;;  %v2530_v26 = vmax.f32 %v2528_v3, %v2529_v2  ;;  %v7719_v47 = vld [vmem:[%s12449_s6 + $0x80] ss:$16 sps:$4 sm:$0xff]  }
 0x32c   : > { %4343 = vmatprep.subr.bf16.mxu1 %v7718_v48 }
 0x32d   : > { %v2545_v39 = vrot.slane %v2544_v46, 2  ;;  %v2553_v18 = vmax.f32 %v2551_v55, %v2552_v5  ;;  %v3836_v3 = vpack.c.bf16 %v2530_v26, %v2530_v26  ;;  %v7727_v5 = vld [vmem:[%s12449_s6 + $0x44] ss:$16 sps:$4 sm:$0xff]  }
 0x32e   : > { %3157 = vmatmul.mubr.bf16.gmra.mxu1 %v9695_v14 }
 0x32f   : > { %v2546_v31 = vmax.f32 %v2544_v46, %v2545_v39  ;;  %v2554_v48 = vrot.slane %v2553_v18, 2  ;;  %3166 = vmatprep.mubr.bf16.mxu1 %v9699_v19  ;;  %4344 = vmatpush1.bf16.msra.mxu1 %v7716_v20  ;;  %v7722_v46 = vld [vmem:[%s12449_s6 + $0x60] ss:$16 sps:$4 sm:$0xff]   ;;  %v3837_v20 = vpack.c.bf16 %v2539_v7, %v2539_v7  ;;  %v12609_v39 = vld [vmem:[#allocation32_spill] sm:$0xff]  ;;  %v3964_v36 = vunpack.c.l.b16 %v3836_v3  ;;  %v7733_v7 = vld [vmem:[%s12449_s6 + $0x4] ss:$16 sps:$4 sm:$0xff]  }
 0x330   : > { %3560 = vmatmul.mubr.bf16.gmra.mxu0 %v9809_v4  ;;  %4345 = vmatprep.subr.bf16.mxu1 %v7721_v45 }
 0x331   : > { %v2547_v14 = vrot.slane %v2546_v31, 1  ;;  %v2555_v55 = vmax.f32 %v2553_v18, %v2554_v48  ;;  %3569 = vmatprep.mubr.bf16.mxu0 %v9814_v29  ;;  %v9833_v18 = vpack.c.bf16 %v12609_v39, %v12608_v34  ;;  %v7725_v48 = vld [vmem:[%s12449_s6 + $0x40] ss:$16 sps:$4 sm:$0xff]  }
 0x333   : > { %v2548_v2 = vmax.f32 %v2546_v31, %v2547_v14  ;;  %v2556_v19 = vrot.slane %v2555_v55, 1  ;;  %4346 = vmatpush1.bf16.msra.mxu1 %v7719_v47  ;;  %v3965_v47 = vunpack.c.l.b16 %v3837_v20  ;;  %v2682_v14 = vpack.c.bf16 %v9060_v16, %v9054_v25  ;;  %v7734_v25 = vld [vmem:[%s12449_s6 + $0x1e0] ss:$16 sps:$4 sm:$0xff]   ;;  %v7739_v16 = vld [vmem:[%s12449_s6 + $0x1c4] ss:$16 sps:$4 sm:$0xff]  }
 0x334   : > { %4347 = vmatprep.subr.bf16.mxu1 %v7724_v21  ;;  %v7728_v21 = vld [vmem:[%s12449_s6 + $0x20] ss:$16 sps:$4 sm:$0xff]  }
 0x335   : > { %v3838_v45 = vpack.c.bf16 %v2548_v2, %v2548_v2  ;;  %v2557_v42 = vmax.f32 %v2555_v55, %v2556_v19  ;;  %v12610_v55 = vld [vmem:[#allocation36_spill] sm:$0xff]  ;;  %v7731_v2 = vld [vmem:[%s12449_s6] ss:$16 sps:$4 sm:$0xff]   ;;  %v7736_v19 = vld [vmem:[%s12449_s6 + $0x1e4] ss:$16 sps:$4 sm:$0xff]  }
 0x336   : > { %3167 = vmatmul.mubr.bf16.gmra.mxu1 %v9709_v23  ;;  %v7730_v23 = vld [vmem:[%s12449_s6 + $0x24] ss:$16 sps:$4 sm:$0xff]   ;;  %v2685_v3 = vpack.c.bf16 %v12610_v55, %v9100_v13  ;;  %v12611_v13 = vld [vmem:[#allocation34_spill] sm:$0xff]  ;;  %v7740_v55 = vld [vmem:[%s12449_s6 + $0x1a0] ss:$16 sps:$4 sm:$0xff]  }
 0x337   : > { %v3966_v26 = vunpack.c.l.b16 %v3838_v45  ;;  %v3839_v31 = vpack.c.bf16 %v2557_v42, %v2557_v42  ;;  %3176 = vmatprep.mubr.bf16.mxu1 %v9716_v15  ;;  %4348 = vmatpush1.bf16.msra.mxu1 %v7722_v46  ;;  %v7737_v45 = vld [vmem:[%s12449_s6 + $0x1c0] ss:$16 sps:$4 sm:$0xff]  }
 0x338   : > { %3570 = vmatmul.mubr.bf16.gmra.mxu0 %v9833_v18  ;;  %4349 = vmatprep.subr.bf16.mxu1 %v7727_v5  ;;  %v12613_v5 = vld [vmem:[#allocation39_spill] sm:$0xff] }
 0x339   : > { %v9849_v62 = vsel %vm3980_vm0, %v3966_v26, %v3964_v36  ;;  %v3967_v41 = vunpack.c.l.b16 %v3839_v31  ;;  %3579 = vmatprep.mubr.bf16.mxu0 %v9838_v24  ;;  %v2687_v20 = vpack.c.bf16 %v12613_v5, %v9179_v38  ;;  %v12614_v31 = vld [vmem:[#allocation37_spill] sm:$0xff] }
 0x33b   : > { %v9853_v15 = vsel %vm3980_vm0, %v3967_v41, %v3965_v47  ;;  %4350 = vmatpush1.bf16.msra.mxu1 %v7725_v48  ;;  %v12615_v48 = vld [vmem:[#allocation38_spill] sm:$0xff]  ;;  %v12616_v47 = vld [vmem:[#allocation41_spill] sm:$0xff]  ;;  %v12617_v41 = vld [vmem:[#allocation43_spill] sm:$0xff] }
 0x33c   : > { %4351 = vmatprep.subr.bf16.mxu1 %v7730_v23  ;;  %v2686_v23 = vpack.c.bf16 %v12615_v48, %v12614_v31 }
 0x33e   : > { %3177 = vmatmul.mubr.bf16.gmra.mxu1 %v9729_v52  ;;  %v12612_v52 = vld [vmem:[#allocation35_spill] sm:$0xff] }
 0x33f   : > { %3186 = vmatprep.mubr.bf16.mxu1 %v9735_v6  ;;  %4352 = vmatpush1.bf16.msra.mxu1 %v7728_v21  ;;  %v2684_v6 = vpack.c.bf16 %v12612_v52, %v12611_v13  ;;  %v2689_v21 = vpack.c.bf16 %v12617_v41, %v12616_v47  ;;  %v2691_v13 = vpack.c.bf16 %v9377_v11, %v9372_v33  ;;  %v12620_v33 = vld [vmem:[#allocation44_spill] sm:$0xff]  ;;  %v12621_v11 = vld [vmem:[#allocation45_spill] sm:$0xff] }
 0x340   : > { %3580 = vmatmul.mubr.bf16.gmra.mxu0 %v2682_v14  ;;  %4353 = vmatprep.subr.bf16.mxu1 %v7733_v7  ;;  %v9930_v52 = vpack.c.bf16 %v9359_v60, %v9348_v30  ;;  %v12623_v30 = vld [vmem:[#allocation49_spill] sm:$0xff] }
 0x341   : > { %3589 = vmatprep.mubr.bf16.mxu0 %v2685_v3 }
 0x343   : > { %4354 = vmatpush1.bf16.msra.mxu1 %v7731_v2  ;;  %v7742_v2 = vld [vmem:[%s12449_s6 + $0x1a4] ss:$16 sps:$4 sm:$0xff]  }
 0x344   : > { %4355 = vmatprep.subr.bf16.mxu1 %v7736_v19  ;;  %v12618_v19 = vld [vmem:[#allocation40_spill] sm:$0xff] }
 0x346   : > { %v2259_v46 = vpop.f32.mrf.mxu0  ;;  %3187 = vmatmul.mubr.bf16.gmra.mxu1 %v9744_v27 }
 0x347   : > { %3196 = vmatprep.mubr.bf16.mxu1 %v9748_v8  ;;  %4356 = vmatpush2.bf16.msra.mxu1 %v7734_v25  ;;  %v9889_v39 = vadd.f32 %v2259_v46, %v8669_v32  ;;  %v12619_v25 = vld [vmem:[#allocation42_spill] sm:$0xff]  ;;  %v9935_v46 = vpack.c.bf16 %v9450_v37, %v9432_v9 }
 0x348   : > { %v2261_v42 = vpop.f32.mrf.mxu0  ;;  %3590 = vmatmul.mubr.bf16.gmra.mxu0 %v2684_v6  ;;  %4357 = vmatprep.subr.bf16.mxu1 %v7739_v16  ;;  %v2688_v16 = vpack.c.bf16 %v12619_v25, %v12618_v19 }
 0x349   : > { %3599 = vmatprep.mubr.bf16.mxu0 %v2687_v20  ;;  %v9895_v8 = vadd.f32 %v2261_v42, %v8678_v54  ;;  %v12627_v42 = vld [vmem:[#allocation53_spill] sm:$0xff] }
 0x34a   : > { %v2263_v34 = vpop.f32.mrf.mxu0 }
 0x34b   : > { %v9892_v27 = vadd.f32 %v2263_v34, %v8669_v32  ;;  %4358 = vmatpush2.bf16.msra.mxu1 %v7737_v45 }
 0x34c   : > { %v2265_v38 = vpop.f32.mrf.mxu0  ;;  %4359 = vmatprep.subr.bf16.mxu1 %v7742_v2 }
 0x34d   : > { %v2558_v36 = vmax.f32 %v9889_v39, %v9892_v27  ;;  %v9900_v26 = vadd.f32 %v2265_v38, %v8678_v54 }
 0x34e   : > { %3197 = vmatmul.mubr.bf16.gmra.mxu1 %v9780_v35  ;;  %v7743_v35 = vld [vmem:[%s12449_s6 + $0x180] ss:$16 sps:$4 sm:$0xff]  }
 0x34f   : > { %v2567_v7 = vmax.f32 %v9895_v8, %v9900_v26  ;;  %3206 = vmatprep.mubr.bf16.mxu1 %v9784_v58  ;;  %4360 = vmatpush2.bf16.msra.mxu1 %v7740_v55  ;;  %v7745_v58 = vld [vmem:[%s12449_s6 + $0x184] ss:$16 sps:$4 sm:$0xff]  }
 0x350   : > { %3600 = vmatmul.mubr.bf16.gmra.mxu0 %v2686_v23  ;;  %4361 = vmatprep.subr.bf16.mxu1 %v7745_v58 }
 0x351   : > { %3609 = vmatprep.mubr.bf16.mxu0 %v2689_v21 }
 0x353   : > { %4362 = vmatpush2.bf16.msra.mxu1 %v7743_v35  ;;  %v12629_v35 = vld [vmem:[#allocation52_spill] sm:$0xff] }
 0x356   : > { %3207 = vmatmul.mubr.bf16.gmra.mxu1 %v9809_v4  ;;  %v9942_v4 = vpack.c.bf16 %v12621_v11, %v12620_v33  ;;  %v7746_v33 = vld [vmem:[%s12449_s6 + $0x160] ss:$16 sps:$4 sm:$0xff]   ;;  %v7748_v11 = vld [vmem:[%s12449_s6 + $0x164] ss:$16 sps:$4 sm:$0xff]  }
 0x357   : > { %3216 = vmatprep.mubr.bf16.mxu1 %v9814_v29  ;;  %v12622_v29 = vld [vmem:[#allocation48_spill] sm:$0xff]  ;;  %4363 = vmatprep.subr.bf16.mxu1 %v7748_v11 }
 0x358   : > { %3610 = vmatmul.mubr.bf16.gmra.mxu0 %v2688_v16  ;;  %v9946_v60 = vpack.c.bf16 %v12623_v30, %v12622_v29  ;;  %4364 = vmatpush2.bf16.msra.mxu1 %v7746_v33 }
 0x359   : > { %3619 = vmatprep.mubr.bf16.mxu0 %v2691_v13 }
 0x35e   : > { %3217 = vmatmul.mubr.bf16.gmra.mxu1 %v9833_v18  ;;  %v12624_v18 = vld [vmem:[#allocation46_spill] sm:$0xff] }
 0x35f   : > { %3226 = vmatprep.mubr.bf16.mxu1 %v9838_v24  ;;  %v12625_v24 = vld [vmem:[#allocation47_spill] sm:$0xff] }
 0x360   : > { %3620 = vmatmul.mubr.bf16.gmra.mxu0 %v9930_v52  ;;  %v9955_v5 = vpack.c.bf16 %v12625_v24, %v12624_v18  ;;  %v10000_v24 = vpack.c.bf16 %v9568_v12, %v9564_v10  ;;  %v7752_v10 = vld [vmem:[%s12449_s6 + $0x120] ss:$16 sps:$4 sm:$0xff]   ;;  %v7754_v12 = vld [vmem:[%s12449_s6 + $0x124] ss:$16 sps:$4 sm:$0xff]  }
 0x361   : > { %3629 = vmatprep.mubr.bf16.mxu0 %v9935_v46 }
 0x366   : > { %3227 = vmatmul.mubr.bf16.gmra.mxu1 %v2682_v14  ;;  %v12626_v14 = vld [vmem:[#allocation51_spill] sm:$0xff] }
 0x367   : > { %3236 = vmatprep.mubr.bf16.mxu1 %v2685_v3  ;;  %v9959_v34 = vpack.c.bf16 %v12627_v42, %v12626_v14 }
 0x368   : > { %3630 = vmatmul.mubr.bf16.gmra.mxu0 %v9942_v4 }
 0x369   : > { %3639 = vmatprep.mubr.bf16.mxu0 %v9946_v60 }
 0x36c   : > { %v2269_v9 = vpop.f32.mrf.mxu0 }
 0x36d   : > { %v9951_v37 = vadd.f32 %v2269_v9, %v8669_v32 }
 0x36e   : > { %v2271_v45 = vpop.f32.mrf.mxu0  ;;  %3237 = vmatmul.mubr.bf16.gmra.mxu1 %v2684_v6 }
 0x36f   : > { %v2559_v3 = vmax.f32 %v2558_v36, %v9951_v37  ;;  %v9963_v38 = vadd.f32 %v2271_v45, %v8678_v54  ;;  %3246 = vmatprep.mubr.bf16.mxu1 %v2687_v20  ;;  %v12628_v20 = vld [vmem:[#allocation50_spill] sm:$0xff]  ;;  %v10004_v45 = vpack.c.bf16 %v9615_v51, %v9603_v43 }
 0x370   : > { %v2273_v31 = vpop.f32.mrf.mxu0  ;;  %3640 = vmatmul.mubr.bf16.gmra.mxu0 %v9955_v5  ;;  %v9978_v58 = vpack.c.bf16 %v12629_v35, %v12628_v20 }
 0x371   : > { %v2568_v48 = vmax.f32 %v2567_v7, %v9963_v38  ;;  %v9968_v47 = vadd.f32 %v2273_v31, %v8669_v32  ;;  %3649 = vmatprep.mubr.bf16.mxu0 %v9959_v34  ;;  %v9982_v7 = vpack.c.bf16 %v9580_v49, %v9577_v44  ;;  %v7751_v44 = vld [vmem:[%s12449_s6 + $0x144] ss:$16 sps:$4 sm:$0xff]  }
 0x372   : > { %v2275_v6 = vpop.f32.mrf.mxu0  ;;  %4365 = vmatprep.subr.bf16.mxu1 %v7751_v44 }
 0x373   : > { %v2560_v41 = vmax.f32 %v2559_v3, %v9968_v47  ;;  %v9973_v55 = vadd.f32 %v2275_v6, %v8678_v54 }
 0x375   : > { %v2561_v36 = vrot.slane %v2560_v41, 4  ;;  %v2569_v2 = vmax.f32 %v2568_v48, %v9973_v55 }
 0x376   : > { %3247 = vmatmul.mubr.bf16.gmra.mxu1 %v2686_v23 }
 0x377   : > { %v2562_v19 = vmax.f32 %v2560_v41, %v2561_v36  ;;  %v2570_v25 = vrot.slane %v2569_v2, 4  ;;  %3256 = vmatprep.mubr.bf16.mxu1 %v2689_v21  ;;  %v7749_v21 = vld [vmem:[%s12449_s6 + $0x140] ss:$16 sps:$4 sm:$0xff]   ;;  %v10025_v41 = vpack.c.bf16 %v9685_v22, %v9680_v57  ;;  %v10041_v57 = vpack.c.bf16 %v9789_v28, %v9763_v1 }
 0x378   : > { %3650 = vmatmul.mubr.bf16.gmra.mxu0 %v9978_v58  ;;  %4366 = vmatpush2.bf16.msra.mxu1 %v7749_v21  ;;  %v10054_v1 = vpack.c.bf16 %v9776_v40, %v9755_v53 }
 0x379   : > { %v2563_v29 = vrot.slane %v2562_v19, 2  ;;  %v2571_v30 = vmax.f32 %v2569_v2, %v2570_v25  ;;  %3659 = vmatprep.mubr.bf16.mxu0 %v9982_v7  ;;  %4367 = vmatprep.subr.bf16.mxu1 %v7754_v12  ;;  %v10074_v25 = vpack.c.bf16 %v9892_v27, %v9889_v39  ;;  %v7760_v39 = vld [vmem:[%s12449_s6 + $0xec] ss:$16 sps:$4 sm:$0xff]  }
 0x37b   : > { %v2564_v49 = vmax.f32 %v2562_v19, %v2563_v29  ;;  %v2572_v23 = vrot.slane %v2571_v30, 2 }
 0x37c   : > { %4368 = vmatpush2.bf16.msra.mxu1 %v7752_v10 }
 0x37d   : > { %v2565_v9 = vrot.slane %v2564_v49, 1  ;;  %v2573_v18 = vmax.f32 %v2571_v30, %v2572_v23 }
 0x37e   : > { %3257 = vmatmul.mubr.bf16.gmra.mxu1 %v2688_v16  ;;  %v12630_v16 = vld [vmem:[#allocation56_spill] sm:$0xff] }
 0x37f   : > { %v2566_v14 = vmax.f32 %v2564_v49, %v2565_v9  ;;  %v2574_v42 = vrot.slane %v2573_v18, 1  ;;  %3266 = vmatprep.mubr.bf16.mxu1 %v2691_v13  ;;  %v10020_v13 = vpack.c.bf16 %v12630_v16, %v9599_v17  ;;  %v2309_v17 = vpop.f32.mrf.mxu1  ;;  %v12632_v49 = vld [vmem:[#allocation57_spill] sm:$0xff] }
 0x380   : > { %3660 = vmatmul.mubr.bf16.gmra.mxu0 %v10000_v24  ;;  %v10092_v27 = vadd.f32 %v2309_v17, %v8669_v32  ;;  %v12633_v23 = vmax.f32 %v9639_v61, %v12632_v49 }
 0x381   : > { %v3840_v3 = vpack.c.bf16 %v2566_v14, %v2566_v14  ;;  %v2575_v31 = vmax.f32 %v2573_v18, %v2574_v42  ;;  %3669 = vmatprep.mubr.bf16.mxu0 %v10004_v45 }
 0x383   : > { %v3968_v48 = vunpack.c.l.b16 %v3840_v3  ;;  %v3841_v6 = vpack.c.bf16 %v2575_v31, %v2575_v31 }
 0x385   : > { %v10016_v43 = vsel %vm3982_vm1, %v3968_v48, %v9849_v62  ;;  %v3969_v51 = vunpack.c.l.b16 %v3841_v6  ;;  %v10036_v62 = vpack.c.bf16 %v9676_v63, %v9671_v59  ;;  %v7755_v59 = vld [vmem:[%s12449_s6 + $0x100] ss:$16 sps:$4 sm:$0xff]   ;;  %v7757_v63 = vld [vmem:[%s12449_s6 + $0x104] ss:$16 sps:$4 sm:$0xff]  }
 0x386   : > { %3267 = vmatmul.mubr.bf16.gmra.mxu1 %v9930_v52  ;;  %v2311_v52 = vpop.f32.mrf.mxu1  ;;  %4369 = vmatprep.subr.bf16.mxu1 %v7757_v63 }
 0x387   : > { %v10029_v36 = vsel %vm3982_vm1, %v3969_v51, %v9853_v15  ;;  %3276 = vmatprep.mubr.bf16.mxu1 %v9935_v46  ;;  %4370 = vmatpush2.bf16.msra.mxu1 %v7755_v59 }
 0x388   : > { %3670 = vmatmul.mubr.bf16.gmra.mxu0 %v10020_v13  ;;  %v2313_v22 = vpop.f32.mrf.mxu1  ;;  %4382 = vmatprep.subr.bf16.mxu1 %v7760_v39 }
 0x389   : > { %3679 = vmatprep.mubr.bf16.mxu0 %v10025_v41  ;;  %v10108_v29 = vadd.f32 %v2313_v22, %v8669_v32 }
 0x38e   : > { %3277 = vmatmul.mubr.bf16.gmra.mxu1 %v9942_v4  ;;  %v2315_v4 = vpop.f32.mrf.mxu1 }
 0x38f   : > { %3286 = vmatprep.mubr.bf16.mxu1 %v9946_v60  ;;  %v10059_v60 = vpack.c.bf16 %v9900_v26, %v9895_v8  ;;  %v10117_v30 = vadd.f32 %v2315_v4, %v8678_v54 }
 0x390   : > { %3680 = vmatmul.mubr.bf16.gmra.mxu0 %v10036_v62  ;;  %v10064_v35 = vpop.f32.mrf.mxu1 }
 0x391   : > { %3689 = vmatprep.mubr.bf16.mxu0 %v10041_v57 }
 0x392   : > { %v2279_v15 = vpop.f32.mrf.mxu0  ;;  %v10070_v26 = vpop.f32.mrf.mxu1 }
 0x393   : > { %v2280_v2 = vadd.f32 %v2279_v15, %v8669_v32 }
 0x394   : > { %v2281_v46 = vpop.f32.mrf.mxu0  ;;  %v10082_v33 = vpop.f32.mrf.mxu1 }
 0x395   : > { %v2282_v53 = vadd.f32 %v2281_v46, %v8678_v54 }
 0x396   : > { %v2283_v28 = vpop.f32.mrf.mxu0  ;;  %3287 = vmatmul.mubr.bf16.gmra.mxu1 %v9955_v5  ;;  %v10086_v11 = vpop.f32.mrf.mxu1 }
 0x397   : > { %v2284_v20 = vadd.f32 %v2283_v28, %v8669_v32  ;;  %3296 = vmatprep.mubr.bf16.mxu1 %v9959_v34  ;;  %v10079_v34 = vpack.c.bf16 %v9973_v55, %v9963_v38  ;;  %v10098_v38 = vpack.c.bf16 %v9968_v47, %v9951_v37  ;;  %v12631_v37 = vmax.f32 %v9631_v56, %v9636_v0 }
 0x398   : > { %v2285_v19 = vpop.f32.mrf.mxu0  ;;  %3690 = vmatmul.mubr.bf16.gmra.mxu0 %v10054_v1 }
 0x399   : > { %v2576_v40 = vmax.f32 %v2280_v2, %v2284_v20  ;;  %v2286_v5 = vadd.f32 %v2285_v19, %v8678_v54  ;;  %3699 = vmatprep.mubr.bf16.mxu0 %v10059_v60  ;;  %v2595_v47 = vmax.f32 %v12631_v37, %v10092_v27 }
 0x39b   : > { %v2585_v8 = vmax.f32 %v2282_v53, %v2286_v5  ;;  %v10101_v55 = vpack.c.bf16 %v2286_v5, %v2282_v53  ;;  %v2596_v9 = vmax.f32 %v2595_v47, %v10108_v29 }
 0x39d   : > { %v2597_v14 = vrot.slane %v2596_v9, 4 }
 0x39e   : > { %3297 = vmatmul.mubr.bf16.gmra.mxu1 %v9978_v58  ;;  %v10094_v58 = vpop.f32.mrf.mxu1 }
 0x39f   : > { %3306 = vmatprep.mubr.bf16.mxu1 %v9982_v7  ;;  %v10105_v7 = vadd.f32 %v2311_v52, %v8678_v54  ;;  %v2598_v31 = vmax.f32 %v2596_v9, %v2597_v14 }
 0x3a0   : > { %3700 = vmatmul.mubr.bf16.gmra.mxu0 %v10074_v25  ;;  %v10119_v44 = vpop.f32.mrf.mxu1 }
 0x3a1   : > { %3709 = vmatprep.mubr.bf16.mxu0 %v10079_v34  ;;  %v2604_v21 = vmax.f32 %v12633_v23, %v10105_v7  ;;  %v2599_v10 = vrot.slane %v2598_v31, 2 }
 0x3a3   : > { %v2605_v18 = vmax.f32 %v2604_v21, %v10117_v30  ;;  %v2600_v22 = vmax.f32 %v2598_v31, %v2599_v10 }
 0x3a5   : > { %v2606_v42 = vrot.slane %v2605_v18, 4 }
 0x3a6   : > { %3307 = vmatmul.mubr.bf16.gmra.mxu1 %v10000_v24  ;;  %v10127_v24 = vpop.f32.mrf.mxu1 }
 0x3a7   : > { %3316 = vmatprep.mubr.bf16.mxu1 %v10004_v45  ;;  %v10129_v45 = vpack.c.bf16 %v2284_v20, %v2280_v2  ;;  %v2607_v6 = vmax.f32 %v2605_v18, %v2606_v42  ;;  %v7779_v2 = vld [vmem:[#allocation5 + $0xb8] sm:$0xff]   ;;  %v2601_v20 = vrot.slane %v2600_v22, 1 }
 0x3a8   : > { %3710 = vmatmul.mubr.bf16.gmra.mxu0 %v10098_v38  ;;  %v10134_v3 = vpop.f32.mrf.mxu1 }
 0x3a9   : > { %3719 = vmatprep.mubr.bf16.mxu0 %v10101_v55  ;;  %6638 = vmatpush1.bf16.msra.mxu0 %v7779_v2  ;;  %v2602_v23 = vmax.f32 %v2600_v22, %v2601_v20  ;;  %v7792_v2 = vld [vmem:[#allocation5 + $0xb0] sm:$0xff]  }
 0x3aa   : > { %v10136_v48 = vpop.f32.mrf.mxu1  ;;  %6639 = vmatprep.subr.bf16.mxu0 %v12558_v50 }
 0x3ac   : > { %v10140_v12 = vpop.f32.mrf.mxu1 }
 0x3ad   : > { %6640 = vmatpush1.bf16.msra.mxu0 %v7792_v2 }
 0x3ae   : > { %3317 = vmatmul.mubr.bf16.gmra.mxu1 %v10020_v13  ;;  %v2608_v13 = vrot.slane %v2607_v6, 2  ;;  %v2343_v15 = vpop.f32.mrf.mxu1  ;;  %6641 = vmatprep.subr.bf16.mxu0 %v12558_v50 }
 0x3af   : > { %3326 = vmatprep.mubr.bf16.mxu1 %v10025_v41 }
 0x3b0   : > { %3720 = vmatmul.mubr.bf16.gmra.mxu0 %v10129_v45  ;;  %v2345_v19 = vpop.f32.mrf.mxu1 }
 0x3b2   : > { %v2349_v39 = vpop.f32.mrf.mxu1 }
 0x3b4   : > { %v2351_v14 = vpop.f32.mrf.mxu1 }
 0x3b6   : > { %3327 = vmatmul.mubr.bf16.gmra.mxu1 %v10036_v62  ;;  %v2609_v62 = vmax.f32 %v2607_v6, %v2608_v13  ;;  %v2326_v6 = vadd.f32 %v10086_v11, %v8678_v54  ;;  %v10180_v13 = vpack.c.bf16 %v10117_v30, %v10105_v7  ;;  %v10184_v11 = vadd.f32 %v10064_v35, %v8669_v32 }
 0x3b7   : > { %3336 = vmatprep.mubr.bf16.mxu1 %v10041_v57 }
 0x3b8   : > { %v2289_v51 = vpop.f32.mrf.mxu0 }
 0x3b9   : > { %v2290_v16 = vadd.f32 %v2289_v51, %v8669_v32  ;;  %v10172_v51 = vpack.c.bf16 %v9636_v0, %v9631_v56  ;;  %v2353_v56 = vpop.f32.mrf.mxu1  ;;  %v10190_v0 = vadd.f32 %v10094_v58, %v8669_v32  ;;  %v10206_v58 = vadd.f32 %v10127_v24, %v8669_v32 }
 0x3ba   : > { %v2291_v41 = vpop.f32.mrf.mxu0 }
 0x3bb   : > { %v2577_v17 = vmax.f32 %v2576_v40, %v2290_v16  ;;  %v2292_v52 = vadd.f32 %v2291_v41, %v8678_v54  ;;  %v2322_v41 = vadd.f32 %v10070_v26, %v8678_v54  ;;  %v2355_v24 = vpop.f32.mrf.mxu1 }
 0x3bc   : > { %v2293_v46 = vpop.f32.mrf.mxu0 }
 0x3bd   : > { %v2586_v59 = vmax.f32 %v2585_v8, %v2292_v52  ;;  %v2294_v63 = vadd.f32 %v2293_v46, %v8669_v32  ;;  %v2610_v8 = vrot.slane %v2609_v62, 1  ;;  %v2621_v35 = vmax.f32 %v2322_v41, %v2326_v6 }
 0x3be   : > { %v2295_v4 = vpop.f32.mrf.mxu0  ;;  %3337 = vmatmul.mubr.bf16.gmra.mxu1 %v10054_v1  ;;  %v10155_v1 = vpack.c.bf16 %v12632_v49, %v9639_v61  ;;  %v3844_v61 = vpack.c.bf16 %v2602_v23, %v2602_v23  ;;  %v10164_v49 = vadd.f32 %v10082_v33, %v8669_v32  ;;  %v10246_v23 = vadd.f32 %v2355_v24, %v8678_v54 }
 0x3bf   : > { %v2578_v57 = vmax.f32 %v2577_v17, %v2294_v63  ;;  %v2296_v28 = vadd.f32 %v2295_v4, %v8678_v54  ;;  %3346 = vmatprep.mubr.bf16.mxu1 %v10059_v60  ;;  %v10150_v37 = vpack.c.bf16 %v2294_v63, %v2290_v16  ;;  %v2611_v18 = vmax.f32 %v2609_v62, %v2610_v8 }
 0x3c0   : > { %v10168_v10 = vpop.f32.mrf.mxu0  ;;  %v3972_v30 = vunpack.c.l.b16 %v3844_v61  ;;  %v2612_v17 = vmax.f32 %v10184_v11, %v10164_v49  ;;  %v10216_v63 = vadd.f32 %v2345_v19, %v8678_v54  ;;  %v10219_v62 = vadd.f32 %v2349_v39, %v8669_v32 }
 0x3c1   : > { %v2579_v53 = vrot.slane %v2578_v57, 4  ;;  %v2587_v40 = vmax.f32 %v2586_v59, %v2296_v28  ;;  %v10148_v5 = vpack.c.bf16 %v2296_v28, %v2292_v52  ;;  %v3845_v33 = vpack.c.bf16 %v2611_v18, %v2611_v18 }
 0x3c2   : > { %v10199_v52 = vadd.f32 %v2343_v15, %v8669_v32  ;;  %v10201_v26 = vpop.f32.mrf.mxu0  ;;  %v10213_v15 = vadd.f32 %v10136_v48, %v8669_v32  ;;  %v10227_v48 = vadd.f32 %v10140_v12, %v8678_v54  ;;  %v10232_v19 = vadd.f32 %v2351_v14, %v8678_v54 }
 0x3c3   : > { %v2580_v47 = vmax.f32 %v2578_v57, %v2579_v53  ;;  %v2588_v60 = vrot.slane %v2587_v40, 4  ;;  %3729 = vmatprep.mubr.bf16.mxu0 %v10148_v5  ;;  %v3973_v59 = vunpack.c.l.b16 %v3845_v33 }
 0x3c4   : > { %3730 = vmatmul.mubr.bf16.gmra.mxu0 %v10150_v37  ;;  %v2630_v20 = vmax.f32 %v10213_v15, %v10199_v52  ;;  %v10237_v53 = vpop.f32.mrf.mxu0 }
 0x3c5   : > { %v2581_v21 = vrot.slane %v2580_v47, 2  ;;  %v2589_v9 = vmax.f32 %v2587_v40, %v2588_v60  ;;  %3739 = vmatprep.mubr.bf16.mxu0 %v10155_v1 }
 0x3c6   : > { %3347 = vmatmul.mubr.bf16.gmra.mxu1 %v10074_v25  ;;  %v10176_v25 = vpack.c.bf16 %v10108_v29, %v10092_v27  ;;  %v10194_v27 = vadd.f32 %v10119_v44, %v8678_v54  ;;  %v2336_v44 = vadd.f32 %v10134_v3, %v8678_v54  ;;  %v2613_v3 = vmax.f32 %v2612_v17, %v10190_v0 }
 0x3c7   : > { %v2582_v42 = vmax.f32 %v2580_v47, %v2581_v21  ;;  %v2590_v31 = vrot.slane %v2589_v9, 2  ;;  %3356 = vmatprep.mubr.bf16.mxu1 %v10079_v34  ;;  %v2639_v47 = vmax.f32 %v10227_v48, %v10216_v63  ;;  %v2631_v60 = vmax.f32 %v2630_v20, %v10219_v62 }
 0x3c8   : > { %v2622_v4 = vmax.f32 %v2621_v35, %v10194_v27  ;;  %v2614_v8 = vmax.f32 %v2613_v3, %v10206_v58  ;;  %v10275_v17 = vpack.c.bf16 %v2336_v44, %v10194_v27  ;;  %v7805_v3 = vld [vmem:[#allocation5 + $0xa8] sm:$0xff]  }
 0x3c9   : > { %v2583_v16 = vrot.slane %v2582_v42, 1  ;;  %v2591_v34 = vmax.f32 %v2589_v9, %v2590_v31  ;;  %v10252_v9 = vpack.c.bf16 %v2326_v6, %v2322_v41  ;;  %v2640_v18 = vmax.f32 %v2639_v47, %v10232_v19  ;;  %6642 = vmatpush1.bf16.msra.mxu0 %v7805_v3 }
 0x3ca   : > { %6643 = vmatprep.subr.bf16.mxu0 %v12558_v50 }
 0x3cb   : > { %v2584_v29 = vmax.f32 %v2582_v42, %v2583_v16  ;;  %v2592_v7 = vrot.slane %v2591_v34, 1  ;;  %v2359_v40 = vpop.f32.mrf.mxu1  ;;  %v10258_v42 = vpop.f32.mrf.mxu0  ;;  %v2615_v16 = vrot.slane %v2614_v8, 4 }
 0x3cc   : > { %3740 = vmatmul.mubr.bf16.gmra.mxu0 %v10172_v51  ;;  %v10286_v27 = vadd.f32 %v2359_v40, %v8669_v32 }
 0x3cd   : > { %v3842_v22 = vpack.c.bf16 %v2584_v29, %v2584_v29  ;;  %v2593_v46 = vmax.f32 %v2591_v34, %v2592_v7  ;;  %3749 = vmatprep.mubr.bf16.mxu0 %v10180_v13  ;;  %v2361_v31 = vpop.f32.mrf.mxu1  ;;  %v2641_v34 = vmax.f32 %v2640_v18, %v10246_v23  ;;  %v10268_v33 = vpop.f32.mrf.mxu0  ;;  %v10272_v29 = vpack.c.bf16 %v10164_v49, %v10184_v11 }
 0x3ce   : > { %3357 = vmatmul.mubr.bf16.gmra.mxu1 %v10098_v38  ;;  %v10235_v38 = vadd.f32 %v2353_v56, %v8669_v32  ;;  %v2616_v56 = vmax.f32 %v2614_v8, %v2615_v16  ;;  %v10298_v20 = vadd.f32 %v2361_v31, %v8678_v54  ;;  %v10307_v8 = vpack.c.bf16 %v10206_v58, %v10190_v0 }
 0x3cf   : > { %v3970_v57 = vunpack.c.l.b16 %v3842_v22  ;;  %v3843_v28 = vpack.c.bf16 %v2593_v46, %v2593_v46  ;;  %3366 = vmatprep.mubr.bf16.mxu1 %v10101_v55  ;;  %v2623_v55 = vmax.f32 %v2622_v4, %v2336_v44  ;;  %v2363_v41 = vpop.f32.mrf.mxu1  ;;  %v10277_v22 = vpop.f32.mrf.mxu0 }
 0x3d0   : > { %v2632_v14 = vmax.f32 %v2631_v60, %v10235_v38  ;;  %v10281_v46 = vadd.f32 %v2363_v41, %v8669_v32 }
 0x3d1   : > { %v4003_v39 = vsel %vm3984_vm2, %v3970_v57, %v10016_v43  ;;  %v3971_v12 = vunpack.c.l.b16 %v3843_v28  ;;  %v2624_v6 = vrot.slane %v2623_v55, 4  ;;  %v10295_v57 = vpop.f32.mrf.mxu0 }
 0x3d2   : > { %v10249_v21 = vsel %vm3986_vm3, %v3972_v30, %v4003_v39  ;;  %v2642_v30 = vrot.slane %v2641_v34, 4 }
 0x3d3   : > { %v4010_v43 = vsel %vm3984_vm2, %v3971_v12, %v10029_v36  ;;  %v2633_v36 = vrot.slane %v2632_v14, 4  ;;  %v2625_v7 = vmax.f32 %v2623_v55, %v2624_v6  ;;  %v10312_v12 = vpack.c.bf16 %v10216_v63, %v10227_v48  ;;  %v10320_v0 = vpop.f32.mrf.mxu0 }
 0x3d4   : > { %3750 = vmatmul.mubr.bf16.gmra.mxu0 %v10176_v25  ;;  %v10262_v61 = vsel %vm3986_vm3, %v3973_v59, %v4010_v43  ;;  %v2643_v49 = vmax.f32 %v2641_v34, %v2642_v30 }
 0x3d5   : > { %3759 = vmatprep.mubr.bf16.mxu0 %v10252_v9  ;;  %v2634_v35 = vmax.f32 %v2632_v14, %v2633_v36  ;;  %v2626_v59 = vrot.slane %v2625_v7, 2 }
 0x3d6   : > { %3367 = vmatmul.mubr.bf16.gmra.mxu1 %v10129_v45  ;;  %v2365_v45 = vpop.f32.mrf.mxu1  ;;  %v2644_v55 = vrot.slane %v2643_v49, 2 }
 0x3d7   : > { %3376 = vmatprep.mubr.bf16.mxu1 %v10148_v5  ;;  %v2617_v5 = vrot.slane %v2616_v56, 2  ;;  %v10289_v44 = vadd.f32 %v2365_v45, %v8678_v54  ;;  %v2635_v4 = vrot.slane %v2634_v35, 2 }
 0x3d8   : > { %v2645_v6 = vmax.f32 %v2643_v49, %v2644_v55  ;;  %v10346_v49 = vpack.c.bf16 %v10246_v23, %v10232_v19  ;;  %v7809_v19 = vld [vmem:[#allocation5 + $0xa0] sm:$0xff]  }
 0x3d9   : > { %v2618_v2 = vmax.f32 %v2616_v56, %v2617_v5  ;;  %v2657_v47 = vmax.f32 %v10298_v20, %v10289_v44  ;;  %v2636_v18 = vmax.f32 %v2634_v35, %v2635_v4  ;;  %v10334_v56 = vpop.f32.mrf.mxu0  ;;  %v10340_v5 = vpack.c.bf16 %v10199_v52, %v10213_v15  ;;  %6644 = vmatpush1.bf16.msra.mxu0 %v7809_v19 }
 0x3da   : > { %6645 = vmatprep.subr.bf16.mxu0 %v12558_v50 }
 0x3db   : > { %v2619_v14 = vrot.slane %v2618_v2, 1  ;;  %v2637_v41 = vrot.slane %v2636_v18, 1  ;;  %v10348_v4 = vpop.f32.mrf.mxu0 }
 0x3dc   : > { %3760 = vmatmul.mubr.bf16.gmra.mxu0 %v10272_v29 }
 0x3dd   : > { %3769 = vmatprep.mubr.bf16.mxu0 %v10275_v17  ;;  %v2638_v3 = vmax.f32 %v2636_v18, %v2637_v41 }
 0x3de   : > { %v2369_v11 = vpop.f32.mrf.mxu1  ;;  %3377 = vmatmul.mubr.bf16.gmra.mxu1 %v10150_v37  ;;  %v2648_v37 = vmax.f32 %v10286_v27, %v10281_v46 }
 0x3df   : > { %v10292_v24 = vadd.f32 %v2369_v11, %v8669_v32  ;;  %3386 = vmatprep.mubr.bf16.mxu1 %v10155_v1  ;;  %v2627_v1 = vmax.f32 %v2625_v7, %v2626_v59  ;;  %v2646_v59 = vrot.slane %v2645_v6, 1 }
 0x3e0   : > { %v2371_v28 = vpop.f32.mrf.mxu1 }
 0x3e1   : > { %v10303_v40 = vadd.f32 %v2371_v28, %v8678_v54  ;;  %v2649_v60 = vmax.f32 %v2648_v37, %v10292_v24  ;;  %v2628_v16 = vrot.slane %v2627_v1, 1 }
 0x3e2   : > { %v2373_v39 = vpop.f32.mrf.mxu1 }
 0x3e3   : > { %v10318_v43 = vadd.f32 %v2373_v39, %v8669_v32  ;;  %v2658_v31 = vmax.f32 %v2657_v47, %v10303_v40  ;;  %v2629_v45 = vmax.f32 %v2627_v1, %v2628_v16  ;;  %v2647_v1 = vmax.f32 %v2645_v6, %v2646_v59 }
 0x3e4   : > { %v2375_v58 = vpop.f32.mrf.mxu1  ;;  %3770 = vmatmul.mubr.bf16.gmra.mxu0 %v10307_v8  ;;  %v3848_v47 = vpack.c.bf16 %v2638_v3, %v2638_v3  ;;  %v12635_v3 = vld [vmem:[#allocation54_spill] sm:$0xff] }
 0x3e5   : > { %v2650_v63 = vmax.f32 %v2649_v60, %v10318_v43  ;;  %v10326_v48 = vadd.f32 %v2375_v58, %v8678_v54  ;;  %3779 = vmatprep.mubr.bf16.mxu0 %v10312_v12  ;;  %v2620_v54 = vmax.f32 %v2618_v2, %v2619_v14  ;;  %v3847_v15 = vpack.c.bf16 %v2629_v45, %v2629_v45  ;;  %v10358_v60 = vpop.f32.mrf.mxu0 }
 0x3e6   : > { %v10329_v32 = vpop.f32.mrf.mxu1  ;;  %3387 = vmatmul.mubr.bf16.gmra.mxu1 %v10172_v51  ;;  %v3849_v16 = vpack.c.bf16 %v2647_v1, %v2647_v1  ;;  %v12636_v1 = vld [vmem:[#allocation55_spill] sm:$0xff] }
 0x3e7   : > { %v2651_v34 = vrot.slane %v2650_v63, 4  ;;  %v2659_v36 = vmax.f32 %v2658_v31, %v10326_v48  ;;  %3396 = vmatprep.mubr.bf16.mxu1 %v10180_v13  ;;  %v3846_v2 = vpack.c.bf16 %v2620_v54, %v2620_v54  ;;  %v3976_v54 = vunpack.c.l.b16 %v3848_v47 }
 0x3e8   : > { %v10336_v7 = vpop.f32.mrf.mxu1  ;;  %v3977_v59 = vunpack.c.l.b16 %v3849_v16 }
 0x3e9   : > { %v2652_v30 = vmax.f32 %v2650_v63, %v2651_v34  ;;  %v2660_v35 = vrot.slane %v2659_v36, 4  ;;  %v3974_v58 = vunpack.c.l.b16 %v3846_v2  ;;  %v3975_v63 = vunpack.c.l.b16 %v3847_v15 }
 0x3ea   : > { %v10342_v51 = vpop.f32.mrf.mxu1  ;;  %v2726_v15 = vpack.c.bf16 %v10281_v46, %v10286_v27 }
 0x3eb   : > { %v2653_v13 = vrot.slane %v2652_v30, 2  ;;  %v2661_v11 = vmax.f32 %v2659_v36, %v2660_v35  ;;  %v4005_v36 = vsel %vm3988_vm4, %v3974_v58, %v10249_v21  ;;  %v7810_v58 = vld [vmem:[#allocation5 + $0x98] sm:$0xff]  }
 0x3ec   : > { %v10350_v28 = vpop.f32.mrf.mxu1  ;;  %3780 = vmatmul.mubr.bf16.gmra.mxu0 %v10340_v5 }
 0x3ed   : > { %v2654_v37 = vmax.f32 %v2652_v30, %v2653_v13  ;;  %v2662_v52 = vrot.slane %v2661_v11, 2  ;;  %3789 = vmatprep.mubr.bf16.mxu0 %v10346_v49  ;;  %v10371_v30 = vpop.f32.mrf.mxu0  ;;  %6646 = vmatpush1.bf16.msra.mxu0 %v7810_v58 }
 0x3ee   : > { %v10354_v55 = vpop.f32.mrf.mxu1  ;;  %3397 = vmatmul.mubr.bf16.gmra.mxu1 %v10176_v25  ;;  %v2724_v25 = vpack.c.bf16 %v10235_v38, %v10219_v62  ;;  %v4012_v38 = vsel %vm3988_vm4, %v3975_v63, %v10262_v61  ;;  %6647 = vmatprep.subr.bf16.mxu0 %v12558_v50 }
 0x3ef   : > { %v2655_v23 = vrot.slane %v2654_v37, 1  ;;  %v2663_v39 = vmax.f32 %v2661_v11, %v2662_v52  ;;  %3406 = vmatprep.mubr.bf16.mxu1 %v10252_v9  ;;  %v2727_v9 = vpack.c.bf16 %v10289_v44, %v10298_v20  ;;  %v4006_v44 = vsel %vm3990_vm5, %v3976_v54, %v4005_v36  ;;  %v10383_v11 = vpop.f32.mrf.mxu0 }
 0x3f0   : > { %v10360_v18 = vpop.f32.mrf.mxu1  ;;  %12634 = vst [vmem:[#allocation20_spill] sm:$0xff] %v10383_v11  ;;  %v4013_v61 = vsel %vm3990_vm5, %v3977_v59, %v4012_v38  ;;  %v7758_v59 = vld [vmem:[%s12449_s6 + $0xe8] ss:$16 sps:$4 sm:$0xff]  }
 0x3f1   : > { %v2656_v14 = vmax.f32 %v2654_v37, %v2655_v23  ;;  %v2664_v31 = vrot.slane %v2663_v39, 1  ;;  %v10399_v23 = vpop.f32.mrf.mxu0 }
 0x3f2   : > { %v10365_v6 = vpop.f32.mrf.mxu1 }
 0x3f3   : > { %v3850_v34 = vpack.c.bf16 %v2656_v14, %v2656_v14  ;;  %v2665_v41 = vmax.f32 %v2663_v39, %v2664_v31  ;;  %v10407_v46 = vpop.f32.mrf.mxu0 }
 0x3f4   : > { %v10373_v35 = vpop.f32.mrf.mxu1  ;;  %3790 = vmatmul.mubr.bf16.gmra.mxu0 %v2724_v25  ;;  %12637 = vst [vmem:[#allocation18_spill] sm:$0xff] %v10407_v46 }
 0x3f5   : > { %v3978_v45 = vunpack.c.l.b16 %v3850_v34  ;;  %3799 = vmatprep.mubr.bf16.mxu0 %v2727_v9  ;;  %v3851_v62 = vpack.c.bf16 %v2665_v41, %v2665_v41  ;;  %v10416_v14 = vpop.f32.mrf.mxu0 }
 0x3f6   : > { %v10378_v20 = vpop.f32.mrf.mxu1  ;;  %3407 = vmatmul.mubr.bf16.gmra.mxu1 %v10272_v29 }
 0x3f7   : > { %v4007_v21 = vsel %vm3992_vm6, %v3978_v45, %v4006_v44  ;;  %3416 = vmatprep.mubr.bf16.mxu1 %v10275_v17  ;;  %v3979_v13 = vunpack.c.l.b16 %v3851_v62  ;;  %v2729_v17 = vpack.c.bf16 %v10326_v48, %v10303_v40  ;;  %v2728_v40 = vpack.c.bf16 %v10318_v43, %v10292_v24  ;;  %v7811_v43 = vld [vmem:[#allocation5 + $0x90] sm:$0xff]   ;;  %v7812_v45 = vld [vmem:[#allocation5 + $0x88] sm:$0xff]  }
 0x3f8   : > { %v10386_v2 = vpack.c.b16 %v4007_v21, %v12635_v3  ;;  %v10388_v37 = vpop.f32.mrf.mxu1  ;;  %6648 = vmatpush1.bf16.msra.mxu0 %v7811_v43  ;;  %v7763_v21 = vld [vmem:[%s12449_s6 + $0xcc] ss:$16 sps:$4 sm:$0xff]   ;;  %v7761_v3 = vld [vmem:[%s12449_s6 + $0xc8] ss:$16 sps:$4 sm:$0xff]  }
 0x3f9   : > { %v4014_v52 = vsel %vm3992_vm6, %v3979_v13, %v4013_v61  ;;  %6649 = vmatprep.subr.bf16.mxu0 %v12558_v50  ;;  %v7767_v43 = vld [vmem:[%s12449_s6 + $0x88] ss:$16 sps:$4 sm:$0xff]  }
 0x3fa   : > { %v10394_v29 = vpop.f32.mrf.mxu1  ;;  %v4016_v19 = vpack.c.b16 %v4014_v52, %v12636_v1  ;;  %v7766_v52 = vld [vmem:[%s12449_s6 + $0xac] ss:$16 sps:$4 sm:$0xff]   ;;  %v7764_v1 = vld [vmem:[%s12449_s6 + $0xa8] ss:$16 sps:$4 sm:$0xff]  }
 0x3fc   : > { %v10401_v39 = vpop.f32.mrf.mxu1  ;;  %3800 = vmatmul.mubr.bf16.gmra.mxu0 %v2726_v15 }
 0x3fd   : > { %3809 = vmatprep.mubr.bf16.mxu0 %v2729_v17  ;;  %6650 = vmatpush1.bf16.msra.mxu0 %v7812_v45 }
 0x3fe   : > { %v10403_v47 = vpop.f32.mrf.mxu1  ;;  %3417 = vmatmul.mubr.bf16.gmra.mxu1 %v10307_v8  ;;  %6651 = vmatprep.subr.bf16.mxu0 %v12558_v50 }
 0x3ff   : > { %3426 = vmatprep.mubr.bf16.mxu1 %v10312_v12 }
 0x400   : > { %v10409_v27 = vpop.f32.mrf.mxu1 }
 0x402   : > { %v10414_v48 = vpop.f32.mrf.mxu1 }
 0x403   : > { %12638 = vst [vmem:[#allocation19_spill] sm:$0xff] %v10414_v48 }
 0x404   : > { %v10418_v31 = vpop.f32.mrf.mxu1  ;;  %3810 = vmatmul.mubr.bf16.gmra.mxu0 %v2728_v40 }
 0x406   : > { %v10420_v8 = vpop.f32.mrf.mxu1  ;;  %3427 = vmatmul.mubr.bf16.gmra.mxu1 %v10340_v5 }
 0x407   : > { %12639 = vst [vmem:[#allocation22_spill] sm:$0xff] %v10420_v8  ;;  %3436 = vmatprep.mubr.bf16.mxu1 %v10346_v49 }
 0x408   : > { %v10424_v12 = vpop.f32.mrf.mxu1 }
 0x409   : > { %12640 = vst [vmem:[#allocation24_spill] sm:$0xff] %v10424_v12 }
 0x40a   : > { %v10426_v63 = vpop.f32.mrf.mxu1 }
 0x40b   : > { %12641 = vst [vmem:[#allocation21_spill] sm:$0xff] %v10426_v63  ;;  %v12811_v63 = vld [vmem:[#allocation16_spill] sm:$0xff] }
 0x40c   : > { %v10428_v16 = vpop.f32.mrf.mxu1 }
 0x40d   : > { %12642 = vst [vmem:[#allocation23_spill] sm:$0xff] %v10428_v16 }
 0x40e   : > { %v10430_v24 = vpop.f32.mrf.mxu1  ;;  %3437 = vmatmul.mubr.bf16.gmra.mxu1 %v2724_v25 }
 0x40f   : > { %12643 = vst [vmem:[#allocation27_spill] sm:$0xff] %v10430_v24  ;;  %3446 = vmatprep.mubr.bf16.mxu1 %v2727_v9 }
 0x410   : > { %v10432_v34 = vpop.f32.mrf.mxu1 }
 0x411   : > { %12644 = vst [vmem:[#allocation28_spill] sm:$0xff] %v10432_v34 }
 0x412   : > { %v10435_v36 = vpop.f32.mrf.mxu1 }
 0x413   : > { %12645 = vst [vmem:[#allocation25_spill] sm:$0xff] %v10435_v36  ;;  %v12809_v36 = vld [vmem:[#allocation17_spill] sm:$0xff] }
 0x414   : > { %v10437_v5 = vpop.f32.mrf.mxu1 }
 0x415   : > { %12646 = vst [vmem:[#allocation26_spill] sm:$0xff] %v10437_v5 }
 0x416   : > { %v10439_v49 = vpop.f32.mrf.mxu1  ;;  %3447 = vmatmul.mubr.bf16.gmra.mxu1 %v2726_v15 }
 0x417   : > { %12647 = vst [vmem:[#allocation29_spill] sm:$0xff] %v10439_v49  ;;  %3456 = vmatprep.mubr.bf16.mxu1 %v2729_v17 }
 0x418   : > { %v10441_v41 = vpop.f32.mrf.mxu1 }
 0x419   : > { %12648 = vst [vmem:[#allocation31_spill] sm:$0xff] %v10441_v41 }
 0x41a   : > { %v10443_v54 = vpop.f32.mrf.mxu1 }
 0x41b   : > { %12649 = vst [vmem:[#allocation33_spill] sm:$0xff] %v10443_v54 }
 0x41c   : > { %v10445_v25 = vpop.f32.mrf.mxu1 }
 0x41d   : > { %12650 = vst [vmem:[#allocation30_spill] sm:$0xff] %v10445_v25 }
 0x41e   : > { %v10447_v9 = vpop.f32.mrf.mxu1  ;;  %3457 = vmatmul.mubr.bf16.gmra.mxu1 %v2728_v40  ;;  %v7813_v40 = vld [vmem:[#allocation5 + $0x80] sm:$0xff]  }
 0x41f   : > { %12651 = vst [vmem:[#allocation32_spill] sm:$0xff] %v10447_v9  ;;  %4371 = vmatprep.mubr.bf16.mxu1 %v4016_v19  ;;  %6652 = vmatpush1.bf16.msra.mxu0 %v7813_v40  ;;  %v7773_v40 = vld [vmem:[%s12449_s6 + $0x48] ss:$16 sps:$4 sm:$0xff]  }
 0x420   : > { %v10449_v62 = vpop.f32.mrf.mxu1  ;;  %6653 = vmatprep.subr.bf16.mxu0 %v12558_v50 }
 0x421   : > { %12652 = vst [vmem:[#allocation36_spill] sm:$0xff] %v10449_v62 }
 0x422   : > { %v10452_v38 = vpop.f32.mrf.mxu1 }
 0x423   : > { %12653 = vst [vmem:[#allocation34_spill] sm:$0xff] %v10452_v38 }
 0x424   : > { %v10457_v44 = vpop.f32.mrf.mxu1 }
 0x425   : > { %12654 = vst [vmem:[#allocation35_spill] sm:$0xff] %v10457_v44  ;;  %v7817_v44 = vld [vmem:[#allocation5 + $0xe0] sm:$0xff]  }
 0x426   : > { %v10462_v13 = vpop.f32.mrf.mxu1  ;;  %4372 = vmatmul.mubr.bf16.vlgmr.msra.gmra.mxu1 %v10386_v2 }
 0x427   : > { %12655 = vst [vmem:[#allocation39_spill] sm:$0xff] %v10462_v13  ;;  %4383 = vmatpush1.bf16.msra.mxu1 %v7758_v59  ;;  %4414 = vmatprep.mubr.bf16.mxu1 %v4016_v19  ;;  %v7769_v19 = vld [vmem:[%s12449_s6 + $0x8c] ss:$16 sps:$4 sm:$0xff]  }
 0x428   : > { %v10468_v61 = vpop.f32.mrf.mxu1  ;;  %4384 = vmatprep.subr.bf16.mxu1 %v7763_v21  ;;  %v7772_v59 = vld [vmem:[%s12449_s6 + $0x6c] ss:$16 sps:$4 sm:$0xff]  }
 0x429   : > { %12656 = vst [vmem:[#allocation37_spill] sm:$0xff] %v10468_v61  ;;  %v7816_v61 = vld [vmem:[#allocation5 + $0xe8] sm:$0xff]  }
 0x42a   : > { %v10473_v15 = vpop.f32.mrf.mxu1 }
 0x42b   : > { %12657 = vst [vmem:[#allocation38_spill] sm:$0xff] %v10473_v15  ;;  %4385 = vmatpush1.bf16.msra.mxu1 %v7761_v3  ;;  %v7770_v3 = vld [vmem:[%s12449_s6 + $0x68] ss:$16 sps:$4 sm:$0xff]  }
 0x42c   : > { %v10478_v17 = vpop.f32.mrf.mxu1  ;;  %4386 = vmatprep.subr.bf16.mxu1 %v7766_v52 }
 0x42d   : > { %12658 = vst [vmem:[#allocation41_spill] sm:$0xff] %v10478_v17 }
 0x42e   : > { %v10483_v58 = vpop.f32.mrf.mxu1 }
 0x42f   : > { %12659 = vst [vmem:[#allocation43_spill] sm:$0xff] %v10483_v58  ;;  %4387 = vmatpush1.bf16.msra.mxu1 %v7764_v1  ;;  %v7775_v1 = vld [vmem:[%s12449_s6 + $0x4c] ss:$16 sps:$4 sm:$0xff]  }
 0x430   : > { %v10488_v45 = vpop.f32.mrf.mxu1  ;;  %4388 = vmatprep.subr.bf16.mxu1 %v7769_v19 }
 0x431   : > { %12660 = vst [vmem:[#allocation40_spill] sm:$0xff] %v10488_v45  ;;  %v7815_v45 = vld [vmem:[#allocation5 + $0xf0] sm:$0xff]  }
 0x432   : > { %v10494_v21 = vpop.f32.mrf.mxu1 }
 0x433   : > { %12661 = vst [vmem:[#allocation42_spill] sm:$0xff] %v10494_v21  ;;  %4389 = vmatpush1.bf16.msra.mxu1 %v7767_v43  ;;  %v7778_v43 = vld [vmem:[%s12449_s6 + $0x2c] ss:$16 sps:$4 sm:$0xff]  }
 0x434   : > { %v10499_v52 = vpop.f32.mrf.mxu1  ;;  %4390 = vmatprep.subr.bf16.mxu1 %v7772_v59  ;;  %v7776_v59 = vld [vmem:[%s12449_s6 + $0x28] ss:$16 sps:$4 sm:$0xff]  }
 0x435   : > { %12662 = vst [vmem:[#allocation44_spill] sm:$0xff] %v10499_v52 }
 0x436   : > { %v10504_v19 = vpop.f32.mrf.mxu1 }
 0x437   : > { %12663 = vst [vmem:[#allocation45_spill] sm:$0xff] %v10504_v19  ;;  %4391 = vmatpush1.bf16.msra.mxu1 %v7770_v3  ;;  %v7782_v3 = vld [vmem:[%s12449_s6 + $0xc] ss:$16 sps:$4 sm:$0xff]  }
 0x438   : > { %v10509_v21 = vpop.f32.mrf.mxu1  ;;  %4392 = vmatprep.subr.bf16.mxu1 %v7775_v1  ;;  %v7814_v1 = vld [vmem:[#allocation5 + $0xf8] sm:$0xff]  }
 0x439   : > { %12664 = vst [vmem:[#allocation48_spill] sm:$0xff] %v10509_v21  ;;  %6654 = vmatpush2.bf16.msra.mxu0 %v7814_v1  ;;  %v7786_v1 = vld [vmem:[%s12449_s6 + $0x1c8] ss:$16 sps:$4 sm:$0xff]  }
 0x43a   : > { %v10514_v58 = vpop.f32.mrf.mxu1  ;;  %6655 = vmatprep.subr.bf16.mxu0 %v12558_v50 }
 0x43b   : > { %12665 = vst [vmem:[#allocation49_spill] sm:$0xff] %v10514_v58  ;;  %4393 = vmatpush1.bf16.msra.mxu1 %v7773_v40  ;;  %v7780_v58 = vld [vmem:[%s12449_s6 + $0x8] ss:$16 sps:$4 sm:$0xff]  }
 0x43c   : > { %v10519_v19 = vpop.f32.mrf.mxu1  ;;  %4394 = vmatprep.subr.bf16.mxu1 %v7778_v43 }
 0x43d   : > { %12666 = vst [vmem:[#allocation46_spill] sm:$0xff] %v10519_v19  ;;  %v7785_v19 = vld [vmem:[%s12449_s6 + $0x1ec] ss:$16 sps:$4 sm:$0xff]   ;;  %6656 = vmatpush2.bf16.msra.mxu0 %v7815_v45  ;;  %v7799_v45 = vld [vmem:[%s12449_s6 + $0x148] ss:$16 sps:$4 sm:$0xff]  }
 0x43e   : > { %v10524_v21 = vpop.f32.mrf.mxu1  ;;  %6657 = vmatprep.subr.bf16.mxu0 %v12558_v50 }
 0x43f   : > { %12667 = vst [vmem:[#allocation47_spill] sm:$0xff] %v10524_v21  ;;  %4395 = vmatpush1.bf16.msra.mxu1 %v7776_v59  ;;  %v7783_v59 = vld [vmem:[%s12449_s6 + $0x1e8] ss:$16 sps:$4 sm:$0xff]  }
 0x440   : > { %v10529_v40 = vpop.f32.mrf.mxu1  ;;  %4396 = vmatprep.subr.bf16.mxu1 %v7782_v3  ;;  %v7788_v3 = vld [vmem:[%s12449_s6 + $0x1cc] ss:$16 sps:$4 sm:$0xff]  }
 0x441   : > { %12668 = vst [vmem:[#allocation51_spill] sm:$0xff] %v10529_v40  ;;  %6658 = vmatpush2.bf16.msra.mxu0 %v7816_v61 }
 0x442   : > { %v10535_v43 = vpop.f32.mrf.mxu1  ;;  %6659 = vmatprep.subr.bf16.mxu0 %v12558_v50 }
 0x443   : > { %12669 = vst [vmem:[#allocation53_spill] sm:$0xff] %v10535_v43  ;;  %4397 = vmatpush1.bf16.msra.mxu1 %v7780_v58  ;;  %v10550_v43 = vpop.f32.mrf.mxu0 }
 0x444   : > { %v10540_v21 = vpop.f32.mrf.mxu1  ;;  %4398 = vmatprep.subr.bf16.mxu1 %v7785_v19  ;;  %12672 = vst [vmem:[#allocation56_spill] sm:$0xff] %v10550_v43  ;;  %v7791_v19 = vld [vmem:[%s12449_s6 + $0x1ac] ss:$16 sps:$4 sm:$0xff]  }
 0x445   : > { %12670 = vst [vmem:[#allocation50_spill] sm:$0xff] %v10540_v21  ;;  %6660 = vmatpush2.bf16.msra.mxu0 %v7817_v44 }
 0x446   : > { %v10545_v40 = vpop.f32.mrf.mxu1  ;;  %6661 = vmatprep.subr.bf16.mxu0 %v12558_v50 }
 0x447   : > { %12671 = vst [vmem:[#allocation52_spill] sm:$0xff] %v10545_v40  ;;  %4399 = vmatpush2.bf16.msra.mxu1 %v7783_v59  ;;  %v7789_v59 = vld [vmem:[%s12449_s6 + $0x1a8] ss:$16 sps:$4 sm:$0xff]   ;;  %v10562_v40 = vpop.f32.mrf.mxu0 }
 0x448   : > { %v10552_v58 = vpop.f32.mrf.mxu1  ;;  %4400 = vmatprep.subr.bf16.mxu1 %v7788_v3  ;;  %12675 = vst [vmem:[#allocation55_spill] sm:$0xff] %v10562_v40  ;;  %v7795_v3 = vld [vmem:[%s12449_s6 + $0x18c] ss:$16 sps:$4 sm:$0xff]  }
 0x449   : > { %12673 = vst [vmem:[#allocation57_spill] sm:$0xff] %v10552_v58 }
 0x44a   : > { %v10557_v21 = vpop.f32.mrf.mxu1 }
 0x44b   : > { %12674 = vst [vmem:[#allocation54_spill] sm:$0xff] %v10557_v21  ;;  %4401 = vmatpush2.bf16.msra.mxu1 %v7786_v1  ;;  %v7793_v1 = vld [vmem:[%s12449_s6 + $0x188] ss:$16 sps:$4 sm:$0xff]   ;;  %v10574_v21 = vpop.f32.mrf.mxu0 }
 0x44c   : > { %v10564_v52 = vpop.f32.mrf.mxu1  ;;  %4402 = vmatprep.subr.bf16.mxu1 %v7791_v19  ;;  %12678 = vst [vmem:[#allocation60_spill] sm:$0xff] %v10574_v21  ;;  %v7798_v19 = vld [vmem:[%s12449_s6 + $0x16c] ss:$16 sps:$4 sm:$0xff]  }
 0x44d   : > { %12676 = vst [vmem:[#allocation58_spill] sm:$0xff] %v10564_v52 }
 0x44e   : > { %v10569_v58 = vpop.f32.mrf.mxu1 }
 0x44f   : > { %12677 = vst [vmem:[#allocation59_spill] sm:$0xff] %v10569_v58  ;;  %4403 = vmatpush2.bf16.msra.mxu1 %v7789_v59  ;;  %v7796_v59 = vld [vmem:[%s12449_s6 + $0x168] ss:$16 sps:$4 sm:$0xff]   ;;  %v10587_v58 = vpop.f32.mrf.mxu0 }
 0x450   : > { %v10576_v15 = vpop.f32.mrf.mxu1  ;;  %4404 = vmatprep.subr.bf16.mxu1 %v7795_v3  ;;  %12681 = vst [vmem:[#allocation63_spill] sm:$0xff] %v10587_v58  ;;  %v7801_v3 = vld [vmem:[%s12449_s6 + $0x14c] ss:$16 sps:$4 sm:$0xff]  }
 0x451   : > { %12679 = vst [vmem:[#allocation61_spill] sm:$0xff] %v10576_v15 }
 0x452   : > { %v10582_v52 = vpop.f32.mrf.mxu1 }
 0x453   : > { %12680 = vst [vmem:[#allocation62_spill] sm:$0xff] %v10582_v52  ;;  %4405 = vmatpush2.bf16.msra.mxu1 %v7793_v1  ;;  %v10599_v1 = vpop.f32.mrf.mxu0 }
 0x454   : > { %v10589_v13 = vpop.f32.mrf.mxu1  ;;  %4406 = vmatprep.subr.bf16.mxu1 %v7798_v19  ;;  %12684 = vst [vmem:[#allocation66_spill] sm:$0xff] %v10599_v1  ;;  %v7804_v19 = vld [vmem:[%s12449_s6 + $0x12c] ss:$16 sps:$4 sm:$0xff]  }
 0x455   : > { %12682 = vst [vmem:[#allocation64_spill] sm:$0xff] %v10589_v13 }
 0x456   : > { %v10594_v15 = vpop.f32.mrf.mxu1 }
 0x457   : > { %12683 = vst [vmem:[#allocation65_spill] sm:$0xff] %v10594_v15  ;;  %4407 = vmatpush2.bf16.msra.mxu1 %v7796_v59  ;;  %v7802_v59 = vld [vmem:[%s12449_s6 + $0x128] ss:$16 sps:$4 sm:$0xff]   ;;  %v10611_v15 = vpop.f32.mrf.mxu0 }
 0x458   : > { %v10601_v52 = vpop.f32.mrf.mxu1  ;;  %4408 = vmatprep.subr.bf16.mxu1 %v7801_v3  ;;  %12687 = vst [vmem:[#allocation69_spill] sm:$0xff] %v10611_v15  ;;  %v7808_v3 = vld [vmem:[%s12449_s6 + $0x10c] ss:$16 sps:$4 sm:$0xff]  }
 0x459   : > { %12685 = vst [vmem:[#allocation67_spill] sm:$0xff] %v10601_v52 }
 0x45a   : > { %v10606_v13 = vpop.f32.mrf.mxu1 }
 0x45b   : > { %12686 = vst [vmem:[#allocation68_spill] sm:$0xff] %v10606_v13  ;;  %4409 = vmatpush2.bf16.msra.mxu1 %v7799_v45  ;;  %v7806_v45 = vld [vmem:[%s12449_s6 + $0x108] ss:$16 sps:$4 sm:$0xff]   ;;  %v10623_v13 = vpop.f32.mrf.mxu0 }
 0x45c   : > { %v10613_v17 = vpop.f32.mrf.mxu1  ;;  %4410 = vmatprep.subr.bf16.mxu1 %v7804_v19  ;;  %12690 = vst [vmem:[#allocation72_spill] sm:$0xff] %v10623_v13 }
 0x45d   : > { %12688 = vst [vmem:[#allocation70_spill] sm:$0xff] %v10613_v17  ;;  %v10630_v17 = vpop.f32.mrf.mxu0 }
 0x45e   : > { %v10618_v52 = vpop.f32.mrf.mxu1  ;;  %12693 = vst [vmem:[#allocation75_spill] sm:$0xff] %v10630_v17 }
 0x45f   : > { %12689 = vst [vmem:[#allocation71_spill] sm:$0xff] %v10618_v52  ;;  %4411 = vmatpush2.bf16.msra.mxu1 %v7802_v59  ;;  %v10638_v9 = vpop.f32.mrf.mxu0 }
 0x460   : > { %v10625_v38 = vpop.f32.mrf.mxu1  ;;  %4412 = vmatprep.subr.bf16.mxu1 %v7808_v3  ;;  %12696 = vst [vmem:[#allocation78_spill] sm:$0xff] %v10638_v9 }
 0x461   : > { %12691 = vst [vmem:[#allocation73_spill] sm:$0xff] %v10625_v38  ;;  %v10644_v3 = vpop.f32.mrf.mxu0 }
 0x462   : > { %v10628_v19 = vpop.f32.mrf.mxu1  ;;  %12699 = vst [vmem:[#allocation81_spill] sm:$0xff] %v10644_v3 }
 0x463   : > { %12692 = vst [vmem:[#allocation74_spill] sm:$0xff] %v10628_v19  ;;  %4413 = vmatpush2.bf16.msra.mxu1 %v7806_v45  ;;  %v10650_v62 = vpop.f32.mrf.mxu0 }
 0x464   : > { %v10632_v52 = vpop.f32.mrf.mxu1  ;;  %6348 = vmatprep.subr.bf16.mxu1 %v12558_v50  ;;  %12702 = vst [vmem:[#allocation84_spill] sm:$0xff] %v10650_v62 }
 0x465   : > { %12694 = vst [vmem:[#allocation76_spill] sm:$0xff] %v10632_v52  ;;  %v7818_v52 = vld [vmem:[#allocation5 + $0x38] sm:$0xff]  }
 0x466   : > { %4415 = vmatmul.mubr.bf16.vlgmr.msra.gmra.mxu1 %v10386_v2  ;;  %v10636_v59 = vpop.f32.mrf.mxu1  ;;  %v7819_v2 = vld [vmem:[#allocation5 + $0xd8] sm:$0xff]  }
 0x467   : > { %12695 = vst [vmem:[#allocation77_spill] sm:$0xff] %v10636_v59  ;;  %6349 = vmatpush1.bf16.msra.mxu1 %v7818_v52  ;;  %v7820_v59 = vld [vmem:[#allocation5 + $0x30] sm:$0xff]   ;;  %6662 = vmatpush2.bf16.msra.mxu0 %v7819_v2 }
 0x468   : > { %v10640_v38 = vpop.f32.mrf.mxu1  ;;  %6350 = vmatprep.subr.bf16.mxu1 %v12558_v50  ;;  %6663 = vmatprep.subr.bf16.mxu0 %v12558_v50 }
 0x469   : > { %12697 = vst [vmem:[#allocation79_spill] sm:$0xff] %v10640_v38  ;;  %v7824_v38 = vld [vmem:[#allocation5 + $0xd0] sm:$0xff]  }
 0x46a   : > { %v10642_v61 = vpop.f32.mrf.mxu1 }
 0x46b   : > { %12698 = vst [vmem:[#allocation80_spill] sm:$0xff] %v10642_v61  ;;  %v10658_v61 = vpop.f32.mrf.mxu0  ;;  %6351 = vmatpush1.bf16.msra.mxu1 %v7820_v59  ;;  %6664 = vmatpush2.bf16.msra.mxu0 %v7824_v38 }
 0x46c   : > { %v10646_v19 = vpop.f32.mrf.mxu1  ;;  %12705 = vst [vmem:[#allocation87_spill] sm:$0xff] %v10658_v61  ;;  %6352 = vmatprep.subr.bf16.mxu1 %v12558_v50  ;;  %6665 = vmatprep.subr.bf16.mxu0 %v12558_v50 }
 0x46d   : > { %12700 = vst [vmem:[#allocation82_spill] sm:$0xff] %v10646_v19  ;;  %v10666_v44 = vpop.f32.mrf.mxu0 }
 0x46e   : > { %v10648_v45 = vpop.f32.mrf.mxu1  ;;  %12708 = vst [vmem:[#allocation90_spill] sm:$0xff] %v10666_v44 }
 0x46f   : > { %12701 = vst [vmem:[#allocation83_spill] sm:$0xff] %v10648_v45  ;;  %v7821_v45 = vld [vmem:[#allocation5 + $0x28] sm:$0xff]   ;;  %v10674_v59 = vpop.f32.mrf.mxu0 }
 0x470   : > { %v10652_v54 = vpop.f32.mrf.mxu1  ;;  %6353 = vmatpush1.bf16.msra.mxu1 %v7821_v45  ;;  %12711 = vst [vmem:[#allocation93_spill] sm:$0xff] %v10674_v59 }
 0x471   : > { %12703 = vst [vmem:[#allocation85_spill] sm:$0xff] %v10652_v54  ;;  %v7829_v54 = vld [vmem:[#allocation5 + $0xc8] sm:$0xff]   ;;  %6354 = vmatprep.subr.bf16.mxu1 %v12558_v50  ;;  %v10682_v38 = vpop.f32.mrf.mxu0 }
 0x472   : > { %v10654_v9 = vpop.f32.mrf.mxu1  ;;  %6666 = vmatpush2.bf16.msra.mxu0 %v7829_v54  ;;  %12714 = vst [vmem:[#allocation96_spill] sm:$0xff] %v10682_v38  ;;  %v7826_v54 = vld [vmem:[#allocation5 + $0x8] sm:$0xff]  }
 0x473   : > { %12704 = vst [vmem:[#allocation86_spill] sm:$0xff] %v10654_v9  ;;  %v7822_v9 = vld [vmem:[#allocation5 + $0x20] sm:$0xff]   ;;  %6667 = vmatprep.subr.bf16.mxu0 %v12558_v50 }
 0x474   : > { %v10660_v19 = vpop.f32.mrf.mxu1  ;;  %6355 = vmatpush1.bf16.msra.mxu1 %v7822_v9 }
 0x475   : > { %12706 = vst [vmem:[#allocation88_spill] sm:$0xff] %v10660_v19  ;;  %6356 = vmatprep.subr.bf16.mxu1 %v12558_v50 }
 0x476   : > { %v10662_v62 = vpop.f32.mrf.mxu1 }
 0x477   : > { %12707 = vst [vmem:[#allocation89_spill] sm:$0xff] %v10662_v62  ;;  %v7823_v62 = vld [vmem:[#allocation5 + $0x18] sm:$0xff]  }
 0x478   : > { %v10668_v52 = vpop.f32.mrf.mxu1  ;;  %6357 = vmatpush1.bf16.msra.mxu1 %v7823_v62  ;;  %v7827_v62 = vld [vmem:[#allocation5] sm:$0xff]  }
 0x479   : > { %12709 = vst [vmem:[#allocation91_spill] sm:$0xff] %v10668_v52  ;;  %6358 = vmatprep.subr.bf16.mxu1 %v12558_v50 }
 0x47a   : > { %v10670_v49 = vpop.f32.mrf.mxu1 }
 0x47b   : > { %12710 = vst [vmem:[#allocation92_spill] sm:$0xff] %v10670_v49  ;;  %v7825_v49 = vld [vmem:[#allocation5 + $0x10] sm:$0xff]  }
 0x47c   : > { %v10676_v2 = vpop.f32.mrf.mxu1  ;;  %6359 = vmatpush1.bf16.msra.mxu1 %v7825_v49  ;;  %v7828_v49 = vld [vmem:[#allocation5 + $0x78] sm:$0xff]  }
 0x47d   : > { %12712 = vst [vmem:[#allocation94_spill] sm:$0xff] %v10676_v2  ;;  %v10689_v2 = vpop.f32.mrf.mxu0  ;;  %6360 = vmatprep.subr.bf16.mxu1 %v12558_v50 }
 0x47e   : > { %v10678_v19 = vpop.f32.mrf.mxu1  ;;  %12717 = vst [vmem:[#allocation99_spill] sm:$0xff] %v10689_v2 }
 0x47f   : > { %12713 = vst [vmem:[#allocation95_spill] sm:$0xff] %v10678_v19  ;;  %v10696_v44 = vpop.f32.mrf.mxu0 }
 0x480   : > { %v10684_v45 = vpop.f32.mrf.mxu1  ;;  %12720 = vst [vmem:[#allocation102_spill] sm:$0xff] %v10696_v44  ;;  %6361 = vmatpush1.bf16.msra.mxu1 %v7826_v54  ;;  %v7830_v54 = vld [vmem:[#allocation5 + $0x70] sm:$0xff]  }
 0x481   : > { %12715 = vst [vmem:[#allocation97_spill] sm:$0xff] %v10684_v45  ;;  %6362 = vmatprep.subr.bf16.mxu1 %v12558_v50 }
 0x482   : > { %v10686_v52 = vpop.f32.mrf.mxu1 }
 0x483   : > { %12716 = vst [vmem:[#allocation98_spill] sm:$0xff] %v10686_v52  ;;  %v10703_v52 = vpop.f32.mrf.mxu0 }
 0x484   : > { %v10691_v9 = vpop.f32.mrf.mxu1  ;;  %12723 = vst [vmem:[#allocation105_spill] sm:$0xff] %v10703_v52  ;;  %6363 = vmatpush1.bf16.msra.mxu1 %v7827_v62 }
 0x485   : > { %12718 = vst [vmem:[#allocation100_spill] sm:$0xff] %v10691_v9  ;;  %6364 = vmatprep.subr.bf16.mxu1 %v12558_v50 }
 0x486   : > { %v10693_v19 = vpop.f32.mrf.mxu1 }
 0x487   : > { %12719 = vst [vmem:[#allocation101_spill] sm:$0xff] %v10693_v19  ;;  %v10710_v19 = vpop.f32.mrf.mxu0 }
 0x488   : > { %v10698_v38 = vpop.f32.mrf.mxu1  ;;  %12726 = vst [vmem:[#allocation108_spill] sm:$0xff] %v10710_v19  ;;  %6365 = vmatpush2.bf16.msra.mxu1 %v7828_v49 }
 0x489   : > { %12721 = vst [vmem:[#allocation103_spill] sm:$0xff] %v10698_v38  ;;  %6366 = vmatprep.subr.bf16.mxu1 %v12558_v50 }
 0x48a   : > { %v10700_v45 = vpop.f32.mrf.mxu1 }
 0x48b   : > { %12722 = vst [vmem:[#allocation104_spill] sm:$0xff] %v10700_v45  ;;  %v10717_v45 = vpop.f32.mrf.mxu0 }
 0x48c   : > { %v10705_v2 = vpop.f32.mrf.mxu1  ;;  %12729 = vst [vmem:[#allocation111_spill] sm:$0xff] %v10717_v45  ;;  %6367 = vmatpush2.bf16.msra.mxu1 %v7830_v54 }
 0x48d   : > { %12724 = vst [vmem:[#allocation106_spill] sm:$0xff] %v10705_v2  ;;  %6368 = vmatprep.subr.bf16.mxu1 %v12558_v50 }
 0x48e   : > { %v10707_v9 = vpop.f32.mrf.mxu1 }
 0x48f   : > { %12725 = vst [vmem:[#allocation107_spill] sm:$0xff] %v10707_v9  ;;  %v10724_v9 = vpop.f32.mrf.mxu0 }
 0x490   : > { %v10712_v44 = vpop.f32.mrf.mxu1  ;;  %12732 = vst [vmem:[#allocation114_spill] sm:$0xff] %v10724_v9 }
 0x491   : > { %12727 = vst [vmem:[#allocation109_spill] sm:$0xff] %v10712_v44  ;;  %v10730_v49 = vpop.f32.mrf.mxu0 }
 0x492   : > { %v10714_v38 = vpop.f32.mrf.mxu1  ;;  %12735 = vst [vmem:[#allocation117_spill] sm:$0xff] %v10730_v49 }
 0x493   : > { %12728 = vst [vmem:[#allocation110_spill] sm:$0xff] %v10714_v38  ;;  %v10736_v45 = vpop.f32.mrf.mxu0 }
 0x494   : > { %v10719_v52 = vpop.f32.mrf.mxu1  ;;  %12738 = vst [vmem:[#allocation120_spill] sm:$0xff] %v10736_v45 }
 0x495   : > { %12730 = vst [vmem:[#allocation112_spill] sm:$0xff] %v10719_v52 }
 0x496   : > { %v10721_v62 = vpop.f32.mrf.mxu1 }
 0x497   : > { %12731 = vst [vmem:[#allocation113_spill] sm:$0xff] %v10721_v62  ;;  %v10742_v62 = vpop.f32.mrf.mxu0 }
 0x498   : > { %v10726_v2 = vpop.f32.mrf.mxu1  ;;  %12741 = vst [vmem:[#allocation123_spill] sm:$0xff] %v10742_v62 }
 0x499   : > { %12733 = vst [vmem:[#allocation115_spill] sm:$0xff] %v10726_v2  ;;  %v7831_v2 = vld [vmem:[#allocation5 + $0x68] sm:$0xff]  }
 0x49a   : > { %v10728_v44 = vpop.f32.mrf.mxu1  ;;  %6369 = vmatpush2.bf16.msra.mxu1 %v7831_v2 }
 0x49b   : > { %12734 = vst [vmem:[#allocation116_spill] sm:$0xff] %v10728_v44  ;;  %v10748_v44 = vpop.f32.mrf.mxu0  ;;  %6370 = vmatprep.subr.bf16.mxu1 %v12558_v50 }
 0x49c   : > { %v10732_v38 = vpop.f32.mrf.mxu1  ;;  %12744 = vst [vmem:[#allocation126_spill] sm:$0xff] %v10748_v44 }
 0x49d   : > { %12736 = vst [vmem:[#allocation118_spill] sm:$0xff] %v10732_v38  ;;  %v7832_v38 = vld [vmem:[#allocation5 + $0x60] sm:$0xff]  }
 0x49e   : > { %v10734_v19 = vpop.f32.mrf.mxu1  ;;  %6371 = vmatpush2.bf16.msra.mxu1 %v7832_v38 }
 0x49f   : > { %12737 = vst [vmem:[#allocation119_spill] sm:$0xff] %v10734_v19  ;;  %6372 = vmatprep.subr.bf16.mxu1 %v12558_v50 }
 0x4a0   : > { %v10738_v52 = vpop.f32.mrf.mxu1 }
 0x4a1   : > { %12739 = vst [vmem:[#allocation121_spill] sm:$0xff] %v10738_v52  ;;  %v10755_v52 = vpop.f32.mrf.mxu0 }
 0x4a2   : > { %v10740_v54 = vpop.f32.mrf.mxu1  ;;  %12747 = vst [vmem:[#allocation129_spill] sm:$0xff] %v10755_v52  ;;  %v7836_v52 = vld [vmem:[#allocation5 + $0x48] sm:$0xff]  }
 0x4a3   : > { %12740 = vst [vmem:[#allocation122_spill] sm:$0xff] %v10740_v54 }
 0x4a4   : > { %v10744_v59 = vpop.f32.mrf.mxu1 }
 0x4a5   : > { %12742 = vst [vmem:[#allocation124_spill] sm:$0xff] %v10744_v59 }
 0x4a6   : > { %v10746_v9 = vpop.f32.mrf.mxu1 }
 0x4a7   : > { %12743 = vst [vmem:[#allocation125_spill] sm:$0xff] %v10746_v9  ;;  %v10762_v9 = vpop.f32.mrf.mxu0 }
 0x4a8   : > { %v10750_v49 = vpop.f32.mrf.mxu1  ;;  %12750 = vst [vmem:[#allocation132_spill] sm:$0xff] %v10762_v9 }
 0x4a9   : > { %12745 = vst [vmem:[#allocation127_spill] sm:$0xff] %v10750_v49  ;;  %v7833_v49 = vld [vmem:[#allocation5 + $0x58] sm:$0xff]  }
 0x4aa   : > { %v10753_v19 = vpop.f32.mrf.mxu1  ;;  %6373 = vmatpush2.bf16.msra.mxu1 %v7833_v49  ;;  %v7837_v49 = vld [vmem:[#allocation5 + $0x40] sm:$0xff]  }
 0x4ab   : > { %12746 = vst [vmem:[#allocation128_spill] sm:$0xff] %v10753_v19  ;;  %6374 = vmatprep.subr.bf16.mxu1 %v12558_v50  ;;  %v10769_v19 = vpop.f32.mrf.mxu0 }
 0x4ac   : > { %v10757_v54 = vpop.f32.mrf.mxu1  ;;  %12753 = vst [vmem:[#allocation135_spill] sm:$0xff] %v10769_v19 }
 0x4ad   : > { %12748 = vst [vmem:[#allocation130_spill] sm:$0xff] %v10757_v54  ;;  %v7835_v54 = vld [vmem:[#allocation5 + $0x50] sm:$0xff]  }
 0x4ae   : > { %v10759_v45 = vpop.f32.mrf.mxu1  ;;  %6375 = vmatpush2.bf16.msra.mxu1 %v7835_v54 }
 0x4af   : > { %12749 = vst [vmem:[#allocation131_spill] sm:$0xff] %v10759_v45  ;;  %6376 = vmatprep.subr.bf16.mxu1 %v12558_v50  ;;  %v10776_v45 = vpop.f32.mrf.mxu0 }
 0x4b0   : > { %v10764_v59 = vpop.f32.mrf.mxu1  ;;  %12756 = vst [vmem:[#allocation138_spill] sm:$0xff] %v10776_v45 }
 0x4b1   : > { %12751 = vst [vmem:[#allocation133_spill] sm:$0xff] %v10764_v59  ;;  %v7834_v59 = vld [vmem:[#allocation5 + $0xc0] sm:$0xff]  }
 0x4b2   : > { %v10766_v2 = vpop.f32.mrf.mxu1  ;;  %6668 = vmatpush2.bf16.msra.mxu0 %v7834_v59  ;;  %6377 = vmatpush2.bf16.msra.mxu1 %v7836_v52 }
 0x4b3   : > { %12752 = vst [vmem:[#allocation134_spill] sm:$0xff] %v10766_v2  ;;  %6378 = vmatprep.subr.bf16.mxu1 %v12558_v50 }
 0x4b4   : > { %v10771_v44 = vpop.f32.mrf.mxu1 }
 0x4b5   : > { %12754 = vst [vmem:[#allocation136_spill] sm:$0xff] %v10771_v44  ;;  %v10783_v44 = vpop.f32.mrf.mxu0 }
 0x4b6   : > { %v10773_v38 = vpop.f32.mrf.mxu1  ;;  %12759 = vst [vmem:[#allocation141_spill] sm:$0xff] %v10783_v44  ;;  %6379 = vmatpush2.bf16.msra.mxu1 %v7837_v49 }
 0x4b7   : > { %12755 = vst [vmem:[#allocation137_spill] sm:$0xff] %v10773_v38  ;;  %v10789_v38 = vpop.f32.mrf.mxu0 }
 0x4b8   : > { %v10778_v9 = vpop.f32.mrf.mxu1  ;;  %12762 = vst [vmem:[#allocation144_spill] sm:$0xff] %v10789_v38 }
 0x4b9   : > { %12757 = vst [vmem:[#allocation139_spill] sm:$0xff] %v10778_v9  ;;  %v10795_v62 = vpop.f32.mrf.mxu0 }
 0x4ba   : > { %v10780_v2 = vpop.f32.mrf.mxu1  ;;  %12765 = vst [vmem:[#allocation147_spill] sm:$0xff] %v10795_v62 }
 0x4bb   : > { %12758 = vst [vmem:[#allocation140_spill] sm:$0xff] %v10780_v2  ;;  %v10801_v50 = vpop.f32.mrf.mxu0 }
 0x4bc   : > { %v10785_v19 = vpop.f32.mrf.mxu1  ;;  %12768 = vst [vmem:[#allocation150_spill] sm:$0xff] %v10801_v50 }
 0x4bd   : > { %12760 = vst [vmem:[#allocation142_spill] sm:$0xff] %v10785_v19 }
 0x4be   : > { %v10787_v54 = vpop.f32.mrf.mxu1 }
 0x4bf   : > { %12761 = vst [vmem:[#allocation143_spill] sm:$0xff] %v10787_v54  ;;  %v10807_v54 = vpop.f32.mrf.mxu0 }
 0x4c0   : > { %v10791_v45 = vpop.f32.mrf.mxu1  ;;  %12771 = vst [vmem:[#allocation153_spill] sm:$0xff] %v10807_v54 }
 0x4c1   : > { %12763 = vst [vmem:[#allocation145_spill] sm:$0xff] %v10791_v45  ;;  %v10813_v45 = vpop.f32.mrf.mxu0 }
 0x4c2   : > { %v10793_v9 = vpop.f32.mrf.mxu1  ;;  %12774 = vst [vmem:[#allocation156_spill] sm:$0xff] %v10813_v45 }
 0x4c3   : > { %12764 = vst [vmem:[#allocation146_spill] sm:$0xff] %v10793_v9 }
 0x4c4   : > { %v10797_v59 = vpop.f32.mrf.mxu1 }
 0x4c5   : > { %12766 = vst [vmem:[#allocation148_spill] sm:$0xff] %v10797_v59  ;;  %v10819_v59 = vpop.f32.mrf.mxu0 }
 0x4c6   : > { %v10799_v52 = vpop.f32.mrf.mxu1  ;;  %12777 = vst [vmem:[#allocation159_spill] sm:$0xff] %v10819_v59 }
 0x4c7   : > { %12767 = vst [vmem:[#allocation149_spill] sm:$0xff] %v10799_v52 }
 0x4c8   : > { %v10803_v2 = vpop.f32.mrf.mxu1 }
 0x4c9   : > { %12769 = vst [vmem:[#allocation151_spill] sm:$0xff] %v10803_v2  ;;  %v10825_v2 = vpop.f32.mrf.mxu0 }
 0x4ca   : > { %v10805_v19 = vpop.f32.mrf.mxu1  ;;  %12780 = vst [vmem:[#allocation162_spill] sm:$0xff] %v10825_v2 }
 0x4cb   : > { %12770 = vst [vmem:[#allocation152_spill] sm:$0xff] %v10805_v19 }
 0x4cc   : > { %v10809_v49 = vpop.f32.mrf.mxu1 }
 0x4cd   : > { %12772 = vst [vmem:[#allocation154_spill] sm:$0xff] %v10809_v49  ;;  %v10831_v49 = vpop.f32.mrf.mxu0 }
 0x4ce   : > { %v10811_v38 = vpop.f32.mrf.mxu1  ;;  %12783 = vst [vmem:[#allocation165_spill] sm:$0xff] %v10831_v49 }
 0x4cf   : > { %12773 = vst [vmem:[#allocation155_spill] sm:$0xff] %v10811_v38 }
 0x4d0   : > { %v10815_v9 = vpop.f32.mrf.mxu1 }
 0x4d1   : > { %12775 = vst [vmem:[#allocation157_spill] sm:$0xff] %v10815_v9  ;;  %v10837_v9 = vpop.f32.mrf.mxu0 }
 0x4d2   : > { %v10817_v62 = vpop.f32.mrf.mxu1  ;;  %12786 = vst [vmem:[#allocation168_spill] sm:$0xff] %v10837_v9 }
 0x4d3   : > { %12776 = vst [vmem:[#allocation158_spill] sm:$0xff] %v10817_v62 }
 0x4d4   : > { %v10821_v52 = vpop.f32.mrf.mxu1 }
 0x4d5   : > { %12778 = vst [vmem:[#allocation160_spill] sm:$0xff] %v10821_v52  ;;  %v10843_v52 = vpop.f32.mrf.mxu0 }
 0x4d6   : > { %v10823_v50 = vpop.f32.mrf.mxu1  ;;  %12789 = vst [vmem:[#allocation171_spill] sm:$0xff] %v10843_v52 }
 0x4d7   : > { %12779 = vst [vmem:[#allocation161_spill] sm:$0xff] %v10823_v50 }
 0x4d8   : > { %v10827_v19 = vpop.f32.mrf.mxu1 }
 0x4d9   : > { %12781 = vst [vmem:[#allocation163_spill] sm:$0xff] %v10827_v19  ;;  %v10847_v19 = vpop.f32.mrf.mxu0 }
 0x4da   : > { %v10829_v54 = vpop.f32.mrf.mxu1  ;;  %12791 = vst [vmem:[#allocation173_spill] sm:$0xff] %v10847_v19 }
 0x4db   : > { %12782 = vst [vmem:[#allocation164_spill] sm:$0xff] %v10829_v54  ;;  %v10849_v49 = vpop.f32.mrf.mxu0 }
 0x4dc   : > { %v10833_v38 = vpop.f32.mrf.mxu1  ;;  %12792 = vst [vmem:[#allocation174_spill] sm:$0xff] %v10849_v49 }
 0x4dd   : > { %12784 = vst [vmem:[#allocation166_spill] sm:$0xff] %v10833_v38  ;;  %v10851_v38 = vpop.f32.mrf.mxu0 }
 0x4de   : > { %v10835_v45 = vpop.f32.mrf.mxu1  ;;  %12793 = vst [vmem:[#allocation175_spill] sm:$0xff] %v10851_v38 }
 0x4df   : > { %12785 = vst [vmem:[#allocation167_spill] sm:$0xff] %v10835_v45  ;;  %v10853_v45 = vpop.f32.mrf.mxu0 }
 0x4e0   : > { %v10839_v62 = vpop.f32.mrf.mxu1  ;;  %12794 = vst [vmem:[#allocation176_spill] sm:$0xff] %v10853_v45  ;;  %v7995_v45 = vmov 1966171168  }
 0x4e1   : > { %12787 = vst [vmem:[#allocation169_spill] sm:$0xff] %v10839_v62  ;;  %v10855_v9 = vpop.f32.mrf.mxu0 }
 0x4e2   : > { %v10841_v59 = vpop.f32.mrf.mxu1  ;;  %12795 = vst [vmem:[#allocation177_spill] sm:$0xff] %v10855_v9  ;;  %v4438_v9 = vunpack.c.l.s4 %v7995_v45  ;;  %v5423_v45 = vld [vmem:[%s12452_s9] sm:$0xf] }
 0x4e3   : > { %12788 = vst [vmem:[#allocation170_spill] sm:$0xff] %v10841_v59  ;;  %v10857_v62 = vpop.f32.mrf.mxu0  ;;  %v10915_v43 = vrot.slane %v5423_v45, %v12809_v36 }
 0x4e4   : > { %v10845_v50 = vpop.f32.mrf.mxu1  ;;  %12796 = vst [vmem:[#allocation178_spill] sm:$0xff] %v10857_v62 }
 0x4e5   : > { %12790 = vst [vmem:[#allocation172_spill] sm:$0xff] %v10845_v50  ;;  %v10859_v59 = vpop.f32.mrf.mxu0 }
 0x4e6   : > { %v4373_v2 = vpop.f32.mrf.mxu1  ;;  %12797 = vst [vmem:[#allocation179_spill] sm:$0xff] %v10859_v59  ;;  %v4439_v59 = vunpack.c.0.s8 %v4438_v9 }
 0x4e7   : > { %v10861_v52 = vpop.f32.mrf.mxu0 }
 0x4e8   : > { %v4375_v54 = vpop.f32.mrf.mxu1  ;;  %12798 = vst [vmem:[#allocation180_spill] sm:$0xff] %v10861_v52 }
 0x4e9   : > { %v4434_v44 = vcombine.high %v4373_v2, %v4375_v54  ;;  %v10863_v50 = vpop.f32.mrf.mxu0  ;;  %v4433_v13 = vcombine.low %v4373_v2, %v4375_v54 }
 0x4ea   : > { %12799 = vst [vmem:[#allocation181_spill] sm:$0xff] %v10863_v50  ;;  %v4377_v62 = vpop.f32.mrf.mxu1 }
 0x4eb   : > { %v10865_v61 = vpop.f32.mrf.mxu0 }
 0x4ec   : > { %12800 = vst [vmem:[#allocation182_spill] sm:$0xff] %v10865_v61  ;;  %v4379_v52 = vpop.f32.mrf.mxu1  ;;  %v12807_v61 = vld [vmem:[#allocation15_spill] sm:$0xff] }
 0x4ed   : > { %v10867_v19 = vpop.f32.mrf.mxu0  ;;  %v10880_v1 = vsub.s32 %v4439_v59, %v12807_v61  ;;  %v10891_v9 = vsub.s32 2, %v12807_v61  ;;  %v4501_v5 = vcombine.low %v4377_v62, %v4379_v52  ;;  %v4502_v34 = vcombine.high %v4377_v62, %v4379_v52 }
 0x4ee   : > { %12801 = vst [vmem:[#allocation183_spill] sm:$0xff] %v10867_v19 }
 0x4ef   : > { %v10869_v3 = vpop.f32.mrf.mxu0  ;;  %v10900_v19 = vrot.slane %v5423_v45, %v10891_v9  ;;  %v4443_v17 = vrot.slane %v4433_v13, %v10880_v1 }
 0x4f0   : > { %12802 = vst [vmem:[#allocation184_spill] sm:$0xff] %v10869_v3 }
 0x4f1   : > { %v10871_v49 = vpop.f32.mrf.mxu0 }
 0x4f2   : > { %12803 = vst [vmem:[#allocation185_spill] sm:$0xff] %v10871_v49  ;;  %v5145_v49 = vld [vmem:[%s12451_s8] sm:$0xf] }
 0x4f3   : > { %v10873_v38 = vpop.f32.mrf.mxu0  ;;  %v10897_v59 = vrot.slane %v5145_v49, %v10891_v9  ;;  %v10903_v24 = vrot.slane %v5145_v49, %v12809_v36  ;;  %v10918_v8 = vrot.slane %v5145_v49, %v12811_v63 }
 0x4f4   : > { %12804 = vst [vmem:[#allocation186_spill] sm:$0xff] %v10873_v38 }
 0x4f5   : > { %v10875_v25 = vpop.f32.mrf.mxu0 }
 0x4f6   : > { %12805 = vst [vmem:[#allocation187_spill] sm:$0xff] %v10875_v25 }
 0x4f7   : > { %v10877_v41 = vpop.f32.mrf.mxu0 }
 0x4f8   : > { %12806 = vst [vmem:[#allocation188_spill] sm:$0xff] %v10877_v41  ;;  %v10894_v41 = vsub.s32 3, %v12807_v61  ;;  %v4450_v61 = vrot.slane %v4434_v44, %v10880_v1 }
 0x4f9   : > { %v10888_v38 = vpop.f32.mrf.mxu0 }
 0x4fa   : > { %12808 = vst [vmem:[#allocation15_spill] sm:$0xff] %v10888_v38  ;;  %v10906_v38 = vrot.slane %v5145_v49, %v10894_v41 }
 0x526   : > { %v4416_v50 = vpop.f32.mrf.mxu1 }
 0x528   : > { %v4418_v25 = vpop.f32.mrf.mxu1 }
 0x529   : > { %v4435_v2 = vcombine.low %v4416_v50, %v4418_v25  ;;  %v4436_v54 = vcombine.high %v4416_v50, %v4418_v25  ;;  %v10912_v50 = vpop.f32.mrf.mxu0 }
 0x52a   : > { %v4420_v3 = vpop.f32.mrf.mxu1  ;;  %12810 = vst [vmem:[#allocation17_spill] sm:$0xff] %v10912_v50 }
 0x52b   : > { %v4457_v15 = vrot.slane %v4435_v2, %v10880_v1  ;;  %v4464_v25 = vrot.slane %v4436_v54, %v10880_v1  ;;  %v10921_v2 = vrot.slane %v5423_v45, %v10894_v41  ;;  %v10924_v54 = vrot.slane %v5423_v45, %v12811_v63 }
 0x52c   : > { %v4422_v21 = vpop.f32.mrf.mxu1 }
 0x52d   : > { %v4465_v58 = vcombine.low %v4443_v17, %v4457_v15  ;;  %v4466_v40 = vcombine.high %v4443_v17, %v4457_v15  ;;  %v4467_v13 = vcombine.low %v4450_v61, %v4464_v25  ;;  %v4468_v16 = vcombine.high %v4450_v61, %v4464_v25  ;;  %v10936_v17 = vpop.f32.mrf.mxu0 }
 0x52e   : > { %v4503_v44 = vcombine.low %v4420_v3, %v4422_v21  ;;  %v4504_v12 = vcombine.high %v4420_v3, %v4422_v21  ;;  %12813 = vst [vmem:[#allocation189_spill] sm:$0xff] %v10936_v17  ;;  %v4511_v21 = vrot.slane %v4501_v5, %v10880_v1  ;;  %v4518_v3 = vrot.slane %v4502_v34, %v10880_v1 }
 0x52f   : > { %v4475_v62 = vrot.slane %v4465_v58, %v10880_v1  ;;  %v10928_v52 = vrot.slane %v4467_v13, %v10880_v1  ;;  %v10931_v49 = vrot.slane %v4466_v40, %v10880_v1  ;;  %v10934_v15 = vrot.slane %v4468_v16, %v10880_v1 }
 0x530   : > { %v4525_v45 = vrot.slane %v4503_v44, %v10880_v1  ;;  %v4532_v61 = vrot.slane %v4504_v12, %v10880_v1 }
 0x531   : > { %12812 = vst [vmem:[#allocation16_spill] sm:$0xff] %v10928_v52  ;;  %v10942_v58 = vcombine.high %v4475_v62, %v4475_v62  ;;  %v10946_v25 = vcombine.high %v10928_v52, %v10928_v52  ;;  %v10950_v16 = vcombine.high %v10931_v49, %v10931_v49  ;;  %v10954_v40 = vcombine.high %v10934_v15, %v10934_v15 }
 0x532   : > { %v10957_v34 = vrot.slane %v4475_v62, %v12811_v63  ;;  %v10960_v5 = vrot.slane %v4475_v62, %v10891_v9  ;;  %v10964_v12 = vrot.slane %v10931_v49, %v12811_v63  ;;  %v10968_v13 = vrot.slane %v10931_v49, %v10891_v9 }
 0x533   : > { %12814 = vst [vmem:[#allocation190_spill] sm:$0xff] %v10942_v58  ;;  %12815 = vst [vmem:[#allocation191_spill] sm:$0xff] %v10946_v25  ;;  %v10972_v44 = vrot.slane %v10928_v52, %v12811_v63  ;;  %v10976_v17 = vrot.slane %v10928_v52, %v10891_v9  ;;  %v10980_v50 = vrot.slane %v10934_v15, %v12811_v63  ;;  %v10986_v25 = vpop.f32.mrf.mxu0 }
 0x534   : > { %12816 = vst [vmem:[#allocation192_spill] sm:$0xff] %v10950_v16  ;;  %12817 = vst [vmem:[#allocation193_spill] sm:$0xff] %v10954_v40  ;;  %v10984_v40 = vrot.slane %v10934_v15, %v10891_v9  ;;  %v4533_v16 = vcombine.low %v4511_v21, %v4525_v45  ;;  %v4534_v58 = vcombine.high %v4511_v21, %v4525_v45 }
 0x535   : > { %12818 = vst [vmem:[#allocation194_spill] sm:$0xff] %v10972_v44  ;;  %12819 = vst [vmem:[#allocation195_spill] sm:$0xff] %v10976_v17  ;;  %v4535_v46 = vcombine.low %v4518_v3, %v4532_v61  ;;  %v4536_v11 = vcombine.high %v4518_v3, %v4532_v61  ;;  %v4576_v44 = vrot.slane %v4475_v62, %v12809_v36  ;;  %v11010_v61 = vpop.f32.mrf.mxu0 }
 0x536   : > { %12820 = vst [vmem:[#allocation196_spill] sm:$0xff] %v10980_v50  ;;  %12821 = vst [vmem:[#allocation197_spill] sm:$0xff] %v10984_v40  ;;  %v4584_v48 = vrot.slane %v4475_v62, %v10894_v41  ;;  %v4889_v17 = vadd.f32 %v10957_v34, %v10329_v32  ;;  %v4893_v50 = vadd.f32 %v10957_v34, %v10342_v51 }
 0x537   : > { %12822 = vst [vmem:[#allocation198_spill] sm:$0xff] %v10986_v25  ;;  %v10995_v52 = vrot.slane %v4533_v16, %v10880_v1  ;;  %v10998_v40 = vrot.slane %v4535_v46, %v10880_v1  ;;  %v11001_v21 = vrot.slane %v4534_v58, %v10880_v1  ;;  %v11004_v3 = vrot.slane %v4536_v11, %v10880_v1 }
 0x538   : > { %v4890_v62 = vadd.f32 %v4576_v44, %v10336_v7  ;;  %v4894_v45 = vadd.f32 %v4576_v44, %v10350_v28  ;;  %v4892_v32 = vadd.f32 %v4584_v48, %v10201_v26  ;;  %v4896_v51 = vadd.f32 %v4584_v48, %v10258_v42  ;;  %12827 = vst [vmem:[#allocation203_spill] sm:$0xff] %v11010_v61 }
 0x539   : > { %12823 = vst [vmem:[#allocation199_spill] sm:$0xff] %v10995_v52  ;;  %12824 = vst [vmem:[#allocation200_spill] sm:$0xff] %v10998_v40  ;;  %v11014_v46 = vcombine.high %v10995_v52, %v10995_v52  ;;  %v11018_v58 = vcombine.high %v10998_v40, %v10998_v40  ;;  %v11022_v11 = vcombine.high %v11001_v21, %v11001_v21 }
 0x53a   : > { %12825 = vst [vmem:[#allocation201_spill] sm:$0xff] %v11001_v21  ;;  %12826 = vst [vmem:[#allocation202_spill] sm:$0xff] %v11004_v3  ;;  %v11026_v7 = vcombine.high %v11004_v3, %v11004_v3  ;;  %v5168_v26 = vmul.f32 %v10903_v24, %v4890_v62  ;;  %v5172_v42 = vmul.f32 %v10903_v24, %v4894_v45  ;;  %v11042_v3 = vpop.f32.mrf.mxu0 }
 0x53b   : > { %12828 = vst [vmem:[#allocation204_spill] sm:$0xff] %v11014_v46  ;;  %12829 = vst [vmem:[#allocation205_spill] sm:$0xff] %v11018_v58  ;;  %v5170_v28 = vmul.f32 %v10906_v38, %v4892_v32  ;;  %v5174_v1 = vmul.f32 %v10906_v38, %v4896_v51  ;;  %v5167_v16 = vmul.f32 %v10918_v8, %v4889_v17 }
 0x53c   : > { %12830 = vst [vmem:[#allocation206_spill] sm:$0xff] %v11022_v11  ;;  %12831 = vst [vmem:[#allocation207_spill] sm:$0xff] %v11026_v7  ;;  %v5171_v58 = vmul.f32 %v10918_v8, %v4893_v50  ;;  %v4891_v40 = vadd.f32 %v10960_v5, %v10168_v10  ;;  %v4895_v11 = vadd.f32 %v10960_v5, %v10237_v53  ;;  %v11052_v52 = vpop.f32.mrf.mxu0 }
 0x53d   : > { %v5446_v7 = vadd.f32 %v10915_v43, %v5168_v26  ;;  %v5450_v62 = vadd.f32 %v10915_v43, %v5172_v42  ;;  %v5448_v45 = vadd.f32 %v10921_v2, %v5170_v28  ;;  %v5452_v32 = vadd.f32 %v10921_v2, %v5174_v1  ;;  %12832 = vst [vmem:[#allocation208_spill] sm:$0xff] %v11042_v3 }
 0x53e   : > { %v5445_v17 = vadd.f32 %v10924_v54, %v5167_v16  ;;  %v5449_v50 = vadd.f32 %v10924_v54, %v5171_v58  ;;  %v5169_v51 = vmul.f32 %v10897_v59, %v4891_v40  ;;  %v5173_v10 = vmul.f32 %v10897_v59, %v4895_v11 }
 0x53f   : > { %v5702_v46 = vmax.f32 %v5446_v7, 0.0  ;;  %v5706_v53 = vmax.f32 %v5450_v62, 0.0  ;;  %v5704_v61 = vmax.f32 %v5448_v45, 0.0  ;;  %v5708_v26 = vmax.f32 %v5452_v32, 0.0 }
 0x540   : > { %v5701_v25 = vmax.f32 %v5445_v17, 0.0  ;;  %v5705_v42 = vmax.f32 %v5449_v50, 0.0  ;;  %v5447_v28 = vadd.f32 %v10900_v19, %v5169_v51  ;;  %v5451_v1 = vadd.f32 %v10900_v19, %v5173_v10 }
 0x541   : > { %v5958_v21 = vpack.c.bf16 %v5706_v53, %v5702_v46  ;;  %v5960_v3 = vpack.c.bf16 %v5708_v26, %v5704_v61  ;;  %v4898_v16 = vadd.f32 %v4576_v44, %v10360_v18  ;;  %v4902_v58 = vadd.f32 %v4576_v44, %v10373_v35 }
 0x542   : > { %v5957_v40 = vpack.c.bf16 %v5705_v42, %v5701_v25  ;;  %v5703_v11 = vmax.f32 %v5447_v28, 0.0  ;;  %v5707_v7 = vmax.f32 %v5451_v1, 0.0  ;;  %v4900_v62 = vadd.f32 %v4584_v48, %v10277_v22 }
 0x543   : > { %6380 = vmatprep.mubr.bf16.mxu1 %v5958_v21  ;;  %6669 = vmatprep.mubr.bf16.mxu0 %v5960_v3  ;;  %v5176_v45 = vmul.f32 %v10903_v24, %v4898_v16  ;;  %v5180_v32 = vmul.f32 %v10903_v24, %v4902_v58  ;;  %v4904_v46 = vadd.f32 %v4584_v48, %v10320_v0  ;;  %v11068_v0 = vpop.f32.mrf.mxu0 }
 0x544   : > { %6381 = vmatmul.mubr.bf16.vlgmr.msra.gmra.mxu1 %v5957_v40  ;;  %v5959_v61 = vpack.c.bf16 %v5707_v7, %v5703_v11  ;;  %v5178_v18 = vmul.f32 %v10906_v38, %v4900_v62  ;;  %v4897_v35 = vadd.f32 %v10957_v34, %v10354_v55  ;;  %v4901_v25 = vadd.f32 %v10957_v34, %v10365_v6 }
 0x545   : > { %v5454_v22 = vadd.f32 %v10915_v43, %v5176_v45  ;;  %v5458_v44 = vadd.f32 %v10915_v43, %v5180_v32  ;;  %v5182_v21 = vmul.f32 %v10906_v38, %v4904_v46  ;;  %v4899_v3 = vadd.f32 %v10960_v5, %v10268_v33 }
 0x546   : > { %6670 = vmatmul.mubr.bf16.vlgmr.msra.gmra.mxu0 %v5959_v61  ;;  %v5456_v48 = vadd.f32 %v10921_v2, %v5178_v18  ;;  %v5175_v17 = vmul.f32 %v10918_v8, %v4897_v35  ;;  %v5179_v55 = vmul.f32 %v10918_v8, %v4901_v25  ;;  %v4903_v6 = vadd.f32 %v10960_v5, %v10295_v57  ;;  %v11083_v5 = vpop.f32.mrf.mxu0 }
 0x547   : > { %v5710_v34 = vmax.f32 %v5454_v22, 0.0  ;;  %v5714_v50 = vmax.f32 %v5458_v44, 0.0  ;;  %v5460_v51 = vadd.f32 %v10921_v2, %v5182_v21  ;;  %v5177_v10 = vmul.f32 %v10897_v59, %v4899_v3 }
 0x548   : > { %v5712_v53 = vmax.f32 %v5456_v48, 0.0  ;;  %v5453_v33 = vadd.f32 %v10924_v54, %v5175_v17  ;;  %v5457_v26 = vadd.f32 %v10924_v54, %v5179_v55  ;;  %v5181_v42 = vmul.f32 %v10897_v59, %v4903_v6 }
 0x549   : > { %v5962_v28 = vpack.c.bf16 %v5714_v50, %v5710_v34  ;;  %v5716_v1 = vmax.f32 %v5460_v51, 0.0  ;;  %v5455_v16 = vadd.f32 %v10900_v19, %v5177_v10  ;;  %v4592_v57 = vrot.slane %v10931_v49, %v12809_v36 }
 0x54a   : > { %v5709_v58 = vmax.f32 %v5453_v33, 0.0  ;;  %v5713_v40 = vmax.f32 %v5457_v26, 0.0  ;;  %v5459_v11 = vadd.f32 %v10900_v19, %v5181_v42  ;;  %v4600_v7 = vrot.slane %v10931_v49, %v10894_v41 }
 0x54b   : > { %6388 = vmatprep.mubr.bf16.mxu1 %v5962_v28  ;;  %v5964_v62 = vpack.c.bf16 %v5716_v1, %v5712_v53  ;;  %v5711_v45 = vmax.f32 %v5455_v16, 0.0  ;;  %v4906_v32 = vadd.f32 %v4592_v57, %v10388_v37  ;;  %v4910_v46 = vadd.f32 %v4592_v57, %v10401_v39  ;;  %v11098_v37 = vpop.f32.mrf.mxu0 }
 0x54c   : > { %v5961_v61 = vpack.c.bf16 %v5713_v40, %v5709_v58  ;;  %v5715_v18 = vmax.f32 %v5459_v11, 0.0  ;;  %v4908_v35 = vadd.f32 %v4600_v7, %v10348_v4  ;;  %v4912_v25 = vadd.f32 %v4600_v7, %v10371_v30 }
 0x54d   : > { %6677 = vmatprep.mubr.bf16.mxu0 %v5964_v62  ;;  %v5184_v22 = vmul.f32 %v10903_v24, %v4906_v32  ;;  %v5188_v44 = vmul.f32 %v10903_v24, %v4910_v46  ;;  %v4905_v49 = vadd.f32 %v10964_v12, %v10378_v20  ;;  %v4909_v21 = vadd.f32 %v10964_v12, %v10394_v29  ;;  %v11115_v33 = vpop.f32.mrf.mxu0 }
 0x54e   : > { %6389 = vmatmul.mubr.bf16.gmra.mxu1 %v5961_v61  ;;  %v5963_v39 = vpack.c.bf16 %v5715_v18, %v5711_v45  ;;  %v5186_v3 = vmul.f32 %v10906_v38, %v4908_v35  ;;  %v5190_v4 = vmul.f32 %v10906_v38, %v4912_v25  ;;  %v4907_v30 = vadd.f32 %v10968_v13, %v10334_v56 }
 0x54f   : > { %v5462_v48 = vadd.f32 %v10915_v43, %v5184_v22  ;;  %v5466_v17 = vadd.f32 %v10915_v43, %v5188_v44  ;;  %v5183_v20 = vmul.f32 %v10918_v8, %v4905_v49  ;;  %v5187_v55 = vmul.f32 %v10918_v8, %v4909_v21  ;;  %v11125_v25 = vpop.f32.mrf.mxu0  ;;  %v12833_v49 = vld [vmem:[#allocation19_spill] sm:$0xff] }
 0x550   : > { %6678 = vmatmul.mubr.bf16.gmra.mxu0 %v5963_v39  ;;  %v5464_v29 = vadd.f32 %v10921_v2, %v5186_v3  ;;  %v5468_v6 = vadd.f32 %v10921_v2, %v5190_v4  ;;  %v4911_v34 = vadd.f32 %v10968_v13, %v10358_v60  ;;  %v5185_v50 = vmul.f32 %v10897_v59, %v4907_v30 }
 0x551   : > { %v5718_v51 = vmax.f32 %v5462_v48, 0.0  ;;  %v5722_v56 = vmax.f32 %v5466_v17, 0.0  ;;  %v5461_v10 = vadd.f32 %v10924_v54, %v5183_v20  ;;  %v5465_v53 = vadd.f32 %v10924_v54, %v5187_v55  ;;  %v12835_v17 = vld [vmem:[#allocation18_spill] sm:$0xff]  ;;  %v11144_v55 = vpop.f32.mrf.mxu0 }
 0x552   : > { %v5720_v26 = vmax.f32 %v5464_v29, 0.0  ;;  %v5724_v42 = vmax.f32 %v5468_v6, 0.0  ;;  %v5189_v28 = vmul.f32 %v10897_v59, %v4911_v34  ;;  %v5463_v1 = vadd.f32 %v10900_v19, %v5185_v50 }
 0x553   : > { %v5966_v16 = vpack.c.bf16 %v5722_v56, %v5718_v51  ;;  %v5717_v58 = vmax.f32 %v5461_v10, 0.0  ;;  %v5721_v40 = vmax.f32 %v5465_v53, 0.0  ;;  %v4914_v60 = vadd.f32 %v4592_v57, %v10409_v27  ;;  %v12836_v53 = vld [vmem:[#allocation190_spill] sm:$0xff] }
 0x554   : > { %v5968_v11 = vpack.c.bf16 %v5724_v42, %v5720_v26  ;;  %v5467_v62 = vadd.f32 %v10900_v19, %v5189_v28  ;;  %v5719_v45 = vmax.f32 %v5463_v1, 0.0  ;;  %v4918_v32 = vadd.f32 %v4592_v57, %v10418_v31 }
 0x555   : > { %6396 = vmatprep.mubr.bf16.mxu1 %v5966_v16  ;;  %v5965_v46 = vpack.c.bf16 %v5721_v40, %v5717_v58  ;;  %v5192_v61 = vmul.f32 %v10903_v24, %v4914_v60  ;;  %v4916_v18 = vadd.f32 %v4600_v7, %v10399_v23  ;;  %v4920_v35 = vadd.f32 %v4600_v7, %v10416_v14  ;;  %v12834_v14 = vld [vmem:[#allocation20_spill] sm:$0xff] }
 0x556   : > { %6685 = vmatprep.mubr.bf16.mxu0 %v5968_v11  ;;  %v5723_v22 = vmax.f32 %v5467_v62, 0.0  ;;  %v5196_v27 = vmul.f32 %v10903_v24, %v4918_v32  ;;  %v4913_v44 = vadd.f32 %v10964_v12, %v10403_v47  ;;  %v4917_v31 = vadd.f32 %v10964_v12, %v12833_v49  ;;  %v12837_v40 = vld [vmem:[#allocation24_spill] sm:$0xff]  ;;  %v12838_v11 = vld [vmem:[#allocation23_spill] sm:$0xff] }
 0x557   : > { %6397 = vmatmul.mubr.bf16.gmra.mxu1 %v5965_v46  ;;  %v5470_v57 = vadd.f32 %v10915_v43, %v5192_v61  ;;  %v5194_v21 = vmul.f32 %v10906_v38, %v4916_v18  ;;  %v5198_v23 = vmul.f32 %v10906_v38, %v4920_v35  ;;  %v4915_v7 = vadd.f32 %v10968_v13, %v12834_v14  ;;  %v12839_v49 = vld [vmem:[#allocation55_spill] sm:$0xff] }
 0x558   : > { %v5967_v39 = vpack.c.bf16 %v5723_v22, %v5719_v45  ;;  %v5474_v3 = vadd.f32 %v10915_v43, %v5196_v27  ;;  %v5191_v4 = vmul.f32 %v10918_v8, %v4913_v44  ;;  %v5195_v47 = vmul.f32 %v10918_v8, %v4917_v31  ;;  %v11156_v45 = vpop.f32.mrf.mxu0 }
 0x559   : > { %v5726_v30 = vmax.f32 %v5470_v57, 0.0  ;;  %v5472_v12 = vadd.f32 %v10921_v2, %v5194_v21  ;;  %v5476_v48 = vadd.f32 %v10921_v2, %v5198_v23  ;;  %v4919_v20 = vadd.f32 %v10968_v13, %v12835_v17  ;;  %v12840_v57 = vld [vmem:[#allocation63_spill] sm:$0xff]  ;;  %v12841_v23 = vld [vmem:[#allocation22_spill] sm:$0xff] }
 0x55a   : > { %6686 = vmatmul.mubr.bf16.gmra.mxu0 %v5967_v39  ;;  %v5730_v29 = vmax.f32 %v5474_v3, 0.0  ;;  %v5469_v6 = vadd.f32 %v10924_v54, %v5191_v4  ;;  %v5473_v34 = vadd.f32 %v10924_v54, %v5195_v47  ;;  %v5193_v50 = vmul.f32 %v10897_v59, %v4915_v7  ;;  %v12842_v7 = vld [vmem:[#allocation21_spill] sm:$0xff] }
 0x55b   : > { %v5728_v51 = vmax.f32 %v5472_v12, 0.0  ;;  %v5732_v56 = vmax.f32 %v5476_v48, 0.0  ;;  %v5197_v10 = vmul.f32 %v10897_v59, %v4919_v20  ;;  %v4608_v26 = vrot.slane %v12836_v53, %v12809_v36  ;;  %v11176_v48 = vpop.f32.mrf.mxu0 }
 0x55c   : > { %v5970_v42 = vpack.c.bf16 %v5730_v29, %v5726_v30  ;;  %v5725_v28 = vmax.f32 %v5469_v6, 0.0  ;;  %v5729_v13 = vmax.f32 %v5473_v34, 0.0  ;;  %v5471_v1 = vadd.f32 %v10900_v19, %v5193_v50  ;;  %v12843_v30 = vld [vmem:[#allocation56_spill] sm:$0xff] }
 0x55d   : > { %v5972_v16 = vpack.c.bf16 %v5732_v56, %v5728_v51  ;;  %v5475_v58 = vadd.f32 %v10900_v19, %v5197_v10  ;;  %v4922_v60 = vadd.f32 %v4608_v26, %v12837_v40  ;;  %v4926_v62 = vadd.f32 %v4608_v26, %v12838_v11  ;;  %v12844_v51 = vld [vmem:[#allocation60_spill] sm:$0xff]  ;;  %v11192_v11 = vpop.f32.mrf.mxu0 }
 0x55e   : > { %6404 = vmatprep.mubr.bf16.mxu1 %v5970_v42  ;;  %v5969_v32 = vpack.c.bf16 %v5729_v13, %v5725_v28  ;;  %v5727_v46 = vmax.f32 %v5471_v1, 0.0  ;;  %v4616_v61 = vrot.slane %v12836_v53, %v10894_v41  ;;  %v4604_v18 = vrot.slane %v12836_v53, %v12811_v63  ;;  %v12845_v40 = vld [vmem:[#allocation28_spill] sm:$0xff] }
 0x55f   : > { %6693 = vmatprep.mubr.bf16.mxu0 %v5972_v16  ;;  %v5731_v35 = vmax.f32 %v5475_v58, 0.0  ;;  %v5200_v22 = vmul.f32 %v10903_v24, %v4922_v60  ;;  %v5204_v27 = vmul.f32 %v10903_v24, %v4926_v62  ;;  %v11166_v44 = vrot.slane %v12836_v53, %v10891_v9 }
 0x560   : > { %6405 = vmatmul.mubr.bf16.gmra.mxu1 %v5969_v32  ;;  %v4924_v31 = vadd.f32 %v4616_v61, %v12839_v49  ;;  %v4928_v21 = vadd.f32 %v4616_v61, %v12840_v57  ;;  %v4921_v14 = vadd.f32 %v4604_v18, %v12841_v23  ;;  %v4925_v39 = vadd.f32 %v4604_v18, %v12842_v7  ;;  %v12846_v49 = vld [vmem:[#allocation26_spill] sm:$0xff] }
 0x561   : > { %v5971_v3 = vpack.c.bf16 %v5731_v35, %v5727_v46  ;;  %v5478_v4 = vadd.f32 %v10915_v43, %v5200_v22  ;;  %v5482_v47 = vadd.f32 %v10915_v43, %v5204_v27  ;;  %v4923_v12 = vadd.f32 %v11166_v44, %v12843_v30 }
 0x562   : > { %v5202_v17 = vmul.f32 %v10906_v38, %v4924_v31  ;;  %v5206_v20 = vmul.f32 %v10906_v38, %v4928_v21  ;;  %v5199_v29 = vmul.f32 %v10918_v8, %v4921_v14  ;;  %v5203_v6 = vmul.f32 %v10918_v8, %v4925_v39  ;;  %v12847_v14 = vld [vmem:[#allocation69_spill] sm:$0xff]  ;;  %v12848_v39 = vld [vmem:[#allocation75_spill] sm:$0xff] }
 0x563   : > { %6694 = vmatmul.mubr.bf16.gmra.mxu0 %v5971_v3  ;;  %v5734_v34 = vmax.f32 %v5478_v4, 0.0  ;;  %v5738_v50 = vmax.f32 %v5482_v47, 0.0  ;;  %v4927_v56 = vadd.f32 %v11166_v44, %v12844_v51  ;;  %v5201_v10 = vmul.f32 %v10897_v59, %v4923_v12  ;;  %v12849_v12 = vld [vmem:[#allocation27_spill] sm:$0xff] }
 0x564   : > { %v5480_v53 = vadd.f32 %v10921_v2, %v5202_v17  ;;  %v5484_v42 = vadd.f32 %v10921_v2, %v5206_v20  ;;  %v5477_v28 = vadd.f32 %v10924_v54, %v5199_v29  ;;  %v5481_v13 = vadd.f32 %v10924_v54, %v5203_v6  ;;  %v11202_v20 = vpop.f32.mrf.mxu0  ;;  %v12850_v6 = vld [vmem:[#allocation25_spill] sm:$0xff] }
 0x565   : > { %v5974_v1 = vpack.c.bf16 %v5738_v50, %v5734_v34  ;;  %v5205_v16 = vmul.f32 %v10897_v59, %v4927_v56  ;;  %v5479_v58 = vadd.f32 %v10900_v19, %v5201_v10  ;;  %v4930_v60 = vadd.f32 %v4608_v26, %v12845_v40  ;;  %v12853_v40 = vld [vmem:[#allocation192_spill] sm:$0xff] }
 0x566   : > { %v5736_v62 = vmax.f32 %v5480_v53, 0.0  ;;  %v5740_v32 = vmax.f32 %v5484_v42, 0.0  ;;  %v5733_v46 = vmax.f32 %v5477_v28, 0.0  ;;  %v5737_v35 = vmax.f32 %v5481_v13, 0.0  ;;  %v12851_v28 = vld [vmem:[#allocation66_spill] sm:$0xff] }
 0x567   : > { %6412 = vmatprep.mubr.bf16.mxu1 %v5974_v1  ;;  %v5483_v22 = vadd.f32 %v10900_v19, %v5205_v16  ;;  %v5735_v27 = vmax.f32 %v5479_v58, 0.0  ;;  %v4934_v31 = vadd.f32 %v4608_v26, %v12846_v49  ;;  %v5208_v57 = vmul.f32 %v10903_v24, %v4930_v60 }
 0x568   : > { %v5976_v21 = vpack.c.bf16 %v5740_v32, %v5736_v62  ;;  %v5973_v23 = vpack.c.bf16 %v5737_v35, %v5733_v46  ;;  %v4932_v7 = vadd.f32 %v4616_v61, %v12847_v14  ;;  %v4936_v3 = vadd.f32 %v4616_v61, %v12848_v39  ;;  %v11219_v62 = vpop.f32.mrf.mxu0 }
 0x569   : > { %v5739_v4 = vmax.f32 %v5483_v22, 0.0  ;;  %v5212_v47 = vmul.f32 %v10903_v24, %v4934_v31  ;;  %v5486_v30 = vadd.f32 %v10915_v43, %v5208_v57  ;;  %v4929_v17 = vadd.f32 %v4604_v18, %v12849_v12  ;;  %v12854_v57 = vld [vmem:[#allocation31_spill] sm:$0xff] }
 0x56a   : > { %6701 = vmatprep.mubr.bf16.mxu0 %v5976_v21  ;;  %6413 = vmatmul.mubr.bf16.gmra.mxu1 %v5973_v23  ;;  %v5210_v26 = vmul.f32 %v10906_v38, %v4932_v7  ;;  %v5214_v29 = vmul.f32 %v10906_v38, %v4936_v3  ;;  %v4933_v34 = vadd.f32 %v4604_v18, %v12850_v6  ;;  %v12852_v18 = vld [vmem:[#allocation72_spill] sm:$0xff]  ;;  %v12855_v7 = vld [vmem:[#allocation30_spill] sm:$0xff]  ;;  %v11233_v12 = vpop.f32.mrf.mxu0 }
 0x56b   : > { %v5975_v50 = vpack.c.bf16 %v5739_v4, %v5735_v27  ;;  %v5490_v61 = vadd.f32 %v10915_v43, %v5212_v47  ;;  %v5742_v51 = vmax.f32 %v5486_v30, 0.0  ;;  %v5207_v56 = vmul.f32 %v10918_v8, %v4929_v17 }
 0x56c   : > { %v5488_v10 = vadd.f32 %v10921_v2, %v5210_v26  ;;  %v5492_v53 = vadd.f32 %v10921_v2, %v5214_v29  ;;  %v5211_v42 = vmul.f32 %v10918_v8, %v4933_v34  ;;  %v4931_v13 = vadd.f32 %v11166_v44, %v12851_v28 }
 0x56d   : > { %6702 = vmatmul.mubr.bf16.gmra.mxu0 %v5975_v50  ;;  %v5746_v1 = vmax.f32 %v5490_v61, 0.0  ;;  %v5485_v16 = vadd.f32 %v10924_v54, %v5207_v56  ;;  %v4935_v58 = vadd.f32 %v11166_v44, %v12852_v18  ;;  %v4624_v60 = vrot.slane %v12853_v40, %v12809_v36  ;;  %v12856_v61 = vld [vmem:[#allocation81_spill] sm:$0xff]  ;;  %v12857_v56 = vld [vmem:[#allocation87_spill] sm:$0xff] }
 0x56e   : > { %v5744_v32 = vmax.f32 %v5488_v10, 0.0  ;;  %v5748_v46 = vmax.f32 %v5492_v53, 0.0  ;;  %v5489_v35 = vadd.f32 %v10924_v54, %v5211_v42  ;;  %v5209_v22 = vmul.f32 %v10897_v59, %v4931_v13  ;;  %v12858_v42 = vld [vmem:[#allocation29_spill] sm:$0xff] }
 0x56f   : > { %v5978_v27 = vpack.c.bf16 %v5746_v1, %v5742_v51  ;;  %v5741_v49 = vmax.f32 %v5485_v16, 0.0  ;;  %v5213_v31 = vmul.f32 %v10897_v59, %v4935_v58  ;;  %v4938_v21 = vadd.f32 %v4624_v60, %v12854_v57  ;;  %v12859_v13 = vld [vmem:[#allocation33_spill] sm:$0xff]  ;;  %v12860_v16 = vld [vmem:[#allocation78_spill] sm:$0xff] }
 0x570   : > { %v5980_v23 = vpack.c.bf16 %v5748_v46, %v5744_v32  ;;  %v5745_v14 = vmax.f32 %v5489_v35, 0.0  ;;  %v5487_v44 = vadd.f32 %v10900_v19, %v5209_v22  ;;  %v4942_v39 = vadd.f32 %v4624_v60, %v12855_v7  ;;  %v11250_v35 = vpop.f32.mrf.mxu0 }
 0x571   : > { %6420 = vmatprep.mubr.bf16.mxu1 %v5978_v27  ;;  %v5491_v3 = vadd.f32 %v10900_v19, %v5213_v31  ;;  %v5216_v4 = vmul.f32 %v10903_v24, %v4938_v21  ;;  %v4632_v47 = vrot.slane %v12853_v40, %v10894_v41  ;;  %v4620_v30 = vrot.slane %v12853_v40, %v12811_v63  ;;  %v12861_v31 = vld [vmem:[#allocation84_spill] sm:$0xff] }
 0x572   : > { %6709 = vmatprep.mubr.bf16.mxu0 %v5980_v23  ;;  %v5977_v17 = vpack.c.bf16 %v5745_v14, %v5741_v49  ;;  %v5743_v26 = vmax.f32 %v5487_v44, 0.0  ;;  %v5220_v29 = vmul.f32 %v10903_v24, %v4942_v39  ;;  %v11238_v6 = vrot.slane %v12853_v40, %v10891_v9  ;;  %v12862_v44 = vld [vmem:[#allocation36_spill] sm:$0xff]  ;;  %v11260_v39 = vpop.f32.mrf.mxu0 }
 0x573   : > { %v5747_v34 = vmax.f32 %v5491_v3, 0.0  ;;  %v5494_v50 = vadd.f32 %v10915_v43, %v5216_v4  ;;  %v4940_v51 = vadd.f32 %v4632_v47, %v12856_v61  ;;  %v4944_v10 = vadd.f32 %v4632_v47, %v12857_v56  ;;  %v12863_v61 = vld [vmem:[#allocation35_spill] sm:$0xff] }
 0x574   : > { %6421 = vmatmul.mubr.bf16.gmra.mxu1 %v5977_v17  ;;  %v5498_v53 = vadd.f32 %v10915_v43, %v5220_v29  ;;  %v4937_v28 = vadd.f32 %v4620_v30, %v12858_v42  ;;  %v4941_v1 = vadd.f32 %v4620_v30, %v12859_v13  ;;  %v4939_v18 = vadd.f32 %v11238_v6, %v12860_v16  ;;  %v12864_v16 = vld [vmem:[#allocation93_spill] sm:$0xff] }
 0x575   : > { %v5979_v58 = vpack.c.bf16 %v5747_v34, %v5743_v26  ;;  %v5750_v40 = vmax.f32 %v5494_v50, 0.0  ;;  %v5218_v32 = vmul.f32 %v10906_v38, %v4940_v51  ;;  %v5222_v46 = vmul.f32 %v10906_v38, %v4944_v10 }
 0x576   : > { %v5754_v22 = vmax.f32 %v5498_v53, 0.0  ;;  %v5215_v27 = vmul.f32 %v10918_v8, %v4937_v28  ;;  %v5219_v49 = vmul.f32 %v10918_v8, %v4941_v1  ;;  %v4943_v57 = vadd.f32 %v11238_v6, %v12861_v31  ;;  %v12866_v31 = vld [vmem:[#allocation32_spill] sm:$0xff] }
 0x577   : > { %6710 = vmatmul.mubr.bf16.gmra.mxu0 %v5979_v58  ;;  %v5496_v21 = vadd.f32 %v10921_v2, %v5218_v32  ;;  %v5500_v23 = vadd.f32 %v10921_v2, %v5222_v46  ;;  %v5217_v14 = vmul.f32 %v10897_v59, %v4939_v18  ;;  %v4946_v7 = vadd.f32 %v4624_v60, %v12862_v44  ;;  %v11271_v58 = vpop.f32.mrf.mxu0 }
 0x578   : > { %v5982_v3 = vpack.c.bf16 %v5754_v22, %v5750_v40  ;;  %v5493_v4 = vadd.f32 %v10924_v54, %v5215_v27  ;;  %v5497_v17 = vadd.f32 %v10924_v54, %v5219_v49  ;;  %v5221_v26 = vmul.f32 %v10897_v59, %v4943_v57 }
 0x579   : > { %v5752_v29 = vmax.f32 %v5496_v21, 0.0  ;;  %v5756_v34 = vmax.f32 %v5500_v23, 0.0  ;;  %v5495_v50 = vadd.f32 %v10900_v19, %v5217_v14  ;;  %v4950_v51 = vadd.f32 %v4624_v60, %v12863_v61  ;;  %v12865_v60 = vld [vmem:[#allocation99_spill] sm:$0xff]  ;;  %v12867_v21 = vld [vmem:[#allocation34_spill] sm:$0xff] }
 0x57a   : > { %6428 = vmatprep.mubr.bf16.mxu1 %v5982_v3  ;;  %v5749_v56 = vmax.f32 %v5493_v4, 0.0  ;;  %v5753_v10 = vmax.f32 %v5497_v17, 0.0  ;;  %v5499_v53 = vadd.f32 %v10900_v19, %v5221_v26  ;;  %v5224_v42 = vmul.f32 %v10903_v24, %v4946_v7  ;;  %v12868_v3 = vld [vmem:[#allocation90_spill] sm:$0xff] }
 0x57b   : > { %v5984_v28 = vpack.c.bf16 %v5756_v34, %v5752_v29  ;;  %v5751_v13 = vmax.f32 %v5495_v50, 0.0  ;;  %v5228_v1 = vmul.f32 %v10903_v24, %v4950_v51  ;;  %v4948_v18 = vadd.f32 %v4632_v47, %v12864_v16  ;;  %v11285_v34 = vpop.f32.mrf.mxu0  ;;  %v12869_v50 = vld [vmem:[#allocation96_spill] sm:$0xff] }
 0x57c   : > { %v5981_v40 = vpack.c.bf16 %v5753_v10, %v5749_v56  ;;  %v5755_v32 = vmax.f32 %v5499_v53, 0.0  ;;  %v5502_v46 = vadd.f32 %v10915_v43, %v5224_v42  ;;  %v4952_v22 = vadd.f32 %v4632_v47, %v12865_v60  ;;  %v12870_v56 = vld [vmem:[#allocation16_spill] sm:$0xff]  ;;  %v12872_v60 = vld [vmem:[#allocation41_spill] sm:$0xff] }
 0x57d   : > { %6717 = vmatprep.mubr.bf16.mxu0 %v5984_v28  ;;  %v5506_v27 = vadd.f32 %v10915_v43, %v5228_v1  ;;  %v5226_v49 = vmul.f32 %v10906_v38, %v4948_v18  ;;  %v4945_v57 = vadd.f32 %v4620_v30, %v12866_v31  ;;  %v4949_v23 = vadd.f32 %v4620_v30, %v12867_v21 }
 0x57e   : > { %6429 = vmatmul.mubr.bf16.gmra.mxu1 %v5981_v40  ;;  %v5983_v14 = vpack.c.bf16 %v5755_v32, %v5751_v13  ;;  %v5758_v44 = vmax.f32 %v5502_v46, 0.0  ;;  %v5230_v7 = vmul.f32 %v10906_v38, %v4952_v22  ;;  %v4947_v4 = vadd.f32 %v11238_v6, %v12868_v3  ;;  %v12871_v40 = vld [vmem:[#allocation37_spill] sm:$0xff] }
 0x57f   : > { %v5762_v17 = vmax.f32 %v5506_v27, 0.0  ;;  %v5504_v47 = vadd.f32 %v10921_v2, %v5226_v49  ;;  %v5223_v26 = vmul.f32 %v10918_v8, %v4945_v57  ;;  %v5227_v29 = vmul.f32 %v10918_v8, %v4949_v23  ;;  %v11301_v49 = vpop.f32.mrf.mxu0 }
 0x580   : > { %6718 = vmatmul.mubr.bf16.gmra.mxu0 %v5983_v14  ;;  %v5508_v30 = vadd.f32 %v10921_v2, %v5230_v7  ;;  %v4951_v61 = vadd.f32 %v11238_v6, %v12869_v50  ;;  %v5225_v51 = vmul.f32 %v10897_v59, %v4947_v4  ;;  %v4640_v10 = vrot.slane %v12870_v56, %v12809_v36  ;;  %v12873_v7 = vld [vmem:[#allocation105_spill] sm:$0xff]  ;;  %v12874_v4 = vld [vmem:[#allocation111_spill] sm:$0xff] }
 0x581   : > { %v5986_v53 = vpack.c.bf16 %v5762_v17, %v5758_v44  ;;  %v5760_v42 = vmax.f32 %v5504_v47, 0.0  ;;  %v5501_v28 = vadd.f32 %v10924_v54, %v5223_v26  ;;  %v5505_v13 = vadd.f32 %v10924_v54, %v5227_v29  ;;  %v12875_v29 = vld [vmem:[#allocation39_spill] sm:$0xff] }
 0x582   : > { %v5764_v1 = vmax.f32 %v5508_v30, 0.0  ;;  %v5229_v16 = vmul.f32 %v10897_v59, %v4951_v61  ;;  %v5503_v18 = vadd.f32 %v10900_v19, %v5225_v51  ;;  %v4954_v32 = vadd.f32 %v4640_v10, %v12871_v40  ;;  %v12876_v30 = vld [vmem:[#allocation194_spill] sm:$0xff] }
 0x583   : > { %6436 = vmatprep.mubr.bf16.mxu1 %v5986_v53  ;;  %v5757_v6 = vmax.f32 %v5501_v28, 0.0  ;;  %v5761_v46 = vmax.f32 %v5505_v13, 0.0  ;;  %v4958_v22 = vadd.f32 %v4640_v10, %v12872_v60  ;;  %v4648_v27 = vrot.slane %v12870_v56, %v10894_v41  ;;  %v12877_v61 = vld [vmem:[#allocation38_spill] sm:$0xff]  ;;  %v12879_v13 = vld [vmem:[#allocation195_spill] sm:$0xff] }
 0x584   : > { %v5988_v31 = vpack.c.bf16 %v5764_v1, %v5760_v42  ;;  %v5507_v57 = vadd.f32 %v10900_v19, %v5229_v16  ;;  %v5759_v21 = vmax.f32 %v5503_v18, 0.0  ;;  %v5232_v23 = vmul.f32 %v10903_v24, %v4954_v32  ;;  %v12878_v28 = vld [vmem:[#allocation102_spill] sm:$0xff]  ;;  %v11318_v16 = vpop.f32.mrf.mxu0 }
 0x585   : > { %v5985_v14 = vpack.c.bf16 %v5761_v46, %v5757_v6  ;;  %v5236_v44 = vmul.f32 %v10903_v24, %v4958_v22  ;;  %v4956_v3 = vadd.f32 %v4648_v27, %v12873_v7  ;;  %v4960_v17 = vadd.f32 %v4648_v27, %v12874_v4 }
 0x586   : > { %6725 = vmatprep.mubr.bf16.mxu0 %v5988_v31  ;;  %v5763_v47 = vmax.f32 %v5507_v57, 0.0  ;;  %v5510_v26 = vadd.f32 %v10915_v43, %v5232_v23  ;;  %v4953_v50 = vadd.f32 %v12876_v30, %v12875_v29  ;;  %v4957_v51 = vadd.f32 %v12876_v30, %v12877_v61  ;;  %v12880_v31 = vld [vmem:[#allocation108_spill] sm:$0xff] }
 0x587   : > { %6437 = vmatmul.mubr.bf16.gmra.mxu1 %v5985_v14  ;;  %v5514_v56 = vadd.f32 %v10915_v43, %v5236_v44  ;;  %v5234_v53 = vmul.f32 %v10906_v38, %v4956_v3  ;;  %v5238_v42 = vmul.f32 %v10906_v38, %v4960_v17  ;;  %v4955_v1 = vadd.f32 %v12879_v13, %v12878_v28  ;;  %v12881_v44 = vld [vmem:[#allocation40_spill] sm:$0xff] }
 0x588   : > { %v5987_v18 = vpack.c.bf16 %v5763_v47, %v5759_v21  ;;  %v5766_v40 = vmax.f32 %v5510_v26, 0.0  ;;  %v5231_v32 = vmul.f32 %v10918_v8, %v4953_v50  ;;  %v5235_v6 = vmul.f32 %v10918_v8, %v4957_v51  ;;  %v11331_v26 = vpop.f32.mrf.mxu0  ;;  %v12882_v51 = vld [vmem:[#allocation44_spill] sm:$0xff] }
 0x589   : > { %v5770_v46 = vmax.f32 %v5514_v56, 0.0  ;;  %v5512_v60 = vadd.f32 %v10921_v2, %v5234_v53  ;;  %v5516_v22 = vadd.f32 %v10921_v2, %v5238_v42  ;;  %v4959_v57 = vadd.f32 %v12879_v13, %v12880_v31 }
 0x58a   : > { %6726 = vmatmul.mubr.bf16.gmra.mxu0 %v5987_v18  ;;  %v5509_v23 = vadd.f32 %v10924_v54, %v5231_v32  ;;  %v5513_v14 = vadd.f32 %v10924_v54, %v5235_v6  ;;  %v5233_v21 = vmul.f32 %v10897_v59, %v4955_v1  ;;  %v4962_v7 = vadd.f32 %v4640_v10, %v12881_v44  ;;  %v12883_v1 = vld [vmem:[#allocation117_spill] sm:$0xff] }
 0x58b   : > { %v5990_v3 = vpack.c.bf16 %v5770_v46, %v5766_v40  ;;  %v5768_v4 = vmax.f32 %v5512_v60, 0.0  ;;  %v5772_v17 = vmax.f32 %v5516_v22, 0.0  ;;  %v5237_v47 = vmul.f32 %v10897_v59, %v4959_v57  ;;  %v12884_v46 = vld [vmem:[#allocation123_spill] sm:$0xff] }
 0x58c   : > { %v5765_v29 = vmax.f32 %v5509_v23, 0.0  ;;  %v5769_v50 = vmax.f32 %v5513_v14, 0.0  ;;  %v5511_v61 = vadd.f32 %v10900_v19, %v5233_v21  ;;  %v4966_v56 = vadd.f32 %v4640_v10, %v12882_v51  ;;  %v12885_v57 = vld [vmem:[#allocation43_spill] sm:$0xff]  ;;  %v11344_v14 = vpop.f32.mrf.mxu0 }
 0x58d   : > { %6444 = vmatprep.mubr.bf16.mxu1 %v5990_v3  ;;  %v5992_v53 = vpack.c.bf16 %v5772_v17, %v5768_v4  ;;  %v5515_v42 = vadd.f32 %v10900_v19, %v5237_v47  ;;  %v5240_v28 = vmul.f32 %v10903_v24, %v4962_v7  ;;  %v4964_v18 = vadd.f32 %v4648_v27, %v12883_v1  ;;  %v12886_v7 = vld [vmem:[#allocation42_spill] sm:$0xff] }
 0x58e   : > { %v5989_v40 = vpack.c.bf16 %v5769_v50, %v5765_v29  ;;  %v5767_v32 = vmax.f32 %v5511_v61, 0.0  ;;  %v5244_v6 = vmul.f32 %v10903_v24, %v4966_v56  ;;  %v4968_v60 = vadd.f32 %v4648_v27, %v12884_v46  ;;  %v12887_v27 = vld [vmem:[#allocation114_spill] sm:$0xff] }
 0x58f   : > { %6733 = vmatprep.mubr.bf16.mxu0 %v5992_v53  ;;  %v5771_v22 = vmax.f32 %v5515_v42, 0.0  ;;  %v5518_v31 = vadd.f32 %v10915_v43, %v5240_v28  ;;  %v5242_v10 = vmul.f32 %v10906_v38, %v4964_v18  ;;  %v4961_v23 = vadd.f32 %v12876_v30, %v12885_v57  ;;  %v12888_v53 = vld [vmem:[#allocation120_spill] sm:$0xff]  ;;  %v12890_v57 = vld [vmem:[#allocation46_spill] sm:$0xff] }
 0x590   : > { %6445 = vmatmul.mubr.bf16.gmra.mxu1 %v5989_v40  ;;  %v5522_v21 = vadd.f32 %v10915_v43, %v5244_v6  ;;  %v5246_v44 = vmul.f32 %v10906_v38, %v4968_v60  ;;  %v4965_v3 = vadd.f32 %v12876_v30, %v12886_v7  ;;  %v4963_v4 = vadd.f32 %v12879_v13, %v12887_v27  ;;  %v11362_v40 = vpop.f32.mrf.mxu0 }
 0x591   : > { %v5991_v17 = vpack.c.bf16 %v5771_v22, %v5767_v32  ;;  %v5774_v47 = vmax.f32 %v5518_v31, 0.0  ;;  %v5520_v29 = vadd.f32 %v10921_v2, %v5242_v10  ;;  %v5239_v50 = vmul.f32 %v10918_v8, %v4961_v23  ;;  %v12889_v31 = vld [vmem:[#allocation48_spill] sm:$0xff] }
 0x592   : > { %v5778_v61 = vmax.f32 %v5522_v21, 0.0  ;;  %v5524_v51 = vadd.f32 %v10921_v2, %v5246_v44  ;;  %v5243_v56 = vmul.f32 %v10918_v8, %v4965_v3  ;;  %v4967_v42 = vadd.f32 %v12879_v13, %v12888_v53  ;;  %v12893_v53 = vld [vmem:[#allocation129_spill] sm:$0xff] }
 0x593   : > { %6734 = vmatmul.mubr.bf16.gmra.mxu0 %v5991_v17  ;;  %v5776_v28 = vmax.f32 %v5520_v29, 0.0  ;;  %v5517_v30 = vadd.f32 %v10924_v54, %v5239_v50  ;;  %v5241_v1 = vmul.f32 %v10897_v59, %v4963_v4  ;;  %v4656_v18 = vrot.slane %v10934_v15, %v12809_v36  ;;  %v12892_v29 = vld [vmem:[#allocation196_spill] sm:$0xff] }
 0x594   : > { %v5994_v32 = vpack.c.bf16 %v5778_v61, %v5774_v47  ;;  %v5780_v6 = vmax.f32 %v5524_v51, 0.0  ;;  %v5521_v46 = vadd.f32 %v10924_v54, %v5243_v56  ;;  %v5245_v60 = vmul.f32 %v10897_v59, %v4967_v42  ;;  %v12891_v47 = vld [vmem:[#allocation45_spill] sm:$0xff]  ;;  %v11376_v61 = vpop.f32.mrf.mxu0 }
 0x595   : > { %v5773_v22 = vmax.f32 %v5517_v30, 0.0  ;;  %v5519_v13 = vadd.f32 %v10900_v19, %v5241_v1  ;;  %v4970_v10 = vadd.f32 %v4656_v18, %v12889_v31  ;;  %v4974_v23 = vadd.f32 %v4656_v18, %v12890_v57  ;;  %v12896_v31 = vld [vmem:[#allocation126_spill] sm:$0xff] }
 0x596   : > { %6452 = vmatprep.mubr.bf16.mxu1 %v5994_v32  ;;  %v5996_v21 = vpack.c.bf16 %v5780_v6, %v5776_v28  ;;  %v5777_v44 = vmax.f32 %v5521_v46, 0.0  ;;  %v5523_v7 = vadd.f32 %v10900_v19, %v5245_v60  ;;  %v4664_v3 = vrot.slane %v10934_v15, %v10894_v41  ;;  %v12894_v28 = vld [vmem:[#allocation135_spill] sm:$0xff]  ;;  %v12895_v32 = vld [vmem:[#allocation49_spill] sm:$0xff] }
 0x597   : > { %v5775_v27 = vmax.f32 %v5519_v13, 0.0  ;;  %v5248_v4 = vmul.f32 %v10903_v24, %v4970_v10  ;;  %v5252_v17 = vmul.f32 %v10903_v24, %v4974_v23  ;;  %v4969_v50 = vadd.f32 %v12892_v29, %v12891_v47  ;;  %v12897_v10 = vld [vmem:[#allocation197_spill] sm:$0xff]  ;;  %v12898_v47 = vld [vmem:[#allocation132_spill] sm:$0xff] }
 0x598   : > { %6741 = vmatprep.mubr.bf16.mxu0 %v5996_v21  ;;  %v5993_v51 = vpack.c.bf16 %v5777_v44, %v5773_v22  ;;  %v5779_v56 = vmax.f32 %v5523_v7, 0.0  ;;  %v4972_v42 = vadd.f32 %v4664_v3, %v12893_v53  ;;  %v4976_v30 = vadd.f32 %v4664_v3, %v12894_v28  ;;  %v12899_v28 = vld [vmem:[#allocation51_spill] sm:$0xff] }
 0x599   : > { %v5526_v1 = vadd.f32 %v10915_v43, %v5248_v4  ;;  %v5530_v15 = vadd.f32 %v10915_v43, %v5252_v17  ;;  %v4973_v6 = vadd.f32 %v12892_v29, %v12895_v32  ;;  %v5247_v46 = vmul.f32 %v10918_v8, %v4969_v50  ;;  %v11391_v4 = vpop.f32.mrf.mxu0 }
 0x59a   : > { %6453 = vmatmul.mubr.bf16.gmra.mxu1 %v5993_v51  ;;  %v5995_v60 = vpack.c.bf16 %v5779_v56, %v5775_v27  ;;  %v5250_v13 = vmul.f32 %v10906_v38, %v4972_v42  ;;  %v5254_v22 = vmul.f32 %v10906_v38, %v4976_v30  ;;  %v4971_v57 = vadd.f32 %v12897_v10, %v12896_v31  ;;  %v12901_v31 = vld [vmem:[#allocation141_spill] sm:$0xff] }
 0x59b   : > { %v5782_v23 = vmax.f32 %v5526_v1, 0.0  ;;  %v5786_v21 = vmax.f32 %v5530_v15, 0.0  ;;  %v5251_v44 = vmul.f32 %v10918_v8, %v4973_v6  ;;  %v5525_v7 = vadd.f32 %v10924_v54, %v5247_v46 }
 0x59c   : > { %6742 = vmatmul.mubr.bf16.gmra.mxu0 %v5995_v60  ;;  %v5528_v17 = vadd.f32 %v10921_v2, %v5250_v13  ;;  %v5532_v27 = vadd.f32 %v10921_v2, %v5254_v22  ;;  %v4975_v50 = vadd.f32 %v12897_v10, %v12898_v47  ;;  %v5249_v51 = vmul.f32 %v10897_v59, %v4971_v57  ;;  %v12900_v60 = vld [vmem:[#allocation50_spill] sm:$0xff] }
 0x59d   : > { %v5998_v56 = vpack.c.bf16 %v5786_v21, %v5782_v23  ;;  %v5529_v53 = vadd.f32 %v10924_v54, %v5251_v44  ;;  %v5781_v42 = vmax.f32 %v5525_v7, 0.0  ;;  %v4978_v30 = vadd.f32 %v4656_v18, %v12899_v28  ;;  %v11405_v23 = vpop.f32.mrf.mxu0  ;;  %v12904_v28 = vld [vmem:[#allocation47_spill] sm:$0xff] }
 0x59e   : > { %v5784_v1 = vmax.f32 %v5528_v17, 0.0  ;;  %v5788_v15 = vmax.f32 %v5532_v27, 0.0  ;;  %v5253_v32 = vmul.f32 %v10897_v59, %v4975_v50  ;;  %v5527_v6 = vadd.f32 %v10900_v19, %v5249_v51  ;;  %12902 = vst [vmem:[#allocation19_spill] sm:$0xff] %v11405_v23  ;;  %v12903_v17 = vld [vmem:[#allocation147_spill] sm:$0xff] }
 0x59f   : > { %6460 = vmatprep.mubr.bf16.mxu1 %v5998_v56  ;;  %v5785_v46 = vmax.f32 %v5529_v53, 0.0  ;;  %v4982_v13 = vadd.f32 %v4656_v18, %v12900_v60  ;;  %v5256_v22 = vmul.f32 %v10903_v24, %v4978_v30  ;;  %v4980_v57 = vadd.f32 %v4664_v3, %v12901_v31  ;;  %v11421_v60 = vpop.f32.mrf.mxu0 }
 0x5a0   : > { %v6000_v21 = vpack.c.bf16 %v5788_v15, %v5784_v1  ;;  %v5531_v44 = vadd.f32 %v10900_v19, %v5253_v32  ;;  %v5783_v7 = vmax.f32 %v5527_v6, 0.0  ;;  %v4984_v27 = vadd.f32 %v4664_v3, %v12903_v17  ;;  %v12905_v1 = vld [vmem:[#allocation53_spill] sm:$0xff]  ;;  %v12906_v6 = vld [vmem:[#allocation138_spill] sm:$0xff] }
 0x5a1   : > { %v5997_v47 = vpack.c.bf16 %v5785_v46, %v5781_v42  ;;  %v5260_v50 = vmul.f32 %v10903_v24, %v4982_v13  ;;  %v5534_v51 = vadd.f32 %v10915_v43, %v5256_v22  ;;  %v5258_v56 = vmul.f32 %v10906_v38, %v4980_v57 }
 0x5a2   : > { %6749 = vmatprep.mubr.bf16.mxu0 %v6000_v21  ;;  %v5787_v18 = vmax.f32 %v5531_v44, 0.0  ;;  %v5262_v53 = vmul.f32 %v10906_v38, %v4984_v27  ;;  %v4977_v30 = vadd.f32 %v12892_v29, %v12904_v28  ;;  %v4981_v15 = vadd.f32 %v12892_v29, %v12905_v1  ;;  %v12907_v44 = vld [vmem:[#allocation144_spill] sm:$0xff] }
 0x5a3   : > { %6461 = vmatmul.mubr.bf16.gmra.mxu1 %v5997_v47  ;;  %v5538_v3 = vadd.f32 %v10915_v43, %v5260_v50  ;;  %v5790_v42 = vmax.f32 %v5534_v51, 0.0  ;;  %v5536_v32 = vadd.f32 %v10921_v2, %v5258_v56  ;;  %v4979_v46 = vadd.f32 %v12897_v10, %v12906_v6 }
 0x5a4   : > { %v5999_v13 = vpack.c.bf16 %v5787_v18, %v5783_v7  ;;  %v5540_v22 = vadd.f32 %v10921_v2, %v5262_v53  ;;  %v5255_v31 = vmul.f32 %v10918_v8, %v4977_v30  ;;  %v5259_v57 = vmul.f32 %v10918_v8, %v4981_v15  ;;  %v12908_v7 = vld [vmem:[#allocation191_spill] sm:$0xff] }
 0x5a5   : > { %v5794_v21 = vmax.f32 %v5538_v3, 0.0  ;;  %v5792_v29 = vmax.f32 %v5536_v32, 0.0  ;;  %v4983_v17 = vadd.f32 %v12897_v10, %v12907_v44  ;;  %v5257_v27 = vmul.f32 %v10897_v59, %v4979_v46  ;;  %v11437_v10 = vpop.f32.mrf.mxu0  ;;  %v12910_v32 = vld [vmem:[#allocation57_spill] sm:$0xff] }
 0x5a6   : > { %6750 = vmatmul.mubr.bf16.gmra.mxu0 %v5999_v13  ;;  %v5796_v47 = vmax.f32 %v5540_v22, 0.0  ;;  %v5533_v50 = vadd.f32 %v10924_v54, %v5255_v31  ;;  %v5537_v51 = vadd.f32 %v10924_v54, %v5259_v57  ;;  %v4672_v56 = vrot.slane %v12908_v7, %v12809_v36  ;;  %12909 = vst [vmem:[#allocation20_spill] sm:$0xff] %v11437_v10  ;;  %v12911_v22 = vld [vmem:[#allocation58_spill] sm:$0xff]  ;;  %v12912_v31 = vld [vmem:[#allocation153_spill] sm:$0xff] }
 0x5a7   : > { %v6002_v18 = vpack.c.bf16 %v5794_v21, %v5790_v42  ;;  %v5261_v53 = vmul.f32 %v10897_v59, %v4983_v17  ;;  %v5535_v28 = vadd.f32 %v10900_v19, %v5257_v27  ;;  %v4680_v30 = vrot.slane %v12908_v7, %v10894_v41  ;;  %v12913_v17 = vld [vmem:[#allocation159_spill] sm:$0xff] }
 0x5a8   : > { %v6004_v1 = vpack.c.bf16 %v5796_v47, %v5792_v29  ;;  %v5789_v15 = vmax.f32 %v5533_v50, 0.0  ;;  %v5793_v3 = vmax.f32 %v5537_v51, 0.0  ;;  %v4986_v6 = vadd.f32 %v4672_v56, %v12910_v32  ;;  %v12916_v32 = vld [vmem:[#allocation54_spill] sm:$0xff] }
 0x5a9   : > { %6468 = vmatprep.mubr.bf16.mxu1 %v6002_v18  ;;  %v5539_v46 = vadd.f32 %v10900_v19, %v5261_v53  ;;  %v5791_v13 = vmax.f32 %v5535_v28, 0.0  ;;  %v4990_v42 = vadd.f32 %v4672_v56, %v12911_v22  ;;  %v4988_v57 = vadd.f32 %v4680_v30, %v12912_v31  ;;  %v11451_v53 = vpop.f32.mrf.mxu0  ;;  %v12917_v31 = vld [vmem:[#allocation150_spill] sm:$0xff] }
 0x5aa   : > { %6757 = vmatprep.mubr.bf16.mxu0 %v6004_v1  ;;  %v6001_v21 = vpack.c.bf16 %v5793_v3, %v5789_v15  ;;  %v5264_v44 = vmul.f32 %v10903_v24, %v4986_v6  ;;  %v4992_v27 = vadd.f32 %v4680_v30, %v12913_v17  ;;  %v4668_v29 = vrot.slane %v12908_v7, %v12811_v63  ;;  %v12915_v15 = vld [vmem:[#allocation52_spill] sm:$0xff] }
 0x5ab   : > { %v5795_v47 = vmax.f32 %v5539_v46, 0.0  ;;  %v5268_v50 = vmul.f32 %v10903_v24, %v4990_v42  ;;  %v5266_v51 = vmul.f32 %v10906_v38, %v4988_v57  ;;  %v4676_v18 = vrot.slane %v12908_v7, %v10891_v9  ;;  %12914 = vst [vmem:[#allocation18_spill] sm:$0xff] %v11451_v53 }
 0x5ac   : > { %6469 = vmatmul.mubr.bf16.gmra.mxu1 %v6001_v21  ;;  %v5542_v28 = vadd.f32 %v10915_v43, %v5264_v44  ;;  %v5270_v1 = vmul.f32 %v10906_v38, %v4992_v27  ;;  %v4985_v3 = vadd.f32 %v4668_v29, %v12915_v15  ;;  %v4989_v6 = vadd.f32 %v4668_v29, %v12916_v32  ;;  %v12918_v15 = vld [vmem:[#allocation156_spill] sm:$0xff]  ;;  %v12920_v32 = vld [vmem:[#allocation61_spill] sm:$0xff] }
 0x5ad   : > { %v6003_v22 = vpack.c.bf16 %v5795_v47, %v5791_v13  ;;  %v5546_v46 = vadd.f32 %v10915_v43, %v5268_v50  ;;  %v5544_v42 = vadd.f32 %v10921_v2, %v5266_v51  ;;  %v4987_v57 = vadd.f32 %v4676_v18, %v12917_v31  ;;  %v11465_v47 = vpop.f32.mrf.mxu0 }
 0x5ae   : > { %v5798_v17 = vmax.f32 %v5542_v28, 0.0  ;;  %v5548_v7 = vadd.f32 %v10921_v2, %v5270_v1  ;;  %v5263_v21 = vmul.f32 %v10918_v8, %v4985_v3  ;;  %v5267_v44 = vmul.f32 %v10918_v8, %v4989_v6  ;;  %12919 = vst [vmem:[#allocation190_spill] sm:$0xff] %v11465_v47  ;;  %v12922_v47 = vld [vmem:[#allocation165_spill] sm:$0xff] }
 0x5af   : > { %6758 = vmatmul.mubr.bf16.gmra.mxu0 %v6003_v22  ;;  %v5802_v27 = vmax.f32 %v5546_v46, 0.0  ;;  %v5800_v10 = vmax.f32 %v5544_v42, 0.0  ;;  %v4991_v53 = vadd.f32 %v4676_v18, %v12918_v15  ;;  %v5265_v13 = vmul.f32 %v10897_v59, %v4987_v57  ;;  %v12921_v22 = vld [vmem:[#allocation64_spill] sm:$0xff] }
 0x5b0   : > { %v5804_v50 = vmax.f32 %v5548_v7, 0.0  ;;  %v5541_v51 = vadd.f32 %v10924_v54, %v5263_v21  ;;  %v5545_v28 = vadd.f32 %v10924_v54, %v5267_v44  ;;  %v4994_v1 = vadd.f32 %v4672_v56, %v12920_v32 }
 0x5b1   : > { %v6006_v31 = vpack.c.bf16 %v5802_v27, %v5798_v17  ;;  %v5269_v3 = vmul.f32 %v10897_v59, %v4991_v53  ;;  %v5543_v6 = vadd.f32 %v10900_v19, %v5265_v13  ;;  %v4998_v46 = vadd.f32 %v4672_v56, %v12921_v22  ;;  %v11477_v17 = vpop.f32.mrf.mxu0  ;;  %v12924_v56 = vld [vmem:[#allocation171_spill] sm:$0xff] }
 0x5b2   : > { %v6008_v42 = vpack.c.bf16 %v5804_v50, %v5800_v10  ;;  %v5797_v15 = vmax.f32 %v5541_v51, 0.0  ;;  %v5801_v23 = vmax.f32 %v5545_v28, 0.0  ;;  %v5272_v57 = vmul.f32 %v10903_v24, %v4994_v1  ;;  %12923 = vst [vmem:[#allocation24_spill] sm:$0xff] %v11477_v17  ;;  %v12925_v13 = vld [vmem:[#allocation59_spill] sm:$0xff]  ;;  %v12945_v17 = vld [vmem:[#allocation180_spill] sm:$0xff] }
 0x5b3   : > { %6476 = vmatprep.mubr.bf16.mxu1 %v6006_v31  ;;  %v5547_v7 = vadd.f32 %v10900_v19, %v5269_v3  ;;  %v5799_v21 = vmax.f32 %v5543_v6, 0.0  ;;  %v5276_v44 = vmul.f32 %v10903_v24, %v4998_v46  ;;  %v4996_v32 = vadd.f32 %v4680_v30, %v12922_v47  ;;  %v12926_v31 = vld [vmem:[#allocation62_spill] sm:$0xff] }
 0x5b4   : > { %6765 = vmatprep.mubr.bf16.mxu0 %v6008_v42  ;;  %v6005_v53 = vpack.c.bf16 %v5801_v23, %v5797_v15  ;;  %v5550_v27 = vadd.f32 %v10915_v43, %v5272_v57  ;;  %v5000_v10 = vadd.f32 %v4680_v30, %v12924_v56  ;;  %v4993_v50 = vadd.f32 %v4668_v29, %v12925_v13  ;;  %v12927_v23 = vld [vmem:[#allocation162_spill] sm:$0xff]  ;;  %v12930_v13 = vld [vmem:[#allocation193_spill] sm:$0xff] }
 0x5b5   : > { %v5803_v51 = vmax.f32 %v5547_v7, 0.0  ;;  %v5554_v28 = vadd.f32 %v10915_v43, %v5276_v44  ;;  %v5274_v1 = vmul.f32 %v10906_v38, %v4996_v32  ;;  %v4997_v3 = vadd.f32 %v4668_v29, %v12926_v31  ;;  %v11490_v7 = vpop.f32.mrf.mxu0  ;;  %v12929_v32 = vld [vmem:[#allocation168_spill] sm:$0xff] }
 0x5b6   : > { %6477 = vmatmul.mubr.bf16.gmra.mxu1 %v6005_v53  ;;  %v5806_v6 = vmax.f32 %v5550_v27, 0.0  ;;  %v5278_v47 = vmul.f32 %v10906_v38, %v5000_v10  ;;  %v5271_v22 = vmul.f32 %v10918_v8, %v4993_v50  ;;  %v4995_v46 = vadd.f32 %v4676_v18, %v12927_v23  ;;  %12928 = vst [vmem:[#allocation23_spill] sm:$0xff] %v11490_v7 }
 0x5b7   : > { %v6007_v42 = vpack.c.bf16 %v5803_v51, %v5799_v21  ;;  %v5810_v15 = vmax.f32 %v5554_v28, 0.0  ;;  %v5552_v30 = vadd.f32 %v10921_v2, %v5274_v1  ;;  %v5275_v57 = vmul.f32 %v10918_v8, %v4997_v3 }
 0x5b8   : > { %v5556_v44 = vadd.f32 %v10921_v2, %v5278_v47  ;;  %v5549_v29 = vadd.f32 %v10924_v54, %v5271_v22  ;;  %v4999_v53 = vadd.f32 %v4676_v18, %v12929_v32  ;;  %v5273_v27 = vmul.f32 %v10897_v59, %v4995_v46  ;;  %v12931_v47 = vld [vmem:[#allocation67_spill] sm:$0xff]  ;;  %v12932_v22 = vld [vmem:[#allocation70_spill] sm:$0xff]  ;;  %v11505_v46 = vpop.f32.mrf.mxu0 }
 0x5b9   : > { %6766 = vmatmul.mubr.bf16.gmra.mxu0 %v6007_v42  ;;  %v6010_v56 = vpack.c.bf16 %v5810_v15, %v5806_v6  ;;  %v5808_v10 = vmax.f32 %v5552_v30, 0.0  ;;  %v5553_v21 = vadd.f32 %v10924_v54, %v5275_v57  ;;  %v4688_v50 = vrot.slane %v12930_v13, %v12809_v36  ;;  %12933 = vst [vmem:[#allocation55_spill] sm:$0xff] %v11505_v46 }
 0x5ba   : > { %v5812_v51 = vmax.f32 %v5556_v44, 0.0  ;;  %v5805_v28 = vmax.f32 %v5549_v29, 0.0  ;;  %v5277_v1 = vmul.f32 %v10897_v59, %v4999_v53  ;;  %v5551_v31 = vadd.f32 %v10900_v19, %v5273_v27  ;;  %v12934_v53 = vld [vmem:[#allocation174_spill] sm:$0xff] }
 0x5bb   : > { %6484 = vmatprep.mubr.bf16.mxu1 %v6010_v56  ;;  %v5809_v3 = vmax.f32 %v5553_v21, 0.0  ;;  %v5002_v18 = vadd.f32 %v4688_v50, %v12931_v47  ;;  %v5006_v23 = vadd.f32 %v4688_v50, %v12932_v22  ;;  %v4696_v6 = vrot.slane %v12930_v13, %v10894_v41  ;;  %v12935_v21 = vld [vmem:[#allocation176_spill] sm:$0xff]  ;;  %v12936_v22 = vld [vmem:[#allocation65_spill] sm:$0xff] }
 0x5bc   : > { %v6012_v42 = vpack.c.bf16 %v5812_v51, %v5808_v10  ;;  %v5555_v15 = vadd.f32 %v10900_v19, %v5277_v1  ;;  %v5807_v30 = vmax.f32 %v5551_v31, 0.0  ;;  %v4684_v57 = vrot.slane %v12930_v13, %v12811_v63  ;;  %v12937_v10 = vld [vmem:[#allocation68_spill] sm:$0xff] }
 0x5bd   : > { %v6009_v44 = vpack.c.bf16 %v5809_v3, %v5805_v28  ;;  %v5280_v29 = vmul.f32 %v10903_v24, %v5002_v18  ;;  %v5284_v32 = vmul.f32 %v10903_v24, %v5006_v23  ;;  %v5004_v27 = vadd.f32 %v4696_v6, %v12934_v53  ;;  %v11521_v18 = vpop.f32.mrf.mxu0 }
 0x5be   : > { %6773 = vmatprep.mubr.bf16.mxu0 %v6012_v42  ;;  %v5811_v56 = vmax.f32 %v5555_v15, 0.0  ;;  %v5008_v47 = vadd.f32 %v4696_v6, %v12935_v21  ;;  %v5001_v7 = vadd.f32 %v4684_v57, %v12936_v22  ;;  %v5005_v51 = vadd.f32 %v4684_v57, %v12937_v10  ;;  %12938 = vst [vmem:[#allocation63_spill] sm:$0xff] %v11521_v18  ;;  %v12939_v22 = vld [vmem:[#allocation173_spill] sm:$0xff] }
 0x5bf   : > { %6485 = vmatmul.mubr.bf16.gmra.mxu1 %v6009_v44  ;;  %v5558_v1 = vadd.f32 %v10915_v43, %v5280_v29  ;;  %v5562_v31 = vadd.f32 %v10915_v43, %v5284_v32  ;;  %v5282_v28 = vmul.f32 %v10906_v38, %v5004_v27  ;;  %v4692_v3 = vrot.slane %v12930_v13, %v10891_v9 }
 0x5c0   : > { %v6011_v23 = vpack.c.bf16 %v5811_v56, %v5807_v30  ;;  %v5286_v42 = vmul.f32 %v10906_v38, %v5008_v47  ;;  %v5279_v15 = vmul.f32 %v10918_v8, %v5001_v7  ;;  %v5283_v53 = vmul.f32 %v10918_v8, %v5005_v51  ;;  %v12940_v30 = vld [vmem:[#allocation175_spill] sm:$0xff]  ;;  %v12941_v51 = vld [vmem:[#allocation73_spill] sm:$0xff] }
 0x5c1   : > { %v5814_v21 = vmax.f32 %v5558_v1, 0.0  ;;  %v5818_v44 = vmax.f32 %v5562_v31, 0.0  ;;  %v5560_v29 = vadd.f32 %v10921_v2, %v5282_v28  ;;  %v5003_v32 = vadd.f32 %v4692_v3, %v12939_v22  ;;  %v11534_v31 = vpop.f32.mrf.mxu0 }
 0x5c2   : > { %6774 = vmatmul.mubr.bf16.gmra.mxu0 %v6011_v23  ;;  %v5564_v27 = vadd.f32 %v10921_v2, %v5286_v42  ;;  %v5557_v13 = vadd.f32 %v10924_v54, %v5279_v15  ;;  %v5561_v10 = vadd.f32 %v10924_v54, %v5283_v53  ;;  %v5007_v56 = vadd.f32 %v4692_v3, %v12940_v30  ;;  %v12943_v15 = vld [vmem:[#allocation76_spill] sm:$0xff] }
 0x5c3   : > { %v6014_v47 = vpack.c.bf16 %v5818_v44, %v5814_v21  ;;  %v5816_v18 = vmax.f32 %v5560_v29, 0.0  ;;  %v5281_v7 = vmul.f32 %v10897_v59, %v5003_v32  ;;  %v5010_v1 = vadd.f32 %v4688_v50, %v12941_v51  ;;  %12942 = vst [vmem:[#allocation22_spill] sm:$0xff] %v11534_v31  ;;  %v12944_v21 = vld [vmem:[#allocation178_spill] sm:$0xff] }
 0x5c4   : > { %v5820_v28 = vmax.f32 %v5564_v27, 0.0  ;;  %v5813_v46 = vmax.f32 %v5557_v13, 0.0  ;;  %v5817_v22 = vmax.f32 %v5561_v10, 0.0  ;;  %v5285_v23 = vmul.f32 %v10897_v59, %v5007_v56 }
 0x5c5   : > { %6492 = vmatprep.mubr.bf16.mxu1 %v6014_v47  ;;  %v5559_v42 = vadd.f32 %v10900_v19, %v5281_v7  ;;  %v5014_v53 = vadd.f32 %v4688_v50, %v12943_v15  ;;  %v5288_v30 = vmul.f32 %v10903_v24, %v5010_v1  ;;  %v5012_v44 = vadd.f32 %v4696_v6, %v12944_v21  ;;  %v11546_v47 = vpop.f32.mrf.mxu0  ;;  %v12948_v1 = vld [vmem:[#allocation74_spill] sm:$0xff] }
 0x5c6   : > { %v6016_v29 = vpack.c.bf16 %v5820_v28, %v5816_v18  ;;  %v6013_v32 = vpack.c.bf16 %v5817_v22, %v5813_v46  ;;  %v5563_v51 = vadd.f32 %v10900_v19, %v5285_v23  ;;  %v5016_v31 = vadd.f32 %v4696_v6, %v12945_v17  ;;  %12946 = vst [vmem:[#allocation21_spill] sm:$0xff] %v11546_v47  ;;  %v12947_v18 = vld [vmem:[#allocation71_spill] sm:$0xff]  ;;  %v12949_v23 = vld [vmem:[#allocation177_spill] sm:$0xff] }
 0x5c7   : > { %v5815_v27 = vmax.f32 %v5559_v42, 0.0  ;;  %v5292_v13 = vmul.f32 %v10903_v24, %v5014_v53  ;;  %v5566_v10 = vadd.f32 %v10915_v43, %v5288_v30  ;;  %v5290_v56 = vmul.f32 %v10906_v38, %v5012_v44  ;;  %v12963_v47 = vld [vmem:[#allocation85_spill] sm:$0xff] }
 0x5c8   : > { %6781 = vmatprep.mubr.bf16.mxu0 %v6016_v29  ;;  %6493 = vmatmul.mubr.bf16.gmra.mxu1 %v6013_v32  ;;  %v5819_v50 = vmax.f32 %v5563_v51, 0.0  ;;  %v5294_v7 = vmul.f32 %v10906_v38, %v5016_v31  ;;  %v5009_v46 = vadd.f32 %v4684_v57, %v12947_v18  ;;  %v5013_v28 = vadd.f32 %v4684_v57, %v12948_v1  ;;  %v12950_v29 = vld [vmem:[#allocation179_spill] sm:$0xff]  ;;  %v11559_v51 = vpop.f32.mrf.mxu0 }
 0x5c9   : > { %v5570_v17 = vadd.f32 %v10915_v43, %v5292_v13  ;;  %v5822_v6 = vmax.f32 %v5566_v10, 0.0  ;;  %v5568_v22 = vadd.f32 %v10921_v2, %v5290_v56  ;;  %v5011_v42 = vadd.f32 %v4692_v3, %v12949_v23  ;;  %12951 = vst [vmem:[#allocation56_spill] sm:$0xff] %v11559_v51  ;;  %v12952_v56 = vld [vmem:[#allocation199_spill] sm:$0xff] }
 0x5ca   : > { %v6015_v15 = vpack.c.bf16 %v5819_v50, %v5815_v27  ;;  %v5572_v53 = vadd.f32 %v10921_v2, %v5294_v7  ;;  %v5287_v30 = vmul.f32 %v10918_v8, %v5009_v46  ;;  %v5291_v21 = vmul.f32 %v10918_v8, %v5013_v28 }
 0x5cb   : > { %v5826_v44 = vmax.f32 %v5570_v17, 0.0  ;;  %v5824_v31 = vmax.f32 %v5568_v22, 0.0  ;;  %v5015_v32 = vadd.f32 %v4692_v3, %v12950_v29  ;;  %v5289_v57 = vmul.f32 %v10897_v59, %v5011_v42  ;;  %v12953_v22 = vld [vmem:[#allocation79_spill] sm:$0xff] }
 0x5cc   : > { %6782 = vmatmul.mubr.bf16.gmra.mxu0 %v6015_v15  ;;  %v5828_v13 = vmax.f32 %v5572_v53, 0.0  ;;  %v5565_v10 = vadd.f32 %v10924_v54, %v5287_v30  ;;  %v5569_v27 = vadd.f32 %v10924_v54, %v5291_v21  ;;  %v4704_v50 = vrot.slane %v12952_v56, %v12809_v36  ;;  %v12954_v53 = vld [vmem:[#allocation82_spill] sm:$0xff] }
 0x5cd   : > { %v6018_v7 = vpack.c.bf16 %v5826_v44, %v5822_v6  ;;  %v5293_v18 = vmul.f32 %v10897_v59, %v5015_v32  ;;  %v5567_v46 = vadd.f32 %v10900_v19, %v5289_v57  ;;  %v4712_v3 = vrot.slane %v12952_v56, %v10894_v41  ;;  %v12955_v21 = vld [vmem:[#allocation182_spill] sm:$0xff]  ;;  %v11573_v44 = vpop.f32.mrf.mxu0  ;;  %v12957_v57 = vld [vmem:[#allocation184_spill] sm:$0xff] }
 0x5ce   : > { %v6020_v1 = vpack.c.bf16 %v5828_v13, %v5824_v31  ;;  %v5821_v28 = vmax.f32 %v5565_v10, 0.0  ;;  %v5825_v17 = vmax.f32 %v5569_v27, 0.0  ;;  %v5018_v23 = vadd.f32 %v4704_v50, %v12953_v22  ;;  %12956 = vst [vmem:[#allocation60_spill] sm:$0xff] %v11573_v44  ;;  %v12959_v22 = vld [vmem:[#allocation80_spill] sm:$0xff] }
 0x5cf   : > { %6500 = vmatprep.mubr.bf16.mxu1 %v6018_v7  ;;  %v5571_v42 = vadd.f32 %v10900_v19, %v5293_v18  ;;  %v5823_v15 = vmax.f32 %v5567_v46, 0.0  ;;  %v5022_v30 = vadd.f32 %v4704_v50, %v12954_v53  ;;  %v5020_v6 = vadd.f32 %v4712_v3, %v12955_v21 }
 0x5d0   : > { %6789 = vmatprep.mubr.bf16.mxu0 %v6020_v1  ;;  %v6017_v29 = vpack.c.bf16 %v5825_v17, %v5821_v28  ;;  %v5296_v32 = vmul.f32 %v10903_v24, %v5018_v23  ;;  %v5024_v31 = vadd.f32 %v4712_v3, %v12957_v57  ;;  %v4700_v13 = vrot.slane %v12952_v56, %v12811_v63  ;;  %v12958_v28 = vld [vmem:[#allocation77_spill] sm:$0xff] }
 0x5d1   : > { %v5827_v10 = vmax.f32 %v5571_v42, 0.0  ;;  %v5300_v27 = vmul.f32 %v10903_v24, %v5022_v30  ;;  %v5298_v7 = vmul.f32 %v10906_v38, %v5020_v6  ;;  %v4708_v18 = vrot.slane %v12952_v56, %v10891_v9  ;;  %v12960_v30 = vld [vmem:[#allocation181_spill] sm:$0xff]  ;;  %v11590_v6 = vpop.f32.mrf.mxu0 }
 0x5d2   : > { %6501 = vmatmul.mubr.bf16.gmra.mxu1 %v6017_v29  ;;  %v5574_v46 = vadd.f32 %v10915_v43, %v5296_v32  ;;  %v5302_v1 = vmul.f32 %v10906_v38, %v5024_v31  ;;  %v5017_v17 = vadd.f32 %v4700_v13, %v12958_v28  ;;  %v5021_v23 = vadd.f32 %v4700_v13, %v12959_v22  ;;  %v12962_v22 = vld [vmem:[#allocation183_spill] sm:$0xff] }
 0x5d3   : > { %v6019_v53 = vpack.c.bf16 %v5827_v10, %v5823_v15  ;;  %v5578_v21 = vadd.f32 %v10915_v43, %v5300_v27  ;;  %v5576_v42 = vadd.f32 %v10921_v2, %v5298_v7  ;;  %v5019_v57 = vadd.f32 %v4708_v18, %v12960_v30  ;;  %12961 = vst [vmem:[#allocation28_spill] sm:$0xff] %v11590_v6 }
 0x5d4   : > { %v5830_v44 = vmax.f32 %v5574_v46, 0.0  ;;  %v5580_v56 = vadd.f32 %v10921_v2, %v5302_v1  ;;  %v5295_v29 = vmul.f32 %v10918_v8, %v5017_v17  ;;  %v5299_v32 = vmul.f32 %v10918_v8, %v5021_v23  ;;  %v12964_v23 = vld [vmem:[#allocation88_spill] sm:$0xff] }
 0x5d5   : > { %6790 = vmatmul.mubr.bf16.gmra.mxu0 %v6019_v53  ;;  %v5834_v31 = vmax.f32 %v5578_v21, 0.0  ;;  %v5832_v28 = vmax.f32 %v5576_v42, 0.0  ;;  %v5023_v15 = vadd.f32 %v4708_v18, %v12962_v22  ;;  %v5297_v10 = vmul.f32 %v10897_v59, %v5019_v57  ;;  %v11603_v21 = vpop.f32.mrf.mxu0 }
 0x5d6   : > { %v5836_v27 = vmax.f32 %v5580_v56, 0.0  ;;  %v5573_v7 = vadd.f32 %v10924_v54, %v5295_v29  ;;  %v5577_v30 = vadd.f32 %v10924_v54, %v5299_v32  ;;  %v5026_v46 = vadd.f32 %v4704_v50, %v12963_v47  ;;  %12965 = vst [vmem:[#allocation26_spill] sm:$0xff] %v11603_v21 }
 0x5d7   : > { %v6022_v6 = vpack.c.bf16 %v5834_v31, %v5830_v44  ;;  %v5301_v1 = vmul.f32 %v10897_v59, %v5023_v15  ;;  %v5575_v17 = vadd.f32 %v10900_v19, %v5297_v10  ;;  %v5030_v53 = vadd.f32 %v4704_v50, %v12964_v23  ;;  %v12966_v44 = vld [vmem:[#allocation186_spill] sm:$0xff]  ;;  %v12967_v50 = vld [vmem:[#allocation188_spill] sm:$0xff]  ;;  %v12968_v23 = vld [vmem:[#allocation83_spill] sm:$0xff] }
 0x5d8   : > { %v6024_v42 = vpack.c.bf16 %v5836_v27, %v5832_v28  ;;  %v5829_v22 = vmax.f32 %v5573_v7, 0.0  ;;  %v5833_v51 = vmax.f32 %v5577_v30, 0.0  ;;  %v5304_v57 = vmul.f32 %v10903_v24, %v5026_v46  ;;  %v12969_v30 = vld [vmem:[#allocation86_spill] sm:$0xff] }
 0x5d9   : > { %6508 = vmatprep.mubr.bf16.mxu1 %v6022_v6  ;;  %v5579_v56 = vadd.f32 %v10900_v19, %v5301_v1  ;;  %v5831_v29 = vmax.f32 %v5575_v17, 0.0  ;;  %v5308_v47 = vmul.f32 %v10903_v24, %v5030_v53  ;;  %v5028_v32 = vadd.f32 %v4712_v3, %v12966_v44  ;;  %v11615_v1 = vpop.f32.mrf.mxu0 }
 0x5da   : > { %6797 = vmatprep.mubr.bf16.mxu0 %v6024_v42  ;;  %v6021_v31 = vpack.c.bf16 %v5833_v51, %v5829_v22  ;;  %v5582_v15 = vadd.f32 %v10915_v43, %v5304_v57  ;;  %v5032_v10 = vadd.f32 %v4712_v3, %v12967_v50  ;;  %v5025_v28 = vadd.f32 %v4700_v13, %v12968_v23  ;;  %v12971_v42 = vld [vmem:[#allocation185_spill] sm:$0xff] }
 0x5db   : > { %v5835_v27 = vmax.f32 %v5579_v56, 0.0  ;;  %v5586_v7 = vadd.f32 %v10915_v43, %v5308_v47  ;;  %v5306_v6 = vmul.f32 %v10906_v38, %v5028_v32  ;;  %v5029_v46 = vadd.f32 %v4700_v13, %v12969_v30  ;;  %12970 = vst [vmem:[#allocation69_spill] sm:$0xff] %v11615_v1  ;;  %v12972_v32 = vld [vmem:[#allocation187_spill] sm:$0xff]  ;;  %v12987_v1 = vld [vmem:[#allocation208_spill] sm:$0xff] }
 0x5dc   : > { %6509 = vmatmul.mubr.bf16.gmra.mxu1 %v6021_v31  ;;  %v5838_v17 = vmax.f32 %v5582_v15, 0.0  ;;  %v5310_v53 = vmul.f32 %v10906_v38, %v5032_v10  ;;  %v5303_v51 = vmul.f32 %v10918_v8, %v5025_v28  ;;  %v5027_v22 = vadd.f32 %v4708_v18, %v12971_v42  ;;  %v12976_v42 = vld [vmem:[#allocation94_spill] sm:$0xff] }
 0x5dd   : > { %v6023_v3 = vpack.c.bf16 %v5835_v27, %v5831_v29  ;;  %v5842_v57 = vmax.f32 %v5586_v7, 0.0  ;;  %v5584_v56 = vadd.f32 %v10921_v2, %v5306_v6  ;;  %v5307_v47 = vmul.f32 %v10918_v8, %v5029_v46  ;;  %v12973_v29 = vld [vmem:[#allocation201_spill] sm:$0xff]  ;;  %v11629_v27 = vpop.f32.mrf.mxu0 }
 0x5de   : > { %v5588_v44 = vadd.f32 %v10921_v2, %v5310_v53  ;;  %v5581_v13 = vadd.f32 %v10924_v54, %v5303_v51  ;;  %v5031_v50 = vadd.f32 %v4708_v18, %v12972_v32  ;;  %v5305_v31 = vmul.f32 %v10897_v59, %v5027_v22  ;;  %12974 = vst [vmem:[#allocation75_spill] sm:$0xff] %v11629_v27  ;;  %v12975_v53 = vld [vmem:[#allocation91_spill] sm:$0xff] }
 0x5df   : > { %6798 = vmatmul.mubr.bf16.gmra.mxu0 %v6023_v3  ;;  %v6026_v15 = vpack.c.bf16 %v5842_v57, %v5838_v17  ;;  %v5840_v10 = vmax.f32 %v5584_v56, 0.0  ;;  %v5585_v23 = vadd.f32 %v10924_v54, %v5307_v47  ;;  %v4720_v28 = vrot.slane %v12973_v29, %v12809_v36 }
 0x5e0   : > { %v5844_v7 = vmax.f32 %v5588_v44, 0.0  ;;  %v5837_v6 = vmax.f32 %v5581_v13, 0.0  ;;  %v5309_v30 = vmul.f32 %v10897_v59, %v5031_v50  ;;  %v5583_v46 = vadd.f32 %v10900_v19, %v5305_v31  ;;  %v12977_v50 = vld [vmem:[#allocation17_spill] sm:$0xff] }
 0x5e1   : > { %6516 = vmatprep.mubr.bf16.mxu1 %v6026_v15  ;;  %v5841_v18 = vmax.f32 %v5585_v23, 0.0  ;;  %v5034_v51 = vadd.f32 %v4720_v28, %v12975_v53  ;;  %v5038_v17 = vadd.f32 %v4720_v28, %v12976_v42  ;;  %v4728_v22 = vrot.slane %v12973_v29, %v10894_v41  ;;  %v11643_v15 = vpop.f32.mrf.mxu0  ;;  %v12979_v53 = vld [vmem:[#allocation198_spill] sm:$0xff] }
 0x5e2   : > { %v6028_v3 = vpack.c.bf16 %v5844_v7, %v5840_v10  ;;  %v5587_v57 = vadd.f32 %v10900_v19, %v5309_v30  ;;  %v5839_v56 = vmax.f32 %v5583_v46, 0.0  ;;  %v4716_v47 = vrot.slane %v12973_v29, %v12811_v63  ;;  %12978 = vst [vmem:[#allocation27_spill] sm:$0xff] %v11643_v15  ;;  %v12980_v10 = vld [vmem:[#allocation89_spill] sm:$0xff]  ;;  %v12981_v30 = vld [vmem:[#allocation92_spill] sm:$0xff] }
 0x5e3   : > { %v6025_v44 = vpack.c.bf16 %v5841_v18, %v5837_v6  ;;  %v5312_v13 = vmul.f32 %v10903_v24, %v5034_v51  ;;  %v5316_v32 = vmul.f32 %v10903_v24, %v5038_v17  ;;  %v5036_v31 = vadd.f32 %v4728_v22, %v12977_v50  ;;  %v11658_v21 = vpop.f32.mrf.mxu0 }
 0x5e4   : > { %6805 = vmatprep.mubr.bf16.mxu0 %v6028_v3  ;;  %v5843_v23 = vmax.f32 %v5587_v57, 0.0  ;;  %v5040_v42 = vadd.f32 %v4728_v22, %v12979_v53  ;;  %v5033_v7 = vadd.f32 %v4716_v47, %v12980_v10  ;;  %v5037_v46 = vadd.f32 %v4716_v47, %v12981_v30  ;;  %v12982_v30 = vld [vmem:[#allocation15_spill] sm:$0xff]  ;;  %12983 = vst [vmem:[#allocation25_spill] sm:$0xff] %v11658_v21 }
 0x5e5   : > { %6517 = vmatmul.mubr.bf16.gmra.mxu1 %v6025_v44  ;;  %v5590_v27 = vadd.f32 %v10915_v43, %v5312_v13  ;;  %v5594_v6 = vadd.f32 %v10915_v43, %v5316_v32  ;;  %v5314_v18 = vmul.f32 %v10906_v38, %v5036_v31  ;;  %v4724_v51 = vrot.slane %v12973_v29, %v10891_v9  ;;  %v12984_v31 = vld [vmem:[#allocation189_spill] sm:$0xff] }
 0x5e6   : > { %v6027_v17 = vpack.c.bf16 %v5843_v23, %v5839_v56  ;;  %v5318_v3 = vmul.f32 %v10906_v38, %v5040_v42  ;;  %v5311_v57 = vmul.f32 %v10918_v8, %v5033_v7  ;;  %v5315_v50 = vmul.f32 %v10918_v8, %v5037_v46  ;;  %v12985_v46 = vld [vmem:[#allocation97_spill] sm:$0xff] }
 0x5e7   : > { %v5846_v53 = vmax.f32 %v5590_v27, 0.0  ;;  %v5850_v10 = vmax.f32 %v5594_v6, 0.0  ;;  %v5592_v44 = vadd.f32 %v10921_v2, %v5314_v18  ;;  %v5035_v13 = vadd.f32 %v4724_v51, %v12982_v30 }
 0x5e8   : > { %6806 = vmatmul.mubr.bf16.gmra.mxu0 %v6027_v17  ;;  %v5596_v32 = vadd.f32 %v10921_v2, %v5318_v3  ;;  %v5589_v29 = vadd.f32 %v10924_v54, %v5311_v57  ;;  %v5593_v56 = vadd.f32 %v10924_v54, %v5315_v50  ;;  %v5039_v23 = vadd.f32 %v4724_v51, %v12984_v31  ;;  %v12986_v3 = vld [vmem:[#allocation100_spill] sm:$0xff] }
 0x5e9   : > { %v6030_v42 = vpack.c.bf16 %v5850_v10, %v5846_v53  ;;  %v5848_v7 = vmax.f32 %v5592_v44, 0.0  ;;  %v5313_v27 = vmul.f32 %v10897_v59, %v5035_v13  ;;  %v5042_v6 = vadd.f32 %v4720_v28, %v12985_v46  ;;  %v11671_v53 = vpop.f32.mrf.mxu0 }
 0x5ea   : > { %v5852_v18 = vmax.f32 %v5596_v32, 0.0  ;;  %v5845_v15 = vmax.f32 %v5589_v29, 0.0  ;;  %v5849_v30 = vmax.f32 %v5593_v56, 0.0  ;;  %v5317_v21 = vmul.f32 %v10897_v59, %v5039_v23 }
 0x5eb   : > { %6524 = vmatprep.mubr.bf16.mxu1 %v6030_v42  ;;  %v5591_v17 = vadd.f32 %v10900_v19, %v5313_v27  ;;  %v5046_v57 = vadd.f32 %v4720_v28, %v12986_v3  ;;  %v5320_v50 = vmul.f32 %v10903_v24, %v5042_v6  ;;  %v5044_v31 = vadd.f32 %v4728_v22, %v12987_v1  ;;  %v12988_v27 = vld [vmem:[#allocation95_spill] sm:$0xff] }
 0x5ec   : > { %v6032_v10 = vpack.c.bf16 %v5852_v18, %v5848_v7  ;;  %v6029_v44 = vpack.c.bf16 %v5849_v30, %v5845_v15  ;;  %v5595_v13 = vadd.f32 %v10900_v19, %v5317_v21  ;;  %v5048_v32 = vadd.f32 %v4728_v22, %v11068_v0  ;;  %v12989_v7 = vld [vmem:[#allocation98_spill] sm:$0xff]  ;;  %v12990_v22 = vld [vmem:[#allocation203_spill] sm:$0xff]  ;;  %v11684_v30 = vpop.f32.mrf.mxu0 }
 0x5ed   : > { %v5847_v29 = vmax.f32 %v5591_v17, 0.0  ;;  %v5324_v56 = vmul.f32 %v10903_v24, %v5046_v57  ;;  %v5598_v23 = vadd.f32 %v10915_v43, %v5320_v50  ;;  %v5322_v42 = vmul.f32 %v10906_v38, %v5044_v31 }
 0x5ee   : > { %6813 = vmatprep.mubr.bf16.mxu0 %v6032_v10  ;;  %6525 = vmatmul.mubr.bf16.gmra.mxu1 %v6029_v44  ;;  %v5851_v28 = vmax.f32 %v5595_v13, 0.0  ;;  %v5326_v1 = vmul.f32 %v10906_v38, %v5048_v32  ;;  %v5041_v46 = vadd.f32 %v4716_v47, %v12988_v27  ;;  %v5045_v15 = vadd.f32 %v4716_v47, %v12989_v7 }
 0x5ef   : > { %v5602_v21 = vadd.f32 %v10915_v43, %v5324_v56  ;;  %v5854_v6 = vmax.f32 %v5598_v23, 0.0  ;;  %v5600_v0 = vadd.f32 %v10921_v2, %v5322_v42  ;;  %v5043_v18 = vadd.f32 %v4724_v51, %v12990_v22 }
 0x5f0   : > { %v6031_v17 = vpack.c.bf16 %v5851_v28, %v5847_v29  ;;  %v5604_v3 = vadd.f32 %v10921_v2, %v5326_v1  ;;  %v5319_v57 = vmul.f32 %v10918_v8, %v5041_v46  ;;  %v5323_v50 = vmul.f32 %v10918_v8, %v5045_v15  ;;  %v12991_v29 = vld [vmem:[#allocation204_spill] sm:$0xff]  ;;  %v12992_v15 = vld [vmem:[#allocation103_spill] sm:$0xff] }
 0x5f1   : > { %v5858_v31 = vmax.f32 %v5602_v21, 0.0  ;;  %v5856_v10 = vmax.f32 %v5600_v0, 0.0  ;;  %v5047_v47 = vadd.f32 %v4724_v51, %v11052_v52  ;;  %v5321_v44 = vmul.f32 %v10897_v59, %v5043_v18  ;;  %v11699_v52 = vpop.f32.mrf.mxu0  ;;  %v12993_v18 = vld [vmem:[#allocation106_spill] sm:$0xff] }
 0x5f2   : > { %6814 = vmatmul.mubr.bf16.gmra.mxu0 %v6031_v17  ;;  %v5860_v13 = vmax.f32 %v5604_v3, 0.0  ;;  %v5597_v32 = vadd.f32 %v10924_v54, %v5319_v57  ;;  %v5601_v56 = vadd.f32 %v10924_v54, %v5323_v50  ;;  %v4736_v23 = vrot.slane %v12991_v29, %v12809_v36 }
 0x5f3   : > { %v6034_v42 = vpack.c.bf16 %v5858_v31, %v5854_v6  ;;  %v5325_v28 = vmul.f32 %v10897_v59, %v5047_v47  ;;  %v5599_v1 = vadd.f32 %v10900_v19, %v5321_v44  ;;  %v4744_v27 = vrot.slane %v12991_v29, %v10894_v41 }
 0x5f4   : > { %v6036_v51 = vpack.c.bf16 %v5860_v13, %v5856_v10  ;;  %v5853_v46 = vmax.f32 %v5597_v32, 0.0  ;;  %v5857_v7 = vmax.f32 %v5601_v56, 0.0  ;;  %v5050_v21 = vadd.f32 %v4736_v23, %v12992_v15  ;;  %v11713_v32 = vpop.f32.mrf.mxu0 }
 0x5f5   : > { %6532 = vmatprep.mubr.bf16.mxu1 %v6034_v42  ;;  %v5603_v0 = vadd.f32 %v10900_v19, %v5325_v28  ;;  %v5855_v22 = vmax.f32 %v5599_v1, 0.0  ;;  %v5054_v6 = vadd.f32 %v4736_v23, %v12993_v18  ;;  %v5052_v17 = vadd.f32 %v4744_v27, %v11098_v37  ;;  %v12994_v42 = vld [vmem:[#allocation101_spill] sm:$0xff]  ;;  %v12995_v28 = vld [vmem:[#allocation104_spill] sm:$0xff] }
 0x5f6   : > { %6821 = vmatprep.mubr.bf16.mxu0 %v6036_v51  ;;  %v6033_v3 = vpack.c.bf16 %v5857_v7, %v5853_v46  ;;  %v5328_v57 = vmul.f32 %v10903_v24, %v5050_v21  ;;  %v5056_v50 = vadd.f32 %v4744_v27, %v11125_v25  ;;  %v4732_v31 = vrot.slane %v12991_v29, %v12811_v63 }
 0x5f7   : > { %v5859_v10 = vmax.f32 %v5603_v0, 0.0  ;;  %v5332_v47 = vmul.f32 %v10903_v24, %v5054_v6  ;;  %v5330_v44 = vmul.f32 %v10906_v38, %v5052_v17  ;;  %v4740_v13 = vrot.slane %v12991_v29, %v10891_v9 }
 0x5f8   : > { %6533 = vmatmul.mubr.bf16.gmra.mxu1 %v6033_v3  ;;  %v5606_v37 = vadd.f32 %v10915_v43, %v5328_v57  ;;  %v5334_v56 = vmul.f32 %v10906_v38, %v5056_v50  ;;  %v5049_v25 = vadd.f32 %v4732_v31, %v12994_v42  ;;  %v5053_v1 = vadd.f32 %v4732_v31, %v12995_v28  ;;  %v11727_v57 = vpop.f32.mrf.mxu0 }
 0x5f9   : > { %v6035_v51 = vpack.c.bf16 %v5859_v10, %v5855_v22  ;;  %v5610_v46 = vadd.f32 %v10915_v43, %v5332_v47  ;;  %v5608_v7 = vadd.f32 %v10921_v2, %v5330_v44  ;;  %v5051_v15 = vadd.f32 %v4740_v13, %v11083_v5  ;;  %v12996_v47 = vld [vmem:[#allocation109_spill] sm:$0xff] }
 0x5fa   : > { %v5862_v21 = vmax.f32 %v5606_v37, 0.0  ;;  %v5612_v29 = vadd.f32 %v10921_v2, %v5334_v56  ;;  %v5327_v0 = vmul.f32 %v10918_v8, %v5049_v25  ;;  %v5331_v18 = vmul.f32 %v10918_v8, %v5053_v1  ;;  %v12997_v25 = vld [vmem:[#allocation112_spill] sm:$0xff] }
 0x5fb   : > { %6822 = vmatmul.mubr.bf16.gmra.mxu0 %v6035_v51  ;;  %v5866_v6 = vmax.f32 %v5610_v46, 0.0  ;;  %v5864_v17 = vmax.f32 %v5608_v7, 0.0  ;;  %v5055_v3 = vadd.f32 %v4740_v13, %v11115_v33  ;;  %v5329_v22 = vmul.f32 %v10897_v59, %v5051_v15 }
 0x5fc   : > { %v5868_v50 = vmax.f32 %v5612_v29, 0.0  ;;  %v5605_v10 = vadd.f32 %v10924_v54, %v5327_v0  ;;  %v5609_v5 = vadd.f32 %v10924_v54, %v5331_v18  ;;  %v5058_v44 = vadd.f32 %v4736_v23, %v12996_v47 }
 0x5fd   : > { %v6038_v37 = vpack.c.bf16 %v5866_v6, %v5862_v21  ;;  %v5333_v56 = vmul.f32 %v10897_v59, %v5055_v3  ;;  %v5607_v42 = vadd.f32 %v10900_v19, %v5329_v22  ;;  %v5062_v28 = vadd.f32 %v4736_v23, %v12997_v25  ;;  %v11739_v21 = vpop.f32.mrf.mxu0 }
 0x5fe   : > { %v6040_v1 = vpack.c.bf16 %v5868_v50, %v5864_v17  ;;  %v5861_v33 = vmax.f32 %v5605_v10, 0.0  ;;  %v5865_v51 = vmax.f32 %v5609_v5, 0.0  ;;  %v5336_v46 = vmul.f32 %v10903_v24, %v5058_v44  ;;  %v12998_v17 = vld [vmem:[#allocation107_spill] sm:$0xff]  ;;  %v12999_v5 = vld [vmem:[#allocation110_spill] sm:$0xff] }
 0x5ff   : > { %6540 = vmatprep.mubr.bf16.mxu1 %v6038_v37  ;;  %v5611_v7 = vadd.f32 %v10900_v19, %v5333_v56  ;;  %v5863_v15 = vmax.f32 %v5607_v42, 0.0  ;;  %v5340_v29 = vmul.f32 %v10903_v24, %v5062_v28  ;;  %v5060_v0 = vadd.f32 %v4744_v27, %v11156_v45  ;;  %v11752_v28 = vpop.f32.mrf.mxu0 }
 0x600   : > { %6829 = vmatprep.mubr.bf16.mxu0 %v6040_v1  ;;  %v6037_v18 = vpack.c.bf16 %v5865_v51, %v5861_v33  ;;  %v5614_v6 = vadd.f32 %v10915_v43, %v5336_v46  ;;  %v5064_v23 = vadd.f32 %v4744_v27, %v11192_v11  ;;  %v5057_v3 = vadd.f32 %v4732_v31, %v12998_v17 }
 0x601   : > { %v5867_v22 = vmax.f32 %v5611_v7, 0.0  ;;  %v5618_v50 = vadd.f32 %v10915_v43, %v5340_v29  ;;  %v5338_v10 = vmul.f32 %v10906_v38, %v5060_v0  ;;  %v5061_v47 = vadd.f32 %v4732_v31, %v12999_v5  ;;  %v13000_v29 = vld [vmem:[#allocation206_spill] sm:$0xff] }
 0x602   : > { %6541 = vmatmul.mubr.bf16.gmra.mxu1 %v6037_v18  ;;  %v5870_v44 = vmax.f32 %v5614_v6, 0.0  ;;  %v5342_v45 = vmul.f32 %v10906_v38, %v5064_v23  ;;  %v5335_v37 = vmul.f32 %v10918_v8, %v5057_v3  ;;  %v5059_v56 = vadd.f32 %v4740_v13, %v11144_v55 }
 0x603   : > { %v6039_v42 = vpack.c.bf16 %v5867_v22, %v5863_v15  ;;  %v5874_v25 = vmax.f32 %v5618_v50, 0.0  ;;  %v5616_v11 = vadd.f32 %v10921_v2, %v5338_v10  ;;  %v5339_v27 = vmul.f32 %v10918_v8, %v5061_v47  ;;  %v13001_v22 = vld [vmem:[#allocation115_spill] sm:$0xff]  ;;  %v13002_v10 = vld [vmem:[#allocation118_spill] sm:$0xff] }
 0x604   : > { %v5620_v1 = vadd.f32 %v10921_v2, %v5342_v45  ;;  %v5613_v31 = vadd.f32 %v10924_v54, %v5335_v37  ;;  %v5063_v33 = vadd.f32 %v4740_v13, %v11176_v48  ;;  %v5337_v51 = vmul.f32 %v10897_v59, %v5059_v56  ;;  %v11758_v46 = vpop.f32.mrf.mxu1 }
 0x605   : > { %6830 = vmatmul.mubr.bf16.gmra.mxu0 %v6039_v42  ;;  %v6042_v55 = vpack.c.bf16 %v5874_v25, %v5870_v44  ;;  %v5872_v7 = vmax.f32 %v5616_v11, 0.0  ;;  %v5617_v15 = vadd.f32 %v10924_v54, %v5339_v27  ;;  %v4752_v0 = vrot.slane %v13000_v29, %v12809_v36 }
 0x606   : > { %v5876_v18 = vmax.f32 %v5620_v1, 0.0  ;;  %v5869_v6 = vmax.f32 %v5613_v31, 0.0  ;;  %v5341_v23 = vmul.f32 %v10897_v59, %v5063_v33  ;;  %v5615_v17 = vadd.f32 %v10900_v19, %v5337_v51  ;;  %v11765_v3 = vpop.f32.mrf.mxu0  ;;  %v6384_v48 = vpop.f32.mrf.mxu1 }
 0x607   : > { %6548 = vmatprep.mubr.bf16.mxu1 %v6042_v55  ;;  %v5873_v13 = vmax.f32 %v5617_v15, 0.0  ;;  %v5066_v50 = vadd.f32 %v4752_v0, %v13001_v22  ;;  %v5070_v5 = vadd.f32 %v4752_v0, %v13002_v10  ;;  %v4760_v47 = vrot.slane %v13000_v29, %v10894_v41  ;;  %v13003_v55 = vld [vmem:[#allocation113_spill] sm:$0xff]  ;;  %v13004_v15 = vld [vmem:[#allocation116_spill] sm:$0xff] }
 0x608   : > { %v6044_v44 = vpack.c.bf16 %v5876_v18, %v5872_v7  ;;  %v5619_v45 = vadd.f32 %v10900_v19, %v5341_v23  ;;  %v5871_v37 = vmax.f32 %v5615_v17, 0.0  ;;  %v11774_v56 = vrot.slane %v13000_v29, %v12811_v63  ;;  %v6673_v42 = vpop.f32.mrf.mxu0  ;;  %v11776_v25 = vpop.f32.mrf.mxu1 }
 0x609   : > { %v6041_v11 = vpack.c.bf16 %v5873_v13, %v5869_v6  ;;  %v5344_v27 = vmul.f32 %v10903_v24, %v5066_v50  ;;  %v5348_v1 = vmul.f32 %v10903_v24, %v5070_v5  ;;  %v5068_v31 = vadd.f32 %v4760_v47, %v11219_v62 }
 0x60a   : > { %6837 = vmatprep.mubr.bf16.mxu0 %v6044_v44  ;;  %v5875_v33 = vmax.f32 %v5619_v45, 0.0  ;;  %v5072_v51 = vadd.f32 %v4760_v47, %v11250_v35  ;;  %v5065_v7 = vadd.f32 %v11774_v56, %v13003_v55  ;;  %v5069_v18 = vadd.f32 %v11774_v56, %v13004_v15  ;;  %v11786_v23 = vpop.f32.mrf.mxu0  ;;  %v6387_v17 = vpop.f32.mrf.mxu1 }
 0x60b   : > { %6549 = vmatmul.mubr.bf16.gmra.mxu1 %v6041_v11  ;;  %v5622_v6 = vadd.f32 %v10915_v43, %v5344_v27  ;;  %v5626_v48 = vadd.f32 %v10915_v43, %v5348_v1  ;;  %v5346_v62 = vmul.f32 %v10906_v38, %v5068_v31  ;;  %v4756_v13 = vrot.slane %v13000_v29, %v10891_v9 }
 0x60c   : > { %v6043_v35 = vpack.c.bf16 %v5875_v33, %v5871_v37  ;;  %v5350_v22 = vmul.f32 %v10906_v38, %v5072_v51  ;;  %v5343_v50 = vmul.f32 %v10918_v8, %v5065_v7  ;;  %v5347_v10 = vmul.f32 %v10918_v8, %v5069_v18  ;;  %v6676_v5 = vpop.f32.mrf.mxu0  ;;  %v13005_v7 = vld [vmem:[#allocation121_spill] sm:$0xff] }
 0x60d   : > { %v5878_v44 = vmax.f32 %v5622_v6, 0.0  ;;  %v5882_v45 = vmax.f32 %v5626_v48, 0.0  ;;  %v5624_v42 = vadd.f32 %v10921_v2, %v5346_v62  ;;  %v5067_v11 = vadd.f32 %v4756_v13, %v11202_v20 }
 0x60e   : > { %6838 = vmatmul.mubr.bf16.gmra.mxu0 %v6043_v35  ;;  %v5628_v27 = vadd.f32 %v10921_v2, %v5350_v22  ;;  %v5621_v1 = vadd.f32 %v10924_v54, %v5343_v50  ;;  %v5625_v29 = vadd.f32 %v10924_v54, %v5347_v10  ;;  %v5071_v37 = vadd.f32 %v4756_v13, %v11233_v12  ;;  %v11802_v31 = vpop.f32.mrf.mxu1  ;;  %v13006_v12 = vld [vmem:[#allocation124_spill] sm:$0xff] }
 0x60f   : > { %v6046_v33 = vpack.c.bf16 %v5882_v45, %v5878_v44  ;;  %v5880_v51 = vmax.f32 %v5624_v42, 0.0  ;;  %v5345_v55 = vmul.f32 %v10897_v59, %v5067_v11  ;;  %v5074_v15 = vadd.f32 %v4752_v0, %v13005_v7  ;;  %v13008_v7 = vld [vmem:[#allocation122_spill] sm:$0xff] }
 0x610   : > { %v5884_v18 = vmax.f32 %v5628_v27, 0.0  ;;  %v5877_v17 = vmax.f32 %v5621_v1, 0.0  ;;  %v5881_v20 = vmax.f32 %v5625_v29, 0.0  ;;  %v5349_v6 = vmul.f32 %v10897_v59, %v5071_v37  ;;  %v11807_v48 = vpop.f32.mrf.mxu0  ;;  %v6392_v62 = vpop.f32.mrf.mxu1 }
 0x611   : > { %6556 = vmatprep.mubr.bf16.mxu1 %v6046_v33  ;;  %v5623_v35 = vadd.f32 %v10900_v19, %v5345_v55  ;;  %v5078_v22 = vadd.f32 %v4752_v0, %v13006_v12  ;;  %v5352_v50 = vmul.f32 %v10903_v24, %v5074_v15  ;;  %v5076_v10 = vadd.f32 %v4760_v47, %v11271_v58 }
 0x612   : > { %v6048_v5 = vpack.c.bf16 %v5884_v18, %v5880_v51  ;;  %v6045_v44 = vpack.c.bf16 %v5881_v20, %v5877_v17  ;;  %v5627_v45 = vadd.f32 %v10900_v19, %v5349_v6  ;;  %v5080_v42 = vadd.f32 %v4760_v47, %v11301_v49  ;;  %v6681_v11 = vpop.f32.mrf.mxu0  ;;  %v11815_v27 = vpop.f32.mrf.mxu1  ;;  %v13007_v51 = vld [vmem:[#allocation119_spill] sm:$0xff] }
 0x613   : > { %v5879_v1 = vmax.f32 %v5623_v35, 0.0  ;;  %v5356_v29 = vmul.f32 %v10903_v24, %v5078_v22  ;;  %v5630_v37 = vadd.f32 %v10915_v43, %v5352_v50  ;;  %v5354_v0 = vmul.f32 %v10906_v38, %v5076_v10 }
 0x614   : > { %6845 = vmatprep.mubr.bf16.mxu0 %v6048_v5  ;;  %6557 = vmatmul.mubr.bf16.gmra.mxu1 %v6045_v44  ;;  %v5883_v33 = vmax.f32 %v5627_v45, 0.0  ;;  %v5358_v58 = vmul.f32 %v10906_v38, %v5080_v42  ;;  %v5073_v55 = vadd.f32 %v11774_v56, %v13007_v51  ;;  %v5077_v49 = vadd.f32 %v11774_v56, %v13008_v7  ;;  %v11825_v47 = vpop.f32.mrf.mxu0  ;;  %v6395_v15 = vpop.f32.mrf.mxu1 }
 0x615   : > { %v5634_v18 = vadd.f32 %v10915_v43, %v5356_v29  ;;  %v5886_v17 = vmax.f32 %v5630_v37, 0.0  ;;  %v5632_v20 = vadd.f32 %v10921_v2, %v5354_v0  ;;  %v5075_v6 = vadd.f32 %v4756_v13, %v11260_v39 }
 0x616   : > { %v6047_v62 = vpack.c.bf16 %v5883_v33, %v5879_v1  ;;  %v5636_v35 = vadd.f32 %v10921_v2, %v5358_v58  ;;  %v5351_v12 = vmul.f32 %v10918_v8, %v5073_v55  ;;  %v5355_v22 = vmul.f32 %v10918_v8, %v5077_v49  ;;  %v6684_v50 = vpop.f32.mrf.mxu0  ;;  %v13009_v1 = vld [vmem:[#allocation200_spill] sm:$0xff]  ;;  %v13010_v49 = vld [vmem:[#allocation127_spill] sm:$0xff] }
 0x617   : > { %v5890_v10 = vmax.f32 %v5634_v18, 0.0  ;;  %v5888_v56 = vmax.f32 %v5632_v20, 0.0  ;;  %v5079_v5 = vadd.f32 %v4756_v13, %v11285_v34  ;;  %v5353_v44 = vmul.f32 %v10897_v59, %v5075_v6  ;;  %v11835_v45 = vpop.f32.mrf.mxu1  ;;  %v11850_v13 = vld [vmem:[%s12454_s11] ss:$0 sm:$0xff]  ;;  %v13011_v6 = vld [vmem:[#allocation130_spill] sm:$0xff] }
 0x618   : > { %6846 = vmatmul.mubr.bf16.gmra.mxu0 %v6047_v62  ;;  %v5892_v42 = vmax.f32 %v5636_v35, 0.0  ;;  %v5629_v39 = vadd.f32 %v10924_v54, %v5351_v12  ;;  %v5633_v11 = vadd.f32 %v10924_v54, %v5355_v22  ;;  %v4768_v29 = vrot.slane %v13009_v1, %v12809_v36 }
 0x619   : > { %v6050_v37 = vpack.c.bf16 %v5890_v10, %v5886_v17  ;;  %v5357_v0 = vmul.f32 %v10897_v59, %v5079_v5  ;;  %v5631_v33 = vadd.f32 %v10900_v19, %v5353_v44  ;;  %v11845_v34 = vrot.slane %v13009_v1, %v10894_v41  ;;  %v6400_v58 = vpop.f32.mrf.mxu1 }
 0x61a   : > { %v6052_v51 = vpack.c.bf16 %v5892_v42, %v5888_v56  ;;  %v5885_v55 = vmax.f32 %v5629_v39, 0.0  ;;  %v5889_v7 = vmax.f32 %v5633_v11, 0.0  ;;  %v5082_v15 = vadd.f32 %v4768_v29, %v13010_v49  ;;  %v11853_v18 = vpop.f32.mrf.mxu0 }
 0x61b   : > { %6564 = vmatprep.mubr.bf16.mxu1 %v6050_v37  ;;  %v5635_v17 = vadd.f32 %v10900_v19, %v5357_v0  ;;  %v5887_v20 = vmax.f32 %v5631_v33, 0.0  ;;  %v5086_v62 = vadd.f32 %v4768_v29, %v13011_v6  ;;  %v5084_v35 = vadd.f32 %v11845_v34, %v11331_v26  ;;  %v11859_v12 = vpop.f32.mrf.mxu1  ;;  %v13013_v6 = vld [vmem:[#allocation128_spill] sm:$0xff] }
 0x61c   : > { %6853 = vmatprep.mubr.bf16.mxu0 %v6052_v51  ;;  %v6049_v22 = vpack.c.bf16 %v5889_v7, %v5885_v55  ;;  %v5360_v50 = vmul.f32 %v10903_v24, %v5082_v15  ;;  %v5088_v10 = vadd.f32 %v11845_v34, %v11362_v40  ;;  %v6383_v56 = vadd.f32 %v11850_v13, %v11758_v46  ;;  %v6689_v5 = vpop.f32.mrf.mxu0  ;;  %v13012_v7 = vld [vmem:[#allocation125_spill] sm:$0xff] }
 0x61d   : > { %v5891_v44 = vmax.f32 %v5635_v17, 0.0  ;;  %v5364_v42 = vmul.f32 %v10903_v24, %v5086_v62  ;;  %v5362_v39 = vmul.f32 %v10906_v38, %v5084_v35  ;;  %v11870_v26 = vrot.slane %v13009_v1, %v12811_v63  ;;  %v6403_v11 = vpop.f32.mrf.mxu1 }
 0x61e   : > { %6565 = vmatmul.mubr.bf16.gmra.mxu1 %v6049_v22  ;;  %v5638_v37 = vadd.f32 %v10915_v43, %v5360_v50  ;;  %v5366_v0 = vmul.f32 %v10906_v38, %v5088_v10  ;;  %v11875_v40 = vadd.f32 %v11765_v3, %v6383_v56  ;;  %v11879_v46 = vrot.slane %v13009_v1, %v10891_v9  ;;  %v11881_v33 = vpop.f32.mrf.mxu0 }
 0x61f   : > { %v6051_v58 = vpack.c.bf16 %v5891_v44, %v5887_v20  ;;  %v5642_v51 = vadd.f32 %v10915_v43, %v5364_v42  ;;  %v5640_v55 = vadd.f32 %v10921_v2, %v5362_v39  ;;  %v5081_v49 = vadd.f32 %v11870_v26, %v13012_v7  ;;  %v13014_v42 = vld [vmem:[#allocation133_spill] sm:$0xff] }
 0x620   : > { %v5894_v15 = vmax.f32 %v5638_v37, 0.0  ;;  %v5644_v17 = vadd.f32 %v10921_v2, %v5366_v0  ;;  %v5085_v3 = vadd.f32 %v11870_v26, %v13013_v6  ;;  %v5083_v1 = vadd.f32 %v11879_v46, %v11318_v16  ;;  %v6692_v62 = vpop.f32.mrf.mxu0  ;;  %v11892_v35 = vpop.f32.mrf.mxu1 }
 0x621   : > { %6854 = vmatmul.mubr.bf16.gmra.mxu0 %v6051_v58  ;;  %v5898_v20 = vmax.f32 %v5642_v51, 0.0  ;;  %v5896_v22 = vmax.f32 %v5640_v55, 0.0  ;;  %v5359_v50 = vmul.f32 %v10918_v8, %v5081_v49  ;;  %v5087_v10 = vadd.f32 %v11879_v46, %v11344_v14  ;;  %v13015_v58 = vld [vmem:[#allocation136_spill] sm:$0xff] }
 0x622   : > { %v5900_v56 = vmax.f32 %v5644_v17, 0.0  ;;  %v5363_v5 = vmul.f32 %v10918_v8, %v5085_v3  ;;  %v5361_v44 = vmul.f32 %v10897_v59, %v5083_v1  ;;  %v5090_v39 = vadd.f32 %v4768_v29, %v13014_v42  ;;  %v6408_v11 = vpop.f32.mrf.mxu1 }
 0x623   : > { %v6054_v16 = vpack.c.bf16 %v5898_v20, %v5894_v15  ;;  %v5637_v37 = vadd.f32 %v10924_v54, %v5359_v50  ;;  %v5365_v0 = vmul.f32 %v10897_v59, %v5087_v10  ;;  %v5094_v51 = vadd.f32 %v4768_v29, %v13015_v58  ;;  %v11903_v55 = vpop.f32.mrf.mxu0 }
 0x624   : > { %v6056_v7 = vpack.c.bf16 %v5900_v56, %v5896_v22  ;;  %v5641_v14 = vadd.f32 %v10924_v54, %v5363_v5  ;;  %v5639_v49 = vadd.f32 %v10900_v19, %v5361_v44  ;;  %v5368_v17 = vmul.f32 %v10903_v24, %v5090_v39  ;;  %v11908_v6 = vpop.f32.mrf.mxu1 }
 0x625   : > { %6572 = vmatprep.mubr.bf16.mxu1 %v6054_v16  ;;  %v5893_v3 = vmax.f32 %v5637_v37, 0.0  ;;  %v5643_v15 = vadd.f32 %v10900_v19, %v5365_v0  ;;  %v5372_v1 = vmul.f32 %v10903_v24, %v5094_v51  ;;  %v5092_v29 = vadd.f32 %v11845_v34, %v11391_v4  ;;  %v6697_v62 = vpop.f32.mrf.mxu0 }
 0x626   : > { %6861 = vmatprep.mubr.bf16.mxu0 %v6056_v7  ;;  %v5897_v20 = vmax.f32 %v5641_v14, 0.0  ;;  %v5895_v22 = vmax.f32 %v5639_v49, 0.0  ;;  %v5646_v50 = vadd.f32 %v10915_v43, %v5368_v17  ;;  %v5096_v10 = vadd.f32 %v11845_v34, %v11421_v60  ;;  %v6411_v56 = vpop.f32.mrf.mxu1  ;;  %v13017_v17 = vld [vmem:[#allocation134_spill] sm:$0xff] }
 0x627   : > { %v5899_v5 = vmax.f32 %v5643_v15, 0.0  ;;  %v5650_v44 = vadd.f32 %v10915_v43, %v5372_v1  ;;  %v5370_v42 = vmul.f32 %v10906_v38, %v5092_v29  ;;  %v6386_v39 = vadd.f32 %v11850_v13, %v11776_v25  ;;  %v11921_v11 = vpop.f32.mrf.mxu0  ;;  %v13016_v25 = vld [vmem:[#allocation131_spill] sm:$0xff] }
 0x628   : > { %v6053_v4 = vpack.c.bf16 %v5897_v20, %v5893_v3  ;;  %v5902_v16 = vmax.f32 %v5646_v50, 0.0  ;;  %v5374_v37 = vmul.f32 %v10906_v38, %v5096_v10  ;;  %v6391_v0 = vadd.f32 %v11850_v13, %v11802_v31  ;;  %v13018_v10 = vld [vmem:[#allocation19_spill] sm:$0xff] }
 0x629   : > { %v6055_v58 = vpack.c.bf16 %v5899_v5, %v5895_v22  ;;  %v5906_v60 = vmax.f32 %v5650_v44, 0.0  ;;  %v5648_v34 = vadd.f32 %v10921_v2, %v5370_v42  ;;  %v6675_v51 = vadd.f32 %v11786_v23, %v6386_v39  ;;  %v6700_v7 = vpop.f32.mrf.mxu0  ;;  %v13019_v44 = vld [vmem:[#allocation202_spill] sm:$0xff] }
 0x62a   : > { %6573 = vmatmul.mubr.bf16.gmra.mxu1 %v6053_v4  ;;  %v5652_v14 = vadd.f32 %v10921_v2, %v5374_v37  ;;  %v5089_v49 = vadd.f32 %v11870_v26, %v13016_v25  ;;  %v5093_v3 = vadd.f32 %v11870_v26, %v13017_v17  ;;  %v6680_v15 = vadd.f32 %v11807_v48, %v6391_v0  ;;  %v11934_v1 = vpop.f32.mrf.mxu1  ;;  %v13022_v7 = vld [vmem:[#allocation18_spill] sm:$0xff] }
 0x62b   : > { %6862 = vmatmul.mubr.bf16.gmra.mxu0 %v6055_v58  ;;  %v6058_v31 = vpack.c.bf16 %v5906_v60, %v5902_v16  ;;  %v5904_v29 = vmax.f32 %v5648_v34, 0.0  ;;  %v6926_v62 = vmax.f32 %v11875_v40, %v6675_v51  ;;  %v5091_v23 = vadd.f32 %v11879_v46, %v11376_v61  ;;  %v13020_v58 = vld [vmem:[#allocation139_spill] sm:$0xff]  ;;  %v13021_v34 = vld [vmem:[#allocation142_spill] sm:$0xff] }
 0x62c   : > { %v5908_v20 = vmax.f32 %v5652_v14, 0.0  ;;  %v5367_v22 = vmul.f32 %v10918_v8, %v5089_v49  ;;  %v5371_v50 = vmul.f32 %v10918_v8, %v5093_v3  ;;  %v5095_v26 = vadd.f32 %v11879_v46, %v13018_v10  ;;  %v6416_v56 = vpop.f32.mrf.mxu1 }
 0x62d   : > { %6580 = vmatprep.mubr.bf16.mxu1 %v6058_v31  ;;  %v6927_v48 = vmax.f32 %v6926_v62, %v6680_v15  ;;  %v5369_v5 = vmul.f32 %v10897_v59, %v5091_v23  ;;  %v4784_v42 = vrot.slane %v13019_v44, %v12809_v36  ;;  %v11948_v40 = vrot.slane %v13019_v44, %v10894_v41  ;;  %v11950_v61 = vpop.f32.mrf.mxu0  ;;  %v13023_v15 = vld [vmem:[#allocation24_spill] sm:$0xff] }
 0x62e   : > { %v6060_v39 = vpack.c.bf16 %v5908_v20, %v5904_v29  ;;  %v5645_v4 = vadd.f32 %v10924_v54, %v5367_v22  ;;  %v5649_v16 = vadd.f32 %v10924_v54, %v5371_v50  ;;  %v5373_v46 = vmul.f32 %v10897_v59, %v5095_v26  ;;  %v11955_v37 = vpop.f32.mrf.mxu1 }
 0x62f   : > { %v5647_v0 = vadd.f32 %v10900_v19, %v5369_v5  ;;  %v5098_v60 = vadd.f32 %v4784_v42, %v13020_v58  ;;  %v5102_v51 = vadd.f32 %v4784_v42, %v13021_v34  ;;  %v5100_v14 = vadd.f32 %v11948_v40, %v13022_v7  ;;  %v6705_v25 = vpop.f32.mrf.mxu0 }
 0x630   : > { %6869 = vmatprep.mubr.bf16.mxu0 %v6060_v39  ;;  %v5901_v49 = vmax.f32 %v5645_v4, 0.0  ;;  %v5905_v17 = vmax.f32 %v5649_v16, 0.0  ;;  %v5651_v3 = vadd.f32 %v10900_v19, %v5373_v46  ;;  %v5104_v31 = vadd.f32 %v11948_v40, %v13023_v15  ;;  %v6419_v29 = vpop.f32.mrf.mxu1 }
 0x631   : > { %v5903_v62 = vmax.f32 %v5647_v0, 0.0  ;;  %v5376_v23 = vmul.f32 %v10903_v24, %v5098_v60  ;;  %v5380_v20 = vmul.f32 %v10903_v24, %v5102_v51  ;;  %v5378_v22 = vmul.f32 %v10906_v38, %v5100_v14  ;;  %v11968_v50 = vpop.f32.mrf.mxu0 }
 0x632   : > { %v6057_v10 = vpack.c.bf16 %v5905_v17, %v5901_v49  ;;  %v5907_v26 = vmax.f32 %v5651_v3, 0.0  ;;  %v5382_v56 = vmul.f32 %v10906_v38, %v5104_v31  ;;  %v6394_v5 = vadd.f32 %v11850_v13, %v11815_v27  ;;  %v13024_v3 = vld [vmem:[#allocation137_spill] sm:$0xff]  ;;  %v13025_v31 = vld [vmem:[#allocation140_spill] sm:$0xff] }
 0x633   : > { %v5654_v39 = vadd.f32 %v10915_v43, %v5376_v23  ;;  %v5658_v4 = vadd.f32 %v10915_v43, %v5380_v20  ;;  %v5656_v16 = vadd.f32 %v10921_v2, %v5378_v22  ;;  %v6399_v46 = vadd.f32 %v11850_v13, %v11835_v45  ;;  %v6708_v0 = vpop.f32.mrf.mxu0  ;;  %v13026_v20 = vld [vmem:[#allocation145_spill] sm:$0xff] }
 0x634   : > { %6581 = vmatmul.mubr.bf16.gmra.mxu1 %v6057_v10  ;;  %v6059_v58 = vpack.c.bf16 %v5907_v26, %v5903_v62  ;;  %v5660_v60 = vadd.f32 %v10921_v2, %v5382_v56  ;;  %v6683_v34 = vadd.f32 %v11825_v47, %v6394_v5  ;;  %v11982_v51 = vrot.slane %v13019_v44, %v12811_v63  ;;  %v11984_v27 = vpop.f32.mrf.mxu1  ;;  %v13027_v10 = vld [vmem:[#allocation148_spill] sm:$0xff] }
 0x635   : > { %v5910_v7 = vmax.f32 %v5654_v39, 0.0  ;;  %v5914_v14 = vmax.f32 %v5658_v4, 0.0  ;;  %v5912_v25 = vmax.f32 %v5656_v16, 0.0  ;;  %v11987_v49 = vadd.f32 %v11853_v18, %v6399_v46  ;;  %v13028_v16 = vld [vmem:[#allocation20_spill] sm:$0xff] }
 0x636   : > { %6870 = vmatmul.mubr.bf16.gmra.mxu0 %v6059_v58  ;;  %v5916_v45 = vmax.f32 %v5660_v60, 0.0  ;;  %v6928_v17 = vmax.f32 %v6927_v48, %v6683_v34  ;;  %v5097_v15 = vadd.f32 %v11982_v51, %v13024_v3  ;;  %v5101_v47 = vadd.f32 %v11982_v51, %v13025_v31  ;;  %v6424_v29 = vpop.f32.mrf.mxu1 }
 0x637   : > { %v6062_v62 = vpack.c.bf16 %v5914_v14, %v5910_v7  ;;  %v11995_v23 = vrot.slane %v13019_v44, %v10891_v9  ;;  %v5106_v22 = vadd.f32 %v4784_v42, %v13026_v20  ;;  %v5110_v18 = vadd.f32 %v4784_v42, %v13027_v10  ;;  %v11999_v26 = vpop.f32.mrf.mxu0  ;;  %v13029_v44 = vld [vmem:[#allocation190_spill] sm:$0xff] }
 0x638   : > { %v6064_v56 = vpack.c.bf16 %v5916_v45, %v5912_v25  ;;  %v6929_v48 = vrot.slane %v6928_v17, 4  ;;  %v5375_v5 = vmul.f32 %v10918_v8, %v5097_v15  ;;  %v5379_v39 = vmul.f32 %v10918_v8, %v5101_v47  ;;  %v12003_v4 = vpop.f32.mrf.mxu1  ;;  %v13030_v25 = vld [vmem:[#allocation55_spill] sm:$0xff]  ;;  %v13031_v10 = vld [vmem:[#allocation22_spill] sm:$0xff] }
 0x639   : > { %6588 = vmatprep.mubr.bf16.mxu1 %v6062_v62  ;;  %v5099_v46 = vadd.f32 %v11995_v23, %v13028_v16  ;;  %v5103_v0 = vadd.f32 %v11995_v23, %v13029_v44  ;;  %v5384_v58 = vmul.f32 %v10903_v24, %v5106_v22  ;;  %v5388_v42 = vmul.f32 %v10903_v24, %v5110_v18  ;;  %v6713_v60 = vpop.f32.mrf.mxu0 }
 0x63a   : > { %6877 = vmatprep.mubr.bf16.mxu0 %v6064_v56  ;;  %v6930_v34 = vmax.f32 %v6928_v17, %v6929_v48  ;;  %v5653_v7 = vadd.f32 %v10924_v54, %v5375_v5  ;;  %v5657_v14 = vadd.f32 %v10924_v54, %v5379_v39  ;;  %v5108_v45 = vadd.f32 %v11948_v40, %v13030_v25  ;;  %v6427_v3 = vpop.f32.mrf.mxu1 }
 0x63b   : > { %v5377_v15 = vmul.f32 %v10897_v59, %v5099_v46  ;;  %v5381_v31 = vmul.f32 %v10897_v59, %v5103_v0  ;;  %v5662_v47 = vadd.f32 %v10915_v43, %v5384_v58  ;;  %v5666_v29 = vadd.f32 %v10915_v43, %v5388_v42  ;;  %v12019_v62 = vpop.f32.mrf.mxu0 }
 0x63c   : > { %v6931_v20 = vrot.slane %v6930_v34, 2  ;;  %v5909_v17 = vmax.f32 %v5653_v7, 0.0  ;;  %v5913_v22 = vmax.f32 %v5657_v14, 0.0  ;;  %v5112_v18 = vadd.f32 %v11948_v40, %v13031_v10 }
 0x63d   : > { %v5655_v56 = vadd.f32 %v10900_v19, %v5377_v15  ;;  %v5659_v48 = vadd.f32 %v10900_v19, %v5381_v31  ;;  %v5918_v5 = vmax.f32 %v5662_v47, 0.0  ;;  %v5922_v39 = vmax.f32 %v5666_v29, 0.0  ;;  %v6716_v16 = vpop.f32.mrf.mxu0 }
 0x63e   : > { %v6932_v46 = vmax.f32 %v6930_v34, %v6931_v20  ;;  %v6061_v44 = vpack.c.bf16 %v5913_v22, %v5909_v17  ;;  %v5386_v0 = vmul.f32 %v10906_v38, %v5108_v45  ;;  %v5390_v58 = vmul.f32 %v10906_v38, %v5112_v18  ;;  %v12027_v42 = vpop.f32.mrf.mxu1  ;;  %v13032_v20 = vld [vmem:[#allocation143_spill] sm:$0xff] }
 0x63f   : > { %v5911_v60 = vmax.f32 %v5655_v56, 0.0  ;;  %v5915_v7 = vmax.f32 %v5659_v48, 0.0  ;;  %v6066_v14 = vpack.c.bf16 %v5922_v39, %v5918_v5  ;;  %v6402_v40 = vadd.f32 %v11850_v13, %v11859_v12  ;;  %v13033_v12 = vld [vmem:[#allocation146_spill] sm:$0xff] }
 0x640   : > { %v6933_v25 = vrot.slane %v6932_v46, 1  ;;  %6589 = vmatmul.mubr.bf16.gmra.mxu1 %v6061_v44  ;;  %v5664_v3 = vadd.f32 %v10921_v2, %v5386_v0  ;;  %v5668_v15 = vadd.f32 %v10921_v2, %v5390_v58  ;;  %v6407_v34 = vadd.f32 %v11850_v13, %v11892_v35  ;;  %v12035_v45 = vpop.f32.mrf.mxu0  ;;  %v6432_v31 = vpop.f32.mrf.mxu1  ;;  %v13034_v44 = vld [vmem:[#allocation23_spill] sm:$0xff] }
 0x641   : > { %v6063_v47 = vpack.c.bf16 %v5915_v7, %v5911_v60  ;;  %6596 = vmatprep.mubr.bf16.mxu1 %v6066_v14  ;;  %v6691_v29 = vadd.f32 %v11881_v33, %v6402_v40  ;;  %v5105_v17 = vadd.f32 %v11982_v51, %v13032_v20  ;;  %v5109_v22 = vadd.f32 %v11982_v51, %v13033_v12  ;;  %v13036_v60 = vld [vmem:[#allocation205_spill] sm:$0xff]  ;;  %v13039_v20 = vld [vmem:[#allocation56_spill] sm:$0xff] }
 0x642   : > { %v12042_v10 = vmax.f32 %v6932_v46, %v6933_v25  ;;  %v5920_v18 = vmax.f32 %v5664_v3, 0.0  ;;  %v5924_v56 = vmax.f32 %v5668_v15, 0.0  ;;  %v6696_v48 = vadd.f32 %v11903_v55, %v6407_v34  ;;  %v6721_v35 = vpop.f32.mrf.mxu0  ;;  %v12045_v5 = vpop.f32.mrf.mxu1  ;;  %v13035_v46 = vld [vmem:[#allocation63_spill] sm:$0xff] }
 0x643   : > { %6878 = vmatmul.mubr.bf16.gmra.mxu0 %v6063_v47  ;;  %v6935_v39 = vmax.f32 %v11987_v49, %v6691_v29  ;;  %v5383_v33 = vmul.f32 %v10918_v8, %v5105_v17  ;;  %v5387_v16 = vmul.f32 %v10918_v8, %v5109_v22  ;;  %v5107_v0 = vadd.f32 %v11995_v23, %v13034_v44  ;;  %v13037_v34 = vld [vmem:[#allocation151_spill] sm:$0xff]  ;;  %v13038_v47 = vld [vmem:[#allocation154_spill] sm:$0xff]  ;;  %v13040_v35 = vld [vmem:[#allocation28_spill] sm:$0xff] }
 0x644   : > { %v6068_v51 = vpack.c.bf16 %v5924_v56, %v5920_v18  ;;  %v5111_v58 = vadd.f32 %v11995_v23, %v13035_v46  ;;  %v4800_v55 = vrot.slane %v13036_v60, %v12809_v36  ;;  %v12058_v7 = vrot.slane %v13036_v60, %v10894_v41  ;;  %v12060_v14 = vpop.f32.mrf.mxu0  ;;  %v6435_v49 = vpop.f32.mrf.mxu1 }
 0x645   : > { %v5661_v40 = vadd.f32 %v10924_v54, %v5383_v33  ;;  %v5665_v25 = vadd.f32 %v10924_v54, %v5387_v16  ;;  %v6936_v3 = vmax.f32 %v6935_v39, %v6696_v48  ;;  %v5385_v15 = vmul.f32 %v10897_v59, %v5107_v0 }
 0x646   : > { %6885 = vmatprep.mubr.bf16.mxu0 %v6068_v51  ;;  %v5389_v23 = vmul.f32 %v10897_v59, %v5111_v58  ;;  %v5114_v31 = vadd.f32 %v4800_v55, %v13037_v34  ;;  %v5118_v29 = vadd.f32 %v4800_v55, %v13038_v47  ;;  %v5116_v17 = vadd.f32 %v12058_v7, %v13039_v20  ;;  %v6724_v12 = vpop.f32.mrf.mxu0 }
 0x647   : > { %v5917_v22 = vmax.f32 %v5661_v40, 0.0  ;;  %v5921_v18 = vmax.f32 %v5665_v25, 0.0  ;;  %v5663_v56 = vadd.f32 %v10900_v19, %v5385_v15  ;;  %v5120_v48 = vadd.f32 %v12058_v7, %v13040_v35  ;;  %v12073_v39 = vpop.f32.mrf.mxu1 }
 0x648   : > { %v5667_v33 = vadd.f32 %v10900_v19, %v5389_v23  ;;  %v5392_v16 = vmul.f32 %v10903_v24, %v5114_v31  ;;  %v5396_v44 = vmul.f32 %v10903_v24, %v5118_v29  ;;  %v5394_v0 = vmul.f32 %v10906_v38, %v5116_v17 }
 0x649   : > { %v6065_v51 = vpack.c.bf16 %v5921_v18, %v5917_v22  ;;  %v5919_v46 = vmax.f32 %v5663_v56, 0.0  ;;  %v5398_v58 = vmul.f32 %v10906_v38, %v5120_v48  ;;  %v6410_v49 = vadd.f32 %v11850_v13, %v11908_v6  ;;  %v6440_v40 = vpop.f32.mrf.mxu1 }
 0x64a   : > { %v5923_v25 = vmax.f32 %v5667_v33, 0.0  ;;  %v5670_v15 = vadd.f32 %v10915_v43, %v5392_v16  ;;  %v5674_v34 = vadd.f32 %v10915_v43, %v5396_v44  ;;  %v5672_v23 = vadd.f32 %v10921_v2, %v5394_v0  ;;  %v12085_v31 = vpop.f32.mrf.mxu0  ;;  %v13041_v16 = vld [vmem:[#allocation149_spill] sm:$0xff] }
 0x64b   : > { %6597 = vmatmul.mubr.bf16.gmra.mxu1 %v6065_v51  ;;  %v5676_v47 = vadd.f32 %v10921_v2, %v5398_v58  ;;  %v6699_v29 = vadd.f32 %v11921_v11, %v6410_v49  ;;  %v6415_v20 = vadd.f32 %v11850_v13, %v11934_v1  ;;  %v12093_v6 = vrot.slane %v13036_v60, %v12811_v63  ;;  %v12095_v17 = vpop.f32.mrf.mxu1  ;;  %v13042_v11 = vld [vmem:[#allocation152_spill] sm:$0xff]  ;;  %v13043_v49 = vld [vmem:[#allocation157_spill] sm:$0xff] }
 0x64c   : > { %v6067_v12 = vpack.c.bf16 %v5923_v25, %v5919_v46  ;;  %v5926_v22 = vmax.f32 %v5670_v15, 0.0  ;;  %v5930_v18 = vmax.f32 %v5674_v34, 0.0  ;;  %v5928_v56 = vmax.f32 %v5672_v23, 0.0  ;;  %v6729_v35 = vpop.f32.mrf.mxu0 }
 0x64d   : > { %v5932_v48 = vmax.f32 %v5676_v47, 0.0  ;;  %v6937_v33 = vmax.f32 %v6936_v3, %v6699_v29  ;;  %v5113_v44 = vadd.f32 %v12093_v6, %v13041_v16  ;;  %v5117_v0 = vadd.f32 %v12093_v6, %v13042_v11  ;;  %v6443_v1 = vpop.f32.mrf.mxu1  ;;  %v13044_v47 = vld [vmem:[#allocation21_spill] sm:$0xff] }
 0x64e   : > { %6886 = vmatmul.mubr.bf16.gmra.mxu0 %v6067_v12  ;;  %v6070_v51 = vpack.c.bf16 %v5930_v18, %v5926_v22  ;;  %v12102_v58 = vadd.f32 %v11950_v61, %v6415_v20  ;;  %v12106_v46 = vrot.slane %v13036_v60, %v10891_v9  ;;  %v5122_v40 = vadd.f32 %v4800_v55, %v13043_v49  ;;  %v12109_v25 = vpop.f32.mrf.mxu0  ;;  %v13045_v61 = vld [vmem:[#allocation60_spill] sm:$0xff] }
 0x64f   : > { %v6072_v3 = vpack.c.bf16 %v5932_v48, %v5928_v56  ;;  %v6938_v15 = vrot.slane %v6937_v33, 4  ;;  %v5391_v34 = vmul.f32 %v10918_v8, %v5113_v44  ;;  %v5395_v23 = vmul.f32 %v10918_v8, %v5117_v0  ;;  %v13046_v12 = vld [vmem:[#allocation160_spill] sm:$0xff]  ;;  %v13047_v44 = vld [vmem:[#allocation69_spill] sm:$0xff] }
 0x650   : > { %6604 = vmatprep.mubr.bf16.mxu1 %v6070_v51  ;;  %v5115_v29 = vadd.f32 %v12106_v46, %v13044_v47  ;;  %v5119_v20 = vadd.f32 %v12106_v46, %v13045_v61  ;;  %v5126_v60 = vadd.f32 %v4800_v55, %v13046_v12  ;;  %v5400_v22 = vmul.f32 %v10903_v24, %v5122_v40  ;;  %v6732_v18 = vpop.f32.mrf.mxu0  ;;  %v12119_v35 = vpop.f32.mrf.mxu1 }
 0x651   : > { %6893 = vmatprep.mubr.bf16.mxu0 %v6072_v3  ;;  %v6939_v56 = vmax.f32 %v6937_v33, %v6938_v15  ;;  %v5669_v48 = vadd.f32 %v10924_v54, %v5391_v34  ;;  %v5673_v16 = vadd.f32 %v10924_v54, %v5395_v23  ;;  %v5124_v11 = vadd.f32 %v12058_v7, %v13047_v44  ;;  %v13048_v33 = vld [vmem:[#allocation27_spill] sm:$0xff] }
 0x652   : > { %v5393_v0 = vmul.f32 %v10897_v59, %v5115_v29  ;;  %v5397_v1 = vmul.f32 %v10897_v59, %v5119_v20  ;;  %v5404_v55 = vmul.f32 %v10903_v24, %v5126_v60  ;;  %v5678_v51 = vadd.f32 %v10915_v43, %v5400_v22  ;;  %v6448_v49 = vpop.f32.mrf.mxu1 }
 0x653   : > { %v6940_v40 = vrot.slane %v6939_v56, 2  ;;  %v5925_v47 = vmax.f32 %v5669_v48, 0.0  ;;  %v5929_v3 = vmax.f32 %v5673_v16, 0.0  ;;  %v5128_v15 = vadd.f32 %v12058_v7, %v13048_v33  ;;  %v12131_v34 = vpop.f32.mrf.mxu0 }
 0x654   : > { %v5671_v23 = vadd.f32 %v10900_v19, %v5393_v0  ;;  %v5675_v61 = vadd.f32 %v10900_v19, %v5397_v1  ;;  %v5682_v29 = vadd.f32 %v10915_v43, %v5404_v55  ;;  %v5934_v20 = vmax.f32 %v5678_v51, 0.0  ;;  %v12136_v12 = vpop.f32.mrf.mxu1 }
 0x655   : > { %v6941_v60 = vmax.f32 %v6939_v56, %v6940_v40  ;;  %v6069_v22 = vpack.c.bf16 %v5929_v3, %v5925_v47  ;;  %v5402_v18 = vmul.f32 %v10906_v38, %v5124_v11  ;;  %v5406_v48 = vmul.f32 %v10906_v38, %v5128_v15  ;;  %v6737_v16 = vpop.f32.mrf.mxu0  ;;  %v13049_v15 = vld [vmem:[#allocation155_spill] sm:$0xff] }
 0x656   : > { %v5927_v44 = vmax.f32 %v5671_v23, 0.0  ;;  %v5931_v7 = vmax.f32 %v5675_v61, 0.0  ;;  %v5938_v49 = vmax.f32 %v5682_v29, 0.0  ;;  %v6418_v0 = vadd.f32 %v11850_v13, %v11955_v37  ;;  %v6451_v33 = vpop.f32.mrf.mxu1 }
 0x657   : > { %v6942_v1 = vrot.slane %v6941_v60, 1  ;;  %6605 = vmatmul.mubr.bf16.gmra.mxu1 %v6069_v22  ;;  %v5680_v55 = vadd.f32 %v10921_v2, %v5402_v18  ;;  %v5684_v51 = vadd.f32 %v10921_v2, %v5406_v48  ;;  %v6423_v56 = vadd.f32 %v11850_v13, %v11984_v27  ;;  %v12146_v11 = vpop.f32.mrf.mxu0  ;;  %v13050_v22 = vld [vmem:[#allocation158_spill] sm:$0xff] }
 0x658   : > { %v6071_v40 = vpack.c.bf16 %v5931_v7, %v5927_v44  ;;  %v6074_v47 = vpack.c.bf16 %v5938_v49, %v5934_v20  ;;  %v6707_v3 = vadd.f32 %v11968_v50, %v6418_v0  ;;  %v5121_v23 = vadd.f32 %v12093_v6, %v13049_v15  ;;  %v13051_v49 = vld [vmem:[#allocation26_spill] sm:$0xff] }
 0x659   : > { %v6943_v37 = vmax.f32 %v6941_v60, %v6942_v1  ;;  %v5936_v61 = vmax.f32 %v5680_v55, 0.0  ;;  %v5940_v29 = vmax.f32 %v5684_v51, 0.0  ;;  %v5125_v18 = vadd.f32 %v12093_v6, %v13050_v22  ;;  %v6740_v16 = vpop.f32.mrf.mxu0 }
 0x65a   : > { %6894 = vmatmul.mubr.bf16.gmra.mxu0 %v6071_v40  ;;  %6612 = vmatprep.mubr.bf16.mxu1 %v6074_v47  ;;  %v6944_v27 = vmax.f32 %v12102_v58, %v6707_v3  ;;  %v5399_v48 = vmul.f32 %v10918_v8, %v5121_v23  ;;  %v6712_v20 = vadd.f32 %v11999_v26, %v6423_v56  ;;  %v12156_v44 = vpop.f32.mrf.mxu1  ;;  %v13052_v58 = vld [vmem:[#allocation75_spill] sm:$0xff] }
 0x65b   : > { %v12160_v50 = vsel %vm3980_vm0, %v6943_v37, %v12042_v10  ;;  %v6076_v60 = vpack.c.bf16 %v5940_v29, %v5936_v61  ;;  %v5403_v7 = vmul.f32 %v10918_v8, %v5125_v18  ;;  %v5123_v6 = vadd.f32 %v12106_v46, %v13051_v49  ;;  %v13053_v26 = vld [vmem:[#allocation207_spill] sm:$0xff]  ;;  %v13055_v37 = vld [vmem:[#allocation166_spill] sm:$0xff] }
 0x65c   : > { %v5677_v0 = vadd.f32 %v10924_v54, %v5399_v48  ;;  %v6945_v33 = vmax.f32 %v6944_v27, %v6712_v20  ;;  %v5127_v1 = vadd.f32 %v12106_v46, %v13052_v58  ;;  %v12170_v55 = vrot.slane %v13053_v26, %v12809_v36  ;;  %v12172_v51 = vpop.f32.mrf.mxu0  ;;  %v6456_v10 = vpop.f32.mrf.mxu1  ;;  %v13054_v36 = vld [vmem:[#allocation163_spill] sm:$0xff] }
 0x65d   : > { %6901 = vmatprep.mubr.bf16.mxu0 %v6076_v60  ;;  %v5681_v56 = vadd.f32 %v10924_v54, %v5403_v7  ;;  %v5401_v40 = vmul.f32 %v10897_v59, %v5123_v6  ;;  %v12178_v47 = vrot.slane %v13053_v26, %v10894_v41  ;;  %v6426_v3 = vadd.f32 %v11850_v13, %v12003_v4 }
 0x65e   : > { %v5933_v46 = vmax.f32 %v5677_v0, 0.0  ;;  %v5405_v15 = vmul.f32 %v10897_v59, %v5127_v1  ;;  %v5130_v23 = vadd.f32 %v12170_v55, %v13054_v36  ;;  %v5134_v61 = vadd.f32 %v12170_v55, %v13055_v37  ;;  %v6745_v29 = vpop.f32.mrf.mxu0  ;;  %v12187_v22 = vpop.f32.mrf.mxu1 }
 0x65f   : > { %v5937_v18 = vmax.f32 %v5681_v56, 0.0  ;;  %v5679_v16 = vadd.f32 %v10900_v19, %v5401_v40  ;;  %v5132_v41 = vadd.f32 %v12178_v47, %v11671_v53  ;;  %v5136_v4 = vadd.f32 %v12178_v47, %v11699_v52 }
 0x660   : > { %v5683_v27 = vadd.f32 %v10900_v19, %v5405_v15  ;;  %v5408_v48 = vmul.f32 %v10903_v24, %v5130_v23  ;;  %v5412_v20 = vmul.f32 %v10903_v24, %v5134_v61  ;;  %v6715_v60 = vadd.f32 %v12019_v62, %v6426_v3  ;;  %v12198_v7 = vpop.f32.mrf.mxu0  ;;  %v6459_v49 = vpop.f32.mrf.mxu1 }
 0x661   : > { %v6073_v6 = vpack.c.bf16 %v5937_v18, %v5933_v46  ;;  %v5935_v0 = vmax.f32 %v5679_v16, 0.0  ;;  %v5410_v58 = vmul.f32 %v10906_v38, %v5132_v41  ;;  %v5414_v53 = vmul.f32 %v10906_v38, %v5136_v4  ;;  %v13056_v16 = vld [vmem:[#allocation161_spill] sm:$0xff]  ;;  %v13057_v4 = vld [vmem:[#allocation164_spill] sm:$0xff] }
 0x662   : > { %v5939_v1 = vmax.f32 %v5683_v27, 0.0  ;;  %v5686_v52 = vadd.f32 %v10915_v43, %v5408_v48  ;;  %v5690_v10 = vadd.f32 %v10915_v43, %v5412_v20  ;;  %v6946_v56 = vmax.f32 %v6945_v33, %v6715_v60  ;;  %v6748_v40 = vpop.f32.mrf.mxu0 }
 0x663   : > { %6613 = vmatmul.mubr.bf16.gmra.mxu1 %v6073_v6  ;;  %v5688_v15 = vadd.f32 %v10921_v2, %v5410_v58  ;;  %v5692_v62 = vadd.f32 %v10921_v2, %v5414_v53  ;;  %v6431_v3 = vadd.f32 %v11850_v13, %v12027_v42  ;;  %v12210_v46 = vrot.slane %v13053_v26, %v12811_v63  ;;  %v12212_v36 = vpop.f32.mrf.mxu1  ;;  %v13058_v53 = vld [vmem:[#allocation169_spill] sm:$0xff] }
 0x664   : > { %v6075_v23 = vpack.c.bf16 %v5939_v1, %v5935_v0  ;;  %v5942_v37 = vmax.f32 %v5686_v52, 0.0  ;;  %v5946_v61 = vmax.f32 %v5690_v10, 0.0  ;;  %v6947_v29 = vrot.slane %v6946_v56, 4 }
 0x665   : > { %v5944_v33 = vmax.f32 %v5688_v15, 0.0  ;;  %v5948_v18 = vmax.f32 %v5692_v62, 0.0  ;;  %v5129_v41 = vadd.f32 %v12210_v46, %v13056_v16  ;;  %v5133_v27 = vadd.f32 %v12210_v46, %v13057_v4  ;;  %v6464_v48 = vpop.f32.mrf.mxu1 }
 0x666   : > { %6902 = vmatmul.mubr.bf16.gmra.mxu0 %v6075_v23  ;;  %v6078_v42 = vpack.c.bf16 %v5946_v61, %v5942_v37  ;;  %v6948_v20 = vmax.f32 %v6946_v56, %v6947_v29  ;;  %v12219_v63 = vadd.f32 %v12035_v45, %v6431_v3  ;;  %v12223_v60 = vrot.slane %v13053_v26, %v10891_v9  ;;  %v12225_v49 = vpop.f32.mrf.mxu0  ;;  %v13059_v45 = vld [vmem:[#allocation25_spill] sm:$0xff]  ;;  %v13060_v26 = vld [vmem:[#allocation172_spill] sm:$0xff] }
 0x667   : > { %v6080_v6 = vpack.c.bf16 %v5948_v18, %v5944_v33  ;;  %v5407_v0 = vmul.f32 %v10918_v8, %v5129_v41  ;;  %v5411_v58 = vmul.f32 %v10918_v8, %v5133_v27  ;;  %v5138_v1 = vadd.f32 %v12170_v55, %v13058_v53  ;;  %v12231_v52 = vpop.f32.mrf.mxu1 }
 0x668   : > { %6620 = vmatprep.mubr.bf16.mxu1 %v6078_v42  ;;  %v6949_v10 = vrot.slane %v6948_v20, 2  ;;  %v5131_v56 = vadd.f32 %v12223_v60, %v13059_v45  ;;  %v5135_v9 = vadd.f32 %v12223_v60, %v11684_v30  ;;  %v5142_v40 = vadd.f32 %v12170_v55, %v13060_v26  ;;  %v6753_v15 = vpop.f32.mrf.mxu0 }
 0x669   : > { %6909 = vmatprep.mubr.bf16.mxu0 %v6080_v6  ;;  %v5685_v62 = vadd.f32 %v10924_v54, %v5407_v0  ;;  %v5689_v3 = vadd.f32 %v10924_v54, %v5411_v58  ;;  %v5416_v23 = vmul.f32 %v10903_v24, %v5138_v1  ;;  %v5140_v37 = vadd.f32 %v12178_v47, %v11727_v57  ;;  %v6467_v61 = vpop.f32.mrf.mxu1 }
 0x66a   : > { %v6950_v29 = vmax.f32 %v6948_v20, %v6949_v10  ;;  %v5409_v33 = vmul.f32 %v10897_v59, %v5131_v56  ;;  %v5413_v30 = vmul.f32 %v10897_v59, %v5135_v9  ;;  %v5420_v18 = vmul.f32 %v10903_v24, %v5142_v40  ;;  %v12247_v55 = vpop.f32.mrf.mxu0 }
 0x66b   : > { %v5941_v16 = vmax.f32 %v5685_v62, 0.0  ;;  %v5945_v41 = vmax.f32 %v5689_v3, 0.0  ;;  %v5694_v4 = vadd.f32 %v10915_v43, %v5416_v23  ;;  %v5144_v27 = vadd.f32 %v12178_v47, %v11752_v28  ;;  %v13061_v23 = vld [vmem:[#allocation167_spill] sm:$0xff] }
 0x66c   : > { %v6951_v48 = vrot.slane %v6950_v29, 1  ;;  %v5687_v57 = vadd.f32 %v10900_v19, %v5409_v33  ;;  %v5691_v42 = vadd.f32 %v10900_v19, %v5413_v30  ;;  %v5698_v20 = vadd.f32 %v10915_v43, %v5420_v18  ;;  %v6756_v6 = vpop.f32.mrf.mxu0  ;;  %v12255_v0 = vpop.f32.mrf.mxu1  ;;  %v13062_v33 = vld [vmem:[#allocation170_spill] sm:$0xff] }
 0x66d   : > { %v6077_v24 = vpack.c.bf16 %v5945_v41, %v5941_v16  ;;  %v5950_v58 = vmax.f32 %v5694_v4, 0.0  ;;  %v5418_v53 = vmul.f32 %v10906_v38, %v5140_v37  ;;  %v5422_v1 = vmul.f32 %v10906_v38, %v5144_v27 }
 0x66e   : > { %v6952_v10 = vmax.f32 %v6950_v29, %v6951_v48  ;;  %v5943_v45 = vmax.f32 %v5687_v57, 0.0  ;;  %v5947_v56 = vmax.f32 %v5691_v42, 0.0  ;;  %v5954_v28 = vmax.f32 %v5698_v20, 0.0  ;;  %v6472_v47 = vpop.f32.mrf.mxu1 }
 0x66f   : > { %6621 = vmatmul.mubr.bf16.gmra.mxu1 %v6077_v24  ;;  %v5696_v9 = vadd.f32 %v10921_v2, %v5418_v53  ;;  %v5700_v26 = vadd.f32 %v10921_v2, %v5422_v1  ;;  %v6434_v43 = vadd.f32 %v11850_v13, %v12045_v5  ;;  %v6439_v40 = vadd.f32 %v11850_v13, %v12073_v39  ;;  %v12265_v15 = vpop.f32.mrf.mxu0 }
 0x670   : > { %v12269_v38 = vsel %vm3982_vm1, %v6952_v10, %v12160_v50  ;;  %v6079_v62 = vpack.c.bf16 %v5947_v56, %v5943_v45  ;;  %v6082_v3 = vpack.c.bf16 %v5954_v28, %v5950_v58  ;;  %v5137_v37 = vadd.f32 %v12210_v46, %v13061_v23  ;;  %v12273_v61 = vpop.f32.mrf.mxu1 }
 0x671   : > { %v5952_v2 = vmax.f32 %v5696_v9, 0.0  ;;  %v5956_v29 = vmax.f32 %v5700_v26, 0.0  ;;  %v6723_v5 = vadd.f32 %v12060_v14, %v6434_v43  ;;  %v5141_v39 = vadd.f32 %v12210_v46, %v13062_v33  ;;  %v6761_v30 = vpop.f32.mrf.mxu0 }
 0x672   : > { %6910 = vmatmul.mubr.bf16.gmra.mxu0 %v6079_v62  ;;  %6628 = vmatprep.mubr.bf16.mxu1 %v6082_v3  ;;  %v5415_v50 = vmul.f32 %v10918_v8, %v5137_v37  ;;  %v6728_v18 = vadd.f32 %v12085_v31, %v6439_v40  ;;  %v5139_v16 = vadd.f32 %v12223_v60, %v11713_v32  ;;  %v6475_v41 = vpop.f32.mrf.mxu1 }
 0x673   : > { %v6084_v4 = vpack.c.bf16 %v5956_v29, %v5952_v2  ;;  %v6953_v27 = vmax.f32 %v12219_v63, %v6723_v5  ;;  %v5419_v48 = vmul.f32 %v10918_v8, %v5141_v39  ;;  %v5143_v14 = vadd.f32 %v12223_v60, %v11739_v21  ;;  %v12286_v46 = vpop.f32.mrf.mxu0 }
 0x674   : > { %v5693_v57 = vadd.f32 %v10924_v54, %v5415_v50  ;;  %v5417_v42 = vmul.f32 %v10897_v59, %v5139_v16  ;;  %v6442_v31 = vadd.f32 %v11850_v13, %v12095_v17  ;;  %v6447_v32 = vadd.f32 %v11850_v13, %v12119_v35 }
 0x675   : > { %6917 = vmatprep.mubr.bf16.mxu0 %v6084_v4  ;;  %v5697_v63 = vadd.f32 %v10924_v54, %v5419_v48  ;;  %v6954_v20 = vmax.f32 %v6953_v27, %v6728_v18  ;;  %v5421_v8 = vmul.f32 %v10897_v59, %v5143_v14  ;;  %v6450_v21 = vadd.f32 %v11850_v13, %v12136_v12  ;;  %v6764_v60 = vpop.f32.mrf.mxu0 }
 0x676   : > { %v5949_v6 = vmax.f32 %v5693_v57, 0.0  ;;  %v5695_v24 = vadd.f32 %v10900_v19, %v5417_v42  ;;  %v6731_v58 = vadd.f32 %v12109_v25, %v6442_v31  ;;  %v6736_v17 = vadd.f32 %v12131_v34, %v6447_v32  ;;  %v6478_v53 = vpop.f32.mrf.mxu1 }
 0x677   : > { %v5953_v1 = vmax.f32 %v5697_v63, 0.0  ;;  %v5699_v35 = vadd.f32 %v10900_v19, %v5421_v8  ;;  %v6739_v54 = vadd.f32 %v12146_v11, %v6450_v21  ;;  %v6455_v59 = vadd.f32 %v11850_v13, %v12156_v44 }
 0x678   : > { %v5951_v10 = vmax.f32 %v5695_v24, 0.0  ;;  %v6955_v45 = vmax.f32 %v6954_v20, %v6731_v58  ;;  %v6458_v12 = vadd.f32 %v11850_v13, %v12187_v22  ;;  %v6480_v56 = vpop.f32.mrf.mxu1 }
 0x679   : > { %v6081_v28 = vpack.c.bf16 %v5953_v1, %v5949_v6  ;;  %v5955_v47 = vmax.f32 %v5699_v35, 0.0  ;;  %v6962_v25 = vmax.f32 %v6736_v17, %v6739_v54  ;;  %v6744_v34 = vadd.f32 %v12172_v51, %v6455_v59  ;;  %v6767_v9 = vpop.f32.mrf.mxu0  ;;  %v12312_v51 = vld [vmem:[%s12454_s11] ss:$0 sm:$0xff] }
 0x67a   : > { %v6956_v26 = vrot.slane %v6955_v45, 4  ;;  %v6747_v19 = vadd.f32 %v12198_v7, %v6458_v12  ;;  %v6481_v43 = vpop.f32.mrf.mxu1  ;;  %v6466_v7 = vadd.f32 %v12312_v51, %v12231_v52  ;;  %v6463_v18 = vadd.f32 %v12312_v51, %v12212_v36 }
 0x67b   : > { %6629 = vmatmul.mubr.bf16.gmra.mxu1 %v6081_v28  ;;  %v6083_v11 = vpack.c.bf16 %v5955_v47, %v5951_v10  ;;  %v6963_v40 = vmax.f32 %v6962_v25, %v6744_v34  ;;  %v6769_v44 = vpop.f32.mrf.mxu0  ;;  %v6482_v39 = vadd.f32 %v12312_v51, %v6481_v43  ;;  %v6471_v16 = vadd.f32 %v12312_v51, %v12255_v0 }
 0x67c   : > { %v6957_v62 = vmax.f32 %v6955_v45, %v6956_v26  ;;  %v6483_v3 = vpop.f32.mrf.mxu1  ;;  %v6479_v27 = vadd.f32 %v12312_v51, %v6478_v53  ;;  %v6755_v52 = vadd.f32 %v12247_v55, %v6466_v7  ;;  %v6474_v42 = vadd.f32 %v12312_v51, %v12273_v61 }
 0x67d   : > { %6918 = vmatmul.mubr.bf16.gmra.mxu0 %v6083_v11  ;;  %v6964_v23 = vmax.f32 %v6963_v40, %v6747_v19  ;;  %v6770_v13 = vpop.f32.mrf.mxu0  ;;  %v6752_v8 = vadd.f32 %v12225_v49, %v6463_v18  ;;  %v6760_v21 = vadd.f32 %v12265_v15, %v6471_v16 }
 0x67e   : > { %v6958_v22 = vrot.slane %v6957_v62, 2  ;;  %v6771_v63 = vadd.f32 %v6770_v13, %v6482_v39  ;;  %v6768_v24 = vadd.f32 %v6767_v9, %v6479_v27  ;;  %v6763_v61 = vadd.f32 %v12286_v46, %v6474_v42 }
 0x67f   : > { %v6965_v37 = vrot.slane %v6964_v23, 4  ;;  %v6772_v2 = vpop.f32.mrf.mxu0  ;;  %v6486_v29 = vpop.f32.mrf.mxu1  ;;  %v6971_v58 = vmax.f32 %v6752_v8, %v6755_v52 }
 0x680   : > { %v6959_v5 = vmax.f32 %v6957_v62, %v6958_v22  ;;  %v6487_v48 = vadd.f32 %v12312_v51, %v6486_v29  ;;  %v6980_v35 = vmax.f32 %v6768_v24, %v6771_v63 }
 0x681   : > { %v6966_v33 = vmax.f32 %v6964_v23, %v6965_v37  ;;  %v6488_v30 = vpop.f32.mrf.mxu1  ;;  %v6972_v59 = vmax.f32 %v6971_v58, %v6760_v21 }
 0x682   : > { %v6960_v50 = vrot.slane %v6959_v5, 1  ;;  %v6775_v41 = vpop.f32.mrf.mxu0 }
 0x683   : > { %v6967_v4 = vrot.slane %v6966_v33, 2  ;;  %v6489_v14 = vpop.f32.mrf.mxu1  ;;  %v6776_v55 = vadd.f32 %v6775_v41, %v6487_v48  ;;  %v6973_v45 = vmax.f32 %v6972_v59, %v6763_v61 }
 0x684   : > { %v6961_v57 = vmax.f32 %v6959_v5, %v6960_v50  ;;  %v6777_v31 = vpop.f32.mrf.mxu0  ;;  %v6490_v36 = vadd.f32 %v12312_v51, %v6489_v14 }
 0x685   : > { %v6968_v32 = vmax.f32 %v6966_v33, %v6967_v4  ;;  %v6491_v20 = vpop.f32.mrf.mxu1  ;;  %v6981_v49 = vmax.f32 %v6980_v35, %v6776_v55  ;;  %v6974_v25 = vrot.slane %v6973_v45, 4 }
 0x686   : > { %v7088_v0 = vsel %vm3984_vm2, %v6961_v57, %v12269_v38  ;;  %v6778_v60 = vpop.f32.mrf.mxu0 }
 0x687   : > { %v6969_v6 = vrot.slane %v6968_v32, 1  ;;  %v6779_v54 = vadd.f32 %v6778_v60, %v6490_v36  ;;  %v6975_v40 = vmax.f32 %v6973_v45, %v6974_v25 }
 0x688   : > { %v6780_v17 = vpop.f32.mrf.mxu0  ;;  %v6494_v53 = vpop.f32.mrf.mxu1 }
 0x689   : > { %v6970_v1 = vmax.f32 %v6968_v32, %v6969_v6  ;;  %v6982_v56 = vmax.f32 %v6981_v49, %v6779_v54  ;;  %v6495_v26 = vadd.f32 %v12312_v51, %v6494_v53  ;;  %v6976_v5 = vrot.slane %v6975_v40, 2 }
 0x68a   : > { %v6496_v10 = vpop.f32.mrf.mxu1 }
 0x68b   : > { %v12333_v38 = vsel %vm3986_vm3, %v6970_v1, %v7088_v0  ;;  %v6983_v9 = vrot.slane %v6982_v56, 4  ;;  %v6977_v41 = vmax.f32 %v6975_v40, %v6976_v5 }
 0x68c   : > { %v6783_v15 = vpop.f32.mrf.mxu0  ;;  %v6497_v12 = vpop.f32.mrf.mxu1 }
 0x68d   : > { %v6498_v46 = vadd.f32 %v12312_v51, %v6497_v12  ;;  %v6984_v3 = vmax.f32 %v6982_v56, %v6983_v9  ;;  %v6784_v13 = vadd.f32 %v6783_v15, %v6495_v26  ;;  %v6978_v31 = vrot.slane %v6977_v41, 1 }
 0x68e   : > { %v6785_v28 = vpop.f32.mrf.mxu0  ;;  %v6499_v47 = vpop.f32.mrf.mxu1 }
 0x68f   : > { %v6985_v39 = vrot.slane %v6984_v3, 2  ;;  %v6979_v24 = vmax.f32 %v6977_v41, %v6978_v31 }
 0x690   : > { %v6786_v34 = vpop.f32.mrf.mxu0 }
 0x691   : > { %v6787_v44 = vadd.f32 %v6786_v34, %v6498_v46  ;;  %v6986_v48 = vmax.f32 %v6984_v3, %v6985_v39  ;;  %v7090_v10 = vsel %vm3988_vm4, %v6979_v24, %v12333_v38 }
 0x692   : > { %v6788_v19 = vpop.f32.mrf.mxu0  ;;  %v6502_v43 = vpop.f32.mrf.mxu1 }
 0x693   : > { %v6503_v11 = vadd.f32 %v12312_v51, %v6502_v43  ;;  %v6989_v7 = vmax.f32 %v6784_v13, %v6787_v44  ;;  %v6987_v20 = vrot.slane %v6986_v48, 1 }
 0x694   : > { %v6504_v62 = vpop.f32.mrf.mxu1 }
 0x695   : > { %v6791_v23 = vpop.f32.mrf.mxu0  ;;  %v6988_v61 = vmax.f32 %v6986_v48, %v6987_v20 }
 0x696   : > { %v6792_v22 = vadd.f32 %v6791_v23, %v6503_v11  ;;  %v6505_v37 = vpop.f32.mrf.mxu1 }
 0x697   : > { %v6793_v2 = vpop.f32.mrf.mxu0  ;;  %v6506_v29 = vadd.f32 %v12312_v51, %v6505_v37  ;;  %v7091_v15 = vsel %vm3990_vm5, %v6988_v61, %v7090_v10 }
 0x698   : > { %v6507_v33 = vpop.f32.mrf.mxu1  ;;  %v6990_v50 = vmax.f32 %v6989_v7, %v6792_v22 }
 0x699   : > { %v6794_v30 = vpop.f32.mrf.mxu0 }
 0x69a   : > { %v6795_v18 = vadd.f32 %v6794_v30, %v6506_v29 }
 0x69b   : > { %v6796_v16 = vpop.f32.mrf.mxu0 }
 0x69c   : > { %v6991_v4 = vmax.f32 %v6990_v50, %v6795_v18  ;;  %v6510_v27 = vpop.f32.mrf.mxu1 }
 0x69d   : > { %v6511_v14 = vadd.f32 %v12312_v51, %v6510_v27 }
 0x69e   : > { %v6992_v57 = vrot.slane %v6991_v4, 4  ;;  %v6512_v52 = vpop.f32.mrf.mxu1 }
 0x69f   : > { %v6799_v42 = vpop.f32.mrf.mxu0 }
 0x6a0   : > { %v6993_v32 = vmax.f32 %v6991_v4, %v6992_v57  ;;  %v6800_v63 = vadd.f32 %v6799_v42, %v6511_v14  ;;  %v6513_v36 = vpop.f32.mrf.mxu1 }
 0x6a1   : > { %v6801_v0 = vpop.f32.mrf.mxu0  ;;  %v6514_v8 = vadd.f32 %v12312_v51, %v6513_v36 }
 0x6a2   : > { %v6994_v21 = vrot.slane %v6993_v32, 2  ;;  %v6515_v60 = vpop.f32.mrf.mxu1 }
 0x6a3   : > { %v6802_v6 = vpop.f32.mrf.mxu0 }
 0x6a4   : > { %v6995_v55 = vmax.f32 %v6993_v32, %v6994_v21  ;;  %v6803_v58 = vadd.f32 %v6802_v6, %v6514_v8 }
 0x6a5   : > { %v6804_v17 = vpop.f32.mrf.mxu0  ;;  %v6518_v53 = vpop.f32.mrf.mxu1 }
 0x6a6   : > { %v6996_v1 = vrot.slane %v6995_v55, 1  ;;  %v6998_v35 = vmax.f32 %v6800_v63, %v6803_v58  ;;  %v6519_v54 = vadd.f32 %v12312_v51, %v6518_v53 }
 0x6a7   : > { %v6520_v59 = vpop.f32.mrf.mxu1 }
 0x6a8   : > { %v6997_v49 = vmax.f32 %v6995_v55, %v6996_v1  ;;  %v6807_v45 = vpop.f32.mrf.mxu0 }
 0x6a9   : > { %v6808_v12 = vadd.f32 %v6807_v45, %v6519_v54  ;;  %v6521_v56 = vpop.f32.mrf.mxu1 }
 0x6aa   : > { %v7092_v28 = vsel %vm3992_vm6, %v6997_v49, %v7091_v15  ;;  %v6809_v47 = vpop.f32.mrf.mxu0  ;;  %v6522_v25 = vadd.f32 %v12312_v51, %v6521_v56 }
 0x6ab   : > { %7102 = vst [vmem:[%s12350_s28] sm:$0xff] %v7092_v28  ;;  %v6999_v46 = vmax.f32 %v6998_v35, %v6808_v12  ;;  %v6523_v34 = vpop.f32.mrf.mxu1 }
 0x6ac   : > { %v6810_v9 = vpop.f32.mrf.mxu0 }
 0x6ad   : > { %v6811_v26 = vadd.f32 %v6810_v9, %v6522_v25 }
 0x6ae   : > { %v6812_v38 = vpop.f32.mrf.mxu0  ;;  %v6526_v19 = vpop.f32.mrf.mxu1 }
 0x6af   : > { %v7000_v43 = vmax.f32 %v6999_v46, %v6811_v26  ;;  %v6527_v11 = vadd.f32 %v12312_v51, %v6526_v19 }
 0x6b0   : > { %v6528_v40 = vpop.f32.mrf.mxu1 }
 0x6b1   : > { %v7001_v39 = vrot.slane %v7000_v43, 4 }
 0x6b2   : > { %v6815_v44 = vpop.f32.mrf.mxu0  ;;  %v6529_v62 = vpop.f32.mrf.mxu1 }
 0x6b3   : > { %v6816_v3 = vadd.f32 %v6815_v44, %v6527_v11  ;;  %v6530_v23 = vadd.f32 %v12312_v51, %v6529_v62  ;;  %v7002_v27 = vmax.f32 %v7000_v43, %v7001_v39 }
 0x6b4   : > { %v6817_v13 = vpop.f32.mrf.mxu0  ;;  %v6531_v22 = vpop.f32.mrf.mxu1 }
 0x6b5   : > { %v7003_v31 = vrot.slane %v7002_v27, 2 }
 0x6b6   : > { %v6818_v37 = vpop.f32.mrf.mxu0 }
 0x6b7   : > { %v6819_v2 = vadd.f32 %v6818_v37, %v6530_v23  ;;  %v7004_v21 = vmax.f32 %v7002_v27, %v7003_v31 }
 0x6b8   : > { %v6820_v29 = vpop.f32.mrf.mxu0  ;;  %v6534_v5 = vpop.f32.mrf.mxu1 }
 0x6b9   : > { %v7007_v7 = vmax.f32 %v6816_v3, %v6819_v2  ;;  %v6535_v33 = vadd.f32 %v12312_v51, %v6534_v5  ;;  %v7005_v1 = vrot.slane %v7004_v21, 1 }
 0x6ba   : > { %v6536_v30 = vpop.f32.mrf.mxu1 }
 0x6bb   : > { %v6823_v50 = vpop.f32.mrf.mxu0  ;;  %v7006_v56 = vmax.f32 %v7004_v21, %v7005_v1 }
 0x6bc   : > { %v6824_v18 = vadd.f32 %v6823_v50, %v6535_v33  ;;  %v6537_v16 = vpop.f32.mrf.mxu1 }
 0x6bd   : > { %v6825_v41 = vpop.f32.mrf.mxu0  ;;  %v6538_v4 = vadd.f32 %v12312_v51, %v6537_v16 }
 0x6be   : > { %v7008_v48 = vmax.f32 %v7007_v7, %v6824_v18  ;;  %v6539_v14 = vpop.f32.mrf.mxu1 }
 0x6bf   : > { %v6826_v57 = vpop.f32.mrf.mxu0 }
 0x6c0   : > { %v6827_v52 = vadd.f32 %v6826_v57, %v6538_v4 }
 0x6c1   : > { %v6828_v42 = vpop.f32.mrf.mxu0 }
 0x6c2   : > { %v7009_v32 = vmax.f32 %v7008_v48, %v6827_v52  ;;  %v6542_v63 = vpop.f32.mrf.mxu1 }
 0x6c3   : > { %v6543_v36 = vadd.f32 %v12312_v51, %v6542_v63 }
 0x6c4   : > { %v7010_v20 = vrot.slane %v7009_v32, 4  ;;  %v6544_v0 = vpop.f32.mrf.mxu1 }
 0x6c5   : > { %v6831_v8 = vpop.f32.mrf.mxu0 }
 0x6c6   : > { %v7011_v60 = vmax.f32 %v7009_v32, %v7010_v20  ;;  %v6832_v6 = vadd.f32 %v6831_v8, %v6543_v36  ;;  %v6545_v24 = vpop.f32.mrf.mxu1 }
 0x6c7   : > { %v6833_v55 = vpop.f32.mrf.mxu0  ;;  %v6546_v58 = vadd.f32 %v12312_v51, %v6545_v24 }
 0x6c8   : > { %v7012_v61 = vrot.slane %v7011_v60, 2  ;;  %v6547_v17 = vpop.f32.mrf.mxu1 }
 0x6c9   : > { %v6834_v53 = vpop.f32.mrf.mxu0 }
 0x6ca   : > { %v7013_v35 = vmax.f32 %v7011_v60, %v7012_v61  ;;  %v6835_v54 = vadd.f32 %v6834_v53, %v6546_v58 }
 0x6cb   : > { %v6836_v59 = vpop.f32.mrf.mxu0  ;;  %v6550_v10 = vpop.f32.mrf.mxu1 }
 0x6cc   : > { %v7014_v49 = vrot.slane %v7013_v35, 1  ;;  %v7016_v45 = vmax.f32 %v6832_v6, %v6835_v54  ;;  %v6551_v15 = vadd.f32 %v12312_v51, %v6550_v10 }
 0x6cd   : > { %v6552_v12 = vpop.f32.mrf.mxu1 }
 0x6ce   : > { %v7015_v28 = vmax.f32 %v7013_v35, %v7014_v49  ;;  %v6839_v47 = vpop.f32.mrf.mxu0 }
 0x6cf   : > { %v6840_v25 = vadd.f32 %v6839_v47, %v6551_v15  ;;  %v6553_v46 = vpop.f32.mrf.mxu1 }
 0x6d0   : > { %v7093_v34 = vsel %vm3980_vm0, %v7015_v28, %v7006_v56  ;;  %v6841_v9 = vpop.f32.mrf.mxu0  ;;  %v6554_v26 = vadd.f32 %v12312_v51, %v6553_v46 }
 0x6d1   : > { %v7017_v38 = vmax.f32 %v7016_v45, %v6840_v25  ;;  %v6555_v19 = vpop.f32.mrf.mxu1 }
 0x6d2   : > { %v6842_v43 = vpop.f32.mrf.mxu0 }
 0x6d3   : > { %v6843_v11 = vadd.f32 %v6842_v43, %v6554_v26 }
 0x6d4   : > { %v6844_v40 = vpop.f32.mrf.mxu0  ;;  %v6558_v44 = vpop.f32.mrf.mxu1 }
 0x6d5   : > { %v7018_v62 = vmax.f32 %v7017_v38, %v6843_v11  ;;  %v6559_v3 = vadd.f32 %v12312_v51, %v6558_v44 }
 0x6d6   : > { %v6560_v23 = vpop.f32.mrf.mxu1 }
 0x6d7   : > { %v7019_v13 = vrot.slane %v7018_v62, 4 }
 0x6d8   : > { %v6847_v22 = vpop.f32.mrf.mxu0  ;;  %v6561_v37 = vpop.f32.mrf.mxu1 }
 0x6d9   : > { %v7020_v2 = vmax.f32 %v7018_v62, %v7019_v13  ;;  %v6848_v29 = vadd.f32 %v6847_v22, %v6559_v3  ;;  %v6562_v5 = vadd.f32 %v12312_v51, %v6561_v37 }
 0x6da   : > { %v6849_v7 = vpop.f32.mrf.mxu0  ;;  %v6563_v33 = vpop.f32.mrf.mxu1 }
 0x6db   : > { %v7021_v39 = vrot.slane %v7020_v2, 2 }
 0x6dc   : > { %v6850_v30 = vpop.f32.mrf.mxu0 }
 0x6dd   : > { %v7022_v50 = vmax.f32 %v7020_v2, %v7021_v39  ;;  %v6851_v18 = vadd.f32 %v6850_v30, %v6562_v5 }
 0x6de   : > { %v6852_v16 = vpop.f32.mrf.mxu0  ;;  %v6566_v41 = vpop.f32.mrf.mxu1 }
 0x6df   : > { %v7023_v4 = vrot.slane %v7022_v50, 1  ;;  %v7025_v27 = vmax.f32 %v6848_v29, %v6851_v18  ;;  %v6567_v48 = vadd.f32 %v12312_v51, %v6566_v41 }
 0x6e0   : > { %v6568_v14 = vpop.f32.mrf.mxu1 }
 0x6e1   : > { %v7024_v57 = vmax.f32 %v7022_v50, %v7023_v4  ;;  %v6855_v52 = vpop.f32.mrf.mxu0 }
 0x6e2   : > { %v6856_v42 = vadd.f32 %v6855_v52, %v6567_v48  ;;  %v6569_v31 = vpop.f32.mrf.mxu1 }
 0x6e3   : > { %v7094_v32 = vsel %vm3982_vm1, %v7024_v57, %v7093_v34  ;;  %v6857_v63 = vpop.f32.mrf.mxu0  ;;  %v6570_v36 = vadd.f32 %v12312_v51, %v6569_v31 }
 0x6e4   : > { %v7026_v20 = vmax.f32 %v7025_v27, %v6856_v42  ;;  %v6571_v0 = vpop.f32.mrf.mxu1 }
 0x6e5   : > { %v6858_v8 = vpop.f32.mrf.mxu0 }
 0x6e6   : > { %v6859_v21 = vadd.f32 %v6858_v8, %v6570_v36 }
 0x6e7   : > { %v6860_v60 = vpop.f32.mrf.mxu0 }
 0x6e8   : > { %v7027_v6 = vmax.f32 %v7026_v20, %v6859_v21 }
 0x6ea   : > { %v7028_v24 = vrot.slane %v7027_v6, 4  ;;  %v6574_v55 = vpop.f32.mrf.mxu1 }
 0x6eb   : > { %v6575_v58 = vadd.f32 %v12312_v51, %v6574_v55  ;;  %v6863_v61 = vpop.f32.mrf.mxu0 }
 0x6ec   : > { %v7029_v17 = vmax.f32 %v7027_v6, %v7028_v24  ;;  %v6576_v53 = vpop.f32.mrf.mxu1 }
 0x6ed   : > { %v6864_v1 = vadd.f32 %v6863_v61, %v6575_v58  ;;  %v6865_v35 = vpop.f32.mrf.mxu0 }
 0x6ee   : > { %v7030_v54 = vrot.slane %v7029_v17, 2  ;;  %v6577_v59 = vpop.f32.mrf.mxu1 }
 0x6ef   : > { %v6578_v10 = vadd.f32 %v12312_v51, %v6577_v59  ;;  %v6866_v49 = vpop.f32.mrf.mxu0 }
 0x6f0   : > { %v7031_v45 = vmax.f32 %v7029_v17, %v7030_v54  ;;  %v6579_v15 = vpop.f32.mrf.mxu1 }
 0x6f1   : > { %v6867_v12 = vadd.f32 %v6866_v49, %v6578_v10  ;;  %v6868_v56 = vpop.f32.mrf.mxu0 }
 0x6f2   : > { %v7032_v28 = vrot.slane %v7031_v45, 1 }
 0x6f3   : > { %v7034_v47 = vmax.f32 %v6864_v1, %v6867_v12 }
 0x6f4   : > { %v7033_v25 = vmax.f32 %v7031_v45, %v7032_v28  ;;  %v6582_v46 = vpop.f32.mrf.mxu1 }
 0x6f5   : > { %v6583_v34 = vadd.f32 %v12312_v51, %v6582_v46 }
 0x6f6   : > { %v7095_v9 = vsel %vm3984_vm2, %v7033_v25, %v7094_v32  ;;  %v6871_v26 = vpop.f32.mrf.mxu0  ;;  %v6584_v38 = vpop.f32.mrf.mxu1 }
 0x6f7   : > { %v6872_v19 = vadd.f32 %v6871_v26, %v6583_v34 }
 0x6f8   : > { %v6873_v43 = vpop.f32.mrf.mxu0  ;;  %v6585_v11 = vpop.f32.mrf.mxu1 }
 0x6f9   : > { %v7035_v40 = vmax.f32 %v7034_v47, %v6872_v19  ;;  %v6586_v44 = vadd.f32 %v12312_v51, %v6585_v11 }
 0x6fa   : > { %v6874_v62 = vpop.f32.mrf.mxu0  ;;  %v6587_v3 = vpop.f32.mrf.mxu1 }
 0x6fb   : > { %v6875_v23 = vadd.f32 %v6874_v62, %v6586_v44 }
 0x6fc   : > { %v6876_v13 = vpop.f32.mrf.mxu0 }
 0x6fd   : > { %v7036_v22 = vmax.f32 %v7035_v40, %v6875_v23 }
 0x6ff   : > { %v7037_v37 = vrot.slane %v7036_v22, 4 }
 0x700   : > { %v6590_v2 = vpop.f32.mrf.mxu1 }
 0x701   : > { %v7038_v29 = vmax.f32 %v7036_v22, %v7037_v37  ;;  %v6591_v10 = vadd.f32 %v12312_v51, %v6590_v2 }
 0x702   : > { %v6592_v5 = vpop.f32.mrf.mxu1 }
 0x703   : > { %v7039_v7 = vrot.slane %v7038_v29, 2  ;;  %v6879_v33 = vpop.f32.mrf.mxu0 }
 0x704   : > { %v6593_v39 = vpop.f32.mrf.mxu1  ;;  %v6880_v34 = vadd.f32 %v6879_v33, %v6591_v10 }
 0x705   : > { %v7040_v30 = vmax.f32 %v7038_v29, %v7039_v7  ;;  %v6881_v50 = vpop.f32.mrf.mxu0  ;;  %v6594_v1 = vadd.f32 %v12312_v51, %v6593_v39 }
 0x706   : > { %v6595_v18 = vpop.f32.mrf.mxu1 }
 0x707   : > { %v7041_v16 = vrot.slane %v7040_v30, 1  ;;  %v6882_v41 = vpop.f32.mrf.mxu0 }
 0x708   : > { %v6883_v56 = vadd.f32 %v6882_v41, %v6594_v1 }
 0x709   : > { %v7042_v4 = vmax.f32 %v7040_v30, %v7041_v16  ;;  %v6884_v27 = vpop.f32.mrf.mxu0 }
 0x70a   : > { %v7043_v43 = vmax.f32 %v6880_v34, %v6883_v56 }
 0x70b   : > { %v12373_v48 = vsel %vm3986_vm3, %v7042_v4, %v7095_v9  ;;  %v6598_v14 = vpop.f32.mrf.mxu1 }
 0x70c   : > { %v6599_v49 = vadd.f32 %v12312_v51, %v6598_v14 }
 0x70d   : > { %v6600_v57 = vpop.f32.mrf.mxu1 }
 0x70e   : > { %v6887_v52 = vpop.f32.mrf.mxu0 }
 0x70f   : > { %v6601_v42 = vpop.f32.mrf.mxu1  ;;  %v6888_v9 = vadd.f32 %v6887_v52, %v6599_v49 }
 0x710   : > { %v6889_v31 = vpop.f32.mrf.mxu0  ;;  %v6602_v28 = vadd.f32 %v12312_v51, %v6601_v42 }
 0x711   : > { %v6603_v32 = vpop.f32.mrf.mxu1  ;;  %v7044_v3 = vmax.f32 %v7043_v43, %v6888_v9 }
 0x712   : > { %v6890_v63 = vpop.f32.mrf.mxu0 }
 0x713   : > { %v6891_v11 = vadd.f32 %v6890_v63, %v6602_v28 }
 0x714   : > { %v6892_v36 = vpop.f32.mrf.mxu0 }
 0x715   : > { %v7045_v37 = vmax.f32 %v7044_v3, %v6891_v11 }
 0x717   : > { %v6606_v20 = vpop.f32.mrf.mxu1  ;;  %v7046_v39 = vrot.slane %v7045_v37, 4 }
 0x718   : > { %v6607_v15 = vadd.f32 %v12312_v51, %v6606_v20 }
 0x719   : > { %v6608_v0 = vpop.f32.mrf.mxu1  ;;  %v7047_v41 = vmax.f32 %v7045_v37, %v7046_v39 }
 0x71a   : > { %v6895_v8 = vpop.f32.mrf.mxu0 }
 0x71b   : > { %v6609_v21 = vpop.f32.mrf.mxu1  ;;  %v6896_v26 = vadd.f32 %v6895_v8, %v6607_v15  ;;  %v7048_v36 = vrot.slane %v7047_v41, 2 }
 0x71c   : > { %v6897_v60 = vpop.f32.mrf.mxu0  ;;  %v6610_v54 = vadd.f32 %v12312_v51, %v6609_v21 }
 0x71d   : > { %v6611_v6 = vpop.f32.mrf.mxu1 }
 0x71e   : > { %v6898_v24 = vpop.f32.mrf.mxu0 }
 0x71f   : > { %v6899_v25 = vadd.f32 %v6898_v24, %v6610_v54 }
 0x720   : > { %v6900_v55 = vpop.f32.mrf.mxu0 }
 0x721   : > { %v7052_v40 = vmax.f32 %v6896_v26, %v6899_v25 }
 0x723   : > { %v6614_v58 = vpop.f32.mrf.mxu1 }
 0x724   : > { %v6615_v12 = vadd.f32 %v12312_v51, %v6614_v58  ;;  %v7049_v58 = vmax.f32 %v7047_v41, %v7048_v36 }
 0x725   : > { %v6616_v61 = vpop.f32.mrf.mxu1 }
 0x726   : > { %v6903_v17 = vpop.f32.mrf.mxu0  ;;  %v7050_v1 = vrot.slane %v7049_v58, 1 }
 0x727   : > { %v6617_v53 = vpop.f32.mrf.mxu1  ;;  %v6904_v38 = vadd.f32 %v6903_v17, %v6615_v12 }
 0x728   : > { %v6905_v35 = vpop.f32.mrf.mxu0  ;;  %v6618_v46 = vadd.f32 %v12312_v51, %v6617_v53  ;;  %v7051_v10 = vmax.f32 %v7049_v58, %v7050_v1 }
 0x729   : > { %v6619_v59 = vpop.f32.mrf.mxu1  ;;  %v7053_v13 = vmax.f32 %v7052_v40, %v6904_v38 }
 0x72a   : > { %v6906_v45 = vpop.f32.mrf.mxu0  ;;  %v7097_v15 = vsel %vm3988_vm4, %v7051_v10, %v12373_v48 }
 0x72b   : > { %v6907_v44 = vadd.f32 %v6906_v45, %v6618_v46 }
 0x72c   : > { %v6908_v47 = vpop.f32.mrf.mxu0 }
 0x72d   : > { %v7054_v29 = vmax.f32 %v7053_v13, %v6907_v44 }
 0x72f   : > { %v6622_v19 = vpop.f32.mrf.mxu1  ;;  %v7055_v50 = vrot.slane %v7054_v29, 4 }
 0x730   : > { %v6623_v18 = vadd.f32 %v12312_v51, %v6622_v19 }
 0x731   : > { %v6624_v62 = vpop.f32.mrf.mxu1  ;;  %v7056_v14 = vmax.f32 %v7054_v29, %v7055_v50 }
 0x732   : > { %v6911_v23 = vpop.f32.mrf.mxu0 }
 0x733   : > { %v6625_v22 = vpop.f32.mrf.mxu1  ;;  %v6912_v42 = vadd.f32 %v6911_v23, %v6623_v18  ;;  %v7057_v8 = vrot.slane %v7056_v14, 2 }
 0x734   : > { %v6913_v2 = vpop.f32.mrf.mxu0  ;;  %v6626_v33 = vadd.f32 %v12312_v51, %v6625_v22 }
 0x735   : > { %v6627_v5 = vpop.f32.mrf.mxu1  ;;  %v7058_v17 = vmax.f32 %v7056_v14, %v7057_v8 }
 0x736   : > { %v6914_v7 = vpop.f32.mrf.mxu0 }
 0x737   : > { %v6915_v4 = vadd.f32 %v6914_v7, %v6626_v33  ;;  %v7059_v54 = vrot.slane %v7058_v17, 1 }
 0x738   : > { %v6916_v30 = vpop.f32.mrf.mxu0 }
 0x739   : > { %v7061_v20 = vmax.f32 %v6912_v42, %v6915_v4  ;;  %v7060_v49 = vmax.f32 %v7058_v17, %v7059_v54 }
 0x73b   : > { %v6630_v16 = vpop.f32.mrf.mxu1  ;;  %v7098_v56 = vsel %vm3990_vm5, %v7060_v49, %v7097_v15 }
 0x73c   : > { %v6631_v27 = vadd.f32 %v12312_v51, %v6630_v16 }
 0x73d   : > { %v6919_v57 = vpop.f32.mrf.mxu0  ;;  %v6632_v52 = vpop.f32.mrf.mxu1 }
 0x73e   : > { %v6920_v31 = vadd.f32 %v6919_v57, %v6631_v27 }
 0x73f   : > { %v6921_v32 = vpop.f32.mrf.mxu0  ;;  %v6633_v63 = vpop.f32.mrf.mxu1 }
 0x740   : > { %v6634_v0 = vadd.f32 %v12312_v51, %v6633_v63  ;;  %v7062_v6 = vmax.f32 %v7061_v20, %v6920_v31 }
 0x741   : > { %v6922_v21 = vpop.f32.mrf.mxu0  ;;  %v6635_v60 = vpop.f32.mrf.mxu1 }
 0x742   : > { %v6923_v24 = vadd.f32 %v6922_v21, %v6634_v0 }
 0x743   : > { %v6924_v55 = vpop.f32.mrf.mxu0 }
 0x744   : > { %v7063_v61 = vmax.f32 %v7062_v6, %v6923_v24 }
 0x746   : > { %v7064_v53 = vrot.slane %v7063_v61, 4 }
 0x748   : > { %v7065_v35 = vmax.f32 %v7063_v61, %v7064_v53 }
 0x74a   : > { %v7066_v59 = vrot.slane %v7065_v35, 2 }
 0x74c   : > { %v7067_v51 = vmax.f32 %v7065_v35, %v7066_v59 }
 0x74e   : > { %v7068_v45 = vrot.slane %v7067_v51, 1 }
 0x750   : > { %v7069_v12 = vmax.f32 %v7067_v51, %v7068_v45 }
 0x752   : > { %v7099_v28 = vsel %vm3992_vm6, %v7069_v12, %v7098_v56 }
 0x753   : > { %7103 = vst [vmem:[%s12350_s28 + $0x8] sm:$0xff] %v7099_v28 }
 0x754   : > { %7929 = shalt.err (!%p7926_p3)
}
 0x755   : > { %s7930_s17 = scalar_lea.hbm %s12394_s30, 256  ;;  %s7934_s28 = scalar_lea.hbm %s12455_s12, 512 }
 0x756   : > { %p7931_p2 = scmp.ne.s32.totalorder %s12394_s30, %s7930_s17  ;;  %p7935_p6 = scmp.lt.s32.totalorder %s12394_s30, %s12455_s12 }
 0x757   : > { %p7936_p9 = scmp.lt.s32.totalorder %s7934_s28, %s7930_s17 }
 0x758   : > { %p7932_p4 = pnand %p7931_p2, %p8102_p5 }
 0x759   : > { %p7937_p10 = por %p7936_p9, %p7935_p6 }
 0x75a   : > { %p7933_p13 = pneg %p7932_p4 }
 0x75c   : > { %p7938_p12 = pnand %p7937_p10, %p7933_p13 }
 0x75e   : > { %7941 = shalt.err (!%p7938_p12)
}
 0x75f   : > { %s7997_s26 = smov 128   ;;  %s7998_s23 = smov 8  }
 0x760   : > { %7427 = dma.vmem_to_hbm [thread:$0]  (%p8102_p5), %s12396_s16, 256, %s12394_s30, %s12403_s25, %s7997_s26, %s7997_s26, %s7998_s23  }
 0x761 PF: > { %s13063_s27 = sld [smem:[#allocation14_spill]]  ;;  %p7444_p7 = scmp.ge.s32.totalorder %s7984_s24, 2 }
 0x762   : > { %s7133_s14 = sand.u32 1, %s7972_s21  }
 0x763   : > { %s7134_s15 = scalar_lea.sflag [#allocation4], %s7133_s14 }
 0x767   : > { %p13064_p8 = scmp.ne.s32.totalorder %s13063_s27, 0 }
 0x769   : > { %p7437_p11 = pnand %p7444_p7, %p13064_p8 }
 0x76b   : > { %p7438_p0 = pneg %p7437_p11 }
 0x76d   : > { %7967 = dma.done.wait (%p7438_p0), %s7134_s15, 256  }
 0x76e   : > { %7969 = vsyncadd (%p7438_p0), %s7134_s15, 4294967040  ;;  %s13065_s24 = sld [smem:[#allocation12_spill]]  ;;  %s13068_s21 = smov %s7976_s22 }
 0x76f   : > { %s13066_s17 = sld [smem:[#allocation11_spill]] }
 0x770   : > { %s13067_s23 = sld [smem:[#allocation13_spill]] }
 0x774   : > { %p24_p1 = scmp.ge.s32.totalorder %s13065_s24, 4  }
 0x775   : > { %s13069_s22 = smov %s13066_s17 }
 0x776   :  { %26 = sbr.rel (!%p24_p1) target bundleno = 5 (0x5), region = 112 }
 0x77b   :  { %7139 = vsyncpa [#allocation3], 1 }
 0x77c   :  { %7141 = vsyncpa [#allocation3 + $0x1], 1 }
 0x77d   :  { %7142 = vsyncpa [#allocation6], 1 }
 0x77e   :  { %7143 = vsyncpa [#allocation4], 1 }
 0x77f   :  { %7145 = vsyncpa [#allocation4 + $0x1], 1 }

</bundles_post_ra>
